<compile_context>
chip_gen: v5e
topology: v5e:2x2
jax: 0.10.0
libtpu: 0.0.40
codegen_flags: <defaults>
</compile_context>

<pallas_src>
import functools

import jax
import jax.numpy as jnp
from jax.experimental import pallas as pl
from jax.experimental.pallas import tpu as pltpu

EPS = 1e-4      # `eps` in the PyTorch source
BN_EPS = 1e-5   # torch.nn.BatchNorm2d default eps

_CP = pltpu.CompilerParams(dimension_semantics=("parallel",))


# ----------------------------- in-kernel helpers -----------------------------

def _embed(core, wp):
    """Place a (C, Lc) core back into the (C, L) zero-bordered padded layout."""
    c = core.shape[0]
    z = jnp.zeros((c, wp + 1), core.dtype)
    return jnp.concatenate([z, core, z], axis=1)


def _conv_core(x_full, w_ref, wp, lc):
    """3x3 conv over the padded layout; returns the (Cout, Lc) core (no bias).

    x_full: (Cin, L) with zero borders.  w_ref: (9, Cout, Cin) VMEM ref where
    index i = dh*3 + dw.  The halo expansion is 9 static lane slices done in
    VMEM (no im2col in HBM)."""
    cout = w_ref.shape[1]
    acc = jnp.zeros((cout, lc), jnp.float32)
    i = 0
    for dh in range(3):
        for dw in range(3):
            off = (wp + 1) + (dh - 1) * wp + (dw - 1)     # in [0, 2*wp+2]
            piece = x_full[:, off:off + lc]               # (Cin, Lc)
            acc = acc + jnp.dot(w_ref[i], piece,
                                preferred_element_type=jnp.float32)
            i += 1
    return acc


# --------------------------------- kernels -----------------------------------

def _conv_kernel(*refs, wp, lc, pre, post):
    """Generic fused conv kernel.

    pre:  'id'          -> input is a padded activation (Cin, L)
          'bnrelu'      -> input is (yraw, scale, shift): apply BN+ReLU here
          'bnrelu_res'  -> same + add a padded residual activation
    post: 'stats'       -> write raw conv core + per-image sum/sumsq (BN pass)
          'relu'        -> +bias, ReLU, write padded activation
          'sig_tr'      -> +bias, sigmoid; t=clamp(x2+fea), r=clamp(x/t)
          'sig_x2'      -> +bias, sigmoid; x2 = x + (r - fea)
    """
    it = iter(refs)
    mask = next(it)[...]                                  # (1, Lc) interior cols

    if pre == "id":
        x_full = next(it)[...]                            # (Cin, L)
    else:
        yr = next(it)[...]                                # (Cin, Lc) raw conv
        sc = next(it)[...]                                # (Cin, 1)
        sh = next(it)[...]                                # (Cin, 1)
        core_in = jnp.maximum(yr * sc + sh, 0.0) * mask
        x_full = _embed(core_in, wp)
        if pre == "bnrelu_res":
            x_full = x_full + next(it)[...]               # padded residual

    w_ref = next(it)                                      # (9, Cout, Cin)
    y = _conv_core(x_full, w_ref, wp, lc)                 # (Cout, Lc), no bias

    if post == "stats":
        yraw_ref = next(it)                               # (Cout, Lc)
        stat_ref = next(it)                               # (Cout, 2)
        yraw_ref[...] = y
        ym = y * mask
        stat_ref[:, 0:1] = jnp.sum(ym, axis=1, keepdims=True)
        stat_ref[:, 1:2] = jnp.sum(ym * y, axis=1, keepdims=True)
        return

    bias = next(it)[...]                                  # (Cout, 1)
    y = y + bias
    if post == "relu":
        o_ref = next(it)
        o_ref[...] = _embed(jnp.maximum(y, 0.0) * mask, wp)
    elif post == "sig_tr":
        x_img = next(it)[...]                             # (3, L) original x
        x2_img = next(it)[...]                            # (3, L) current x2
        t_ref = next(it)
        r_ref = next(it)
        fea = jax.nn.sigmoid(y) * mask
        xc = x_img[:, wp + 1:wp + 1 + lc]
        x2c = x2_img[:, wp + 1:wp + 1 + lc]
        t = jnp.clip(x2c + fea, EPS, 1.0)
        r = jnp.clip(xc / t, 0.0, 1.0)                    # exact division
        t_ref[...] = _embed(t, wp)
        r_ref[...] = _embed(r, wp)
    elif post == "sig_x2":
        x_img = next(it)[...]                             # (3, L) original x
        r_img = next(it)[...]                             # (3, L) r
        o_ref = next(it)
        fea = jax.nn.sigmoid(y) * mask
        xc = x_img[:, wp + 1:wp + 1 + lc]
        rc = r_img[:, wp + 1:wp + 1 + lc]
        o_ref[...] = _embed(xc + (rc - fea), wp)
    else:
        raise ValueError(post)


def _bn_apply_kernel(*refs, wp, lc, with_res):
    """Elementwise BN-apply (scale/shift + ReLU [+ residual]) -> padded act."""
    it = iter(refs)
    mask = next(it)[...]
    yr = next(it)[...]
    sc = next(it)[...]
    sh = next(it)[...]
    core = jnp.maximum(yr * sc + sh, 0.0) * mask
    full = _embed(core, wp)
    if with_res:
        full = next(it)[...] + full
    next(it)[...] = full


def _cem_kernel(ab_ref, x_ref, t_ref, y_ref):
    """SigmoidCorrection: y = ((b+1) k^a x) / (b (k^a - 1) x + (b+1)), k=1/t.

    Exact divisions (no approx reciprocal) per the correctness review."""
    a = jnp.maximum(ab_ref[0], EPS)
    b = ab_ref[1]
    x = x_ref[...]
    t = t_ref[...]
    k = 1.0 / t                                           # t in [eps, 1]
    ka = jnp.exp(a * jnp.log(k))                          # k ** a
    num = (b + 1.0) * ka * x
    den = b * (ka - 1.0) * x + (b + 1.0)
    y_ref[...] = jnp.clip(num / den, 0.0, 1.0)


# ------------------------------ pallas wrappers -------------------------------

def _act_spec(c, L):
    return pl.BlockSpec((None, c, L), lambda g: (g, 0, 0))


def _core_spec(c, lc):
    return pl.BlockSpec((None, c, lc), lambda g: (g, 0, 0))


def _const_spec(shape):
    nd = len(shape)
    return pl.BlockSpec(shape, lambda g: (0,) * nd)


def _run_conv(geom, pre, pre_args, w9, post, post_args):
    n, L, lc, wp = geom["n"], geom["L"], geom["lc"], geom["wp"]
    cout, cin = w9.shape[1], w9.shape[2]

    in_specs = [_const_spec((1, lc))]
    args = [geom["mask"]]

    if pre == "id":
        in_specs.append(_act_spec(cin, L))
        args.append(pre_args[0])
    else:
        yr, sc, sh = pre_args[:3]
        in_specs += [_core_spec(cin, lc), _const_spec((cin, 1)),
                     _const_spec((cin, 1))]
        args += [yr, sc, sh]
        if pre == "bnrelu_res":
            in_specs.append(_act_spec(cin, L))
            args.append(pre_args[3])

    in_specs.append(_const_spec((9, cout, cin)))
    args.append(w9)

    if post == "stats":
        out_specs = (_core_spec(cout, lc),
                     pl.BlockSpec((None, cout, 2), lambda g: (g, 0, 0)))
        out_shape = (jax.ShapeDtypeStruct((n, cout, lc), jnp.float32),
                     jax.ShapeDtypeStruct((n, cout, 2), jnp.float32))
    else:
        in_specs.append(_const_spec((cout, 1)))
        args.append(post_args[0])                          # bias
        if post == "relu":
            out_specs = _act_spec(cout, L)
            out_shape = jax.ShapeDtypeStruct((n, cout, L), jnp.float32)
        elif post == "sig_tr":
            in_specs += [_act_spec(3, L), _act_spec(3, L)]
            args += [post_args[1], post_args[2]]           # x, x2 (padded)
            out_specs = (_act_spec(cout, L), _act_spec(cout, L))
            out_shape = (jax.ShapeDtypeStruct((n, cout, L), jnp.float32),
                         jax.ShapeDtypeStruct((n, cout, L), jnp.float32))
        elif post == "sig_x2":
            in_specs += [_act_spec(3, L), _act_spec(3, L)]
            args += [post_args[1], post_args[2]]           # x, r (padded)
            out_specs = _act_spec(cout, L)
            out_shape = jax.ShapeDtypeStruct((n, cout, L), jnp.float32)
        else:
            raise ValueError(post)

    return pl.pallas_call(
        functools.partial(_conv_kernel, wp=wp, lc=lc, pre=pre, post=post),
        grid=(n,), in_specs=in_specs, out_specs=out_specs, out_shape=out_shape,
        compiler_params=_CP,
    )(*args)


def _bn_params(stats, gamma, beta, count):
    """Fold per-image (sum, sumsq) into BN scale/shift (training-mode stats).

    Sums are f32 of the f32 conv output; biased variance like PyTorch."""
    tot = jnp.sum(stats, axis=0)                           # (Cout, 2)
    mean = tot[:, 0] / count
    var = jnp.maximum(tot[:, 1] / count - mean * mean, 0.0)
    scale = gamma * jax.lax.rsqrt(var + BN_EPS)
    shift = beta - mean * scale
    return scale.reshape(-1, 1), shift.reshape(-1, 1)


def _bn_conv_stats(geom, pre, pre_args, w9, gamma, beta):
    yraw, stats = _run_conv(geom, pre, pre_args, w9, "stats", ())
    sc, sh = _bn_params(stats, gamma, beta, float(geom["count"]))
    return yraw, sc, sh


def _run_bn_apply(geom, yraw, sc, sh, res=None):
    n, L, lc, wp = geom["n"], geom["L"], geom["lc"], geom["wp"]
    c = yraw.shape[1]
    in_specs = [_const_spec((1, lc)), _core_spec(c, lc),
                _const_spec((c, 1)), _const_spec((c, 1))]
    args = [geom["mask"], yraw, sc, sh]
    if res is not None:
        in_specs.append(_act_spec(c, L))
        args.append(res)
    return pl.pallas_call(
        functools.partial(_bn_apply_kernel, wp=wp, lc=lc,
                          with_res=res is not None),
        grid=(n,), in_specs=in_specs,
        out_specs=_act_spec(c, L),
        out_shape=jax.ShapeDtypeStruct((n, c, L), jnp.float32),
        compiler_params=_CP,
    )(*args)


def _run_cem(geom, x_u, t_u, a, b):
    n = geom["n"]
    c, hw = x_u.shape[1], x_u.shape[2]
    ab = jnp.concatenate([a, b]).astype(jnp.float32)       # (2,) -> SMEM
    gs = pltpu.PrefetchScalarGridSpec(
        num_scalar_prefetch=1,
        grid=(n,),
        in_specs=[pl.BlockSpec((None, c, hw), lambda g, ab_ref: (g, 0, 0)),
                  pl.BlockSpec((None, c, hw), lambda g, ab_ref: (g, 0, 0))],
        out_specs=pl.BlockSpec((None, c, hw), lambda g, ab_ref: (g, 0, 0)),
    )
    return pl.pallas_call(
        _cem_kernel, grid_spec=gs,
        out_shape=jax.ShapeDtypeStruct((n, c, hw), jnp.float32),
        compiler_params=_CP,
    )(ab, x_u, t_u)


# --------------------------------- stages ------------------------------------

def enhance_stage(geom, p, x_pad, x2_pad):
    """EnhancementNetwork on x2, fused with t=clamp(x2+fea,eps,1), r=clamp(x/t)."""
    fea = _run_conv(geom, "id", (x2_pad,), p["e_in_w9"], "relu", (p["e_in_b"],))
    yraw, sc, sh = _bn_conv_stats(geom, "id", (fea,), p["e_blk_w9"],
                                  p["e_blk_g"], p["e_blk_bt"])
    # out_conv input = fea + ReLU(BN(conv(fea))): BN-apply fused into its pre.
    t, r = _run_conv(geom, "bnrelu_res", (yraw, sc, sh, fea), p["e_out_w9"],
                     "sig_tr", (p["e_out_b"], x_pad, x2_pad))
    return t, r


def calibrate_stage(geom, p, x_pad, r_pad):
    """SelfCalibratedNetwork on r, fused with x2 = x + (r - fea)."""
    yraw, sc, sh = _bn_conv_stats(geom, "id", (r_pad,), p["c_in_w9"],
                                  p["c_in_g"], p["c_in_bt"])
    fea = _run_bn_apply(geom, yraw, sc, sh)                # residual base
    for _ in range(3):                                     # shared-weight blocks
        y1, s1, h1 = _bn_conv_stats(geom, "id", (fea,), p["c_b1_w9"],
                                    p["c_b1_g"], p["c_b1_bt"])
        y2, s2, h2 = _bn_conv_stats(geom, "bnrelu", (y1, s1, h1),
                                    p["c_b2_w9"], p["c_b2_g"], p["c_b2_bt"])
        fea = _run_bn_apply(geom, y2, s2, h2, res=fea)     # fea += BN-ReLU(y2)
    x2 = _run_conv(geom, "id", (fea,), p["c_out_w9"],
                   "sig_x2", (p["c_out_b"], x_pad, r_pad))
    return x2


# ------------------------------ params / model -------------------------------

def init_params(key):
    ks = jax.random.split(key, 7)

    def conv_w(k, ci, co):
        return 0.02 * jax.random.normal(k, (3, 3, ci, co), jnp.float32)

    def w9(w):  # (3,3,ci,co) -> (9, co, ci), index i = dh*3 + dw
        return jnp.transpose(w.reshape(9, w.shape[2], w.shape[3]), (0, 2, 1))

    p = {}
    # EnhancementNetwork(blocks=1, channels=3)
    p["e_in_w9"] = w9(conv_w(ks[0], 3, 3))
    p["e_in_b"] = jnp.zeros((3, 1), jnp.float32)
    p["e_blk_w9"] = w9(conv_w(ks[1], 3, 3))   # conv bias cancels under BN
    p["e_blk_g"] = jnp.ones((3,), jnp.float32)
    p["e_blk_bt"] = jnp.zeros((3,), jnp.float32)
    p["e_out_w9"] = w9(conv_w(ks[2], 3, 3))
    p["e_out_b"] = jnp.zeros((3, 1), jnp.float32)
    # SelfCalibratedNetwork(blocks=3, channels=16) -- block module is SHARED
    c = 16
    p["c_in_w9"] = w9(conv_w(ks[3], 3, c))
    p["c_in_g"] = jnp.ones((c,), jnp.float32)
    p["c_in_bt"] = jnp.zeros((c,), jnp.float32)
    p["c_b1_w9"] = w9(conv_w(ks[4], c, c))
    p["c_b1_g"] = jnp.ones((c,), jnp.float32)
    p["c_b1_bt"] = jnp.zeros((c,), jnp.float32)
    p["c_b2_w9"] = w9(conv_w(ks[5], c, c))
    p["c_b2_g"] = jnp.ones((c,), jnp.float32)
    p["c_b2_bt"] = jnp.zeros((c,), jnp.float32)
    p["c_out_w9"] = w9(conv_w(ks[6], c, 3))
    p["c_out_b"] = jnp.zeros((3, 1), jnp.float32)
    # SigmoidCorrection params (torch init: a=1, b=0)
    p["cem_a"] = jnp.ones((1,), jnp.float32)
    p["cem_b"] = jnp.zeros((1,), jnp.float32)
    return p


def network_forward(x_nchw, p, stages=3):
    n, c, h, w = x_nchw.shape
    hp, wp = h + 2, w + 2
    L = hp * wp
    lc = L - 2 * (wp + 1)

    # Interior-column mask over the conv core (junk columns are the zero-pad
    # columns that fall inside the contiguous core range).
    cols = jnp.arange(L, dtype=jnp.int32) % wp
    core_cols = cols[wp + 1:L - wp - 1]
    mask = ((core_cols >= 1) & (core_cols <= wp - 2)).astype(jnp.float32)
    mask = mask.reshape(1, lc)

    geom = dict(n=n, wp=wp, L=L, lc=lc, count=n * h * w, mask=mask)

    # Channel-major, zero-bordered padded layout (N, C, L): pixels on lanes.
    x_pad = jnp.pad(x_nchw, ((0, 0), (0, 0), (1, 1), (1, 1))).reshape(n, c, L)

    x_list_pad, t_list_pad = [], []
    x2_pad = x_pad
    for _ in range(stages):
        x_list_pad.append(x2_pad)
        t_pad, r_pad = enhance_stage(geom, p, x_pad, x2_pad)
        x2_pad = calibrate_stage(geom, p, x_pad, r_pad)
        t_list_pad.append(t_pad)

    def unpad(a):
        return a.reshape(n, c, hp, wp)[:, :, 1:h + 1, 1:w + 1]

    x_list = [unpad(a) for a in x_list_pad]
    t_list = [unpad(a) for a in t_list_pad]

    # SigmoidCorrection on lane-dense unpadded (C, H*W) views.
    x_u = x_nchw.reshape(n, c, h * w)
    t_u = t_list[0].reshape(n, c, h * w)
    y = _run_cem(geom, x_u, t_u, p["cem_a"], p["cem_b"]).reshape(n, c, h, w)

    return x_list, t_list, y


if __name__ == "__main__":
    key = jax.random.PRNGKey(0)
    pkey, xkey = jax.random.split(key)
    params = init_params(pkey)
    # Input matches PyTorch Conv2d(in_channels=3, ...): NCHW, small shapes.
    x = jax.random.uniform(xkey, (2, 3, 16, 16), jnp.float32)

    fwd = jax.jit(functools.partial(network_forward, stages=3))
    x_list, t_list, y = fwd(x, params)
    jax.block_until_ready(y)
    for a in x_list + t_list:
        jax.block_until_ready(a)
    print("KERNEL_OK")
</pallas_src>

<mosaic_0001>
module attributes {stable_mosaic.version = 11 : i64} {
  func.func @_conv_kernel(%arg0: i32, %arg1: memref<1x286xf32, #tpu.memory_space<vmem>>, %arg2: memref<1x3x324xf32, #tpu.memory_space<vmem>>, %arg3: memref<9x3x3xf32, #tpu.memory_space<vmem>>, %arg4: memref<3x1xf32, #tpu.memory_space<vmem>>, %arg5: memref<1x3x324xf32, #tpu.memory_space<vmem>>) attributes {dimension_semantics = [#tpu.dimension_semantics<parallel>], iteration_bounds = array<i64: 2>, scalar_prefetch = 0 : i64, scratch_operands = 0 : i64, tpu.core_type = #tpu.core_type<tc>, window_params = [{pipeline_mode = #tpu.pipeline_mode<synchronous>, transform_indices = @transform_0, window_bounds = array<i64: 1, 286>}, {transform_indices = @transform_1, window_bounds = array<i64: 1, 3, 324>}, {pipeline_mode = #tpu.pipeline_mode<synchronous>, transform_indices = @transform_2, window_bounds = array<i64: 9, 3, 3>}, {pipeline_mode = #tpu.pipeline_mode<synchronous>, transform_indices = @transform_3, window_bounds = array<i64: 3, 1>}, {transform_indices = @transform_4, window_bounds = array<i64: 1, 3, 324>}]} {
    %c0 = arith.constant 0 : index
    %c0_0 = arith.constant 0 : index
    %0 = vector.load %arg1[%c0, %c0_0] : memref<1x286xf32, #tpu.memory_space<vmem>>, vector<1x286xf32>
    %c0_1 = arith.constant 0 : index
    %c0_2 = arith.constant 0 : index
    %c0_3 = arith.constant 0 : index
    %1 = vector.load %arg2[%c0_1, %c0_2, %c0_3] : memref<1x3x324xf32, #tpu.memory_space<vmem>>, vector<1x3x324xf32>
    %2 = vector.shape_cast %1 : vector<1x3x324xf32> to vector<3x324xf32>
    %cst = arith.constant 0.000000e+00 : f32
    %3 = vector.broadcast %cst : f32 to vector<3x286xf32>
    %4 = vector.extract_strided_slice %2 {offsets = [0, 0], sizes = [3, 286], strides = [1, 1]} : vector<3x324xf32> to vector<3x286xf32>
    %c0_4 = arith.constant 0 : index
    %c0_5 = arith.constant 0 : index
    %c0_6 = arith.constant 0 : index
    %5 = vector.load %arg3[%c0_4, %c0_5, %c0_6] : memref<9x3x3xf32, #tpu.memory_space<vmem>>, vector<1x3x3xf32>
    %6 = vector.shape_cast %5 : vector<1x3x3xf32> to vector<3x3xf32>
    %cst_7 = arith.constant dense<0.000000e+00> : vector<3x286xf32>
    %7 = tpu.matmul %6, %4, %cst_7 {dimension_numbers = #tpu.dot_dimension_numbers<[1], [0], [0], [1], [0, 0, 1, 1], [], []>} : vector<3x3xf32>, vector<3x286xf32>, vector<3x286xf32> -> vector<3x286xf32>
    %8 = arith.addf %3, %7 : vector<3x286xf32>
    %9 = vector.extract_strided_slice %2 {offsets = [0, 1], sizes = [3, 286], strides = [1, 1]} : vector<3x324xf32> to vector<3x286xf32>
    %c1 = arith.constant 1 : index
    %c0_8 = arith.constant 0 : index
    %c0_9 = arith.constant 0 : index
    %10 = vector.load %arg3[%c1, %c0_8, %c0_9] : memref<9x3x3xf32, #tpu.memory_space<vmem>>, vector<1x3x3xf32>
    %11 = vector.shape_cast %10 : vector<1x3x3xf32> to vector<3x3xf32>
    %cst_10 = arith.constant dense<0.000000e+00> : vector<3x286xf32>
    %12 = tpu.matmul %11, %9, %cst_10 {dimension_numbers = #tpu.dot_dimension_numbers<[1], [0], [0], [1], [0, 0, 1, 1], [], []>} : vector<3x3xf32>, vector<3x286xf32>, vector<3x286xf32> -> vector<3x286xf32>
    %13 = arith.addf %8, %12 : vector<3x286xf32>
    %14 = vector.extract_strided_slice %2 {offsets = [0, 2], sizes = [3, 286], strides = [1, 1]} : vector<3x324xf32> to vector<3x286xf32>
    %c2 = arith.constant 2 : index
    %c0_11 = arith.constant 0 : index
    %c0_12 = arith.constant 0 : index
    %15 = vector.load %arg3[%c2, %c0_11, %c0_12] : memref<9x3x3xf32, #tpu.memory_space<vmem>>, vector<1x3x3xf32>
    %16 = vector.shape_cast %15 : vector<1x3x3xf32> to vector<3x3xf32>
    %cst_13 = arith.constant dense<0.000000e+00> : vector<3x286xf32>
    %17 = tpu.matmul %16, %14, %cst_13 {dimension_numbers = #tpu.dot_dimension_numbers<[1], [0], [0], [1], [0, 0, 1, 1], [], []>} : vector<3x3xf32>, vector<3x286xf32>, vector<3x286xf32> -> vector<3x286xf32>
    %18 = arith.addf %13, %17 : vector<3x286xf32>
    %19 = vector.extract_strided_slice %2 {offsets = [0, 18], sizes = [3, 286], strides = [1, 1]} : vector<3x324xf32> to vector<3x286xf32>
    %c3 = arith.constant 3 : index
    %c0_14 = arith.constant 0 : index
    %c0_15 = arith.constant 0 : index
    %20 = vector.load %arg3[%c3, %c0_14, %c0_15] : memref<9x3x3xf32, #tpu.memory_space<vmem>>, vector<1x3x3xf32>
    %21 = vector.shape_cast %20 : vector<1x3x3xf32> to vector<3x3xf32>
    %cst_16 = arith.constant dense<0.000000e+00> : vector<3x286xf32>
    %22 = tpu.matmul %21, %19, %cst_16 {dimension_numbers = #tpu.dot_dimension_numbers<[1], [0], [0], [1], [0, 0, 1, 1], [], []>} : vector<3x3xf32>, vector<3x286xf32>, vector<3x286xf32> -> vector<3x286xf32>
    %23 = arith.addf %18, %22 : vector<3x286xf32>
    %24 = vector.extract_strided_slice %2 {offsets = [0, 19], sizes = [3, 286], strides = [1, 1]} : vector<3x324xf32> to vector<3x286xf32>
    %c4 = arith.constant 4 : index
    %c0_17 = arith.constant 0 : index
    %c0_18 = arith.constant 0 : index
    %25 = vector.load %arg3[%c4, %c0_17, %c0_18] : memref<9x3x3xf32, #tpu.memory_space<vmem>>, vector<1x3x3xf32>
    %26 = vector.shape_cast %25 : vector<1x3x3xf32> to vector<3x3xf32>
    %cst_19 = arith.constant dense<0.000000e+00> : vector<3x286xf32>
    %27 = tpu.matmul %26, %24, %cst_19 {dimension_numbers = #tpu.dot_dimension_numbers<[1], [0], [0], [1], [0, 0, 1, 1], [], []>} : vector<3x3xf32>, vector<3x286xf32>, vector<3x286xf32> -> vector<3x286xf32>
    %28 = arith.addf %23, %27 : vector<3x286xf32>
    %29 = vector.extract_strided_slice %2 {offsets = [0, 20], sizes = [3, 286], strides = [1, 1]} : vector<3x324xf32> to vector<3x286xf32>
    %c5 = arith.constant 5 : index
    %c0_20 = arith.constant 0 : index
    %c0_21 = arith.constant 0 : index
    %30 = vector.load %arg3[%c5, %c0_20, %c0_21] : memref<9x3x3xf32, #tpu.memory_space<vmem>>, vector<1x3x3xf32>
    %31 = vector.shape_cast %30 : vector<1x3x3xf32> to vector<3x3xf32>
    %cst_22 = arith.constant dense<0.000000e+00> : vector<3x286xf32>
    %32 = tpu.matmul %31, %29, %cst_22 {dimension_numbers = #tpu.dot_dimension_numbers<[1], [0], [0], [1], [0, 0, 1, 1], [], []>} : vector<3x3xf32>, vector<3x286xf32>, vector<3x286xf32> -> vector<3x286xf32>
    %33 = arith.addf %28, %32 : vector<3x286xf32>
    %34 = vector.extract_strided_slice %2 {offsets = [0, 36], sizes = [3, 286], strides = [1, 1]} : vector<3x324xf32> to vector<3x286xf32>
    %c6 = arith.constant 6 : index
    %c0_23 = arith.constant 0 : index
    %c0_24 = arith.constant 0 : index
    %35 = vector.load %arg3[%c6, %c0_23, %c0_24] : memref<9x3x3xf32, #tpu.memory_space<vmem>>, vector<1x3x3xf32>
    %36 = vector.shape_cast %35 : vector<1x3x3xf32> to vector<3x3xf32>
    %cst_25 = arith.constant dense<0.000000e+00> : vector<3x286xf32>
    %37 = tpu.matmul %36, %34, %cst_25 {dimension_numbers = #tpu.dot_dimension_numbers<[1], [0], [0], [1], [0, 0, 1, 1], [], []>} : vector<3x3xf32>, vector<3x286xf32>, vector<3x286xf32> -> vector<3x286xf32>
    %38 = arith.addf %33, %37 : vector<3x286xf32>
    %39 = vector.extract_strided_slice %2 {offsets = [0, 37], sizes = [3, 286], strides = [1, 1]} : vector<3x324xf32> to vector<3x286xf32>
    %c7 = arith.constant 7 : index
    %c0_26 = arith.constant 0 : index
    %c0_27 = arith.constant 0 : index
    %40 = vector.load %arg3[%c7, %c0_26, %c0_27] : memref<9x3x3xf32, #tpu.memory_space<vmem>>, vector<1x3x3xf32>
    %41 = vector.shape_cast %40 : vector<1x3x3xf32> to vector<3x3xf32>
    %cst_28 = arith.constant dense<0.000000e+00> : vector<3x286xf32>
    %42 = tpu.matmul %41, %39, %cst_28 {dimension_numbers = #tpu.dot_dimension_numbers<[1], [0], [0], [1], [0, 0, 1, 1], [], []>} : vector<3x3xf32>, vector<3x286xf32>, vector<3x286xf32> -> vector<3x286xf32>
    %43 = arith.addf %38, %42 : vector<3x286xf32>
    %44 = vector.extract_strided_slice %2 {offsets = [0, 38], sizes = [3, 286], strides = [1, 1]} : vector<3x324xf32> to vector<3x286xf32>
    %c8 = arith.constant 8 : index
    %c0_29 = arith.constant 0 : index
    %c0_30 = arith.constant 0 : index
    %45 = vector.load %arg3[%c8, %c0_29, %c0_30] : memref<9x3x3xf32, #tpu.memory_space<vmem>>, vector<1x3x3xf32>
    %46 = vector.shape_cast %45 : vector<1x3x3xf32> to vector<3x3xf32>
    %cst_31 = arith.constant dense<0.000000e+00> : vector<3x286xf32>
    %47 = tpu.matmul %46, %44, %cst_31 {dimension_numbers = #tpu.dot_dimension_numbers<[1], [0], [0], [1], [0, 0, 1, 1], [], []>} : vector<3x3xf32>, vector<3x286xf32>, vector<3x286xf32> -> vector<3x286xf32>
    %48 = arith.addf %43, %47 : vector<3x286xf32>
    %c0_32 = arith.constant 0 : index
    %c0_33 = arith.constant 0 : index
    %49 = vector.load %arg4[%c0_32, %c0_33] : memref<3x1xf32, #tpu.memory_space<vmem>>, vector<3x1xf32>
    %50 = vector.broadcast %49 : vector<3x1xf32> to vector<3x286xf32>
    %51 = arith.addf %48, %50 : vector<3x286xf32>
    %cst_34 = arith.constant 0.000000e+00 : f32
    %52 = vector.broadcast %cst_34 : f32 to vector<3x286xf32>
    %53 = arith.maximumf %51, %52 : vector<3x286xf32>
    %54 = vector.broadcast %0 : vector<1x286xf32> to vector<3x286xf32>
    %55 = arith.mulf %53, %54 : vector<3x286xf32>
    %cst_35 = arith.constant 0.000000e+00 : f32
    %56 = vector.broadcast %cst_35 : f32 to vector<3x19xf32>
    %57 = tpu.concatenate %56, %55, %56 in 1 : vector<3x19xf32>, vector<3x286xf32>, vector<3x19xf32> -> vector<3x324xf32>
    %c0_36 = arith.constant 0 : index
    %c0_37 = arith.constant 0 : index
    %c0_38 = arith.constant 0 : index
    %58 = vector.load %arg5[%c0_36, %c0_37, %c0_38] : memref<1x3x324xf32, #tpu.memory_space<vmem>>, vector<1x3x324xf32>
    %59 = vector.shape_cast %58 : vector<1x3x324xf32> to vector<3x324xf32>
    %60 = vector.shape_cast %57 : vector<3x324xf32> to vector<1x3x324xf32>
    tpu.vector_store %arg5[%c0_36, %c0_37, %c0_38], %60 {strides = array<i32>} : memref<1x3x324xf32, #tpu.memory_space<vmem>>, vector<1x3x324xf32>,
    return
  }
  func.func @transform_0(%arg0: i32) -> (i32, i32) {
    %c0_i32 = arith.constant 0 : i32
    %c0_i32_0 = arith.constant 0 : i32
    %c0_i32_1 = arith.constant 0 : i32
    return %c0_i32, %c0_i32_0 : i32, i32
  }
  func.func @transform_1(%arg0: i32) -> (i32, i32, i32) {
    %c0_i32 = arith.constant 0 : i32
    %c0_i32_0 = arith.constant 0 : i32
    %c0_i32_1 = arith.constant 0 : i32
    return %arg0, %c0_i32, %c0_i32_0 : i32, i32, i32
  }
  func.func @transform_2(%arg0: i32) -> (i32, i32, i32) {
    %c0_i32 = arith.constant 0 : i32
    %c0_i32_0 = arith.constant 0 : i32
    %c0_i32_1 = arith.constant 0 : i32
    %c0_i32_2 = arith.constant 0 : i32
    return %c0_i32, %c0_i32_0, %c0_i32_1 : i32, i32, i32
  }
  func.func @transform_3(%arg0: i32) -> (i32, i32) {
    %c0_i32 = arith.constant 0 : i32
    %c0_i32_0 = arith.constant 0 : i32
    %c0_i32_1 = arith.constant 0 : i32
    return %c0_i32, %c0_i32_0 : i32, i32
  }
  func.func @transform_4(%arg0: i32) -> (i32, i32, i32) {
    %c0_i32 = arith.constant 0 : i32
    %c0_i32_0 = arith.constant 0 : i32
    %c0_i32_1 = arith.constant 0 : i32
    return %arg0, %c0_i32, %c0_i32_0 : i32, i32, i32
  }
}

module attributes {stable_mosaic.version = 11 : i64} {
  func.func @_conv_kernel(%arg0: i32, %arg1: memref<1x286xf32, #tpu.memory_space<vmem>>, %arg2: memref<1x3x324xf32, #tpu.memory_space<vmem>>, %arg3: memref<9x3x3xf32, #tpu.memory_space<vmem>>, %arg4: memref<1x3x286xf32, #tpu.memory_space<vmem>>, %arg5: memref<1x3x2xf32, #tpu.memory_space<vmem>>) attributes {dimension_semantics = [#tpu.dimension_semantics<parallel>], iteration_bounds = array<i64: 2>, scalar_prefetch = 0 : i64, scratch_operands = 0 : i64, tpu.core_type = #tpu.core_type<tc>, window_params = [{pipeline_mode = #tpu.pipeline_mode<synchronous>, transform_indices = @transform_0, window_bounds = array<i64: 1, 286>}, {transform_indices = @transform_1, window_bounds = array<i64: 1, 3, 324>}, {pipeline_mode = #tpu.pipeline_mode<synchronous>, transform_indices = @transform_2, window_bounds = array<i64: 9, 3, 3>}, {transform_indices = @transform_3, window_bounds = array<i64: 1, 3, 286>}, {transform_indices = @transform_4, window_bounds = array<i64: 1, 3, 2>}]} {
    %c0 = arith.constant 0 : index
    %c0_0 = arith.constant 0 : index
    %0 = vector.load %arg1[%c0, %c0_0] : memref<1x286xf32, #tpu.memory_space<vmem>>, vector<1x286xf32>
    %c0_1 = arith.constant 0 : index
    %c0_2 = arith.constant 0 : index
    %c0_3 = arith.constant 0 : index
    %1 = vector.load %arg2[%c0_1, %c0_2, %c0_3] : memref<1x3x324xf32, #tpu.memory_space<vmem>>, vector<1x3x324xf32>
    %2 = vector.shape_cast %1 : vector<1x3x324xf32> to vector<3x324xf32>
    %cst = arith.constant 0.000000e+00 : f32
    %3 = vector.broadcast %cst : f32 to vector<3x286xf32>
    %4 = vector.extract_strided_slice %2 {offsets = [0, 0], sizes = [3, 286], strides = [1, 1]} : vector<3x324xf32> to vector<3x286xf32>
    %c0_4 = arith.constant 0 : index
    %c0_5 = arith.constant 0 : index
    %c0_6 = arith.constant 0 : index
    %5 = vector.load %arg3[%c0_4, %c0_5, %c0_6] : memref<9x3x3xf32, #tpu.memory_space<vmem>>, vector<1x3x3xf32>
    %6 = vector.shape_cast %5 : vector<1x3x3xf32> to vector<3x3xf32>
    %cst_7 = arith.constant dense<0.000000e+00> : vector<3x286xf32>
    %7 = tpu.matmul %6, %4, %cst_7 {dimension_numbers = #tpu.dot_dimension_numbers<[1], [0], [0], [1], [0, 0, 1, 1], [], []>} : vector<3x3xf32>, vector<3x286xf32>, vector<3x286xf32> -> vector<3x286xf32>
    %8 = arith.addf %3, %7 : vector<3x286xf32>
    %9 = vector.extract_strided_slice %2 {offsets = [0, 1], sizes = [3, 286], strides = [1, 1]} : vector<3x324xf32> to vector<3x286xf32>
    %c1 = arith.constant 1 : index
    %c0_8 = arith.constant 0 : index
    %c0_9 = arith.constant 0 : index
    %10 = vector.load %arg3[%c1, %c0_8, %c0_9] : memref<9x3x3xf32, #tpu.memory_space<vmem>>, vector<1x3x3xf32>
    %11 = vector.shape_cast %10 : vector<1x3x3xf32> to vector<3x3xf32>
    %cst_10 = arith.constant dense<0.000000e+00> : vector<3x286xf32>
    %12 = tpu.matmul %11, %9, %cst_10 {dimension_numbers = #tpu.dot_dimension_numbers<[1], [0], [0], [1], [0, 0, 1, 1], [], []>} : vector<3x3xf32>, vector<3x286xf32>, vector<3x286xf32> -> vector<3x286xf32>
    %13 = arith.addf %8, %12 : vector<3x286xf32>
    %14 = vector.extract_strided_slice %2 {offsets = [0, 2], sizes = [3, 286], strides = [1, 1]} : vector<3x324xf32> to vector<3x286xf32>
    %c2 = arith.constant 2 : index
    %c0_11 = arith.constant 0 : index
    %c0_12 = arith.constant 0 : index
    %15 = vector.load %arg3[%c2, %c0_11, %c0_12] : memref<9x3x3xf32, #tpu.memory_space<vmem>>, vector<1x3x3xf32>
    %16 = vector.shape_cast %15 : vector<1x3x3xf32> to vector<3x3xf32>
    %cst_13 = arith.constant dense<0.000000e+00> : vector<3x286xf32>
    %17 = tpu.matmul %16, %14, %cst_13 {dimension_numbers = #tpu.dot_dimension_numbers<[1], [0], [0], [1], [0, 0, 1, 1], [], []>} : vector<3x3xf32>, vector<3x286xf32>, vector<3x286xf32> -> vector<3x286xf32>
    %18 = arith.addf %13, %17 : vector<3x286xf32>
    %19 = vector.extract_strided_slice %2 {offsets = [0, 18], sizes = [3, 286], strides = [1, 1]} : vector<3x324xf32> to vector<3x286xf32>
    %c3 = arith.constant 3 : index
    %c0_14 = arith.constant 0 : index
    %c0_15 = arith.constant 0 : index
    %20 = vector.load %arg3[%c3, %c0_14, %c0_15] : memref<9x3x3xf32, #tpu.memory_space<vmem>>, vector<1x3x3xf32>
    %21 = vector.shape_cast %20 : vector<1x3x3xf32> to vector<3x3xf32>
    %cst_16 = arith.constant dense<0.000000e+00> : vector<3x286xf32>
    %22 = tpu.matmul %21, %19, %cst_16 {dimension_numbers = #tpu.dot_dimension_numbers<[1], [0], [0], [1], [0, 0, 1, 1], [], []>} : vector<3x3xf32>, vector<3x286xf32>, vector<3x286xf32> -> vector<3x286xf32>
    %23 = arith.addf %18, %22 : vector<3x286xf32>
    %24 = vector.extract_strided_slice %2 {offsets = [0, 19], sizes = [3, 286], strides = [1, 1]} : vector<3x324xf32> to vector<3x286xf32>
    %c4 = arith.constant 4 : index
    %c0_17 = arith.constant 0 : index
    %c0_18 = arith.constant 0 : index
    %25 = vector.load %arg3[%c4, %c0_17, %c0_18] : memref<9x3x3xf32, #tpu.memory_space<vmem>>, vector<1x3x3xf32>
    %26 = vector.shape_cast %25 : vector<1x3x3xf32> to vector<3x3xf32>
    %cst_19 = arith.constant dense<0.000000e+00> : vector<3x286xf32>
    %27 = tpu.matmul %26, %24, %cst_19 {dimension_numbers = #tpu.dot_dimension_numbers<[1], [0], [0], [1], [0, 0, 1, 1], [], []>} : vector<3x3xf32>, vector<3x286xf32>, vector<3x286xf32> -> vector<3x286xf32>
    %28 = arith.addf %23, %27 : vector<3x286xf32>
    %29 = vector.extract_strided_slice %2 {offsets = [0, 20], sizes = [3, 286], strides = [1, 1]} : vector<3x324xf32> to vector<3x286xf32>
    %c5 = arith.constant 5 : index
    %c0_20 = arith.constant 0 : index
    %c0_21 = arith.constant 0 : index
    %30 = vector.load %arg3[%c5, %c0_20, %c0_21] : memref<9x3x3xf32, #tpu.memory_space<vmem>>, vector<1x3x3xf32>
    %31 = vector.shape_cast %30 : vector<1x3x3xf32> to vector<3x3xf32>
    %cst_22 = arith.constant dense<0.000000e+00> : vector<3x286xf32>
    %32 = tpu.matmul %31, %29, %cst_22 {dimension_numbers = #tpu.dot_dimension_numbers<[1], [0], [0], [1], [0, 0, 1, 1], [], []>} : vector<3x3xf32>, vector<3x286xf32>, vector<3x286xf32> -> vector<3x286xf32>
    %33 = arith.addf %28, %32 : vector<3x286xf32>
    %34 = vector.extract_strided_slice %2 {offsets = [0, 36], sizes = [3, 286], strides = [1, 1]} : vector<3x324xf32> to vector<3x286xf32>
    %c6 = arith.constant 6 : index
    %c0_23 = arith.constant 0 : index
    %c0_24 = arith.constant 0 : index
    %35 = vector.load %arg3[%c6, %c0_23, %c0_24] : memref<9x3x3xf32, #tpu.memory_space<vmem>>, vector<1x3x3xf32>
    %36 = vector.shape_cast %35 : vector<1x3x3xf32> to vector<3x3xf32>
    %cst_25 = arith.constant dense<0.000000e+00> : vector<3x286xf32>
    %37 = tpu.matmul %36, %34, %cst_25 {dimension_numbers = #tpu.dot_dimension_numbers<[1], [0], [0], [1], [0, 0, 1, 1], [], []>} : vector<3x3xf32>, vector<3x286xf32>, vector<3x286xf32> -> vector<3x286xf32>
    %38 = arith.addf %33, %37 : vector<3x286xf32>
    %39 = vector.extract_strided_slice %2 {offsets = [0, 37], sizes = [3, 286], strides = [1, 1]} : vector<3x324xf32> to vector<3x286xf32>
    %c7 = arith.constant 7 : index
    %c0_26 = arith.constant 0 : index
    %c0_27 = arith.constant 0 : index
    %40 = vector.load %arg3[%c7, %c0_26, %c0_27] : memref<9x3x3xf32, #tpu.memory_space<vmem>>, vector<1x3x3xf32>
    %41 = vector.shape_cast %40 : vector<1x3x3xf32> to vector<3x3xf32>
    %cst_28 = arith.constant dense<0.000000e+00> : vector<3x286xf32>
    %42 = tpu.matmul %41, %39, %cst_28 {dimension_numbers = #tpu.dot_dimension_numbers<[1], [0], [0], [1], [0, 0, 1, 1], [], []>} : vector<3x3xf32>, vector<3x286xf32>, vector<3x286xf32> -> vector<3x286xf32>
    %43 = arith.addf %38, %42 : vector<3x286xf32>
    %44 = vector.extract_strided_slice %2 {offsets = [0, 38], sizes = [3, 286], strides = [1, 1]} : vector<3x324xf32> to vector<3x286xf32>
    %c8 = arith.constant 8 : index
    %c0_29 = arith.constant 0 : index
    %c0_30 = arith.constant 0 : index
    %45 = vector.load %arg3[%c8, %c0_29, %c0_30] : memref<9x3x3xf32, #tpu.memory_space<vmem>>, vector<1x3x3xf32>
    %46 = vector.shape_cast %45 : vector<1x3x3xf32> to vector<3x3xf32>
    %cst_31 = arith.constant dense<0.000000e+00> : vector<3x286xf32>
    %47 = tpu.matmul %46, %44, %cst_31 {dimension_numbers = #tpu.dot_dimension_numbers<[1], [0], [0], [1], [0, 0, 1, 1], [], []>} : vector<3x3xf32>, vector<3x286xf32>, vector<3x286xf32> -> vector<3x286xf32>
    %48 = arith.addf %43, %47 : vector<3x286xf32>
    %c0_32 = arith.constant 0 : index
    %c0_33 = arith.constant 0 : index
    %c0_34 = arith.constant 0 : index
    %49 = vector.load %arg4[%c0_32, %c0_33, %c0_34] : memref<1x3x286xf32, #tpu.memory_space<vmem>>, vector<1x3x286xf32>
    %50 = vector.shape_cast %49 : vector<1x3x286xf32> to vector<3x286xf32>
    %51 = vector.shape_cast %48 : vector<3x286xf32> to vector<1x3x286xf32>
    tpu.vector_store %arg4[%c0_32, %c0_33, %c0_34], %51 {strides = array<i32>} : memref<1x3x286xf32, #tpu.memory_space<vmem>>, vector<1x3x286xf32>,
    %52 = vector.broadcast %0 : vector<1x286xf32> to vector<3x286xf32>
    %53 = arith.mulf %48, %52 : vector<3x286xf32>
    %cst_35 = arith.constant dense<0.000000e+00> : vector<3xf32>
    %54 = vector.multi_reduction <add>, %53, %cst_35 [1] : vector<3x286xf32> to vector<3xf32>
    %55 = vector.shape_cast %54 : vector<3xf32> to vector<3x1xf32>
    %c0_36 = arith.constant 0 : index
    %c0_37 = arith.constant 0 : index
    %c0_38 = arith.constant 0 : index
    %56 = vector.load %arg5[%c0_36, %c0_37, %c0_38] : memref<1x3x2xf32, #tpu.memory_space<vmem>>, vector<1x3x1xf32>
    %57 = vector.shape_cast %56 : vector<1x3x1xf32> to vector<3x1xf32>
    %58 = vector.shape_cast %55 : vector<3x1xf32> to vector<1x3x1xf32>
    tpu.vector_store %arg5[%c0_36, %c0_37, %c0_38], %58 {strides = array<i32>} : memref<1x3x2xf32, #tpu.memory_space<vmem>>, vector<1x3x1xf32>,
    %59 = arith.mulf %53, %48 : vector<3x286xf32>
    %cst_39 = arith.constant dense<0.000000e+00> : vector<3xf32>
    %60 = vector.multi_reduction <add>, %59, %cst_39 [1] : vector<3x286xf32> to vector<3xf32>
    %61 = vector.shape_cast %60 : vector<3xf32> to vector<3x1xf32>
    %c0_40 = arith.constant 0 : index
    %c0_41 = arith.constant 0 : index
    %c1_42 = arith.constant 1 : index
    %62 = vector.load %arg5[%c0_40, %c0_41, %c1_42] : memref<1x3x2xf32, #tpu.memory_space<vmem>>, vector<1x3x1xf32>
    %63 = vector.shape_cast %62 : vector<1x3x1xf32> to vector<3x1xf32>
    %64 = vector.shape_cast %61 : vector<3x1xf32> to vector<1x3x1xf32>
    tpu.vector_store %arg5[%c0_40, %c0_41, %c1_42], %64 {strides = array<i32>} : memref<1x3x2xf32, #tpu.memory_space<vmem>>, vector<1x3x1xf32>,
    return
  }
  func.func @transform_0(%arg0: i32) -> (i32, i32) {
    %c0_i32 = arith.constant 0 : i32
    %c0_i32_0 = arith.constant 0 : i32
    %c0_i32_1 = arith.constant 0 : i32
    return %c0_i32, %c0_i32_0 : i32, i32
  }
  func.func @transform_1(%arg0: i32) -> (i32, i32, i32) {
    %c0_i32 = arith.constant 0 : i32
    %c0_i32_0 = arith.constant 0 : i32
    %c0_i32_1 = arith.constant 0 : i32
    return %arg0, %c0_i32, %c0_i32_0 : i32, i32, i32
  }
  func.func @transform_2(%arg0: i32) -> (i32, i32, i32) {
    %c0_i32 = arith.constant 0 : i32
    %c0_i32_0 = arith.constant 0 : i32
    %c0_i32_1 = arith.constant 0 : i32
    %c0_i32_2 = arith.constant 0 : i32
    return %c0_i32, %c0_i32_0, %c0_i32_1 : i32, i32, i32
  }
  func.func @transform_3(%arg0: i32) -> (i32, i32, i32) {
    %c0_i32 = arith.constant 0 : i32
    %c0_i32_0 = arith.constant 0 : i32
    %c0_i32_1 = arith.constant 0 : i32
    return %arg0, %c0_i32, %c0_i32_0 : i32, i32, i32
  }
  func.func @transform_4(%arg0: i32) -> (i32, i32, i32) {
    %c0_i32 = arith.constant 0 : i32
    %c0_i32_0 = arith.constant 0 : i32
    %c0_i32_1 = arith.constant 0 : i32
    return %arg0, %c0_i32, %c0_i32_0 : i32, i32, i32
  }
}

module attributes {stable_mosaic.version = 11 : i64} {
  func.func @_conv_kernel(%arg0: i32, %arg1: memref<1x286xf32, #tpu.memory_space<vmem>>, %arg2: memref<1x3x286xf32, #tpu.memory_space<vmem>>, %arg3: memref<3x1xf32, #tpu.memory_space<vmem>>, %arg4: memref<3x1xf32, #tpu.memory_space<vmem>>, %arg5: memref<1x3x324xf32, #tpu.memory_space<vmem>>, %arg6: memref<9x3x3xf32, #tpu.memory_space<vmem>>, %arg7: memref<3x1xf32, #tpu.memory_space<vmem>>, %arg8: memref<1x3x324xf32, #tpu.memory_space<vmem>>, %arg9: memref<1x3x324xf32, #tpu.memory_space<vmem>>, %arg10: memref<1x3x324xf32, #tpu.memory_space<vmem>>, %arg11: memref<1x3x324xf32, #tpu.memory_space<vmem>>) attributes {dimension_semantics = [#tpu.dimension_semantics<parallel>], iteration_bounds = array<i64: 2>, scalar_prefetch = 0 : i64, scratch_operands = 0 : i64, tpu.core_type = #tpu.core_type<tc>, window_params = [{pipeline_mode = #tpu.pipeline_mode<synchronous>, transform_indices = @transform_0, window_bounds = array<i64: 1, 286>}, {transform_indices = @transform_1, window_bounds = array<i64: 1, 3, 286>}, {pipeline_mode = #tpu.pipeline_mode<synchronous>, transform_indices = @transform_2, window_bounds = array<i64: 3, 1>}, {pipeline_mode = #tpu.pipeline_mode<synchronous>, transform_indices = @transform_3, window_bounds = array<i64: 3, 1>}, {transform_indices = @transform_4, window_bounds = array<i64: 1, 3, 324>}, {pipeline_mode = #tpu.pipeline_mode<synchronous>, transform_indices = @transform_5, window_bounds = array<i64: 9, 3, 3>}, {pipeline_mode = #tpu.pipeline_mode<synchronous>, transform_indices = @transform_6, window_bounds = array<i64: 3, 1>}, {transform_indices = @transform_7, window_bounds = array<i64: 1, 3, 324>}, {transform_indices = @transform_8, window_bounds = array<i64: 1, 3, 324>}, {transform_indices = @transform_9, window_bounds = array<i64: 1, 3, 324>}, {transform_indices = @transform_10, window_bounds = array<i64: 1, 3, 324>}]} {
    %c0 = arith.constant 0 : index
    %c0_0 = arith.constant 0 : index
    %0 = vector.load %arg1[%c0, %c0_0] : memref<1x286xf32, #tpu.memory_space<vmem>>, vector<1x286xf32>
    %c0_1 = arith.constant 0 : index
    %c0_2 = arith.constant 0 : index
    %c0_3 = arith.constant 0 : index
    %1 = vector.load %arg2[%c0_1, %c0_2, %c0_3] : memref<1x3x286xf32, #tpu.memory_space<vmem>>, vector<1x3x286xf32>
    %2 = vector.shape_cast %1 : vector<1x3x286xf32> to vector<3x286xf32>
    %c0_4 = arith.constant 0 : index
    %c0_5 = arith.constant 0 : index
    %3 = vector.load %arg3[%c0_4, %c0_5] : memref<3x1xf32, #tpu.memory_space<vmem>>, vector<3x1xf32>
    %c0_6 = arith.constant 0 : index
    %c0_7 = arith.constant 0 : index
    %4 = vector.load %arg4[%c0_6, %c0_7] : memref<3x1xf32, #tpu.memory_space<vmem>>, vector<3x1xf32>
    %5 = vector.broadcast %3 : vector<3x1xf32> to vector<3x286xf32>
    %6 = arith.mulf %2, %5 : vector<3x286xf32>
    %7 = vector.broadcast %4 : vector<3x1xf32> to vector<3x286xf32>
    %8 = arith.addf %6, %7 : vector<3x286xf32>
    %cst = arith.constant 0.000000e+00 : f32
    %9 = vector.broadcast %cst : f32 to vector<3x286xf32>
    %10 = arith.maximumf %8, %9 : vector<3x286xf32>
    %11 = vector.broadcast %0 : vector<1x286xf32> to vector<3x286xf32>
    %12 = arith.mulf %10, %11 : vector<3x286xf32>
    %cst_8 = arith.constant 0.000000e+00 : f32
    %13 = vector.broadcast %cst_8 : f32 to vector<3x19xf32>
    %14 = tpu.concatenate %13, %12, %13 in 1 : vector<3x19xf32>, vector<3x286xf32>, vector<3x19xf32> -> vector<3x324xf32>
    %c0_9 = arith.constant 0 : index
    %c0_10 = arith.constant 0 : index
    %c0_11 = arith.constant 0 : index
    %15 = vector.load %arg5[%c0_9, %c0_10, %c0_11] : memref<1x3x324xf32, #tpu.memory_space<vmem>>, vector<1x3x324xf32>
    %16 = vector.shape_cast %15 : vector<1x3x324xf32> to vector<3x324xf32>
    %17 = arith.addf %14, %16 : vector<3x324xf32>
    %cst_12 = arith.constant 0.000000e+00 : f32
    %18 = vector.broadcast %cst_12 : f32 to vector<3x286xf32>
    %19 = vector.extract_strided_slice %17 {offsets = [0, 0], sizes = [3, 286], strides = [1, 1]} : vector<3x324xf32> to vector<3x286xf32>
    %c0_13 = arith.constant 0 : index
    %c0_14 = arith.constant 0 : index
    %c0_15 = arith.constant 0 : index
    %20 = vector.load %arg6[%c0_13, %c0_14, %c0_15] : memref<9x3x3xf32, #tpu.memory_space<vmem>>, vector<1x3x3xf32>
    %21 = vector.shape_cast %20 : vector<1x3x3xf32> to vector<3x3xf32>
    %cst_16 = arith.constant dense<0.000000e+00> : vector<3x286xf32>
    %22 = tpu.matmul %21, %19, %cst_16 {dimension_numbers = #tpu.dot_dimension_numbers<[1], [0], [0], [1], [0, 0, 1, 1], [], []>} : vector<3x3xf32>, vector<3x286xf32>, vector<3x286xf32> -> vector<3x286xf32>
    %23 = arith.addf %18, %22 : vector<3x286xf32>
    %24 = vector.extract_strided_slice %17 {offsets = [0, 1], sizes = [3, 286], strides = [1, 1]} : vector<3x324xf32> to vector<3x286xf32>
    %c1 = arith.constant 1 : index
    %c0_17 = arith.constant 0 : index
    %c0_18 = arith.constant 0 : index
    %25 = vector.load %arg6[%c1, %c0_17, %c0_18] : memref<9x3x3xf32, #tpu.memory_space<vmem>>, vector<1x3x3xf32>
    %26 = vector.shape_cast %25 : vector<1x3x3xf32> to vector<3x3xf32>
    %cst_19 = arith.constant dense<0.000000e+00> : vector<3x286xf32>
    %27 = tpu.matmul %26, %24, %cst_19 {dimension_numbers = #tpu.dot_dimension_numbers<[1], [0], [0], [1], [0, 0, 1, 1], [], []>} : vector<3x3xf32>, vector<3x286xf32>, vector<3x286xf32> -> vector<3x286xf32>
    %28 = arith.addf %23, %27 : vector<3x286xf32>
    %29 = vector.extract_strided_slice %17 {offsets = [0, 2], sizes = [3, 286], strides = [1, 1]} : vector<3x324xf32> to vector<3x286xf32>
    %c2 = arith.constant 2 : index
    %c0_20 = arith.constant 0 : index
    %c0_21 = arith.constant 0 : index
    %30 = vector.load %arg6[%c2, %c0_20, %c0_21] : memref<9x3x3xf32, #tpu.memory_space<vmem>>, vector<1x3x3xf32>
    %31 = vector.shape_cast %30 : vector<1x3x3xf32> to vector<3x3xf32>
    %cst_22 = arith.constant dense<0.000000e+00> : vector<3x286xf32>
    %32 = tpu.matmul %31, %29, %cst_22 {dimension_numbers = #tpu.dot_dimension_numbers<[1], [0], [0], [1], [0, 0, 1, 1], [], []>} : vector<3x3xf32>, vector<3x286xf32>, vector<3x286xf32> -> vector<3x286xf32>
    %33 = arith.addf %28, %32 : vector<3x286xf32>
    %34 = vector.extract_strided_slice %17 {offsets = [0, 18], sizes = [3, 286], strides = [1, 1]} : vector<3x324xf32> to vector<3x286xf32>
    %c3 = arith.constant 3 : index
    %c0_23 = arith.constant 0 : index
    %c0_24 = arith.constant 0 : index
    %35 = vector.load %arg6[%c3, %c0_23, %c0_24] : memref<9x3x3xf32, #tpu.memory_space<vmem>>, vector<1x3x3xf32>
    %36 = vector.shape_cast %35 : vector<1x3x3xf32> to vector<3x3xf32>
    %cst_25 = arith.constant dense<0.000000e+00> : vector<3x286xf32>
    %37 = tpu.matmul %36, %34, %cst_25 {dimension_numbers = #tpu.dot_dimension_numbers<[1], [0], [0], [1], [0, 0, 1, 1], [], []>} : vector<3x3xf32>, vector<3x286xf32>, vector<3x286xf32> -> vector<3x286xf32>
    %38 = arith.addf %33, %37 : vector<3x286xf32>
    %39 = vector.extract_strided_slice %17 {offsets = [0, 19], sizes = [3, 286], strides = [1, 1]} : vector<3x324xf32> to vector<3x286xf32>
    %c4 = arith.constant 4 : index
    %c0_26 = arith.constant 0 : index
    %c0_27 = arith.constant 0 : index
    %40 = vector.load %arg6[%c4, %c0_26, %c0_27] : memref<9x3x3xf32, #tpu.memory_space<vmem>>, vector<1x3x3xf32>
    %41 = vector.shape_cast %40 : vector<1x3x3xf32> to vector<3x3xf32>
    %cst_28 = arith.constant dense<0.000000e+00> : vector<3x286xf32>
    %42 = tpu.matmul %41, %39, %cst_28 {dimension_numbers = #tpu.dot_dimension_numbers<[1], [0], [0], [1], [0, 0, 1, 1], [], []>} : vector<3x3xf32>, vector<3x286xf32>, vector<3x286xf32> -> vector<3x286xf32>
    %43 = arith.addf %38, %42 : vector<3x286xf32>
    %44 = vector.extract_strided_slice %17 {offsets = [0, 20], sizes = [3, 286], strides = [1, 1]} : vector<3x324xf32> to vector<3x286xf32>
    %c5 = arith.constant 5 : index
    %c0_29 = arith.constant 0 : index
    %c0_30 = arith.constant 0 : index
    %45 = vector.load %arg6[%c5, %c0_29, %c0_30] : memref<9x3x3xf32, #tpu.memory_space<vmem>>, vector<1x3x3xf32>
    %46 = vector.shape_cast %45 : vector<1x3x3xf32> to vector<3x3xf32>
    %cst_31 = arith.constant dense<0.000000e+00> : vector<3x286xf32>
    %47 = tpu.matmul %46, %44, %cst_31 {dimension_numbers = #tpu.dot_dimension_numbers<[1], [0], [0], [1], [0, 0, 1, 1], [], []>} : vector<3x3xf32>, vector<3x286xf32>, vector<3x286xf32> -> vector<3x286xf32>
    %48 = arith.addf %43, %47 : vector<3x286xf32>
    %49 = vector.extract_strided_slice %17 {offsets = [0, 36], sizes = [3, 286], strides = [1, 1]} : vector<3x324xf32> to vector<3x286xf32>
    %c6 = arith.constant 6 : index
    %c0_32 = arith.constant 0 : index
    %c0_33 = arith.constant 0 : index
    %50 = vector.load %arg6[%c6, %c0_32, %c0_33] : memref<9x3x3xf32, #tpu.memory_space<vmem>>, vector<1x3x3xf32>
    %51 = vector.shape_cast %50 : vector<1x3x3xf32> to vector<3x3xf32>
    %cst_34 = arith.constant dense<0.000000e+00> : vector<3x286xf32>
    %52 = tpu.matmul %51, %49, %cst_34 {dimension_numbers = #tpu.dot_dimension_numbers<[1], [0], [0], [1], [0, 0, 1, 1], [], []>} : vector<3x3xf32>, vector<3x286xf32>, vector<3x286xf32> -> vector<3x286xf32>
    %53 = arith.addf %48, %52 : vector<3x286xf32>
    %54 = vector.extract_strided_slice %17 {offsets = [0, 37], sizes = [3, 286], strides = [1, 1]} : vector<3x324xf32> to vector<3x286xf32>
    %c7 = arith.constant 7 : index
    %c0_35 = arith.constant 0 : index
    %c0_36 = arith.constant 0 : index
    %55 = vector.load %arg6[%c7, %c0_35, %c0_36] : memref<9x3x3xf32, #tpu.memory_space<vmem>>, vector<1x3x3xf32>
    %56 = vector.shape_cast %55 : vector<1x3x3xf32> to vector<3x3xf32>
    %cst_37 = arith.constant dense<0.000000e+00> : vector<3x286xf32>
    %57 = tpu.matmul %56, %54, %cst_37 {dimension_numbers = #tpu.dot_dimension_numbers<[1], [0], [0], [1], [0, 0, 1, 1], [], []>} : vector<3x3xf32>, vector<3x286xf32>, vector<3x286xf32> -> vector<3x286xf32>
    %58 = arith.addf %53, %57 : vector<3x286xf32>
    %59 = vector.extract_strided_slice %17 {offsets = [0, 38], sizes = [3, 286], strides = [1, 1]} : vector<3x324xf32> to vector<3x286xf32>
    %c8 = arith.constant 8 : index
    %c0_38 = arith.constant 0 : index
    %c0_39 = arith.constant 0 : index
    %60 = vector.load %arg6[%c8, %c0_38, %c0_39] : memref<9x3x3xf32, #tpu.memory_space<vmem>>, vector<1x3x3xf32>
    %61 = vector.shape_cast %60 : vector<1x3x3xf32> to vector<3x3xf32>
    %cst_40 = arith.constant dense<0.000000e+00> : vector<3x286xf32>
    %62 = tpu.matmul %61, %59, %cst_40 {dimension_numbers = #tpu.dot_dimension_numbers<[1], [0], [0], [1], [0, 0, 1, 1], [], []>} : vector<3x3xf32>, vector<3x286xf32>, vector<3x286xf32> -> vector<3x286xf32>
    %63 = arith.addf %58, %62 : vector<3x286xf32>
    %c0_41 = arith.constant 0 : index
    %c0_42 = arith.constant 0 : index
    %64 = vector.load %arg7[%c0_41, %c0_42] : memref<3x1xf32, #tpu.memory_space<vmem>>, vector<3x1xf32>
    %65 = vector.broadcast %64 : vector<3x1xf32> to vector<3x286xf32>
    %66 = arith.addf %63, %65 : vector<3x286xf32>
    %c0_43 = arith.constant 0 : index
    %c0_44 = arith.constant 0 : index
    %c0_45 = arith.constant 0 : index
    %67 = vector.load %arg8[%c0_43, %c0_44, %c0_45] : memref<1x3x324xf32, #tpu.memory_space<vmem>>, vector<1x3x324xf32>
    %68 = vector.shape_cast %67 : vector<1x3x324xf32> to vector<3x324xf32>
    %c0_46 = arith.constant 0 : index
    %c0_47 = arith.constant 0 : index
    %c0_48 = arith.constant 0 : index
    %69 = vector.load %arg9[%c0_46, %c0_47, %c0_48] : memref<1x3x324xf32, #tpu.memory_space<vmem>>, vector<1x3x324xf32>
    %70 = vector.shape_cast %69 : vector<1x3x324xf32> to vector<3x324xf32>
    %71 = arith.negf %66 : vector<3x286xf32>
    %72 = math.exp %71 : vector<3x286xf32>
    %cst_49 = arith.constant 1.000000e+00 : f32
    %73 = vector.broadcast %cst_49 : f32 to vector<3x286xf32>
    %74 = arith.addf %73, %72 : vector<3x286xf32>
    %75 = arith.divf %73, %74 : vector<3x286xf32>
    %76 = vector.broadcast %0 : vector<1x286xf32> to vector<3x286xf32>
    %77 = arith.mulf %75, %76 : vector<3x286xf32>
    %78 = vector.extract_strided_slice %68 {offsets = [0, 19], sizes = [3, 286], strides = [1, 1]} : vector<3x324xf32> to vector<3x286xf32>
    %79 = vector.extract_strided_slice %70 {offsets = [0, 19], sizes = [3, 286], strides = [1, 1]} : vector<3x324xf32> to vector<3x286xf32>
    %80 = arith.addf %79, %77 : vector<3x286xf32>
    %cst_50 = arith.constant 9.99999974E-5 : f32
    %cst_51 = arith.constant 1.000000e+00 : f32
    %81 = vector.broadcast %cst_50 : f32 to vector<3x286xf32>
    %82 = arith.maximumf %81, %80 : vector<3x286xf32>
    %83 = vector.broadcast %cst_51 : f32 to vector<3x286xf32>
    %84 = arith.minimumf %83, %82 : vector<3x286xf32>
    %85 = arith.divf %78, %84 : vector<3x286xf32>
    %cst_52 = arith.constant 0.000000e+00 : f32
    %cst_53 = arith.constant 1.000000e+00 : f32
    %86 = vector.broadcast %cst_52 : f32 to vector<3x286xf32>
    %87 = arith.maximumf %86, %85 : vector<3x286xf32>
    %88 = vector.broadcast %cst_53 : f32 to vector<3x286xf32>
    %89 = arith.minimumf %88, %87 : vector<3x286xf32>
    %cst_54 = arith.constant 0.000000e+00 : f32
    %90 = vector.broadcast %cst_54 : f32 to vector<3x19xf32>
    %91 = tpu.concatenate %90, %84, %90 in 1 : vector<3x19xf32>, vector<3x286xf32>, vector<3x19xf32> -> vector<3x324xf32>
    %c0_55 = arith.constant 0 : index
    %c0_56 = arith.constant 0 : index
    %c0_57 = arith.constant 0 : index
    %92 = vector.load %arg10[%c0_55, %c0_56, %c0_57] : memref<1x3x324xf32, #tpu.memory_space<vmem>>, vector<1x3x324xf32>
    %93 = vector.shape_cast %92 : vector<1x3x324xf32> to vector<3x324xf32>
    %94 = vector.shape_cast %91 : vector<3x324xf32> to vector<1x3x324xf32>
    tpu.vector_store %arg10[%c0_55, %c0_56, %c0_57], %94 {strides = array<i32>} : memref<1x3x324xf32, #tpu.memory_space<vmem>>, vector<1x3x324xf32>,
    %cst_58 = arith.constant 0.000000e+00 : f32
    %95 = vector.broadcast %cst_58 : f32 to vector<3x19xf32>
    %96 = tpu.concatenate %95, %89, %95 in 1 : vector<3x19xf32>, vector<3x286xf32>, vector<3x19xf32> -> vector<3x324xf32>
    %c0_59 = arith.constant 0 : index
    %c0_60 = arith.constant 0 : index
    %c0_61 = arith.constant 0 : index
    %97 = vector.load %arg11[%c0_59, %c0_60, %c0_61] : memref<1x3x324xf32, #tpu.memory_space<vmem>>, vector<1x3x324xf32>
    %98 = vector.shape_cast %97 : vector<1x3x324xf32> to vector<3x324xf32>
    %99 = vector.shape_cast %96 : vector<3x324xf32> to vector<1x3x324xf32>
    tpu.vector_store %arg11[%c0_59, %c0_60, %c0_61], %99 {strides = array<i32>} : memref<1x3x324xf32, #tpu.memory_space<vmem>>, vector<1x3x324xf32>,
    return
  }
  func.func @transform_0(%arg0: i32) -> (i32, i32) {
    %c0_i32 = arith.constant 0 : i32
    %c0_i32_0 = arith.constant 0 : i32
    %c0_i32_1 = arith.constant 0 : i32
    return %c0_i32, %c0_i32_0 : i32, i32
  }
  func.func @transform_1(%arg0: i32) -> (i32, i32, i32) {
    %c0_i32 = arith.constant 0 : i32
    %c0_i32_0 = arith.constant 0 : i32
    %c0_i32_1 = arith.constant 0 : i32
    return %arg0, %c0_i32, %c0_i32_0 : i32, i32, i32
  }
  func.func @transform_2(%arg0: i32) -> (i32, i32) {
    %c0_i32 = arith.constant 0 : i32
    %c0_i32_0 = arith.constant 0 : i32
    %c0_i32_1 = arith.constant 0 : i32
    return %c0_i32, %c0_i32_0 : i32, i32
  }
  func.func @transform_3(%arg0: i32) -> (i32, i32) {
    %c0_i32 = arith.constant 0 : i32
    %c0_i32_0 = arith.constant 0 : i32
    %c0_i32_1 = arith.constant 0 : i32
    return %c0_i32, %c0_i32_0 : i32, i32
  }
  func.func @transform_4(%arg0: i32) -> (i32, i32, i32) {
    %c0_i32 = arith.constant 0 : i32
    %c0_i32_0 = arith.constant 0 : i32
    %c0_i32_1 = arith.constant 0 : i32
    return %arg0, %c0_i32, %c0_i32_0 : i32, i32, i32
  }
  func.func @transform_5(%arg0: i32) -> (i32, i32, i32) {
    %c0_i32 = arith.constant 0 : i32
    %c0_i32_0 = arith.constant 0 : i32
    %c0_i32_1 = arith.constant 0 : i32
    %c0_i32_2 = arith.constant 0 : i32
    return %c0_i32, %c0_i32_0, %c0_i32_1 : i32, i32, i32
  }
  func.func @transform_6(%arg0: i32) -> (i32, i32) {
    %c0_i32 = arith.constant 0 : i32
    %c0_i32_0 = arith.constant 0 : i32
    %c0_i32_1 = arith.constant 0 : i32
    return %c0_i32, %c0_i32_0 : i32, i32
  }
  func.func @transform_7(%arg0: i32) -> (i32, i32, i32) {
    %c0_i32 = arith.constant 0 : i32
    %c0_i32_0 = arith.constant 0 : i32
    %c0_i32_1 = arith.constant 0 : i32
    return %arg0, %c0_i32, %c0_i32_0 : i32, i32, i32
  }
  func.func @transform_8(%arg0: i32) -> (i32, i32, i32) {
    %c0_i32 = arith.constant 0 : i32
    %c0_i32_0 = arith.constant 0 : i32
    %c0_i32_1 = arith.constant 0 : i32
    return %arg0, %c0_i32, %c0_i32_0 : i32, i32, i32
  }
  func.func @transform_9(%arg0: i32) -> (i32, i32, i32) {
    %c0_i32 = arith.constant 0 : i32
    %c0_i32_0 = arith.constant 0 : i32
    %c0_i32_1 = arith.constant 0 : i32
    return %arg0, %c0_i32, %c0_i32_0 : i32, i32, i32
  }
  func.func @transform_10(%arg0: i32) -> (i32, i32, i32) {
    %c0_i32 = arith.constant 0 : i32
    %c0_i32_0 = arith.constant 0 : i32
    %c0_i32_1 = arith.constant 0 : i32
    return %arg0, %c0_i32, %c0_i32_0 : i32, i32, i32
  }
}

module attributes {stable_mosaic.version = 11 : i64} {
  func.func @_conv_kernel(%arg0: i32, %arg1: memref<1x286xf32, #tpu.memory_space<vmem>>, %arg2: memref<1x3x324xf32, #tpu.memory_space<vmem>>, %arg3: memref<9x16x3xf32, #tpu.memory_space<vmem>>, %arg4: memref<1x16x286xf32, #tpu.memory_space<vmem>>, %arg5: memref<1x16x2xf32, #tpu.memory_space<vmem>>) attributes {dimension_semantics = [#tpu.dimension_semantics<parallel>], iteration_bounds = array<i64: 2>, scalar_prefetch = 0 : i64, scratch_operands = 0 : i64, tpu.core_type = #tpu.core_type<tc>, window_params = [{pipeline_mode = #tpu.pipeline_mode<synchronous>, transform_indices = @transform_0, window_bounds = array<i64: 1, 286>}, {transform_indices = @transform_1, window_bounds = array<i64: 1, 3, 324>}, {pipeline_mode = #tpu.pipeline_mode<synchronous>, transform_indices = @transform_2, window_bounds = array<i64: 9, 16, 3>}, {transform_indices = @transform_3, window_bounds = array<i64: 1, 16, 286>}, {transform_indices = @transform_4, window_bounds = array<i64: 1, 16, 2>}]} {
    %c0 = arith.constant 0 : index
    %c0_0 = arith.constant 0 : index
    %0 = vector.load %arg1[%c0, %c0_0] : memref<1x286xf32, #tpu.memory_space<vmem>>, vector<1x286xf32>
    %c0_1 = arith.constant 0 : index
    %c0_2 = arith.constant 0 : index
    %c0_3 = arith.constant 0 : index
    %1 = vector.load %arg2[%c0_1, %c0_2, %c0_3] : memref<1x3x324xf32, #tpu.memory_space<vmem>>, vector<1x3x324xf32>
    %2 = vector.shape_cast %1 : vector<1x3x324xf32> to vector<3x324xf32>
    %cst = arith.constant 0.000000e+00 : f32
    %3 = vector.broadcast %cst : f32 to vector<16x286xf32>
    %4 = vector.extract_strided_slice %2 {offsets = [0, 0], sizes = [3, 286], strides = [1, 1]} : vector<3x324xf32> to vector<3x286xf32>
    %c0_4 = arith.constant 0 : index
    %c0_5 = arith.constant 0 : index
    %c0_6 = arith.constant 0 : index
    %5 = vector.load %arg3[%c0_4, %c0_5, %c0_6] : memref<9x16x3xf32, #tpu.memory_space<vmem>>, vector<1x16x3xf32>
    %6 = vector.shape_cast %5 : vector<1x16x3xf32> to vector<16x3xf32>
    %cst_7 = arith.constant dense<0.000000e+00> : vector<16x286xf32>
    %7 = tpu.matmul %6, %4, %cst_7 {dimension_numbers = #tpu.dot_dimension_numbers<[1], [0], [0], [1], [0, 0, 1, 1], [], []>} : vector<16x3xf32>, vector<3x286xf32>, vector<16x286xf32> -> vector<16x286xf32>
    %8 = arith.addf %3, %7 : vector<16x286xf32>
    %9 = vector.extract_strided_slice %2 {offsets = [0, 1], sizes = [3, 286], strides = [1, 1]} : vector<3x324xf32> to vector<3x286xf32>
    %c1 = arith.constant 1 : index
    %c0_8 = arith.constant 0 : index
    %c0_9 = arith.constant 0 : index
    %10 = vector.load %arg3[%c1, %c0_8, %c0_9] : memref<9x16x3xf32, #tpu.memory_space<vmem>>, vector<1x16x3xf32>
    %11 = vector.shape_cast %10 : vector<1x16x3xf32> to vector<16x3xf32>
    %cst_10 = arith.constant dense<0.000000e+00> : vector<16x286xf32>
    %12 = tpu.matmul %11, %9, %cst_10 {dimension_numbers = #tpu.dot_dimension_numbers<[1], [0], [0], [1], [0, 0, 1, 1], [], []>} : vector<16x3xf32>, vector<3x286xf32>, vector<16x286xf32> -> vector<16x286xf32>
    %13 = arith.addf %8, %12 : vector<16x286xf32>
    %14 = vector.extract_strided_slice %2 {offsets = [0, 2], sizes = [3, 286], strides = [1, 1]} : vector<3x324xf32> to vector<3x286xf32>
    %c2 = arith.constant 2 : index
    %c0_11 = arith.constant 0 : index
    %c0_12 = arith.constant 0 : index
    %15 = vector.load %arg3[%c2, %c0_11, %c0_12] : memref<9x16x3xf32, #tpu.memory_space<vmem>>, vector<1x16x3xf32>
    %16 = vector.shape_cast %15 : vector<1x16x3xf32> to vector<16x3xf32>
    %cst_13 = arith.constant dense<0.000000e+00> : vector<16x286xf32>
    %17 = tpu.matmul %16, %14, %cst_13 {dimension_numbers = #tpu.dot_dimension_numbers<[1], [0], [0], [1], [0, 0, 1, 1], [], []>} : vector<16x3xf32>, vector<3x286xf32>, vector<16x286xf32> -> vector<16x286xf32>
    %18 = arith.addf %13, %17 : vector<16x286xf32>
    %19 = vector.extract_strided_slice %2 {offsets = [0, 18], sizes = [3, 286], strides = [1, 1]} : vector<3x324xf32> to vector<3x286xf32>
    %c3 = arith.constant 3 : index
    %c0_14 = arith.constant 0 : index
    %c0_15 = arith.constant 0 : index
    %20 = vector.load %arg3[%c3, %c0_14, %c0_15] : memref<9x16x3xf32, #tpu.memory_space<vmem>>, vector<1x16x3xf32>
    %21 = vector.shape_cast %20 : vector<1x16x3xf32> to vector<16x3xf32>
    %cst_16 = arith.constant dense<0.000000e+00> : vector<16x286xf32>
    %22 = tpu.matmul %21, %19, %cst_16 {dimension_numbers = #tpu.dot_dimension_numbers<[1], [0], [0], [1], [0, 0, 1, 1], [], []>} : vector<16x3xf32>, vector<3x286xf32>, vector<16x286xf32> -> vector<16x286xf32>
    %23 = arith.addf %18, %22 : vector<16x286xf32>
    %24 = vector.extract_strided_slice %2 {offsets = [0, 19], sizes = [3, 286], strides = [1, 1]} : vector<3x324xf32> to vector<3x286xf32>
    %c4 = arith.constant 4 : index
    %c0_17 = arith.constant 0 : index
    %c0_18 = arith.constant 0 : index
    %25 = vector.load %arg3[%c4, %c0_17, %c0_18] : memref<9x16x3xf32, #tpu.memory_space<vmem>>, vector<1x16x3xf32>
    %26 = vector.shape_cast %25 : vector<1x16x3xf32> to vector<16x3xf32>
    %cst_19 = arith.constant dense<0.000000e+00> : vector<16x286xf32>
    %27 = tpu.matmul %26, %24, %cst_19 {dimension_numbers = #tpu.dot_dimension_numbers<[1], [0], [0], [1], [0, 0, 1, 1], [], []>} : vector<16x3xf32>, vector<3x286xf32>, vector<16x286xf32> -> vector<16x286xf32>
    %28 = arith.addf %23, %27 : vector<16x286xf32>
    %29 = vector.extract_strided_slice %2 {offsets = [0, 20], sizes = [3, 286], strides = [1, 1]} : vector<3x324xf32> to vector<3x286xf32>
    %c5 = arith.constant 5 : index
    %c0_20 = arith.constant 0 : index
    %c0_21 = arith.constant 0 : index
    %30 = vector.load %arg3[%c5, %c0_20, %c0_21] : memref<9x16x3xf32, #tpu.memory_space<vmem>>, vector<1x16x3xf32>
    %31 = vector.shape_cast %30 : vector<1x16x3xf32> to vector<16x3xf32>
    %cst_22 = arith.constant dense<0.000000e+00> : vector<16x286xf32>
    %32 = tpu.matmul %31, %29, %cst_22 {dimension_numbers = #tpu.dot_dimension_numbers<[1], [0], [0], [1], [0, 0, 1, 1], [], []>} : vector<16x3xf32>, vector<3x286xf32>, vector<16x286xf32> -> vector<16x286xf32>
    %33 = arith.addf %28, %32 : vector<16x286xf32>
    %34 = vector.extract_strided_slice %2 {offsets = [0, 36], sizes = [3, 286], strides = [1, 1]} : vector<3x324xf32> to vector<3x286xf32>
    %c6 = arith.constant 6 : index
    %c0_23 = arith.constant 0 : index
    %c0_24 = arith.constant 0 : index
    %35 = vector.load %arg3[%c6, %c0_23, %c0_24] : memref<9x16x3xf32, #tpu.memory_space<vmem>>, vector<1x16x3xf32>
    %36 = vector.shape_cast %35 : vector<1x16x3xf32> to vector<16x3xf32>
    %cst_25 = arith.constant dense<0.000000e+00> : vector<16x286xf32>
    %37 = tpu.matmul %36, %34, %cst_25 {dimension_numbers = #tpu.dot_dimension_numbers<[1], [0], [0], [1], [0, 0, 1, 1], [], []>} : vector<16x3xf32>, vector<3x286xf32>, vector<16x286xf32> -> vector<16x286xf32>
    %38 = arith.addf %33, %37 : vector<16x286xf32>
    %39 = vector.extract_strided_slice %2 {offsets = [0, 37], sizes = [3, 286], strides = [1, 1]} : vector<3x324xf32> to vector<3x286xf32>
    %c7 = arith.constant 7 : index
    %c0_26 = arith.constant 0 : index
    %c0_27 = arith.constant 0 : index
    %40 = vector.load %arg3[%c7, %c0_26, %c0_27] : memref<9x16x3xf32, #tpu.memory_space<vmem>>, vector<1x16x3xf32>
    %41 = vector.shape_cast %40 : vector<1x16x3xf32> to vector<16x3xf32>
    %cst_28 = arith.constant dense<0.000000e+00> : vector<16x286xf32>
    %42 = tpu.matmul %41, %39, %cst_28 {dimension_numbers = #tpu.dot_dimension_numbers<[1], [0], [0], [1], [0, 0, 1, 1], [], []>} : vector<16x3xf32>, vector<3x286xf32>, vector<16x286xf32> -> vector<16x286xf32>
    %43 = arith.addf %38, %42 : vector<16x286xf32>
    %44 = vector.extract_strided_slice %2 {offsets = [0, 38], sizes = [3, 286], strides = [1, 1]} : vector<3x324xf32> to vector<3x286xf32>
    %c8 = arith.constant 8 : index
    %c0_29 = arith.constant 0 : index
    %c0_30 = arith.constant 0 : index
    %45 = vector.load %arg3[%c8, %c0_29, %c0_30] : memref<9x16x3xf32, #tpu.memory_space<vmem>>, vector<1x16x3xf32>
    %46 = vector.shape_cast %45 : vector<1x16x3xf32> to vector<16x3xf32>
    %cst_31 = arith.constant dense<0.000000e+00> : vector<16x286xf32>
    %47 = tpu.matmul %46, %44, %cst_31 {dimension_numbers = #tpu.dot_dimension_numbers<[1], [0], [0], [1], [0, 0, 1, 1], [], []>} : vector<16x3xf32>, vector<3x286xf32>, vector<16x286xf32> -> vector<16x286xf32>
    %48 = arith.addf %43, %47 : vector<16x286xf32>
    %c0_32 = arith.constant 0 : index
    %c0_33 = arith.constant 0 : index
    %c0_34 = arith.constant 0 : index
    %49 = vector.load %arg4[%c0_32, %c0_33, %c0_34] : memref<1x16x286xf32, #tpu.memory_space<vmem>>, vector<1x16x286xf32>
    %50 = vector.shape_cast %49 : vector<1x16x286xf32> to vector<16x286xf32>
    %51 = vector.shape_cast %48 : vector<16x286xf32> to vector<1x16x286xf32>
    tpu.vector_store %arg4[%c0_32, %c0_33, %c0_34], %51 {strides = array<i32>} : memref<1x16x286xf32, #tpu.memory_space<vmem>>, vector<1x16x286xf32>,
    %52 = vector.broadcast %0 : vector<1x286xf32> to vector<16x286xf32>
    %53 = arith.mulf %48, %52 : vector<16x286xf32>
    %cst_35 = arith.constant dense<0.000000e+00> : vector<16xf32>
    %54 = vector.multi_reduction <add>, %53, %cst_35 [1] : vector<16x286xf32> to vector<16xf32>
    %55 = vector.shape_cast %54 : vector<16xf32> to vector<16x1xf32>
    %c0_36 = arith.constant 0 : index
    %c0_37 = arith.constant 0 : index
    %c0_38 = arith.constant 0 : index
    %56 = vector.load %arg5[%c0_36, %c0_37, %c0_38] : memref<1x16x2xf32, #tpu.memory_space<vmem>>, vector<1x16x1xf32>
    %57 = vector.shape_cast %56 : vector<1x16x1xf32> to vector<16x1xf32>
    %58 = vector.shape_cast %55 : vector<16x1xf32> to vector<1x16x1xf32>
    tpu.vector_store %arg5[%c0_36, %c0_37, %c0_38], %58 {strides = array<i32>} : memref<1x16x2xf32, #tpu.memory_space<vmem>>, vector<1x16x1xf32>,
    %59 = arith.mulf %53, %48 : vector<16x286xf32>
    %cst_39 = arith.constant dense<0.000000e+00> : vector<16xf32>
    %60 = vector.multi_reduction <add>, %59, %cst_39 [1] : vector<16x286xf32> to vector<16xf32>
    %61 = vector.shape_cast %60 : vector<16xf32> to vector<16x1xf32>
    %c0_40 = arith.constant 0 : index
    %c0_41 = arith.constant 0 : index
    %c1_42 = arith.constant 1 : index
    %62 = vector.load %arg5[%c0_40, %c0_41, %c1_42] : memref<1x16x2xf32, #tpu.memory_space<vmem>>, vector<1x16x1xf32>
    %63 = vector.shape_cast %62 : vector<1x16x1xf32> to vector<16x1xf32>
    %64 = vector.shape_cast %61 : vector<16x1xf32> to vector<1x16x1xf32>
    tpu.vector_store %arg5[%c0_40, %c0_41, %c1_42], %64 {strides = array<i32>} : memref<1x16x2xf32, #tpu.memory_space<vmem>>, vector<1x16x1xf32>,
    return
  }
  func.func @transform_0(%arg0: i32) -> (i32, i32) {
    %c0_i32 = arith.constant 0 : i32
    %c0_i32_0 = arith.constant 0 : i32
    %c0_i32_1 = arith.constant 0 : i32
    return %c0_i32, %c0_i32_0 : i32, i32
  }
  func.func @transform_1(%arg0: i32) -> (i32, i32, i32) {
    %c0_i32 = arith.constant 0 : i32
    %c0_i32_0 = arith.constant 0 : i32
    %c0_i32_1 = arith.constant 0 : i32
    return %arg0, %c0_i32, %c0_i32_0 : i32, i32, i32
  }
  func.func @transform_2(%arg0: i32) -> (i32, i32, i32) {
    %c0_i32 = arith.constant 0 : i32
    %c0_i32_0 = arith.constant 0 : i32
    %c0_i32_1 = arith.constant 0 : i32
    %c0_i32_2 = arith.constant 0 : i32
    return %c0_i32, %c0_i32_0, %c0_i32_1 : i32, i32, i32
  }
  func.func @transform_3(%arg0: i32) -> (i32, i32, i32) {
    %c0_i32 = arith.constant 0 : i32
    %c0_i32_0 = arith.constant 0 : i32
    %c0_i32_1 = arith.constant 0 : i32
    return %arg0, %c0_i32, %c0_i32_0 : i32, i32, i32
  }
  func.func @transform_4(%arg0: i32) -> (i32, i32, i32) {
    %c0_i32 = arith.constant 0 : i32
    %c0_i32_0 = arith.constant 0 : i32
    %c0_i32_1 = arith.constant 0 : i32
    return %arg0, %c0_i32, %c0_i32_0 : i32, i32, i32
  }
}

module attributes {stable_mosaic.version = 11 : i64} {
  func.func @_bn_apply_kernel(%arg0: i32, %arg1: memref<1x286xf32, #tpu.memory_space<vmem>>, %arg2: memref<1x16x286xf32, #tpu.memory_space<vmem>>, %arg3: memref<16x1xf32, #tpu.memory_space<vmem>>, %arg4: memref<16x1xf32, #tpu.memory_space<vmem>>, %arg5: memref<1x16x324xf32, #tpu.memory_space<vmem>>) attributes {dimension_semantics = [#tpu.dimension_semantics<parallel>], iteration_bounds = array<i64: 2>, scalar_prefetch = 0 : i64, scratch_operands = 0 : i64, tpu.core_type = #tpu.core_type<tc>, window_params = [{pipeline_mode = #tpu.pipeline_mode<synchronous>, transform_indices = @transform_0, window_bounds = array<i64: 1, 286>}, {transform_indices = @transform_1, window_bounds = array<i64: 1, 16, 286>}, {pipeline_mode = #tpu.pipeline_mode<synchronous>, transform_indices = @transform_2, window_bounds = array<i64: 16, 1>}, {pipeline_mode = #tpu.pipeline_mode<synchronous>, transform_indices = @transform_3, window_bounds = array<i64: 16, 1>}, {transform_indices = @transform_4, window_bounds = array<i64: 1, 16, 324>}]} {
    %c0 = arith.constant 0 : index
    %c0_0 = arith.constant 0 : index
    %0 = vector.load %arg1[%c0, %c0_0] : memref<1x286xf32, #tpu.memory_space<vmem>>, vector<1x286xf32>
    %c0_1 = arith.constant 0 : index
    %c0_2 = arith.constant 0 : index
    %c0_3 = arith.constant 0 : index
    %1 = vector.load %arg2[%c0_1, %c0_2, %c0_3] : memref<1x16x286xf32, #tpu.memory_space<vmem>>, vector<1x16x286xf32>
    %2 = vector.shape_cast %1 : vector<1x16x286xf32> to vector<16x286xf32>
    %c0_4 = arith.constant 0 : index
    %c0_5 = arith.constant 0 : index
    %3 = vector.load %arg3[%c0_4, %c0_5] : memref<16x1xf32, #tpu.memory_space<vmem>>, vector<16x1xf32>
    %c0_6 = arith.constant 0 : index
    %c0_7 = arith.constant 0 : index
    %4 = vector.load %arg4[%c0_6, %c0_7] : memref<16x1xf32, #tpu.memory_space<vmem>>, vector<16x1xf32>
    %5 = vector.broadcast %3 : vector<16x1xf32> to vector<16x286xf32>
    %6 = arith.mulf %2, %5 : vector<16x286xf32>
    %7 = vector.broadcast %4 : vector<16x1xf32> to vector<16x286xf32>
    %8 = arith.addf %6, %7 : vector<16x286xf32>
    %cst = arith.constant 0.000000e+00 : f32
    %9 = vector.broadcast %cst : f32 to vector<16x286xf32>
    %10 = arith.maximumf %8, %9 : vector<16x286xf32>
    %11 = vector.broadcast %0 : vector<1x286xf32> to vector<16x286xf32>
    %12 = arith.mulf %10, %11 : vector<16x286xf32>
    %cst_8 = arith.constant 0.000000e+00 : f32
    %13 = vector.broadcast %cst_8 : f32 to vector<16x19xf32>
    %14 = tpu.concatenate %13, %12, %13 in 1 : vector<16x19xf32>, vector<16x286xf32>, vector<16x19xf32> -> vector<16x324xf32>
    %c0_9 = arith.constant 0 : index
    %c0_10 = arith.constant 0 : index
    %c0_11 = arith.constant 0 : index
    %15 = vector.load %arg5[%c0_9, %c0_10, %c0_11] : memref<1x16x324xf32, #tpu.memory_space<vmem>>, vector<1x16x324xf32>
    %16 = vector.shape_cast %15 : vector<1x16x324xf32> to vector<16x324xf32>
    %17 = vector.shape_cast %14 : vector<16x324xf32> to vector<1x16x324xf32>
    tpu.vector_store %arg5[%c0_9, %c0_10, %c0_11], %17 {strides = array<i32>} : memref<1x16x324xf32, #tpu.memory_space<vmem>>, vector<1x16x324xf32>,
    return
  }
  func.func @transform_0(%arg0: i32) -> (i32, i32) {
    %c0_i32 = arith.constant 0 : i32
    %c0_i32_0 = arith.constant 0 : i32
    %c0_i32_1 = arith.constant 0 : i32
    return %c0_i32, %c0_i32_0 : i32, i32
  }
  func.func @transform_1(%arg0: i32) -> (i32, i32, i32) {
    %c0_i32 = arith.constant 0 : i32
    %c0_i32_0 = arith.constant 0 : i32
    %c0_i32_1 = arith.constant 0 : i32
    return %arg0, %c0_i32, %c0_i32_0 : i32, i32, i32
  }
  func.func @transform_2(%arg0: i32) -> (i32, i32) {
    %c0_i32 = arith.constant 0 : i32
    %c0_i32_0 = arith.constant 0 : i32
    %c0_i32_1 = arith.constant 0 : i32
    return %c0_i32, %c0_i32_0 : i32, i32
  }
  func.func @transform_3(%arg0: i32) -> (i32, i32) {
    %c0_i32 = arith.constant 0 : i32
    %c0_i32_0 = arith.constant 0 : i32
    %c0_i32_1 = arith.constant 0 : i32
    return %c0_i32, %c0_i32_0 : i32, i32
  }
  func.func @transform_4(%arg0: i32) -> (i32, i32, i32) {
    %c0_i32 = arith.constant 0 : i32
    %c0_i32_0 = arith.constant 0 : i32
    %c0_i32_1 = arith.constant 0 : i32
    return %arg0, %c0_i32, %c0_i32_0 : i32, i32, i32
  }
}

module attributes {stable_mosaic.version = 11 : i64} {
  func.func @_conv_kernel(%arg0: i32, %arg1: memref<1x286xf32, #tpu.memory_space<vmem>>, %arg2: memref<1x16x286xf32, #tpu.memory_space<vmem>>, %arg3: memref<16x1xf32, #tpu.memory_space<vmem>>, %arg4: memref<16x1xf32, #tpu.memory_space<vmem>>, %arg5: memref<9x16x16xf32, #tpu.memory_space<vmem>>, %arg6: memref<1x16x286xf32, #tpu.memory_space<vmem>>, %arg7: memref<1x16x2xf32, #tpu.memory_space<vmem>>) attributes {dimension_semantics = [#tpu.dimension_semantics<parallel>], iteration_bounds = array<i64: 2>, scalar_prefetch = 0 : i64, scratch_operands = 0 : i64, tpu.core_type = #tpu.core_type<tc>, window_params = [{pipeline_mode = #tpu.pipeline_mode<synchronous>, transform_indices = @transform_0, window_bounds = array<i64: 1, 286>}, {transform_indices = @transform_1, window_bounds = array<i64: 1, 16, 286>}, {pipeline_mode = #tpu.pipeline_mode<synchronous>, transform_indices = @transform_2, window_bounds = array<i64: 16, 1>}, {pipeline_mode = #tpu.pipeline_mode<synchronous>, transform_indices = @transform_3, window_bounds = array<i64: 16, 1>}, {pipeline_mode = #tpu.pipeline_mode<synchronous>, transform_indices = @transform_4, window_bounds = array<i64: 9, 16, 16>}, {transform_indices = @transform_5, window_bounds = array<i64: 1, 16, 286>}, {transform_indices = @transform_6, window_bounds = array<i64: 1, 16, 2>}]} {
    %c0 = arith.constant 0 : index
    %c0_0 = arith.constant 0 : index
    %0 = vector.load %arg1[%c0, %c0_0] : memref<1x286xf32, #tpu.memory_space<vmem>>, vector<1x286xf32>
    %c0_1 = arith.constant 0 : index
    %c0_2 = arith.constant 0 : index
    %c0_3 = arith.constant 0 : index
    %1 = vector.load %arg2[%c0_1, %c0_2, %c0_3] : memref<1x16x286xf32, #tpu.memory_space<vmem>>, vector<1x16x286xf32>
    %2 = vector.shape_cast %1 : vector<1x16x286xf32> to vector<16x286xf32>
    %c0_4 = arith.constant 0 : index
    %c0_5 = arith.constant 0 : index
    %3 = vector.load %arg3[%c0_4, %c0_5] : memref<16x1xf32, #tpu.memory_space<vmem>>, vector<16x1xf32>
    %c0_6 = arith.constant 0 : index
    %c0_7 = arith.constant 0 : index
    %4 = vector.load %arg4[%c0_6, %c0_7] : memref<16x1xf32, #tpu.memory_space<vmem>>, vector<16x1xf32>
    %5 = vector.broadcast %3 : vector<16x1xf32> to vector<16x286xf32>
    %6 = arith.mulf %2, %5 : vector<16x286xf32>
    %7 = vector.broadcast %4 : vector<16x1xf32> to vector<16x286xf32>
    %8 = arith.addf %6, %7 : vector<16x286xf32>
    %cst = arith.constant 0.000000e+00 : f32
    %9 = vector.broadcast %cst : f32 to vector<16x286xf32>
    %10 = arith.maximumf %8, %9 : vector<16x286xf32>
    %11 = vector.broadcast %0 : vector<1x286xf32> to vector<16x286xf32>
    %12 = arith.mulf %10, %11 : vector<16x286xf32>
    %cst_8 = arith.constant 0.000000e+00 : f32
    %13 = vector.broadcast %cst_8 : f32 to vector<16x19xf32>
    %14 = tpu.concatenate %13, %12, %13 in 1 : vector<16x19xf32>, vector<16x286xf32>, vector<16x19xf32> -> vector<16x324xf32>
    %cst_9 = arith.constant 0.000000e+00 : f32
    %15 = vector.broadcast %cst_9 : f32 to vector<16x286xf32>
    %16 = vector.extract_strided_slice %14 {offsets = [0, 0], sizes = [16, 286], strides = [1, 1]} : vector<16x324xf32> to vector<16x286xf32>
    %c0_10 = arith.constant 0 : index
    %c0_11 = arith.constant 0 : index
    %c0_12 = arith.constant 0 : index
    %17 = vector.load %arg5[%c0_10, %c0_11, %c0_12] : memref<9x16x16xf32, #tpu.memory_space<vmem>>, vector<1x16x16xf32>
    %18 = vector.shape_cast %17 : vector<1x16x16xf32> to vector<16x16xf32>
    %cst_13 = arith.constant dense<0.000000e+00> : vector<16x286xf32>
    %19 = tpu.matmul %18, %16, %cst_13 {dimension_numbers = #tpu.dot_dimension_numbers<[1], [0], [0], [1], [0, 0, 1, 1], [], []>} : vector<16x16xf32>, vector<16x286xf32>, vector<16x286xf32> -> vector<16x286xf32>
    %20 = arith.addf %15, %19 : vector<16x286xf32>
    %21 = vector.extract_strided_slice %14 {offsets = [0, 1], sizes = [16, 286], strides = [1, 1]} : vector<16x324xf32> to vector<16x286xf32>
    %c1 = arith.constant 1 : index
    %c0_14 = arith.constant 0 : index
    %c0_15 = arith.constant 0 : index
    %22 = vector.load %arg5[%c1, %c0_14, %c0_15] : memref<9x16x16xf32, #tpu.memory_space<vmem>>, vector<1x16x16xf32>
    %23 = vector.shape_cast %22 : vector<1x16x16xf32> to vector<16x16xf32>
    %cst_16 = arith.constant dense<0.000000e+00> : vector<16x286xf32>
    %24 = tpu.matmul %23, %21, %cst_16 {dimension_numbers = #tpu.dot_dimension_numbers<[1], [0], [0], [1], [0, 0, 1, 1], [], []>} : vector<16x16xf32>, vector<16x286xf32>, vector<16x286xf32> -> vector<16x286xf32>
    %25 = arith.addf %20, %24 : vector<16x286xf32>
    %26 = vector.extract_strided_slice %14 {offsets = [0, 2], sizes = [16, 286], strides = [1, 1]} : vector<16x324xf32> to vector<16x286xf32>
    %c2 = arith.constant 2 : index
    %c0_17 = arith.constant 0 : index
    %c0_18 = arith.constant 0 : index
    %27 = vector.load %arg5[%c2, %c0_17, %c0_18] : memref<9x16x16xf32, #tpu.memory_space<vmem>>, vector<1x16x16xf32>
    %28 = vector.shape_cast %27 : vector<1x16x16xf32> to vector<16x16xf32>
    %cst_19 = arith.constant dense<0.000000e+00> : vector<16x286xf32>
    %29 = tpu.matmul %28, %26, %cst_19 {dimension_numbers = #tpu.dot_dimension_numbers<[1], [0], [0], [1], [0, 0, 1, 1], [], []>} : vector<16x16xf32>, vector<16x286xf32>, vector<16x286xf32> -> vector<16x286xf32>
    %30 = arith.addf %25, %29 : vector<16x286xf32>
    %31 = vector.extract_strided_slice %14 {offsets = [0, 18], sizes = [16, 286], strides = [1, 1]} : vector<16x324xf32> to vector<16x286xf32>
    %c3 = arith.constant 3 : index
    %c0_20 = arith.constant 0 : index
    %c0_21 = arith.constant 0 : index
    %32 = vector.load %arg5[%c3, %c0_20, %c0_21] : memref<9x16x16xf32, #tpu.memory_space<vmem>>, vector<1x16x16xf32>
    %33 = vector.shape_cast %32 : vector<1x16x16xf32> to vector<16x16xf32>
    %cst_22 = arith.constant dense<0.000000e+00> : vector<16x286xf32>
    %34 = tpu.matmul %33, %31, %cst_22 {dimension_numbers = #tpu.dot_dimension_numbers<[1], [0], [0], [1], [0, 0, 1, 1], [], []>} : vector<16x16xf32>, vector<16x286xf32>, vector<16x286xf32> -> vector<16x286xf32>
    %35 = arith.addf %30, %34 : vector<16x286xf32>
    %36 = vector.extract_strided_slice %14 {offsets = [0, 19], sizes = [16, 286], strides = [1, 1]} : vector<16x324xf32> to vector<16x286xf32>
    %c4 = arith.constant 4 : index
    %c0_23 = arith.constant 0 : index
    %c0_24 = arith.constant 0 : index
    %37 = vector.load %arg5[%c4, %c0_23, %c0_24] : memref<9x16x16xf32, #tpu.memory_space<vmem>>, vector<1x16x16xf32>
    %38 = vector.shape_cast %37 : vector<1x16x16xf32> to vector<16x16xf32>
    %cst_25 = arith.constant dense<0.000000e+00> : vector<16x286xf32>
    %39 = tpu.matmul %38, %36, %cst_25 {dimension_numbers = #tpu.dot_dimension_numbers<[1], [0], [0], [1], [0, 0, 1, 1], [], []>} : vector<16x16xf32>, vector<16x286xf32>, vector<16x286xf32> -> vector<16x286xf32>
    %40 = arith.addf %35, %39 : vector<16x286xf32>
    %41 = vector.extract_strided_slice %14 {offsets = [0, 20], sizes = [16, 286], strides = [1, 1]} : vector<16x324xf32> to vector<16x286xf32>
    %c5 = arith.constant 5 : index
    %c0_26 = arith.constant 0 : index
    %c0_27 = arith.constant 0 : index
    %42 = vector.load %arg5[%c5, %c0_26, %c0_27] : memref<9x16x16xf32, #tpu.memory_space<vmem>>, vector<1x16x16xf32>
    %43 = vector.shape_cast %42 : vector<1x16x16xf32> to vector<16x16xf32>
    %cst_28 = arith.constant dense<0.000000e+00> : vector<16x286xf32>
    %44 = tpu.matmul %43, %41, %cst_28 {dimension_numbers = #tpu.dot_dimension_numbers<[1], [0], [0], [1], [0, 0, 1, 1], [], []>} : vector<16x16xf32>, vector<16x286xf32>, vector<16x286xf32> -> vector<16x286xf32>
    %45 = arith.addf %40, %44 : vector<16x286xf32>
    %46 = vector.extract_strided_slice %14 {offsets = [0, 36], sizes = [16, 286], strides = [1, 1]} : vector<16x324xf32> to vector<16x286xf32>
    %c6 = arith.constant 6 : index
    %c0_29 = arith.constant 0 : index
    %c0_30 = arith.constant 0 : index
    %47 = vector.load %arg5[%c6, %c0_29, %c0_30] : memref<9x16x16xf32, #tpu.memory_space<vmem>>, vector<1x16x16xf32>
    %48 = vector.shape_cast %47 : vector<1x16x16xf32> to vector<16x16xf32>
    %cst_31 = arith.constant dense<0.000000e+00> : vector<16x286xf32>
    %49 = tpu.matmul %48, %46, %cst_31 {dimension_numbers = #tpu.dot_dimension_numbers<[1], [0], [0], [1], [0, 0, 1, 1], [], []>} : vector<16x16xf32>, vector<16x286xf32>, vector<16x286xf32> -> vector<16x286xf32>
    %50 = arith.addf %45, %49 : vector<16x286xf32>
    %51 = vector.extract_strided_slice %14 {offsets = [0, 37], sizes = [16, 286], strides = [1, 1]} : vector<16x324xf32> to vector<16x286xf32>
    %c7 = arith.constant 7 : index
    %c0_32 = arith.constant 0 : index
    %c0_33 = arith.constant 0 : index
    %52 = vector.load %arg5[%c7, %c0_32, %c0_33] : memref<9x16x16xf32, #tpu.memory_space<vmem>>, vector<1x16x16xf32>
    %53 = vector.shape_cast %52 : vector<1x16x16xf32> to vector<16x16xf32>
    %cst_34 = arith.constant dense<0.000000e+00> : vector<16x286xf32>
    %54 = tpu.matmul %53, %51, %cst_34 {dimension_numbers = #tpu.dot_dimension_numbers<[1], [0], [0], [1], [0, 0, 1, 1], [], []>} : vector<16x16xf32>, vector<16x286xf32>, vector<16x286xf32> -> vector<16x286xf32>
    %55 = arith.addf %50, %54 : vector<16x286xf32>
    %56 = vector.extract_strided_slice %14 {offsets = [0, 38], sizes = [16, 286], strides = [1, 1]} : vector<16x324xf32> to vector<16x286xf32>
    %c8 = arith.constant 8 : index
    %c0_35 = arith.constant 0 : index
    %c0_36 = arith.constant 0 : index
    %57 = vector.load %arg5[%c8, %c0_35, %c0_36] : memref<9x16x16xf32, #tpu.memory_space<vmem>>, vector<1x16x16xf32>
    %58 = vector.shape_cast %57 : vector<1x16x16xf32> to vector<16x16xf32>
    %cst_37 = arith.constant dense<0.000000e+00> : vector<16x286xf32>
    %59 = tpu.matmul %58, %56, %cst_37 {dimension_numbers = #tpu.dot_dimension_numbers<[1], [0], [0], [1], [0, 0, 1, 1], [], []>} : vector<16x16xf32>, vector<16x286xf32>, vector<16x286xf32> -> vector<16x286xf32>
    %60 = arith.addf %55, %59 : vector<16x286xf32>
    %c0_38 = arith.constant 0 : index
    %c0_39 = arith.constant 0 : index
    %c0_40 = arith.constant 0 : index
    %61 = vector.load %arg6[%c0_38, %c0_39, %c0_40] : memref<1x16x286xf32, #tpu.memory_space<vmem>>, vector<1x16x286xf32>
    %62 = vector.shape_cast %61 : vector<1x16x286xf32> to vector<16x286xf32>
    %63 = vector.shape_cast %60 : vector<16x286xf32> to vector<1x16x286xf32>
    tpu.vector_store %arg6[%c0_38, %c0_39, %c0_40], %63 {strides = array<i32>} : memref<1x16x286xf32, #tpu.memory_space<vmem>>, vector<1x16x286xf32>,
    %64 = vector.broadcast %0 : vector<1x286xf32> to vector<16x286xf32>
    %65 = arith.mulf %60, %64 : vector<16x286xf32>
    %cst_41 = arith.constant dense<0.000000e+00> : vector<16xf32>
    %66 = vector.multi_reduction <add>, %65, %cst_41 [1] : vector<16x286xf32> to vector<16xf32>
    %67 = vector.shape_cast %66 : vector<16xf32> to vector<16x1xf32>
    %c0_42 = arith.constant 0 : index
    %c0_43 = arith.constant 0 : index
    %c0_44 = arith.constant 0 : index
    %68 = vector.load %arg7[%c0_42, %c0_43, %c0_44] : memref<1x16x2xf32, #tpu.memory_space<vmem>>, vector<1x16x1xf32>
    %69 = vector.shape_cast %68 : vector<1x16x1xf32> to vector<16x1xf32>
    %70 = vector.shape_cast %67 : vector<16x1xf32> to vector<1x16x1xf32>
    tpu.vector_store %arg7[%c0_42, %c0_43, %c0_44], %70 {strides = array<i32>} : memref<1x16x2xf32, #tpu.memory_space<vmem>>, vector<1x16x1xf32>,
    %71 = arith.mulf %65, %60 : vector<16x286xf32>
    %cst_45 = arith.constant dense<0.000000e+00> : vector<16xf32>
    %72 = vector.multi_reduction <add>, %71, %cst_45 [1] : vector<16x286xf32> to vector<16xf32>
    %73 = vector.shape_cast %72 : vector<16xf32> to vector<16x1xf32>
    %c0_46 = arith.constant 0 : index
    %c0_47 = arith.constant 0 : index
    %c1_48 = arith.constant 1 : index
    %74 = vector.load %arg7[%c0_46, %c0_47, %c1_48] : memref<1x16x2xf32, #tpu.memory_space<vmem>>, vector<1x16x1xf32>
    %75 = vector.shape_cast %74 : vector<1x16x1xf32> to vector<16x1xf32>
    %76 = vector.shape_cast %73 : vector<16x1xf32> to vector<1x16x1xf32>
    tpu.vector_store %arg7[%c0_46, %c0_47, %c1_48], %76 {strides = array<i32>} : memref<1x16x2xf32, #tpu.memory_space<vmem>>, vector<1x16x1xf32>,
    return
  }
  func.func @transform_0(%arg0: i32) -> (i32, i32) {
    %c0_i32 = arith.constant 0 : i32
    %c0_i32_0 = arith.constant 0 : i32
    %c0_i32_1 = arith.constant 0 : i32
    return %c0_i32, %c0_i32_0 : i32, i32
  }
  func.func @transform_1(%arg0: i32) -> (i32, i32, i32) {
    %c0_i32 = arith.constant 0 : i32
    %c0_i32_0 = arith.constant 0 : i32
    %c0_i32_1 = arith.constant 0 : i32
    return %arg0, %c0_i32, %c0_i32_0 : i32, i32, i32
  }
  func.func @transform_2(%arg0: i32) -> (i32, i32) {
    %c0_i32 = arith.constant 0 : i32
    %c0_i32_0 = arith.constant 0 : i32
    %c0_i32_1 = arith.constant 0 : i32
    return %c0_i32, %c0_i32_0 : i32, i32
  }
  func.func @transform_3(%arg0: i32) -> (i32, i32) {
    %c0_i32 = arith.constant 0 : i32
    %c0_i32_0 = arith.constant 0 : i32
    %c0_i32_1 = arith.constant 0 : i32
    return %c0_i32, %c0_i32_0 : i32, i32
  }
  func.func @transform_4(%arg0: i32) -> (i32, i32, i32) {
    %c0_i32 = arith.constant 0 : i32
    %c0_i32_0 = arith.constant 0 : i32
    %c0_i32_1 = arith.constant 0 : i32
    %c0_i32_2 = arith.constant 0 : i32
    return %c0_i32, %c0_i32_0, %c0_i32_1 : i32, i32, i32
  }
  func.func @transform_5(%arg0: i32) -> (i32, i32, i32) {
    %c0_i32 = arith.constant 0 : i32
    %c0_i32_0 = arith.constant 0 : i32
    %c0_i32_1 = arith.constant 0 : i32
    return %arg0, %c0_i32, %c0_i32_0 : i32, i32, i32
  }
  func.func @transform_6(%arg0: i32) -> (i32, i32, i32) {
    %c0_i32 = arith.constant 0 : i32
    %c0_i32_0 = arith.constant 0 : i32
    %c0_i32_1 = arith.constant 0 : i32
    return %arg0, %c0_i32, %c0_i32_0 : i32, i32, i32
  }
}

module attributes {stable_mosaic.version = 11 : i64} {
  func.func @_conv_kernel(%arg0: i32, %arg1: memref<1x286xf32, #tpu.memory_space<vmem>>, %arg2: memref<1x16x324xf32, #tpu.memory_space<vmem>>, %arg3: memref<9x16x16xf32, #tpu.memory_space<vmem>>, %arg4: memref<1x16x286xf32, #tpu.memory_space<vmem>>, %arg5: memref<1x16x2xf32, #tpu.memory_space<vmem>>) attributes {dimension_semantics = [#tpu.dimension_semantics<parallel>], iteration_bounds = array<i64: 2>, scalar_prefetch = 0 : i64, scratch_operands = 0 : i64, tpu.core_type = #tpu.core_type<tc>, window_params = [{pipeline_mode = #tpu.pipeline_mode<synchronous>, transform_indices = @transform_0, window_bounds = array<i64: 1, 286>}, {transform_indices = @transform_1, window_bounds = array<i64: 1, 16, 324>}, {pipeline_mode = #tpu.pipeline_mode<synchronous>, transform_indices = @transform_2, window_bounds = array<i64: 9, 16, 16>}, {transform_indices = @transform_3, window_bounds = array<i64: 1, 16, 286>}, {transform_indices = @transform_4, window_bounds = array<i64: 1, 16, 2>}]} {
    %c0 = arith.constant 0 : index
    %c0_0 = arith.constant 0 : index
    %0 = vector.load %arg1[%c0, %c0_0] : memref<1x286xf32, #tpu.memory_space<vmem>>, vector<1x286xf32>
    %c0_1 = arith.constant 0 : index
    %c0_2 = arith.constant 0 : index
    %c0_3 = arith.constant 0 : index
    %1 = vector.load %arg2[%c0_1, %c0_2, %c0_3] : memref<1x16x324xf32, #tpu.memory_space<vmem>>, vector<1x16x324xf32>
    %2 = vector.shape_cast %1 : vector<1x16x324xf32> to vector<16x324xf32>
    %cst = arith.constant 0.000000e+00 : f32
    %3 = vector.broadcast %cst : f32 to vector<16x286xf32>
    %4 = vector.extract_strided_slice %2 {offsets = [0, 0], sizes = [16, 286], strides = [1, 1]} : vector<16x324xf32> to vector<16x286xf32>
    %c0_4 = arith.constant 0 : index
    %c0_5 = arith.constant 0 : index
    %c0_6 = arith.constant 0 : index
    %5 = vector.load %arg3[%c0_4, %c0_5, %c0_6] : memref<9x16x16xf32, #tpu.memory_space<vmem>>, vector<1x16x16xf32>
    %6 = vector.shape_cast %5 : vector<1x16x16xf32> to vector<16x16xf32>
    %cst_7 = arith.constant dense<0.000000e+00> : vector<16x286xf32>
    %7 = tpu.matmul %6, %4, %cst_7 {dimension_numbers = #tpu.dot_dimension_numbers<[1], [0], [0], [1], [0, 0, 1, 1], [], []>} : vector<16x16xf32>, vector<16x286xf32>, vector<16x286xf32> -> vector<16x286xf32>
    %8 = arith.addf %3, %7 : vector<16x286xf32>
    %9 = vector.extract_strided_slice %2 {offsets = [0, 1], sizes = [16, 286], strides = [1, 1]} : vector<16x324xf32> to vector<16x286xf32>
    %c1 = arith.constant 1 : index
    %c0_8 = arith.constant 0 : index
    %c0_9 = arith.constant 0 : index
    %10 = vector.load %arg3[%c1, %c0_8, %c0_9] : memref<9x16x16xf32, #tpu.memory_space<vmem>>, vector<1x16x16xf32>
    %11 = vector.shape_cast %10 : vector<1x16x16xf32> to vector<16x16xf32>
    %cst_10 = arith.constant dense<0.000000e+00> : vector<16x286xf32>
    %12 = tpu.matmul %11, %9, %cst_10 {dimension_numbers = #tpu.dot_dimension_numbers<[1], [0], [0], [1], [0, 0, 1, 1], [], []>} : vector<16x16xf32>, vector<16x286xf32>, vector<16x286xf32> -> vector<16x286xf32>
    %13 = arith.addf %8, %12 : vector<16x286xf32>
    %14 = vector.extract_strided_slice %2 {offsets = [0, 2], sizes = [16, 286], strides = [1, 1]} : vector<16x324xf32> to vector<16x286xf32>
    %c2 = arith.constant 2 : index
    %c0_11 = arith.constant 0 : index
    %c0_12 = arith.constant 0 : index
    %15 = vector.load %arg3[%c2, %c0_11, %c0_12] : memref<9x16x16xf32, #tpu.memory_space<vmem>>, vector<1x16x16xf32>
    %16 = vector.shape_cast %15 : vector<1x16x16xf32> to vector<16x16xf32>
    %cst_13 = arith.constant dense<0.000000e+00> : vector<16x286xf32>
    %17 = tpu.matmul %16, %14, %cst_13 {dimension_numbers = #tpu.dot_dimension_numbers<[1], [0], [0], [1], [0, 0, 1, 1], [], []>} : vector<16x16xf32>, vector<16x286xf32>, vector<16x286xf32> -> vector<16x286xf32>
    %18 = arith.addf %13, %17 : vector<16x286xf32>
    %19 = vector.extract_strided_slice %2 {offsets = [0, 18], sizes = [16, 286], strides = [1, 1]} : vector<16x324xf32> to vector<16x286xf32>
    %c3 = arith.constant 3 : index
    %c0_14 = arith.constant 0 : index
    %c0_15 = arith.constant 0 : index
    %20 = vector.load %arg3[%c3, %c0_14, %c0_15] : memref<9x16x16xf32, #tpu.memory_space<vmem>>, vector<1x16x16xf32>
    %21 = vector.shape_cast %20 : vector<1x16x16xf32> to vector<16x16xf32>
    %cst_16 = arith.constant dense<0.000000e+00> : vector<16x286xf32>
    %22 = tpu.matmul %21, %19, %cst_16 {dimension_numbers = #tpu.dot_dimension_numbers<[1], [0], [0], [1], [0, 0, 1, 1], [], []>} : vector<16x16xf32>, vector<16x286xf32>, vector<16x286xf32> -> vector<16x286xf32>
    %23 = arith.addf %18, %22 : vector<16x286xf32>
    %24 = vector.extract_strided_slice %2 {offsets = [0, 19], sizes = [16, 286], strides = [1, 1]} : vector<16x324xf32> to vector<16x286xf32>
    %c4 = arith.constant 4 : index
    %c0_17 = arith.constant 0 : index
    %c0_18 = arith.constant 0 : index
    %25 = vector.load %arg3[%c4, %c0_17, %c0_18] : memref<9x16x16xf32, #tpu.memory_space<vmem>>, vector<1x16x16xf32>
    %26 = vector.shape_cast %25 : vector<1x16x16xf32> to vector<16x16xf32>
    %cst_19 = arith.constant dense<0.000000e+00> : vector<16x286xf32>
    %27 = tpu.matmul %26, %24, %cst_19 {dimension_numbers = #tpu.dot_dimension_numbers<[1], [0], [0], [1], [0, 0, 1, 1], [], []>} : vector<16x16xf32>, vector<16x286xf32>, vector<16x286xf32> -> vector<16x286xf32>
    %28 = arith.addf %23, %27 : vector<16x286xf32>
    %29 = vector.extract_strided_slice %2 {offsets = [0, 20], sizes = [16, 286], strides = [1, 1]} : vector<16x324xf32> to vector<16x286xf32>
    %c5 = arith.constant 5 : index
    %c0_20 = arith.constant 0 : index
    %c0_21 = arith.constant 0 : index
    %30 = vector.load %arg3[%c5, %c0_20, %c0_21] : memref<9x16x16xf32, #tpu.memory_space<vmem>>, vector<1x16x16xf32>
    %31 = vector.shape_cast %30 : vector<1x16x16xf32> to vector<16x16xf32>
    %cst_22 = arith.constant dense<0.000000e+00> : vector<16x286xf32>
    %32 = tpu.matmul %31, %29, %cst_22 {dimension_numbers = #tpu.dot_dimension_numbers<[1], [0], [0], [1], [0, 0, 1, 1], [], []>} : vector<16x16xf32>, vector<16x286xf32>, vector<16x286xf32> -> vector<16x286xf32>
    %33 = arith.addf %28, %32 : vector<16x286xf32>
    %34 = vector.extract_strided_slice %2 {offsets = [0, 36], sizes = [16, 286], strides = [1, 1]} : vector<16x324xf32> to vector<16x286xf32>
    %c6 = arith.constant 6 : index
    %c0_23 = arith.constant 0 : index
    %c0_24 = arith.constant 0 : index
    %35 = vector.load %arg3[%c6, %c0_23, %c0_24] : memref<9x16x16xf32, #tpu.memory_space<vmem>>, vector<1x16x16xf32>
    %36 = vector.shape_cast %35 : vector<1x16x16xf32> to vector<16x16xf32>
    %cst_25 = arith.constant dense<0.000000e+00> : vector<16x286xf32>
    %37 = tpu.matmul %36, %34, %cst_25 {dimension_numbers = #tpu.dot_dimension_numbers<[1], [0], [0], [1], [0, 0, 1, 1], [], []>} : vector<16x16xf32>, vector<16x286xf32>, vector<16x286xf32> -> vector<16x286xf32>
    %38 = arith.addf %33, %37 : vector<16x286xf32>
    %39 = vector.extract_strided_slice %2 {offsets = [0, 37], sizes = [16, 286], strides = [1, 1]} : vector<16x324xf32> to vector<16x286xf32>
    %c7 = arith.constant 7 : index
    %c0_26 = arith.constant 0 : index
    %c0_27 = arith.constant 0 : index
    %40 = vector.load %arg3[%c7, %c0_26, %c0_27] : memref<9x16x16xf32, #tpu.memory_space<vmem>>, vector<1x16x16xf32>
    %41 = vector.shape_cast %40 : vector<1x16x16xf32> to vector<16x16xf32>
    %cst_28 = arith.constant dense<0.000000e+00> : vector<16x286xf32>
    %42 = tpu.matmul %41, %39, %cst_28 {dimension_numbers = #tpu.dot_dimension_numbers<[1], [0], [0], [1], [0, 0, 1, 1], [], []>} : vector<16x16xf32>, vector<16x286xf32>, vector<16x286xf32> -> vector<16x286xf32>
    %43 = arith.addf %38, %42 : vector<16x286xf32>
    %44 = vector.extract_strided_slice %2 {offsets = [0, 38], sizes = [16, 286], strides = [1, 1]} : vector<16x324xf32> to vector<16x286xf32>
    %c8 = arith.constant 8 : index
    %c0_29 = arith.constant 0 : index
    %c0_30 = arith.constant 0 : index
    %45 = vector.load %arg3[%c8, %c0_29, %c0_30] : memref<9x16x16xf32, #tpu.memory_space<vmem>>, vector<1x16x16xf32>
    %46 = vector.shape_cast %45 : vector<1x16x16xf32> to vector<16x16xf32>
    %cst_31 = arith.constant dense<0.000000e+00> : vector<16x286xf32>
    %47 = tpu.matmul %46, %44, %cst_31 {dimension_numbers = #tpu.dot_dimension_numbers<[1], [0], [0], [1], [0, 0, 1, 1], [], []>} : vector<16x16xf32>, vector<16x286xf32>, vector<16x286xf32> -> vector<16x286xf32>
    %48 = arith.addf %43, %47 : vector<16x286xf32>
    %c0_32 = arith.constant 0 : index
    %c0_33 = arith.constant 0 : index
    %c0_34 = arith.constant 0 : index
    %49 = vector.load %arg4[%c0_32, %c0_33, %c0_34] : memref<1x16x286xf32, #tpu.memory_space<vmem>>, vector<1x16x286xf32>
    %50 = vector.shape_cast %49 : vector<1x16x286xf32> to vector<16x286xf32>
    %51 = vector.shape_cast %48 : vector<16x286xf32> to vector<1x16x286xf32>
    tpu.vector_store %arg4[%c0_32, %c0_33, %c0_34], %51 {strides = array<i32>} : memref<1x16x286xf32, #tpu.memory_space<vmem>>, vector<1x16x286xf32>,
    %52 = vector.broadcast %0 : vector<1x286xf32> to vector<16x286xf32>
    %53 = arith.mulf %48, %52 : vector<16x286xf32>
    %cst_35 = arith.constant dense<0.000000e+00> : vector<16xf32>
    %54 = vector.multi_reduction <add>, %53, %cst_35 [1] : vector<16x286xf32> to vector<16xf32>
    %55 = vector.shape_cast %54 : vector<16xf32> to vector<16x1xf32>
    %c0_36 = arith.constant 0 : index
    %c0_37 = arith.constant 0 : index
    %c0_38 = arith.constant 0 : index
    %56 = vector.load %arg5[%c0_36, %c0_37, %c0_38] : memref<1x16x2xf32, #tpu.memory_space<vmem>>, vector<1x16x1xf32>
    %57 = vector.shape_cast %56 : vector<1x16x1xf32> to vector<16x1xf32>
    %58 = vector.shape_cast %55 : vector<16x1xf32> to vector<1x16x1xf32>
    tpu.vector_store %arg5[%c0_36, %c0_37, %c0_38], %58 {strides = array<i32>} : memref<1x16x2xf32, #tpu.memory_space<vmem>>, vector<1x16x1xf32>,
    %59 = arith.mulf %53, %48 : vector<16x286xf32>
    %cst_39 = arith.constant dense<0.000000e+00> : vector<16xf32>
    %60 = vector.multi_reduction <add>, %59, %cst_39 [1] : vector<16x286xf32> to vector<16xf32>
    %61 = vector.shape_cast %60 : vector<16xf32> to vector<16x1xf32>
    %c0_40 = arith.constant 0 : index
    %c0_41 = arith.constant 0 : index
    %c1_42 = arith.constant 1 : index
    %62 = vector.load %arg5[%c0_40, %c0_41, %c1_42] : memref<1x16x2xf32, #tpu.memory_space<vmem>>, vector<1x16x1xf32>
    %63 = vector.shape_cast %62 : vector<1x16x1xf32> to vector<16x1xf32>
    %64 = vector.shape_cast %61 : vector<16x1xf32> to vector<1x16x1xf32>
    tpu.vector_store %arg5[%c0_40, %c0_41, %c1_42], %64 {strides = array<i32>} : memref<1x16x2xf32, #tpu.memory_space<vmem>>, vector<1x16x1xf32>,
    return
  }
  func.func @transform_0(%arg0: i32) -> (i32, i32) {
    %c0_i32 = arith.constant 0 : i32
    %c0_i32_0 = arith.constant 0 : i32
    %c0_i32_1 = arith.constant 0 : i32
    return %c0_i32, %c0_i32_0 : i32, i32
  }
  func.func @transform_1(%arg0: i32) -> (i32, i32, i32) {
    %c0_i32 = arith.constant 0 : i32
    %c0_i32_0 = arith.constant 0 : i32
    %c0_i32_1 = arith.constant 0 : i32
    return %arg0, %c0_i32, %c0_i32_0 : i32, i32, i32
  }
  func.func @transform_2(%arg0: i32) -> (i32, i32, i32) {
    %c0_i32 = arith.constant 0 : i32
    %c0_i32_0 = arith.constant 0 : i32
    %c0_i32_1 = arith.constant 0 : i32
    %c0_i32_2 = arith.constant 0 : i32
    return %c0_i32, %c0_i32_0, %c0_i32_1 : i32, i32, i32
  }
  func.func @transform_3(%arg0: i32) -> (i32, i32, i32) {
    %c0_i32 = arith.constant 0 : i32
    %c0_i32_0 = arith.constant 0 : i32
    %c0_i32_1 = arith.constant 0 : i32
    return %arg0, %c0_i32, %c0_i32_0 : i32, i32, i32
  }
  func.func @transform_4(%arg0: i32) -> (i32, i32, i32) {
    %c0_i32 = arith.constant 0 : i32
    %c0_i32_0 = arith.constant 0 : i32
    %c0_i32_1 = arith.constant 0 : i32
    return %arg0, %c0_i32, %c0_i32_0 : i32, i32, i32
  }
}

module attributes {stable_mosaic.version = 11 : i64} {
  func.func @_bn_apply_kernel(%arg0: i32, %arg1: memref<1x286xf32, #tpu.memory_space<vmem>>, %arg2: memref<1x16x286xf32, #tpu.memory_space<vmem>>, %arg3: memref<16x1xf32, #tpu.memory_space<vmem>>, %arg4: memref<16x1xf32, #tpu.memory_space<vmem>>, %arg5: memref<1x16x324xf32, #tpu.memory_space<vmem>>, %arg6: memref<1x16x324xf32, #tpu.memory_space<vmem>>) attributes {dimension_semantics = [#tpu.dimension_semantics<parallel>], iteration_bounds = array<i64: 2>, scalar_prefetch = 0 : i64, scratch_operands = 0 : i64, tpu.core_type = #tpu.core_type<tc>, window_params = [{pipeline_mode = #tpu.pipeline_mode<synchronous>, transform_indices = @transform_0, window_bounds = array<i64: 1, 286>}, {transform_indices = @transform_1, window_bounds = array<i64: 1, 16, 286>}, {pipeline_mode = #tpu.pipeline_mode<synchronous>, transform_indices = @transform_2, window_bounds = array<i64: 16, 1>}, {pipeline_mode = #tpu.pipeline_mode<synchronous>, transform_indices = @transform_3, window_bounds = array<i64: 16, 1>}, {transform_indices = @transform_4, window_bounds = array<i64: 1, 16, 324>}, {transform_indices = @transform_5, window_bounds = array<i64: 1, 16, 324>}]} {
    %c0 = arith.constant 0 : index
    %c0_0 = arith.constant 0 : index
    %0 = vector.load %arg1[%c0, %c0_0] : memref<1x286xf32, #tpu.memory_space<vmem>>, vector<1x286xf32>
    %c0_1 = arith.constant 0 : index
    %c0_2 = arith.constant 0 : index
    %c0_3 = arith.constant 0 : index
    %1 = vector.load %arg2[%c0_1, %c0_2, %c0_3] : memref<1x16x286xf32, #tpu.memory_space<vmem>>, vector<1x16x286xf32>
    %2 = vector.shape_cast %1 : vector<1x16x286xf32> to vector<16x286xf32>
    %c0_4 = arith.constant 0 : index
    %c0_5 = arith.constant 0 : index
    %3 = vector.load %arg3[%c0_4, %c0_5] : memref<16x1xf32, #tpu.memory_space<vmem>>, vector<16x1xf32>
    %c0_6 = arith.constant 0 : index
    %c0_7 = arith.constant 0 : index
    %4 = vector.load %arg4[%c0_6, %c0_7] : memref<16x1xf32, #tpu.memory_space<vmem>>, vector<16x1xf32>
    %5 = vector.broadcast %3 : vector<16x1xf32> to vector<16x286xf32>
    %6 = arith.mulf %2, %5 : vector<16x286xf32>
    %7 = vector.broadcast %4 : vector<16x1xf32> to vector<16x286xf32>
    %8 = arith.addf %6, %7 : vector<16x286xf32>
    %cst = arith.constant 0.000000e+00 : f32
    %9 = vector.broadcast %cst : f32 to vector<16x286xf32>
    %10 = arith.maximumf %8, %9 : vector<16x286xf32>
    %11 = vector.broadcast %0 : vector<1x286xf32> to vector<16x286xf32>
    %12 = arith.mulf %10, %11 : vector<16x286xf32>
    %cst_8 = arith.constant 0.000000e+00 : f32
    %13 = vector.broadcast %cst_8 : f32 to vector<16x19xf32>
    %14 = tpu.concatenate %13, %12, %13 in 1 : vector<16x19xf32>, vector<16x286xf32>, vector<16x19xf32> -> vector<16x324xf32>
    %c0_9 = arith.constant 0 : index
    %c0_10 = arith.constant 0 : index
    %c0_11 = arith.constant 0 : index
    %15 = vector.load %arg5[%c0_9, %c0_10, %c0_11] : memref<1x16x324xf32, #tpu.memory_space<vmem>>, vector<1x16x324xf32>
    %16 = vector.shape_cast %15 : vector<1x16x324xf32> to vector<16x324xf32>
    %17 = arith.addf %16, %14 : vector<16x324xf32>
    %c0_12 = arith.constant 0 : index
    %c0_13 = arith.constant 0 : index
    %c0_14 = arith.constant 0 : index
    %18 = vector.load %arg6[%c0_12, %c0_13, %c0_14] : memref<1x16x324xf32, #tpu.memory_space<vmem>>, vector<1x16x324xf32>
    %19 = vector.shape_cast %18 : vector<1x16x324xf32> to vector<16x324xf32>
    %20 = vector.shape_cast %17 : vector<16x324xf32> to vector<1x16x324xf32>
    tpu.vector_store %arg6[%c0_12, %c0_13, %c0_14], %20 {strides = array<i32>} : memref<1x16x324xf32, #tpu.memory_space<vmem>>, vector<1x16x324xf32>,
    return
  }
  func.func @transform_0(%arg0: i32) -> (i32, i32) {
    %c0_i32 = arith.constant 0 : i32
    %c0_i32_0 = arith.constant 0 : i32
    %c0_i32_1 = arith.constant 0 : i32
    return %c0_i32, %c0_i32_0 : i32, i32
  }
  func.func @transform_1(%arg0: i32) -> (i32, i32, i32) {
    %c0_i32 = arith.constant 0 : i32
    %c0_i32_0 = arith.constant 0 : i32
    %c0_i32_1 = arith.constant 0 : i32
    return %arg0, %c0_i32, %c0_i32_0 : i32, i32, i32
  }
  func.func @transform_2(%arg0: i32) -> (i32, i32) {
    %c0_i32 = arith.constant 0 : i32
    %c0_i32_0 = arith.constant 0 : i32
    %c0_i32_1 = arith.constant 0 : i32
    return %c0_i32, %c0_i32_0 : i32, i32
  }
  func.func @transform_3(%arg0: i32) -> (i32, i32) {
    %c0_i32 = arith.constant 0 : i32
    %c0_i32_0 = arith.constant 0 : i32
    %c0_i32_1 = arith.constant 0 : i32
    return %c0_i32, %c0_i32_0 : i32, i32
  }
  func.func @transform_4(%arg0: i32) -> (i32, i32, i32) {
    %c0_i32 = arith.constant 0 : i32
    %c0_i32_0 = arith.constant 0 : i32
    %c0_i32_1 = arith.constant 0 : i32
    return %arg0, %c0_i32, %c0_i32_0 : i32, i32, i32
  }
  func.func @transform_5(%arg0: i32) -> (i32, i32, i32) {
    %c0_i32 = arith.constant 0 : i32
    %c0_i32_0 = arith.constant 0 : i32
    %c0_i32_1 = arith.constant 0 : i32
    return %arg0, %c0_i32, %c0_i32_0 : i32, i32, i32
  }
}

module attributes {stable_mosaic.version = 11 : i64} {
  func.func @_conv_kernel(%arg0: i32, %arg1: memref<1x286xf32, #tpu.memory_space<vmem>>, %arg2: memref<1x16x324xf32, #tpu.memory_space<vmem>>, %arg3: memref<9x3x16xf32, #tpu.memory_space<vmem>>, %arg4: memref<3x1xf32, #tpu.memory_space<vmem>>, %arg5: memref<1x3x324xf32, #tpu.memory_space<vmem>>, %arg6: memref<1x3x324xf32, #tpu.memory_space<vmem>>, %arg7: memref<1x3x324xf32, #tpu.memory_space<vmem>>) attributes {dimension_semantics = [#tpu.dimension_semantics<parallel>], iteration_bounds = array<i64: 2>, scalar_prefetch = 0 : i64, scratch_operands = 0 : i64, tpu.core_type = #tpu.core_type<tc>, window_params = [{pipeline_mode = #tpu.pipeline_mode<synchronous>, transform_indices = @transform_0, window_bounds = array<i64: 1, 286>}, {transform_indices = @transform_1, window_bounds = array<i64: 1, 16, 324>}, {pipeline_mode = #tpu.pipeline_mode<synchronous>, transform_indices = @transform_2, window_bounds = array<i64: 9, 3, 16>}, {pipeline_mode = #tpu.pipeline_mode<synchronous>, transform_indices = @transform_3, window_bounds = array<i64: 3, 1>}, {transform_indices = @transform_4, window_bounds = array<i64: 1, 3, 324>}, {transform_indices = @transform_5, window_bounds = array<i64: 1, 3, 324>}, {transform_indices = @transform_6, window_bounds = array<i64: 1, 3, 324>}]} {
    %c0 = arith.constant 0 : index
    %c0_0 = arith.constant 0 : index
    %0 = vector.load %arg1[%c0, %c0_0] : memref<1x286xf32, #tpu.memory_space<vmem>>, vector<1x286xf32>
    %c0_1 = arith.constant 0 : index
    %c0_2 = arith.constant 0 : index
    %c0_3 = arith.constant 0 : index
    %1 = vector.load %arg2[%c0_1, %c0_2, %c0_3] : memref<1x16x324xf32, #tpu.memory_space<vmem>>, vector<1x16x324xf32>
    %2 = vector.shape_cast %1 : vector<1x16x324xf32> to vector<16x324xf32>
    %cst = arith.constant 0.000000e+00 : f32
    %3 = vector.broadcast %cst : f32 to vector<3x286xf32>
    %4 = vector.extract_strided_slice %2 {offsets = [0, 0], sizes = [16, 286], strides = [1, 1]} : vector<16x324xf32> to vector<16x286xf32>
    %c0_4 = arith.constant 0 : index
    %c0_5 = arith.constant 0 : index
    %c0_6 = arith.constant 0 : index
    %5 = vector.load %arg3[%c0_4, %c0_5, %c0_6] : memref<9x3x16xf32, #tpu.memory_space<vmem>>, vector<1x3x16xf32>
    %6 = vector.shape_cast %5 : vector<1x3x16xf32> to vector<3x16xf32>
    %cst_7 = arith.constant dense<0.000000e+00> : vector<3x286xf32>
    %7 = tpu.matmul %6, %4, %cst_7 {dimension_numbers = #tpu.dot_dimension_numbers<[1], [0], [0], [1], [0, 0, 1, 1], [], []>} : vector<3x16xf32>, vector<16x286xf32>, vector<3x286xf32> -> vector<3x286xf32>
    %8 = arith.addf %3, %7 : vector<3x286xf32>
    %9 = vector.extract_strided_slice %2 {offsets = [0, 1], sizes = [16, 286], strides = [1, 1]} : vector<16x324xf32> to vector<16x286xf32>
    %c1 = arith.constant 1 : index
    %c0_8 = arith.constant 0 : index
    %c0_9 = arith.constant 0 : index
    %10 = vector.load %arg3[%c1, %c0_8, %c0_9] : memref<9x3x16xf32, #tpu.memory_space<vmem>>, vector<1x3x16xf32>
    %11 = vector.shape_cast %10 : vector<1x3x16xf32> to vector<3x16xf32>
    %cst_10 = arith.constant dense<0.000000e+00> : vector<3x286xf32>
    %12 = tpu.matmul %11, %9, %cst_10 {dimension_numbers = #tpu.dot_dimension_numbers<[1], [0], [0], [1], [0, 0, 1, 1], [], []>} : vector<3x16xf32>, vector<16x286xf32>, vector<3x286xf32> -> vector<3x286xf32>
    %13 = arith.addf %8, %12 : vector<3x286xf32>
    %14 = vector.extract_strided_slice %2 {offsets = [0, 2], sizes = [16, 286], strides = [1, 1]} : vector<16x324xf32> to vector<16x286xf32>
    %c2 = arith.constant 2 : index
    %c0_11 = arith.constant 0 : index
    %c0_12 = arith.constant 0 : index
    %15 = vector.load %arg3[%c2, %c0_11, %c0_12] : memref<9x3x16xf32, #tpu.memory_space<vmem>>, vector<1x3x16xf32>
    %16 = vector.shape_cast %15 : vector<1x3x16xf32> to vector<3x16xf32>
    %cst_13 = arith.constant dense<0.000000e+00> : vector<3x286xf32>
    %17 = tpu.matmul %16, %14, %cst_13 {dimension_numbers = #tpu.dot_dimension_numbers<[1], [0], [0], [1], [0, 0, 1, 1], [], []>} : vector<3x16xf32>, vector<16x286xf32>, vector<3x286xf32> -> vector<3x286xf32>
    %18 = arith.addf %13, %17 : vector<3x286xf32>
    %19 = vector.extract_strided_slice %2 {offsets = [0, 18], sizes = [16, 286], strides = [1, 1]} : vector<16x324xf32> to vector<16x286xf32>
    %c3 = arith.constant 3 : index
    %c0_14 = arith.constant 0 : index
    %c0_15 = arith.constant 0 : index
    %20 = vector.load %arg3[%c3, %c0_14, %c0_15] : memref<9x3x16xf32, #tpu.memory_space<vmem>>, vector<1x3x16xf32>
    %21 = vector.shape_cast %20 : vector<1x3x16xf32> to vector<3x16xf32>
    %cst_16 = arith.constant dense<0.000000e+00> : vector<3x286xf32>
    %22 = tpu.matmul %21, %19, %cst_16 {dimension_numbers = #tpu.dot_dimension_numbers<[1], [0], [0], [1], [0, 0, 1, 1], [], []>} : vector<3x16xf32>, vector<16x286xf32>, vector<3x286xf32> -> vector<3x286xf32>
    %23 = arith.addf %18, %22 : vector<3x286xf32>
    %24 = vector.extract_strided_slice %2 {offsets = [0, 19], sizes = [16, 286], strides = [1, 1]} : vector<16x324xf32> to vector<16x286xf32>
    %c4 = arith.constant 4 : index
    %c0_17 = arith.constant 0 : index
    %c0_18 = arith.constant 0 : index
    %25 = vector.load %arg3[%c4, %c0_17, %c0_18] : memref<9x3x16xf32, #tpu.memory_space<vmem>>, vector<1x3x16xf32>
    %26 = vector.shape_cast %25 : vector<1x3x16xf32> to vector<3x16xf32>
    %cst_19 = arith.constant dense<0.000000e+00> : vector<3x286xf32>
    %27 = tpu.matmul %26, %24, %cst_19 {dimension_numbers = #tpu.dot_dimension_numbers<[1], [0], [0], [1], [0, 0, 1, 1], [], []>} : vector<3x16xf32>, vector<16x286xf32>, vector<3x286xf32> -> vector<3x286xf32>
    %28 = arith.addf %23, %27 : vector<3x286xf32>
    %29 = vector.extract_strided_slice %2 {offsets = [0, 20], sizes = [16, 286], strides = [1, 1]} : vector<16x324xf32> to vector<16x286xf32>
    %c5 = arith.constant 5 : index
    %c0_20 = arith.constant 0 : index
    %c0_21 = arith.constant 0 : index
    %30 = vector.load %arg3[%c5, %c0_20, %c0_21] : memref<9x3x16xf32, #tpu.memory_space<vmem>>, vector<1x3x16xf32>
    %31 = vector.shape_cast %30 : vector<1x3x16xf32> to vector<3x16xf32>
    %cst_22 = arith.constant dense<0.000000e+00> : vector<3x286xf32>
    %32 = tpu.matmul %31, %29, %cst_22 {dimension_numbers = #tpu.dot_dimension_numbers<[1], [0], [0], [1], [0, 0, 1, 1], [], []>} : vector<3x16xf32>, vector<16x286xf32>, vector<3x286xf32> -> vector<3x286xf32>
    %33 = arith.addf %28, %32 : vector<3x286xf32>
    %34 = vector.extract_strided_slice %2 {offsets = [0, 36], sizes = [16, 286], strides = [1, 1]} : vector<16x324xf32> to vector<16x286xf32>
    %c6 = arith.constant 6 : index
    %c0_23 = arith.constant 0 : index
    %c0_24 = arith.constant 0 : index
    %35 = vector.load %arg3[%c6, %c0_23, %c0_24] : memref<9x3x16xf32, #tpu.memory_space<vmem>>, vector<1x3x16xf32>
    %36 = vector.shape_cast %35 : vector<1x3x16xf32> to vector<3x16xf32>
    %cst_25 = arith.constant dense<0.000000e+00> : vector<3x286xf32>
    %37 = tpu.matmul %36, %34, %cst_25 {dimension_numbers = #tpu.dot_dimension_numbers<[1], [0], [0], [1], [0, 0, 1, 1], [], []>} : vector<3x16xf32>, vector<16x286xf32>, vector<3x286xf32> -> vector<3x286xf32>
    %38 = arith.addf %33, %37 : vector<3x286xf32>
    %39 = vector.extract_strided_slice %2 {offsets = [0, 37], sizes = [16, 286], strides = [1, 1]} : vector<16x324xf32> to vector<16x286xf32>
    %c7 = arith.constant 7 : index
    %c0_26 = arith.constant 0 : index
    %c0_27 = arith.constant 0 : index
    %40 = vector.load %arg3[%c7, %c0_26, %c0_27] : memref<9x3x16xf32, #tpu.memory_space<vmem>>, vector<1x3x16xf32>
    %41 = vector.shape_cast %40 : vector<1x3x16xf32> to vector<3x16xf32>
    %cst_28 = arith.constant dense<0.000000e+00> : vector<3x286xf32>
    %42 = tpu.matmul %41, %39, %cst_28 {dimension_numbers = #tpu.dot_dimension_numbers<[1], [0], [0], [1], [0, 0, 1, 1], [], []>} : vector<3x16xf32>, vector<16x286xf32>, vector<3x286xf32> -> vector<3x286xf32>
    %43 = arith.addf %38, %42 : vector<3x286xf32>
    %44 = vector.extract_strided_slice %2 {offsets = [0, 38], sizes = [16, 286], strides = [1, 1]} : vector<16x324xf32> to vector<16x286xf32>
    %c8 = arith.constant 8 : index
    %c0_29 = arith.constant 0 : index
    %c0_30 = arith.constant 0 : index
    %45 = vector.load %arg3[%c8, %c0_29, %c0_30] : memref<9x3x16xf32, #tpu.memory_space<vmem>>, vector<1x3x16xf32>
    %46 = vector.shape_cast %45 : vector<1x3x16xf32> to vector<3x16xf32>
    %cst_31 = arith.constant dense<0.000000e+00> : vector<3x286xf32>
    %47 = tpu.matmul %46, %44, %cst_31 {dimension_numbers = #tpu.dot_dimension_numbers<[1], [0], [0], [1], [0, 0, 1, 1], [], []>} : vector<3x16xf32>, vector<16x286xf32>, vector<3x286xf32> -> vector<3x286xf32>
    %48 = arith.addf %43, %47 : vector<3x286xf32>
    %c0_32 = arith.constant 0 : index
    %c0_33 = arith.constant 0 : index
    %49 = vector.load %arg4[%c0_32, %c0_33] : memref<3x1xf32, #tpu.memory_space<vmem>>, vector<3x1xf32>
    %50 = vector.broadcast %49 : vector<3x1xf32> to vector<3x286xf32>
    %51 = arith.addf %48, %50 : vector<3x286xf32>
    %c0_34 = arith.constant 0 : index
    %c0_35 = arith.constant 0 : index
    %c0_36 = arith.constant 0 : index
    %52 = vector.load %arg5[%c0_34, %c0_35, %c0_36] : memref<1x3x324xf32, #tpu.memory_space<vmem>>, vector<1x3x324xf32>
    %53 = vector.shape_cast %52 : vector<1x3x324xf32> to vector<3x324xf32>
    %c0_37 = arith.constant 0 : index
    %c0_38 = arith.constant 0 : index
    %c0_39 = arith.constant 0 : index
    %54 = vector.load %arg6[%c0_37, %c0_38, %c0_39] : memref<1x3x324xf32, #tpu.memory_space<vmem>>, vector<1x3x324xf32>
    %55 = vector.shape_cast %54 : vector<1x3x324xf32> to vector<3x324xf32>
    %56 = arith.negf %51 : vector<3x286xf32>
    %57 = math.exp %56 : vector<3x286xf32>
    %cst_40 = arith.constant 1.000000e+00 : f32
    %58 = vector.broadcast %cst_40 : f32 to vector<3x286xf32>
    %59 = arith.addf %58, %57 : vector<3x286xf32>
    %60 = arith.divf %58, %59 : vector<3x286xf32>
    %61 = vector.broadcast %0 : vector<1x286xf32> to vector<3x286xf32>
    %62 = arith.mulf %60, %61 : vector<3x286xf32>
    %63 = vector.extract_strided_slice %53 {offsets = [0, 19], sizes = [3, 286], strides = [1, 1]} : vector<3x324xf32> to vector<3x286xf32>
    %64 = vector.extract_strided_slice %55 {offsets = [0, 19], sizes = [3, 286], strides = [1, 1]} : vector<3x324xf32> to vector<3x286xf32>
    %65 = arith.subf %64, %62 : vector<3x286xf32>
    %66 = arith.addf %63, %65 : vector<3x286xf32>
    %cst_41 = arith.constant 0.000000e+00 : f32
    %67 = vector.broadcast %cst_41 : f32 to vector<3x19xf32>
    %68 = tpu.concatenate %67, %66, %67 in 1 : vector<3x19xf32>, vector<3x286xf32>, vector<3x19xf32> -> vector<3x324xf32>
    %c0_42 = arith.constant 0 : index
    %c0_43 = arith.constant 0 : index
    %c0_44 = arith.constant 0 : index
    %69 = vector.load %arg7[%c0_42, %c0_43, %c0_44] : memref<1x3x324xf32, #tpu.memory_space<vmem>>, vector<1x3x324xf32>
    %70 = vector.shape_cast %69 : vector<1x3x324xf32> to vector<3x324xf32>
    %71 = vector.shape_cast %68 : vector<3x324xf32> to vector<1x3x324xf32>
    tpu.vector_store %arg7[%c0_42, %c0_43, %c0_44], %71 {strides = array<i32>} : memref<1x3x324xf32, #tpu.memory_space<vmem>>, vector<1x3x324xf32>,
    return
  }
  func.func @transform_0(%arg0: i32) -> (i32, i32) {
    %c0_i32 = arith.constant 0 : i32
    %c0_i32_0 = arith.constant 0 : i32
    %c0_i32_1 = arith.constant 0 : i32
    return %c0_i32, %c0_i32_0 : i32, i32
  }
  func.func @transform_1(%arg0: i32) -> (i32, i32, i32) {
    %c0_i32 = arith.constant 0 : i32
    %c0_i32_0 = arith.constant 0 : i32
    %c0_i32_1 = arith.constant 0 : i32
    return %arg0, %c0_i32, %c0_i32_0 : i32, i32, i32
  }
  func.func @transform_2(%arg0: i32) -> (i32, i32, i32) {
    %c0_i32 = arith.constant 0 : i32
    %c0_i32_0 = arith.constant 0 : i32
    %c0_i32_1 = arith.constant 0 : i32
    %c0_i32_2 = arith.constant 0 : i32
    return %c0_i32, %c0_i32_0, %c0_i32_1 : i32, i32, i32
  }
  func.func @transform_3(%arg0: i32) -> (i32, i32) {
    %c0_i32 = arith.constant 0 : i32
    %c0_i32_0 = arith.constant 0 : i32
    %c0_i32_1 = arith.constant 0 : i32
    return %c0_i32, %c0_i32_0 : i32, i32
  }
  func.func @transform_4(%arg0: i32) -> (i32, i32, i32) {
    %c0_i32 = arith.constant 0 : i32
    %c0_i32_0 = arith.constant 0 : i32
    %c0_i32_1 = arith.constant 0 : i32
    return %arg0, %c0_i32, %c0_i32_0 : i32, i32, i32
  }
  func.func @transform_5(%arg0: i32) -> (i32, i32, i32) {
    %c0_i32 = arith.constant 0 : i32
    %c0_i32_0 = arith.constant 0 : i32
    %c0_i32_1 = arith.constant 0 : i32
    return %arg0, %c0_i32, %c0_i32_0 : i32, i32, i32
  }
  func.func @transform_6(%arg0: i32) -> (i32, i32, i32) {
    %c0_i32 = arith.constant 0 : i32
    %c0_i32_0 = arith.constant 0 : i32
    %c0_i32_1 = arith.constant 0 : i32
    return %arg0, %c0_i32, %c0_i32_0 : i32, i32, i32
  }
}

module attributes {stable_mosaic.version = 11 : i64} {
  func.func @_conv_kernel(%arg0: i32, %arg1: memref<1x286xf32, #tpu.memory_space<vmem>>, %arg2: memref<1x3x286xf32, #tpu.memory_space<vmem>>, %arg3: memref<3x1xf32, #tpu.memory_space<vmem>>, %arg4: memref<3x1xf32, #tpu.memory_space<vmem>>, %arg5: memref<1x3x324xf32, #tpu.memory_space<vmem>>, %arg6: memref<9x3x3xf32, #tpu.memory_space<vmem>>, %arg7: memref<3x1xf32, #tpu.memory_space<vmem>>, %arg8: memref<1x3x324xf32, #tpu.memory_space<vmem>>, %arg9: memref<1x3x324xf32, #tpu.memory_space<vmem>>, %arg10: memref<1x3x324xf32, #tpu.memory_space<vmem>>, %arg11: memref<1x3x324xf32, #tpu.memory_space<vmem>>) attributes {dimension_semantics = [#tpu.dimension_semantics<parallel>], iteration_bounds = array<i64: 2>, scalar_prefetch = 0 : i64, scratch_operands = 0 : i64, tpu.core_type = #tpu.core_type<tc>, window_params = [{pipeline_mode = #tpu.pipeline_mode<synchronous>, transform_indices = @transform_0, window_bounds = array<i64: 1, 286>}, {transform_indices = @transform_1, window_bounds = array<i64: 1, 3, 286>}, {pipeline_mode = #tpu.pipeline_mode<synchronous>, transform_indices = @transform_2, window_bounds = array<i64: 3, 1>}, {pipeline_mode = #tpu.pipeline_mode<synchronous>, transform_indices = @transform_3, window_bounds = array<i64: 3, 1>}, {transform_indices = @transform_4, window_bounds = array<i64: 1, 3, 324>}, {pipeline_mode = #tpu.pipeline_mode<synchronous>, transform_indices = @transform_5, window_bounds = array<i64: 9, 3, 3>}, {pipeline_mode = #tpu.pipeline_mode<synchronous>, transform_indices = @transform_6, window_bounds = array<i64: 3, 1>}, {transform_indices = @transform_7, window_bounds = array<i64: 1, 3, 324>}, {transform_indices = @transform_8, window_bounds = array<i64: 1, 3, 324>}, {transform_indices = @transform_9, window_bounds = array<i64: 1, 3, 324>}, {transform_indices = @transform_10, window_bounds = array<i64: 1, 3, 324>}]} {
    %c0 = arith.constant 0 : index
    %c0_0 = arith.constant 0 : index
    %0 = vector.load %arg1[%c0, %c0_0] : memref<1x286xf32, #tpu.memory_space<vmem>>, vector<1x286xf32>
    %c0_1 = arith.constant 0 : index
    %c0_2 = arith.constant 0 : index
    %c0_3 = arith.constant 0 : index
    %1 = vector.load %arg2[%c0_1, %c0_2, %c0_3] : memref<1x3x286xf32, #tpu.memory_space<vmem>>, vector<1x3x286xf32>
    %2 = vector.shape_cast %1 : vector<1x3x286xf32> to vector<3x286xf32>
    %c0_4 = arith.constant 0 : index
    %c0_5 = arith.constant 0 : index
    %3 = vector.load %arg3[%c0_4, %c0_5] : memref<3x1xf32, #tpu.memory_space<vmem>>, vector<3x1xf32>
    %c0_6 = arith.constant 0 : index
    %c0_7 = arith.constant 0 : index
    %4 = vector.load %arg4[%c0_6, %c0_7] : memref<3x1xf32, #tpu.memory_space<vmem>>, vector<3x1xf32>
    %5 = vector.broadcast %3 : vector<3x1xf32> to vector<3x286xf32>
    %6 = arith.mulf %2, %5 : vector<3x286xf32>
    %7 = vector.broadcast %4 : vector<3x1xf32> to vector<3x286xf32>
    %8 = arith.addf %6, %7 : vector<3x286xf32>
    %cst = arith.constant 0.000000e+00 : f32
    %9 = vector.broadcast %cst : f32 to vector<3x286xf32>
    %10 = arith.maximumf %8, %9 : vector<3x286xf32>
    %11 = vector.broadcast %0 : vector<1x286xf32> to vector<3x286xf32>
    %12 = arith.mulf %10, %11 : vector<3x286xf32>
    %cst_8 = arith.constant 0.000000e+00 : f32
    %13 = vector.broadcast %cst_8 : f32 to vector<3x19xf32>
    %14 = tpu.concatenate %13, %12, %13 in 1 : vector<3x19xf32>, vector<3x286xf32>, vector<3x19xf32> -> vector<3x324xf32>
    %c0_9 = arith.constant 0 : index
    %c0_10 = arith.constant 0 : index
    %c0_11 = arith.constant 0 : index
    %15 = vector.load %arg5[%c0_9, %c0_10, %c0_11] : memref<1x3x324xf32, #tpu.memory_space<vmem>>, vector<1x3x324xf32>
    %16 = vector.shape_cast %15 : vector<1x3x324xf32> to vector<3x324xf32>
    %17 = arith.addf %14, %16 : vector<3x324xf32>
    %cst_12 = arith.constant 0.000000e+00 : f32
    %18 = vector.broadcast %cst_12 : f32 to vector<3x286xf32>
    %19 = vector.extract_strided_slice %17 {offsets = [0, 0], sizes = [3, 286], strides = [1, 1]} : vector<3x324xf32> to vector<3x286xf32>
    %c0_13 = arith.constant 0 : index
    %c0_14 = arith.constant 0 : index
    %c0_15 = arith.constant 0 : index
    %20 = vector.load %arg6[%c0_13, %c0_14, %c0_15] : memref<9x3x3xf32, #tpu.memory_space<vmem>>, vector<1x3x3xf32>
    %21 = vector.shape_cast %20 : vector<1x3x3xf32> to vector<3x3xf32>
    %cst_16 = arith.constant dense<0.000000e+00> : vector<3x286xf32>
    %22 = tpu.matmul %21, %19, %cst_16 {dimension_numbers = #tpu.dot_dimension_numbers<[1], [0], [0], [1], [0, 0, 1, 1], [], []>} : vector<3x3xf32>, vector<3x286xf32>, vector<3x286xf32> -> vector<3x286xf32>
    %23 = arith.addf %18, %22 : vector<3x286xf32>
    %24 = vector.extract_strided_slice %17 {offsets = [0, 1], sizes = [3, 286], strides = [1, 1]} : vector<3x324xf32> to vector<3x286xf32>
    %c1 = arith.constant 1 : index
    %c0_17 = arith.constant 0 : index
    %c0_18 = arith.constant 0 : index
    %25 = vector.load %arg6[%c1, %c0_17, %c0_18] : memref<9x3x3xf32, #tpu.memory_space<vmem>>, vector<1x3x3xf32>
    %26 = vector.shape_cast %25 : vector<1x3x3xf32> to vector<3x3xf32>
    %cst_19 = arith.constant dense<0.000000e+00> : vector<3x286xf32>
    %27 = tpu.matmul %26, %24, %cst_19 {dimension_numbers = #tpu.dot_dimension_numbers<[1], [0], [0], [1], [0, 0, 1, 1], [], []>} : vector<3x3xf32>, vector<3x286xf32>, vector<3x286xf32> -> vector<3x286xf32>
    %28 = arith.addf %23, %27 : vector<3x286xf32>
    %29 = vector.extract_strided_slice %17 {offsets = [0, 2], sizes = [3, 286], strides = [1, 1]} : vector<3x324xf32> to vector<3x286xf32>
    %c2 = arith.constant 2 : index
    %c0_20 = arith.constant 0 : index
    %c0_21 = arith.constant 0 : index
    %30 = vector.load %arg6[%c2, %c0_20, %c0_21] : memref<9x3x3xf32, #tpu.memory_space<vmem>>, vector<1x3x3xf32>
    %31 = vector.shape_cast %30 : vector<1x3x3xf32> to vector<3x3xf32>
    %cst_22 = arith.constant dense<0.000000e+00> : vector<3x286xf32>
    %32 = tpu.matmul %31, %29, %cst_22 {dimension_numbers = #tpu.dot_dimension_numbers<[1], [0], [0], [1], [0, 0, 1, 1], [], []>} : vector<3x3xf32>, vector<3x286xf32>, vector<3x286xf32> -> vector<3x286xf32>
    %33 = arith.addf %28, %32 : vector<3x286xf32>
    %34 = vector.extract_strided_slice %17 {offsets = [0, 18], sizes = [3, 286], strides = [1, 1]} : vector<3x324xf32> to vector<3x286xf32>
    %c3 = arith.constant 3 : index
    %c0_23 = arith.constant 0 : index
    %c0_24 = arith.constant 0 : index
    %35 = vector.load %arg6[%c3, %c0_23, %c0_24] : memref<9x3x3xf32, #tpu.memory_space<vmem>>, vector<1x3x3xf32>
    %36 = vector.shape_cast %35 : vector<1x3x3xf32> to vector<3x3xf32>
    %cst_25 = arith.constant dense<0.000000e+00> : vector<3x286xf32>
    %37 = tpu.matmul %36, %34, %cst_25 {dimension_numbers = #tpu.dot_dimension_numbers<[1], [0], [0], [1], [0, 0, 1, 1], [], []>} : vector<3x3xf32>, vector<3x286xf32>, vector<3x286xf32> -> vector<3x286xf32>
    %38 = arith.addf %33, %37 : vector<3x286xf32>
    %39 = vector.extract_strided_slice %17 {offsets = [0, 19], sizes = [3, 286], strides = [1, 1]} : vector<3x324xf32> to vector<3x286xf32>
    %c4 = arith.constant 4 : index
    %c0_26 = arith.constant 0 : index
    %c0_27 = arith.constant 0 : index
    %40 = vector.load %arg6[%c4, %c0_26, %c0_27] : memref<9x3x3xf32, #tpu.memory_space<vmem>>, vector<1x3x3xf32>
    %41 = vector.shape_cast %40 : vector<1x3x3xf32> to vector<3x3xf32>
    %cst_28 = arith.constant dense<0.000000e+00> : vector<3x286xf32>
    %42 = tpu.matmul %41, %39, %cst_28 {dimension_numbers = #tpu.dot_dimension_numbers<[1], [0], [0], [1], [0, 0, 1, 1], [], []>} : vector<3x3xf32>, vector<3x286xf32>, vector<3x286xf32> -> vector<3x286xf32>
    %43 = arith.addf %38, %42 : vector<3x286xf32>
    %44 = vector.extract_strided_slice %17 {offsets = [0, 20], sizes = [3, 286], strides = [1, 1]} : vector<3x324xf32> to vector<3x286xf32>
    %c5 = arith.constant 5 : index
    %c0_29 = arith.constant 0 : index
    %c0_30 = arith.constant 0 : index
    %45 = vector.load %arg6[%c5, %c0_29, %c0_30] : memref<9x3x3xf32, #tpu.memory_space<vmem>>, vector<1x3x3xf32>
    %46 = vector.shape_cast %45 : vector<1x3x3xf32> to vector<3x3xf32>
    %cst_31 = arith.constant dense<0.000000e+00> : vector<3x286xf32>
    %47 = tpu.matmul %46, %44, %cst_31 {dimension_numbers = #tpu.dot_dimension_numbers<[1], [0], [0], [1], [0, 0, 1, 1], [], []>} : vector<3x3xf32>, vector<3x286xf32>, vector<3x286xf32> -> vector<3x286xf32>
    %48 = arith.addf %43, %47 : vector<3x286xf32>
    %49 = vector.extract_strided_slice %17 {offsets = [0, 36], sizes = [3, 286], strides = [1, 1]} : vector<3x324xf32> to vector<3x286xf32>
    %c6 = arith.constant 6 : index
    %c0_32 = arith.constant 0 : index
    %c0_33 = arith.constant 0 : index
    %50 = vector.load %arg6[%c6, %c0_32, %c0_33] : memref<9x3x3xf32, #tpu.memory_space<vmem>>, vector<1x3x3xf32>
    %51 = vector.shape_cast %50 : vector<1x3x3xf32> to vector<3x3xf32>
    %cst_34 = arith.constant dense<0.000000e+00> : vector<3x286xf32>
    %52 = tpu.matmul %51, %49, %cst_34 {dimension_numbers = #tpu.dot_dimension_numbers<[1], [0], [0], [1], [0, 0, 1, 1], [], []>} : vector<3x3xf32>, vector<3x286xf32>, vector<3x286xf32> -> vector<3x286xf32>
    %53 = arith.addf %48, %52 : vector<3x286xf32>
    %54 = vector.extract_strided_slice %17 {offsets = [0, 37], sizes = [3, 286], strides = [1, 1]} : vector<3x324xf32> to vector<3x286xf32>
    %c7 = arith.constant 7 : index
    %c0_35 = arith.constant 0 : index
    %c0_36 = arith.constant 0 : index
    %55 = vector.load %arg6[%c7, %c0_35, %c0_36] : memref<9x3x3xf32, #tpu.memory_space<vmem>>, vector<1x3x3xf32>
    %56 = vector.shape_cast %55 : vector<1x3x3xf32> to vector<3x3xf32>
    %cst_37 = arith.constant dense<0.000000e+00> : vector<3x286xf32>
    %57 = tpu.matmul %56, %54, %cst_37 {dimension_numbers = #tpu.dot_dimension_numbers<[1], [0], [0], [1], [0, 0, 1, 1], [], []>} : vector<3x3xf32>, vector<3x286xf32>, vector<3x286xf32> -> vector<3x286xf32>
    %58 = arith.addf %53, %57 : vector<3x286xf32>
    %59 = vector.extract_strided_slice %17 {offsets = [0, 38], sizes = [3, 286], strides = [1, 1]} : vector<3x324xf32> to vector<3x286xf32>
    %c8 = arith.constant 8 : index
    %c0_38 = arith.constant 0 : index
    %c0_39 = arith.constant 0 : index
    %60 = vector.load %arg6[%c8, %c0_38, %c0_39] : memref<9x3x3xf32, #tpu.memory_space<vmem>>, vector<1x3x3xf32>
    %61 = vector.shape_cast %60 : vector<1x3x3xf32> to vector<3x3xf32>
    %cst_40 = arith.constant dense<0.000000e+00> : vector<3x286xf32>
    %62 = tpu.matmul %61, %59, %cst_40 {dimension_numbers = #tpu.dot_dimension_numbers<[1], [0], [0], [1], [0, 0, 1, 1], [], []>} : vector<3x3xf32>, vector<3x286xf32>, vector<3x286xf32> -> vector<3x286xf32>
    %63 = arith.addf %58, %62 : vector<3x286xf32>
    %c0_41 = arith.constant 0 : index
    %c0_42 = arith.constant 0 : index
    %64 = vector.load %arg7[%c0_41, %c0_42] : memref<3x1xf32, #tpu.memory_space<vmem>>, vector<3x1xf32>
    %65 = vector.broadcast %64 : vector<3x1xf32> to vector<3x286xf32>
    %66 = arith.addf %63, %65 : vector<3x286xf32>
    %c0_43 = arith.constant 0 : index
    %c0_44 = arith.constant 0 : index
    %c0_45 = arith.constant 0 : index
    %67 = vector.load %arg8[%c0_43, %c0_44, %c0_45] : memref<1x3x324xf32, #tpu.memory_space<vmem>>, vector<1x3x324xf32>
    %68 = vector.shape_cast %67 : vector<1x3x324xf32> to vector<3x324xf32>
    %c0_46 = arith.constant 0 : index
    %c0_47 = arith.constant 0 : index
    %c0_48 = arith.constant 0 : index
    %69 = vector.load %arg9[%c0_46, %c0_47, %c0_48] : memref<1x3x324xf32, #tpu.memory_space<vmem>>, vector<1x3x324xf32>
    %70 = vector.shape_cast %69 : vector<1x3x324xf32> to vector<3x324xf32>
    %71 = arith.negf %66 : vector<3x286xf32>
    %72 = math.exp %71 : vector<3x286xf32>
    %cst_49 = arith.constant 1.000000e+00 : f32
    %73 = vector.broadcast %cst_49 : f32 to vector<3x286xf32>
    %74 = arith.addf %73, %72 : vector<3x286xf32>
    %75 = arith.divf %73, %74 : vector<3x286xf32>
    %76 = vector.broadcast %0 : vector<1x286xf32> to vector<3x286xf32>
    %77 = arith.mulf %75, %76 : vector<3x286xf32>
    %78 = vector.extract_strided_slice %68 {offsets = [0, 19], sizes = [3, 286], strides = [1, 1]} : vector<3x324xf32> to vector<3x286xf32>
    %79 = vector.extract_strided_slice %70 {offsets = [0, 19], sizes = [3, 286], strides = [1, 1]} : vector<3x324xf32> to vector<3x286xf32>
    %80 = arith.addf %79, %77 : vector<3x286xf32>
    %cst_50 = arith.constant 9.99999974E-5 : f32
    %cst_51 = arith.constant 1.000000e+00 : f32
    %81 = vector.broadcast %cst_50 : f32 to vector<3x286xf32>
    %82 = arith.maximumf %81, %80 : vector<3x286xf32>
    %83 = vector.broadcast %cst_51 : f32 to vector<3x286xf32>
    %84 = arith.minimumf %83, %82 : vector<3x286xf32>
    %85 = arith.divf %78, %84 : vector<3x286xf32>
    %cst_52 = arith.constant 0.000000e+00 : f32
    %cst_53 = arith.constant 1.000000e+00 : f32
    %86 = vector.broadcast %cst_52 : f32 to vector<3x286xf32>
    %87 = arith.maximumf %86, %85 : vector<3x286xf32>
    %88 = vector.broadcast %cst_53 : f32 to vector<3x286xf32>
    %89 = arith.minimumf %88, %87 : vector<3x286xf32>
    %cst_54 = arith.constant 0.000000e+00 : f32
    %90 = vector.broadcast %cst_54 : f32 to vector<3x19xf32>
    %91 = tpu.concatenate %90, %84, %90 in 1 : vector<3x19xf32>, vector<3x286xf32>, vector<3x19xf32> -> vector<3x324xf32>
    %c0_55 = arith.constant 0 : index
    %c0_56 = arith.constant 0 : index
    %c0_57 = arith.constant 0 : index
    %92 = vector.load %arg10[%c0_55, %c0_56, %c0_57] : memref<1x3x324xf32, #tpu.memory_space<vmem>>, vector<1x3x324xf32>
    %93 = vector.shape_cast %92 : vector<1x3x324xf32> to vector<3x324xf32>
    %94 = vector.shape_cast %91 : vector<3x324xf32> to vector<1x3x324xf32>
    tpu.vector_store %arg10[%c0_55, %c0_56, %c0_57], %94 {strides = array<i32>} : memref<1x3x324xf32, #tpu.memory_space<vmem>>, vector<1x3x324xf32>,
    %cst_58 = arith.constant 0.000000e+00 : f32
    %95 = vector.broadcast %cst_58 : f32 to vector<3x19xf32>
    %96 = tpu.concatenate %95, %89, %95 in 1 : vector<3x19xf32>, vector<3x286xf32>, vector<3x19xf32> -> vector<3x324xf32>
    %c0_59 = arith.constant 0 : index
    %c0_60 = arith.constant 0 : index
    %c0_61 = arith.constant 0 : index
    %97 = vector.load %arg11[%c0_59, %c0_60, %c0_61] : memref<1x3x324xf32, #tpu.memory_space<vmem>>, vector<1x3x324xf32>
    %98 = vector.shape_cast %97 : vector<1x3x324xf32> to vector<3x324xf32>
    %99 = vector.shape_cast %96 : vector<3x324xf32> to vector<1x3x324xf32>
    tpu.vector_store %arg11[%c0_59, %c0_60, %c0_61], %99 {strides = array<i32>} : memref<1x3x324xf32, #tpu.memory_space<vmem>>, vector<1x3x324xf32>,
    return
  }
  func.func @transform_0(%arg0: i32) -> (i32, i32) {
    %c0_i32 = arith.constant 0 : i32
    %c0_i32_0 = arith.constant 0 : i32
    %c0_i32_1 = arith.constant 0 : i32
    return %c0_i32, %c0_i32_0 : i32, i32
  }
  func.func @transform_1(%arg0: i32) -> (i32, i32, i32) {
    %c0_i32 = arith.constant 0 : i32
    %c0_i32_0 = arith.constant 0 : i32
    %c0_i32_1 = arith.constant 0 : i32
    return %arg0, %c0_i32, %c0_i32_0 : i32, i32, i32
  }
  func.func @transform_2(%arg0: i32) -> (i32, i32) {
    %c0_i32 = arith.constant 0 : i32
    %c0_i32_0 = arith.constant 0 : i32
    %c0_i32_1 = arith.constant 0 : i32
    return %c0_i32, %c0_i32_0 : i32, i32
  }
  func.func @transform_3(%arg0: i32) -> (i32, i32) {
    %c0_i32 = arith.constant 0 : i32
    %c0_i32_0 = arith.constant 0 : i32
    %c0_i32_1 = arith.constant 0 : i32
    return %c0_i32, %c0_i32_0 : i32, i32
  }
  func.func @transform_4(%arg0: i32) -> (i32, i32, i32) {
    %c0_i32 = arith.constant 0 : i32
    %c0_i32_0 = arith.constant 0 : i32
    %c0_i32_1 = arith.constant 0 : i32
    return %arg0, %c0_i32, %c0_i32_0 : i32, i32, i32
  }
  func.func @transform_5(%arg0: i32) -> (i32, i32, i32) {
    %c0_i32 = arith.constant 0 : i32
    %c0_i32_0 = arith.constant 0 : i32
    %c0_i32_1 = arith.constant 0 : i32
    %c0_i32_2 = arith.constant 0 : i32
    return %c0_i32, %c0_i32_0, %c0_i32_1 : i32, i32, i32
  }
  func.func @transform_6(%arg0: i32) -> (i32, i32) {
    %c0_i32 = arith.constant 0 : i32
    %c0_i32_0 = arith.constant 0 : i32
    %c0_i32_1 = arith.constant 0 : i32
    return %c0_i32, %c0_i32_0 : i32, i32
  }
  func.func @transform_7(%arg0: i32) -> (i32, i32, i32) {
    %c0_i32 = arith.constant 0 : i32
    %c0_i32_0 = arith.constant 0 : i32
    %c0_i32_1 = arith.constant 0 : i32
    return %arg0, %c0_i32, %c0_i32_0 : i32, i32, i32
  }
  func.func @transform_8(%arg0: i32) -> (i32, i32, i32) {
    %c0_i32 = arith.constant 0 : i32
    %c0_i32_0 = arith.constant 0 : i32
    %c0_i32_1 = arith.constant 0 : i32
    return %arg0, %c0_i32, %c0_i32_0 : i32, i32, i32
  }
  func.func @transform_9(%arg0: i32) -> (i32, i32, i32) {
    %c0_i32 = arith.constant 0 : i32
    %c0_i32_0 = arith.constant 0 : i32
    %c0_i32_1 = arith.constant 0 : i32
    return %arg0, %c0_i32, %c0_i32_0 : i32, i32, i32
  }
  func.func @transform_10(%arg0: i32) -> (i32, i32, i32) {
    %c0_i32 = arith.constant 0 : i32
    %c0_i32_0 = arith.constant 0 : i32
    %c0_i32_1 = arith.constant 0 : i32
    return %arg0, %c0_i32, %c0_i32_0 : i32, i32, i32
  }
}

module attributes {stable_mosaic.version = 11 : i64} {
  func.func @_cem_kernel(%arg0: i32, %arg1: memref<2xf32, #tpu.memory_space<smem>>, %arg2: memref<1x3x256xf32, #tpu.memory_space<vmem>>, %arg3: memref<1x3x256xf32, #tpu.memory_space<vmem>>, %arg4: memref<1x3x256xf32, #tpu.memory_space<vmem>>) attributes {dimension_semantics = [#tpu.dimension_semantics<parallel>], iteration_bounds = array<i64: 2>, scalar_prefetch = 1 : i64, scratch_operands = 0 : i64, tpu.core_type = #tpu.core_type<tc>, window_params = [{transform_indices = @transform_0, window_bounds = array<i64: 1, 3, 256>}, {transform_indices = @transform_1, window_bounds = array<i64: 1, 3, 256>}, {transform_indices = @transform_2, window_bounds = array<i64: 1, 3, 256>}]} {
    %c0 = arith.constant 0 : index
    %0 = memref.load %arg1[%c0] : memref<2xf32, #tpu.memory_space<smem>>
    %cst = arith.constant 9.99999974E-5 : f32
    %1 = arith.maximumf %0, %cst : f32
    %c1 = arith.constant 1 : index
    %2 = memref.load %arg1[%c1] : memref<2xf32, #tpu.memory_space<smem>>
    %c0_0 = arith.constant 0 : index
    %c0_1 = arith.constant 0 : index
    %c0_2 = arith.constant 0 : index
    %3 = vector.load %arg2[%c0_0, %c0_1, %c0_2] : memref<1x3x256xf32, #tpu.memory_space<vmem>>, vector<1x3x256xf32>
    %4 = vector.shape_cast %3 : vector<1x3x256xf32> to vector<3x256xf32>
    %c0_3 = arith.constant 0 : index
    %c0_4 = arith.constant 0 : index
    %c0_5 = arith.constant 0 : index
    %5 = vector.load %arg3[%c0_3, %c0_4, %c0_5] : memref<1x3x256xf32, #tpu.memory_space<vmem>>, vector<1x3x256xf32>
    %6 = vector.shape_cast %5 : vector<1x3x256xf32> to vector<3x256xf32>
    %cst_6 = arith.constant 1.000000e+00 : f32
    %7 = vector.broadcast %cst_6 : f32 to vector<3x256xf32>
    %8 = arith.divf %7, %6 : vector<3x256xf32>
    %9 = math.log %8 : vector<3x256xf32>
    %10 = vector.broadcast %1 : f32 to vector<3x256xf32>
    %11 = arith.mulf %10, %9 : vector<3x256xf32>
    %12 = math.exp %11 : vector<3x256xf32>
    %cst_7 = arith.constant 1.000000e+00 : f32
    %13 = arith.addf %2, %cst_7 : f32
    %14 = vector.broadcast %13 : f32 to vector<3x256xf32>
    %15 = arith.mulf %14, %12 : vector<3x256xf32>
    %16 = arith.mulf %15, %4 : vector<3x256xf32>
    %cst_8 = arith.constant 1.000000e+00 : f32
    %17 = vector.broadcast %cst_8 : f32 to vector<3x256xf32>
    %18 = arith.subf %12, %17 : vector<3x256xf32>
    %19 = vector.broadcast %2 : f32 to vector<3x256xf32>
    %20 = arith.mulf %19, %18 : vector<3x256xf32>
    %21 = arith.mulf %20, %4 : vector<3x256xf32>
    %cst_9 = arith.constant 1.000000e+00 : f32
    %22 = arith.addf %2, %cst_9 : f32
    %23 = vector.broadcast %22 : f32 to vector<3x256xf32>
    %24 = arith.addf %21, %23 : vector<3x256xf32>
    %25 = arith.divf %16, %24 : vector<3x256xf32>
    %cst_10 = arith.constant 0.000000e+00 : f32
    %cst_11 = arith.constant 1.000000e+00 : f32
    %26 = vector.broadcast %cst_10 : f32 to vector<3x256xf32>
    %27 = arith.maximumf %26, %25 : vector<3x256xf32>
    %28 = vector.broadcast %cst_11 : f32 to vector<3x256xf32>
    %29 = arith.minimumf %28, %27 : vector<3x256xf32>
    %c0_12 = arith.constant 0 : index
    %c0_13 = arith.constant 0 : index
    %c0_14 = arith.constant 0 : index
    %30 = vector.load %arg4[%c0_12, %c0_13, %c0_14] : memref<1x3x256xf32, #tpu.memory_space<vmem>>, vector<1x3x256xf32>
    %31 = vector.shape_cast %30 : vector<1x3x256xf32> to vector<3x256xf32>
    %32 = vector.shape_cast %29 : vector<3x256xf32> to vector<1x3x256xf32>
    tpu.vector_store %arg4[%c0_12, %c0_13, %c0_14], %32 {strides = array<i32>} : memref<1x3x256xf32, #tpu.memory_space<vmem>>, vector<1x3x256xf32>,
    return
  }
  func.func @transform_0(%arg0: i32, %arg1: memref<2xf32, #tpu.memory_space<smem>>) -> (i32, i32, i32) {
    %c0_i32 = arith.constant 0 : i32
    %c0_i32_0 = arith.constant 0 : i32
    %c0_i32_1 = arith.constant 0 : i32
    return %arg0, %c0_i32, %c0_i32_0 : i32, i32, i32
  }
  func.func @transform_1(%arg0: i32, %arg1: memref<2xf32, #tpu.memory_space<smem>>) -> (i32, i32, i32) {
    %c0_i32 = arith.constant 0 : i32
    %c0_i32_0 = arith.constant 0 : i32
    %c0_i32_1 = arith.constant 0 : i32
    return %arg0, %c0_i32, %c0_i32_0 : i32, i32, i32
  }
  func.func @transform_2(%arg0: i32, %arg1: memref<2xf32, #tpu.memory_space<smem>>) -> (i32, i32, i32) {
    %c0_i32 = arith.constant 0 : i32
    %c0_i32_0 = arith.constant 0 : i32
    %c0_i32_1 = arith.constant 0 : i32
    return %arg0, %c0_i32, %c0_i32_0 : i32, i32, i32
  }
}

</mosaic_0001>

<bundles_post_ra>
// kernel: network_forward.35
= control target key start
LH: loop header
LB: loop body
LE: loop exit
PB: predicated region body
PF: predicated region fallthrough
CT: control target
= control target key end

     0   :  { %s1257_s15 = smov 0   ;;  %s1397_s0 = inlined_call_operand.vmem [shape: f32[1,286], index: 0, kind: input, shape index: {}]   ;;  %s1398_s1 = inlined_call_operand.vmem [shape: f32[2,3,324], index: 1, kind: input, shape index: {}]   ;;  %s1399_s2 = inlined_call_operand.vmem [shape: f32[9,3,3], index: 2, kind: input, shape index: {}]   ;;  %s1400_s3 = inlined_call_operand.vmem [shape: f32[2,3,286], index: 3, kind: output, shape index: {0}]   ;;  %s1401_s4 = inlined_call_operand.vmem [shape: f32[2,3,2], index: 4, kind: output, shape index: {1}]  }
   0x1 LB: > { %s1127_s16 = sadd.s32 4294967295, %s1222_s15   ;;  %p1131_p0 = scmp.ge.s32.totalorder %s1222_s15, 1  ;;  %s1222_s15 = sphi %s1257_s15, %s15_s15  }
   0x2   : > { %p165_p1 = scmp.lt.s32.totalorder %s1222_s15, 3 }
   0x4   : > { %p166_p2 = pnand %p1131_p0, %p165_p1 }
   0x5   : > { %p195_p3 = scmp.lt.s32.totalorder (!%p166_p2), %s1127_s16, 1  ;;  %s1224_s21 = smov (!%p166_p2), 127  }
   0x6   : > { %169 = sbr.rel (%p166_p2) target bundleno = 466 (0x1d2), region = 32  ;;  %s1225_s22 = smov (!%p166_p2), 126  }
   0x7   : > { %s1226_s23 = smov (!%p166_p2), 110   ;;  %s1227_s24 = smov (!%p166_p2), 109  }
   0x8   : > { %s1228_s25 = smov (!%p166_p2), 108   ;;  %s1229_s26 = smov (!%p166_p2), 92  }
   0x9   : > { %s1230_s27 = smov (!%p166_p2), 91   ;;  %s1231_s28 = smov (!%p166_p2), 90  }
   0xb   : > { %s1403_s16 = smov (!%p195_p3, %s1127_s16), 1  ;;  %vm236_vm0 = vcmask 1042432   ;;  %vm232_vm1 = vcmask 23552   ;;  %v212_v29 = vld [vmem:[%s1399_s2] sm:$0x7]  ;;  %vm229_vm2 = vcmask 1039360  }
   0xc   : > { %s1199_s17 = smul.u32 12, %s1403_s16  ;;  %v1135_v31 = vld [vmem:[%s1399_s2 + $0x4] sm:$0x7]  ;;  %vm392_vm3 = vcmask 1031168   ;;  %v1148_v36 = vld [vmem:[%s1399_s2 + $0x8] sm:$0x7] }
   0xd   : > { %vm481_vm4 = vcmask 900096   ;;  %v1155_v46 = vld [vmem:[%s1399_s2 + $0xc] sm:$0x7]  ;;  %vm570_vm5 = vcmask 891904   ;;  %v1162_v52 = vld [vmem:[%s1399_s2 + $0x10] sm:$0x7] }
   0xe   : > { %s199_s20 = scalar_lea.vmem %s1398_s1, %s1199_s17  ;;  %vm659_vm6 = vcmask 883712   ;;  %v1169_v57 = vld [vmem:[%s1399_s2 + $0x14] sm:$0x7]  ;;  %vm748_vm7 = vcmask 752640   ;;  %vm837_vm8 = vcmask 744448   ;;  %vm926_vm9 = vcmask 736256  }
   0xf   : > { %v211_v0 = vld [vmem:[%s199_s20 + $0x8] sm:$0x7]  ;;  %v1273_v1 = vld [vmem:[%s199_s20] sm:$0x77]  ;;  %vm1004_vm10 = vcmask 1043456   ;;  %vm1008_vm11 = vcmask 239616  }
  0x10   : > { %219 = vst [vmem:[#allocation1 + $0x10] ss:$2 sm:$0xff] %v211_v0  ;;  %vm1027_vm12 = vcmask 2048   ;;  %vm1039_vm13 = vcmask 10248  }
  0x11   : > { %217 = vst [vmem:[#allocation1] ss:$2 sm:$0xff] %v1273_v1 }
  0x17   : > { %v222_v2 = vld.sshfl [vmem:[#allocation1 + $0x10] sm:$0xff pattern:$0x75316420] }
  0x18   : > { %227 = vrot.lane.b32.xlu0 %v222_v2, %s1224_s21  ;;  %305 = vst [vmem:[#allocation1 + $0x10] ss:$2 sm:$0xff] %v211_v0  ;;  %v221_v3 = vld.sshfl [vmem:[#allocation1 + $0x8] sm:$0xff pattern:$0x75316420] }
  0x19   : > { %225 = vrot.lane.b32.xlu1 %v221_v3, %s1224_s21  ;;  %v220_v4 = vld.sshfl [vmem:[#allocation1] sm:$0xff pattern:$0x75316420] }
  0x1a   : > { %303 = vst [vmem:[#allocation1] ss:$2 sm:$0xff] %v1273_v1 }
  0x1f   : > { %v1277_v5 = vld.sshfl [vmem:[#allocation1 + $0x10] sm:$0xff pattern:$0x75316420] }
  0x20   : > { %223 = vrot.lane.b32.xlu0 %v220_v4, %s1224_s21  ;;  %382 = vst [vmem:[#allocation1 + $0x10] ss:$2 sm:$0xff] %v211_v0 }
  0x21   : > { %v1279_v6 = vld.sshfl [vmem:[#allocation1] sm:$0xff pattern:$0x75316420]  ;;  %v1281_v7 = vld.sshfl [vmem:[#allocation1 + $0x8] sm:$0xff pattern:$0x75316420] }
  0x22   : > { %380 = vst [vmem:[#allocation1] ss:$2 sm:$0xff] %v1273_v1  ;;  %1142 = vmatpush.msk.msra.mxu3 %vm236_vm0, %v1279_v6 }
  0x23   : > { %1143 = vmatmul.msk.f32.vlgmr.msra.gmra.mxu3 %vm232_vm1, %v212_v29 }
  0x27   : > { %v385_v8 = vld.sshfl [vmem:[#allocation1 + $0x10] sm:$0xff pattern:$0x75316420] }
  0x28   : > { %471 = vst [vmem:[#allocation1 + $0x10] ss:$2 sm:$0xff] %v211_v0 }
  0x29   : > { %v383_v9 = vld.sshfl [vmem:[#allocation1] sm:$0xff pattern:$0x75316420]  ;;  %v384_v10 = vld.sshfl [vmem:[#allocation1 + $0x8] sm:$0xff pattern:$0x75316420] }
  0x2a   : > { %386 = vrot.lane.b32.xlu1 %v383_v9, %s1225_s22  ;;  %469 = vst [vmem:[#allocation1] ss:$2 sm:$0xff] %v1273_v1  ;;  %388 = vrot.lane.b32.xlu2 %v384_v10, %s1225_s22 }
  0x2f   : > { %v474_v11 = vld.sshfl [vmem:[#allocation1 + $0x10] sm:$0xff pattern:$0x75316420] }
  0x30   : > { %560 = vst [vmem:[#allocation1 + $0x10] ss:$2 sm:$0xff] %v211_v0 }
  0x31   : > { %v473_v12 = vld.sshfl [vmem:[#allocation1 + $0x8] sm:$0xff pattern:$0x75316420]  ;;  %v472_v13 = vld.sshfl [vmem:[#allocation1] sm:$0xff pattern:$0x75316420] }
  0x32   : > { %479 = vrot.lane.b32.xlu1 %v474_v11, %s1226_s23  ;;  %477 = vrot.lane.b32.xlu0 %v473_v12, %s1226_s23  ;;  %558 = vst [vmem:[#allocation1] ss:$2 sm:$0xff] %v1273_v1  ;;  %v1190_v11 = vld [vmem:[%s1399_s2 + $0x20] sm:$0x7] }
  0x33   : > { %390 = vrot.lane.b32.xlu2 %v385_v8, %s1225_s22 }
  0x37   : > { %v563_v14 = vld.sshfl [vmem:[#allocation1 + $0x10] sm:$0xff pattern:$0x75316420] }
  0x38   : > { %649 = vst [vmem:[#allocation1 + $0x10] ss:$2 sm:$0xff] %v211_v0 }
  0x39   : > { %v562_v15 = vld.sshfl [vmem:[#allocation1 + $0x8] sm:$0xff pattern:$0x75316420]  ;;  %v561_v16 = vld.sshfl [vmem:[#allocation1] sm:$0xff pattern:$0x75316420] }
  0x3a   : > { %568 = vrot.lane.b32.xlu0 %v563_v14, %s1227_s24  ;;  %564 = vrot.lane.b32.xlu1 %v561_v16, %s1227_s24  ;;  %647 = vst [vmem:[#allocation1] ss:$2 sm:$0xff] %v1273_v1 }
  0x3b   : > { %475 = vrot.lane.b32.xlu2 %v472_v13, %s1226_s23 }
  0x3f   : > { %v652_v17 = vld.sshfl [vmem:[#allocation1 + $0x10] sm:$0xff pattern:$0x75316420] }
  0x40   : > { %738 = vst [vmem:[#allocation1 + $0x10] ss:$2 sm:$0xff] %v211_v0 }
  0x41   : > { %v651_v18 = vld.sshfl [vmem:[#allocation1 + $0x8] sm:$0xff pattern:$0x75316420]  ;;  %v650_v19 = vld.sshfl [vmem:[#allocation1] sm:$0xff pattern:$0x75316420] }
  0x42   : > { %655 = vrot.lane.b32.xlu1 %v651_v18, %s1228_s25  ;;  %653 = vrot.lane.b32.xlu0 %v650_v19, %s1228_s25  ;;  %736 = vst [vmem:[#allocation1] ss:$2 sm:$0xff] %v1273_v1 }
  0x43   : > { %566 = vrot.lane.b32.xlu2 %v562_v15, %s1227_s24 }
  0x47   : > { %v741_v20 = vld.sshfl [vmem:[#allocation1 + $0x10] sm:$0xff pattern:$0x75316420] }
  0x48   : > { %827 = vst [vmem:[#allocation1 + $0x10] ss:$2 sm:$0xff] %v211_v0 }
  0x49   : > { %v740_v21 = vld.sshfl [vmem:[#allocation1 + $0x8] sm:$0xff pattern:$0x75316420]  ;;  %v739_v22 = vld.sshfl [vmem:[#allocation1] sm:$0xff pattern:$0x75316420] }
  0x4a   : > { %657 = vrot.lane.b32.xlu1 %v652_v17, %s1228_s25  ;;  %744 = vrot.lane.b32.xlu0 %v740_v21, %s1229_s26  ;;  %825 = vst [vmem:[#allocation1] ss:$2 sm:$0xff] %v1273_v1 }
  0x4b   : > { %742 = vrot.lane.b32.xlu2 %v739_v22, %s1229_s26 }
  0x4f   : > { %v830_v23 = vld.sshfl [vmem:[#allocation1 + $0x10] sm:$0xff pattern:$0x75316420] }
  0x50   : > { %916 = vst [vmem:[#allocation1 + $0x10] ss:$2 sm:$0xff] %v211_v0 }
  0x51   : > { %v829_v24 = vld.sshfl [vmem:[#allocation1 + $0x8] sm:$0xff pattern:$0x75316420]  ;;  %v828_v25 = vld.sshfl [vmem:[#allocation1] sm:$0xff pattern:$0x75316420] }
  0x52   : > { %835 = vrot.lane.b32.xlu1 %v830_v23, %s1230_s27  ;;  %833 = vrot.lane.b32.xlu0 %v829_v24, %s1230_s27  ;;  %914 = vst [vmem:[#allocation1] ss:$2 sm:$0xff] %v1273_v1  ;;  %v1176_v1 = vld [vmem:[%s1399_s2 + $0x18] sm:$0x7] }
  0x53   : > { %746 = vrot.lane.b32.xlu2 %v741_v20, %s1229_s26 }
  0x57   : > { %v919_v26 = vld.sshfl [vmem:[#allocation1 + $0x10] sm:$0xff pattern:$0x75316420] }
  0x59   : > { %v917_v27 = vld.sshfl [vmem:[#allocation1] sm:$0xff pattern:$0x75316420]  ;;  %v918_v28 = vld.sshfl [vmem:[#allocation1 + $0x8] sm:$0xff pattern:$0x75316420] }
  0x5a   : > { %924 = vrot.lane.b32.xlu0 %v919_v26, %s1231_s28  ;;  %920 = vrot.lane.b32.xlu1 %v917_v27, %s1231_s28 }
  0x5b   : > { %831 = vrot.lane.b32.xlu2 %v828_v25, %s1230_s27 }
  0x63   : > { %922 = vrot.lane.b32.xlu2 %v918_v28, %s1231_s28  ;;  %s204_s28 = scalar_lea.vmem %s1400_s3, %s1199_s17  ;;  %s1134_s17 = sshll.u32 %s1403_s16, 2 }
  0x64   : > { %s208_s5 = scalar_lea.vmem %s1401_s4, %s1134_s17 }
  0x84   : > { %v389_v30 = vpop.permute.xlu2 %388 }
  0x8a   : > { %v228_v32 = vpop.permute.xlu0 %227 }
  0x8b   : > { %v226_v33 = vpop.permute.xlu1 %225  ;;  %1140 = vmatpush.msk.msra.mxu2 %vm236_vm0, %v228_v32 }
  0x8c   : > { %v231_v34 = vsel %vm229_vm2, %v226_v33, %v228_v32  ;;  %1141 = vmatmul.msk.f32.vlgmr.msra.gmra.mxu2 %vm232_vm1, %v1135_v31 }
  0x8d   : > { %1138 = vmatpush.msk.msra.mxu1 %vm236_vm0, %v231_v34  ;;  %v391_v35 = vpop.permute.xlu2 %390 }
  0x8e   : > { %1139 = vmatmul.msk.f32.vlgmr.msra.gmra.mxu1 %vm232_vm1, %v1135_v31  ;;  %v394_v37 = vsel %vm392_vm3, %v389_v30, %v391_v35 }
  0x8f   : > { %1151 = vmatpush.msk.msrb.mxu3 %vm236_vm0, %v394_v37  ;;  %1146 = vmatpush.msk.msrb.mxu1 %vm236_vm0, %v1277_v5  ;;  %v1183_v5 = vld [vmem:[%s1399_s2 + $0x1c] sm:$0x7] }
  0x90   : > { %1152 = vmatmul.msk.f32.vlgmr.msrb.gmra.mxu3 %vm232_vm1, %v1148_v36 }
  0x92   : > { %v224_v38 = vpop.permute.xlu0 %223 }
  0x93   : > { %v230_v39 = vsel %vm229_vm2, %v224_v38, %v226_v33 }
  0x94   : > { %1136 = vmatpush.msk.msra.mxu0 %vm236_vm0, %v230_v39 }
  0x95   : > { %1137 = vmatmul.msk.f32.vlgmr.msra.gmra.mxu0 %vm232_vm1, %v1135_v31  ;;  %v476_v40 = vpop.permute.xlu2 %475 }
  0x96   : > { %1144 = vmatpush.msk.msrb.mxu0 %vm236_vm0, %v1281_v7  ;;  %1147 = vmatmul.msk.f32.vlgmr.msrb.gmra.mxu1 %vm232_vm1, %v212_v29 }
  0x98   : > { %1153 = vmatpush.msk.msra.mxu0 %vm236_vm0, %v391_v35 }
  0x9c   : > { %v387_v41 = vpop.permute.xlu1 %386 }
  0x9d   : > { %v393_v42 = vsel %vm392_vm3, %v387_v41, %v389_v30  ;;  %1145 = vmatmul.msk.f32.vlgmr.msrb.gmra.mxu0 %vm232_vm1, %v212_v29  ;;  %v567_v43 = vpop.permute.xlu2 %566 }
  0x9e   : > { %1149 = vmatpush.msk.msrb.mxu2 %vm236_vm0, %v393_v42 }
  0x9f   : > { %1150 = vmatmul.msk.f32.vlgmr.msrb.gmra.mxu2 %vm232_vm1, %v1148_v36 }
  0xa4   : > { %v480_v44 = vpop.permute.xlu1 %479  ;;  %v478_v45 = vpop.permute.xlu0 %477 }
  0xa5   : > { %v483_v47 = vsel %vm481_vm4, %v478_v45, %v480_v44  ;;  %v482_v48 = vsel %vm481_vm4, %v476_v40, %v478_v45  ;;  %1160 = vmatpush.msk.msra.mxu3 %vm236_vm0, %v480_v44  ;;  %1154 = vmatmul.msk.f32.vlgmr.msra.gmra.mxu0 %vm232_vm1, %v1148_v36  ;;  %v743_v49 = vpop.permute.xlu2 %742 }
  0xa6   : > { %1156 = vmatpush.msk.msra.mxu1 %vm236_vm0, %v482_v48  ;;  %1158 = vmatpush.msk.msra.mxu2 %vm236_vm0, %v483_v47  ;;  %v335_v17 = vpop.f32.mrf.mxu3 }
  0xa7   : > { %1159 = vmatmul.msk.f32.vlgmr.msra.gmra.mxu2 %vm232_vm1, %v1155_v46  ;;  %1157 = vmatmul.msk.f32.vlgmr.msra.gmra.mxu1 %vm232_vm1, %v1155_v46 }
  0xa8   : > { %1161 = vmatmul.msk.f32.vlgmr.msra.gmra.mxu3 %vm232_vm1, %v1155_v46 }
  0xac   : > { %v569_v50 = vpop.permute.xlu0 %568  ;;  %v565_v51 = vpop.permute.xlu1 %564 }
  0xad   : > { %v572_v53 = vsel %vm570_vm5, %v567_v43, %v569_v50  ;;  %v571_v54 = vsel %vm570_vm5, %v565_v51, %v567_v43  ;;  %1167 = vmatpush.msk.msrb.mxu2 %vm236_vm0, %v569_v50  ;;  %v747_v59 = vpop.permute.xlu2 %746 }
  0xae   : > { %1163 = vmatpush.msk.msrb.mxu0 %vm236_vm0, %v571_v54  ;;  %1165 = vmatpush.msk.msrb.mxu1 %vm236_vm0, %v572_v53 }
  0xaf   : > { %1168 = vmatmul.msk.f32.vlgmr.msrb.gmra.mxu2 %vm232_vm1, %v1162_v52  ;;  %1164 = vmatmul.msk.f32.vlgmr.msrb.gmra.mxu0 %vm232_vm1, %v1162_v52 }
  0xb0   : > { %1166 = vmatmul.msk.f32.vlgmr.msrb.gmra.mxu1 %vm232_vm1, %v1162_v52 }
  0xb4   : > { %v656_v55 = vpop.permute.xlu1 %655  ;;  %v654_v56 = vpop.permute.xlu0 %653 }
  0xb5   : > { %v660_v58 = vsel %vm659_vm6, %v654_v56, %v656_v55  ;;  %v832_v2 = vpop.permute.xlu2 %831 }
  0xb6   : > { %1170 = vmatpush.msk.msrb.mxu3 %vm236_vm0, %v660_v58 }
  0xb7   : > { %1171 = vmatmul.msk.f32.vlgmr.msrb.gmra.mxu3 %vm232_vm1, %v1169_v57 }
  0xbc   : > { %v658_v60 = vpop.permute.xlu1 %657  ;;  %v745_v61 = vpop.permute.xlu0 %744 }
  0xbd   : > { %v661_v62 = vsel %vm659_vm6, %v656_v55, %v658_v60  ;;  %v749_v63 = vsel %vm748_vm7, %v743_v49, %v745_v61  ;;  %v750_v0 = vsel %vm748_vm7, %v745_v61, %v747_v59  ;;  %1174 = vmatpush.msk.msra.mxu1 %vm236_vm0, %v658_v60  ;;  %v923_v8 = vpop.permute.xlu2 %922  ;;  %v209_v49 = vld [vmem:[%s1397_s0] sm:$0x7] }
  0xbe   : > { %1172 = vmatpush.msk.msra.mxu0 %vm236_vm0, %v661_v62  ;;  %1175 = vmatmul.msk.f32.vlgmr.msra.gmra.mxu1 %vm232_vm1, %v1169_v57  ;;  %v1011_v53 = vperm.slane %v209_v49, 0  ;;  %v1012_v58 = vperm.slane %v209_v49, 1 }
  0xbf   : > { %1177 = vmatpush.msk.msra.mxu2 %vm236_vm0, %v749_v63  ;;  %1179 = vmatpush.msk.msra.mxu3 %vm236_vm0, %v750_v0 }
  0xc0   : > { %1173 = vmatmul.msk.f32.vlgmr.msra.gmra.mxu0 %vm232_vm1, %v1169_v57  ;;  %1178 = vmatmul.msk.f32.vlgmr.msra.gmra.mxu2 %vm232_vm1, %v1176_v1 }
  0xc1   : > { %1180 = vmatmul.msk.f32.vlgmr.msra.gmra.mxu3 %vm232_vm1, %v1176_v1  ;;  %1181 = vmatpush.msk.msrb.mxu0 %vm236_vm0, %v747_v59 }
  0xc4   : > { %v836_v3 = vpop.permute.xlu1 %835  ;;  %v834_v4 = vpop.permute.xlu0 %833 }
  0xc5   : > { %v839_v6 = vsel %vm837_vm8, %v834_v4, %v836_v3  ;;  %v838_v7 = vsel %vm837_vm8, %v832_v2, %v834_v4  ;;  %1188 = vmatpush.msk.msrb.mxu3 %vm236_vm0, %v836_v3  ;;  %v1013_v4 = vperm.slane %v209_v49, 2 }
  0xc6   : > { %1184 = vmatpush.msk.msrb.mxu1 %vm236_vm0, %v838_v7  ;;  %1186 = vmatpush.msk.msrb.mxu2 %vm236_vm0, %v839_v6 }
  0xc7   : > { %1185 = vmatmul.msk.f32.vlgmr.msrb.gmra.mxu1 %vm232_vm1, %v1183_v5 }
  0xc8   : > { %1182 = vmatmul.msk.f32.vlgmr.msrb.gmra.mxu0 %vm232_vm1, %v1176_v1  ;;  %1187 = vmatmul.msk.f32.vlgmr.msrb.gmra.mxu2 %vm232_vm1, %v1183_v5 }
  0xc9   : > { %1189 = vmatmul.msk.f32.vlgmr.msrb.gmra.mxu3 %vm232_vm1, %v1183_v5 }
  0xcc   : > { %v925_v9 = vpop.permute.xlu0 %924  ;;  %v921_v10 = vpop.permute.xlu1 %920 }
  0xcd   : > { %v928_v12 = vsel %vm926_vm9, %v923_v8, %v925_v9  ;;  %v927_v13 = vsel %vm926_vm9, %v921_v10, %v923_v8  ;;  %1195 = vmatpush.msk.msra.mxu2 %vm236_vm0, %v925_v9 }
  0xce   : > { %1191 = vmatpush.msk.msra.mxu0 %vm236_vm0, %v927_v13  ;;  %1193 = vmatpush.msk.msra.mxu1 %vm236_vm0, %v928_v12 }
  0xcf   : > { %1194 = vmatmul.msk.f32.vlgmr.msra.gmra.mxu1 %vm232_vm1, %v1190_v11 }
  0xd0   : > { %1192 = vmatmul.msk.f32.vlgmr.msra.gmra.mxu0 %vm232_vm1, %v1190_v11  ;;  %1196 = vmatmul.msk.f32.vlgmr.msra.gmra.mxu2 %vm232_vm1, %v1190_v11 }
 0x10b   : > { %v280_v14 = vpop.f32.mrf.mxu1 }
 0x10f   : > { %v300_v16 = vpop.f32.mrf.mxu2 }
 0x112   : > { %v260_v15 = vpop.f32.mrf.mxu0 }
 0x113   : > { %v375_v18 = vpop.f32.mrf.mxu1  ;;  %v441_v21 = vpop.f32.mrf.mxu3  ;;  %v336_v28 = vadd.f32 %v335_v17, %v260_v15 }
 0x114   : > { %v376_v39 = vadd.f32 %v375_v18, %v300_v16 }
 0x11a   : > { %v355_v19 = vpop.f32.mrf.mxu0 }
 0x11b   : > { %v356_v32 = vadd.f32 %v355_v19, %v280_v14 }
 0x11d   : > { %v465_v35 = vadd.f32 %v441_v21, %v356_v32 }
 0x122   : > { %v421_v20 = vpop.f32.mrf.mxu2  ;;  %v461_v23 = vpop.f32.mrf.mxu0 }
 0x123   : > { %v464_v34 = vadd.f32 %v421_v20, %v336_v28  ;;  %v466_v46 = vadd.f32 %v461_v23, %v376_v39 }
 0x124   : > { %v510_v22 = vpop.f32.mrf.mxu1 }
 0x125   : > { %v553_v36 = vadd.f32 %v510_v22, %v464_v34 }
 0x12a   : > { %v530_v24 = vpop.f32.mrf.mxu2 }
 0x12b   : > { %v550_v25 = vpop.f32.mrf.mxu3  ;;  %v554_v37 = vadd.f32 %v530_v24, %v465_v35 }
 0x12c   : > { %v599_v27 = vpop.f32.mrf.mxu0  ;;  %v555_v50 = vadd.f32 %v550_v25, %v466_v46 }
 0x12d   : > { %v619_v26 = vpop.f32.mrf.mxu1  ;;  %v642_v40 = vadd.f32 %v599_v27, %v553_v36 }
 0x12e   : > { %v643_v44 = vadd.f32 %v619_v26, %v554_v37 }
 0x132   : > { %v639_v29 = vpop.f32.mrf.mxu2 }
 0x133   : > { %v644_v54 = vadd.f32 %v639_v29, %v555_v50 }
 0x13a   : > { %v688_v30 = vpop.f32.mrf.mxu3 }
 0x13b   : > { %v728_v31 = vpop.f32.mrf.mxu1  ;;  %v731_v45 = vadd.f32 %v688_v30, %v642_v40 }
 0x13c   : > { %v733_v60 = vadd.f32 %v728_v31, %v644_v54 }
 0x13d   : > { %v708_v33 = vpop.f32.mrf.mxu0 }
 0x13e   : > { %v732_v47 = vadd.f32 %v708_v33, %v643_v44 }
 0x143   : > { %v777_v38 = vpop.f32.mrf.mxu2 }
 0x144   : > { %v866_v41 = vpop.f32.mrf.mxu1  ;;  %v797_v42 = vpop.f32.mrf.mxu3  ;;  %v820_v48 = vadd.f32 %v777_v38, %v731_v45 }
 0x145   : > { %v817_v43 = vpop.f32.mrf.mxu0  ;;  %v821_v51 = vadd.f32 %v797_v42, %v732_v47 }
 0x146   : > { %v909_v55 = vadd.f32 %v866_v41, %v820_v48  ;;  %v822_v0 = vadd.f32 %v817_v43, %v733_v60 }
 0x14b   : > { %v886_v52 = vpop.f32.mrf.mxu2 }
 0x14c   : > { %v910_v56 = vadd.f32 %v886_v52, %v821_v51  ;;  %v975_v57 = vpop.f32.mrf.mxu1  ;;  %v906_v63 = vpop.f32.mrf.mxu3 }
 0x14d   : > { %v955_v59 = vpop.f32.mrf.mxu0  ;;  %v911_v5 = vadd.f32 %v906_v63, %v822_v0 }
 0x14e   : > { %v998_v61 = vadd.f32 %v955_v59, %v909_v55  ;;  %v999_v62 = vadd.f32 %v975_v57, %v910_v56 }
 0x150   : > { %v1017_v1 = vmul.f32 %v1011_v53, %v998_v61  ;;  %v1003_v2 = vrot.slane %v999_v62, 4  ;;  %v1018_v3 = vmul.f32 %v1012_v58, %v999_v62 }
 0x152   : > { %v1029_v6 = vmul.f32 %v1017_v1, %v998_v61  ;;  %v1005_v7 = vsel %vm1004_vm10, %v998_v61, %v1003_v2  ;;  %v1030_v8 = vmul.f32 %v1018_v3, %v999_v62  ;;  %v1020_v11 = vsel %vm236_vm0, %v1017_v1, 0.0 }
 0x153   : > { %v995_v9 = vpop.f32.mrf.mxu2  ;;  %1007 = vst [vmem:[%s204_s28] sm:$0x77] %v1005_v7  ;;  %v1021_v12 = vsel %vm236_vm0, %v1018_v3, 0.0 }
 0x154   : > { %v1000_v10 = vadd.f32 %v995_v9, %v911_v5  ;;  %v1032_v14 = vsel %vm236_vm0, %v1029_v6, 0.0  ;;  %v1033_v15 = vsel %vm236_vm0, %v1030_v8, 0.0  ;;  %v1022_v16 = vadd.f32 %v1021_v12, %v1020_v11 }
 0x155   : > { %v1034_v20 = vadd.f32 %v1033_v15, %v1032_v14 }
 0x156   : > { %1009 = vst.msk [vmem:[%s204_s28 + $0x8] sm:$0x7] %vm1008_vm11, %v1000_v10  ;;  %v1019_v13 = vmul.f32 %v1013_v4, %v1000_v10 }
 0x158   : > { %v1023_v17 = vsel %vm1008_vm11, %v1019_v13, 0.0  ;;  %v1031_v18 = vmul.f32 %v1019_v13, %v1000_v10 }
 0x159   : > { %v1024_v19 = vadd.f32 %v1023_v17, %v1022_v16 }
 0x15a   : > { %v1035_v21 = vsel %vm1008_vm11, %v1031_v18, 0.0 }
 0x15b   : > { %1025 = vadd.xlane.f32.xlu0 %v1024_v19  ;;  %v1036_v22 = vadd.f32 %v1035_v21, %v1034_v20 }
 0x15d   : > { %1037 = vadd.xlane.f32.xlu1 %v1036_v22 }
 0x1ce   : > { %v1026_v23 = vpop.xlane.xlu0 %1025 }
 0x1cf   : > { %1028 = vst.msk [vmem:[%s208_s5] sm:$0x7] %vm1027_vm12, %v1026_v23 }
 0x1d0   : > { %v1038_v24 = vpop.xlane.xlu1 %1037 }
 0x1d1   : > { %1040 = vst.msk [vmem:[%s208_s5] sm:$0x7] %vm1039_vm13, %v1038_v24 }
 0x1d2 PF: > { %s15_s15 = sadd.s32 1, %s1222_s15  }
 0x1d3   : > { %p12_p4 = scmp.ge.s32.totalorder %s15_s15, 4  }
 0x1d5   :  { %14 = sbr.rel (!%p12_p4) target bundleno = 1 (0x1), region = 91 }

// kernel: network_forward.34
= control target key start
LH: loop header
LB: loop body
LE: loop exit
PB: predicated region body
PF: predicated region fallthrough
CT: control target
= control target key end

     0   :  { %s1226_s15 = smov 0   ;;  %s1361_s0 = inlined_call_operand.vmem [shape: f32[1,286], index: 0, kind: input, shape index: {}]   ;;  %s1362_s1 = inlined_call_operand.vmem [shape: f32[2,3,324], index: 1, kind: input, shape index: {}]   ;;  %s1363_s2 = inlined_call_operand.vmem [shape: f32[9,3,3], index: 2, kind: input, shape index: {}]   ;;  %s1364_s3 = inlined_call_operand.vmem [shape: f32[3,1], index: 3, kind: input, shape index: {}]   ;;  %s1365_s4 = inlined_call_operand.vmem [shape: f32[2,3,324], index: 4, kind: output, shape index: {}]  }
   0x1 LB: > { %s1092_s16 = sadd.s32 4294967295, %s1189_s15   ;;  %p1096_p0 = scmp.ge.s32.totalorder %s1189_s15, 1  ;;  %s1189_s15 = sphi %s1226_s15, %s14_s15  }
   0x2   : > { %p162_p1 = scmp.lt.s32.totalorder %s1189_s15, 3 }
   0x4   : > { %p163_p2 = pnand %p1096_p0, %p162_p1 }
   0x5   : > { %p188_p3 = scmp.lt.s32.totalorder (!%p163_p2), %s1092_s16, 1  ;;  %s1191_s21 = smov (!%p163_p2), 127  }
   0x6   : > { %166 = sbr.rel (%p163_p2) target bundleno = 468 (0x1d4), region = 36  ;;  %s1192_s22 = smov (!%p163_p2), 126  }
   0x7   : > { %s1193_s23 = smov (!%p163_p2), 110   ;;  %s1194_s24 = smov (!%p163_p2), 109  }
   0x8   : > { %s1195_s25 = smov (!%p163_p2), 108   ;;  %s1196_s26 = smov (!%p163_p2), 92  }
   0x9   : > { %s1197_s27 = smov (!%p163_p2), 91   ;;  %s1198_s28 = smov (!%p163_p2), 90  }
   0xb   : > { %s1367_s16 = smov (!%p188_p3, %s1092_s16), 1  ;;  %vm225_vm0 = vcmask 1042432   ;;  %vm221_vm1 = vcmask 23552   ;;  %v201_v29 = vld [vmem:[%s1363_s2] sm:$0x7]  ;;  %vm218_vm2 = vcmask 1039360  }
   0xc   : > { %s1163_s17 = smul.u32 12, %s1367_s16  ;;  %v1099_v31 = vld [vmem:[%s1363_s2 + $0x4] sm:$0x7]  ;;  %vm381_vm3 = vcmask 1031168   ;;  %v1112_v36 = vld [vmem:[%s1363_s2 + $0x8] sm:$0x7] }
   0xd   : > { %vm470_vm4 = vcmask 900096   ;;  %v1119_v46 = vld [vmem:[%s1363_s2 + $0xc] sm:$0x7]  ;;  %vm559_vm5 = vcmask 891904   ;;  %v1126_v52 = vld [vmem:[%s1363_s2 + $0x10] sm:$0x7] }
   0xe   : > { %s192_s20 = scalar_lea.vmem %s1362_s1, %s1163_s17  ;;  %v990_v55 = vld [vmem:[%s1364_s3] sm:$0x7]  ;;  %v1199_v56 = vmov 0   ;;  %vm648_vm6 = vcmask 883712   ;;  %v1133_v59 = vld [vmem:[%s1363_s2 + $0x14] sm:$0x7]  ;;  %s197_s5 = scalar_lea.vmem %s1365_s4, %s1163_s17 }
   0xf   : > { %v200_v0 = vld [vmem:[%s192_s20 + $0x8] sm:$0x7]  ;;  %v1242_v1 = vld [vmem:[%s192_s20] sm:$0x77]  ;;  %1182 = vset.pattern.permute.xlu0 %v1199_v56  ;;  %vm737_vm7 = vcmask 752640   ;;  %vm826_vm8 = vcmask 744448  }
  0x10   : > { %208 = vst [vmem:[#allocation1 + $0x10] ss:$2 sm:$0xff] %v200_v0  ;;  %vm915_vm9 = vcmask 736256   ;;  %vm1021_vm10 = vcmask 154624   ;;  %vm1031_vm11 = vcmask 1043456   ;;  %vm1027_vm12 = vcmask 400384  }
  0x11   : > { %206 = vst [vmem:[#allocation1] ss:$2 sm:$0xff] %v1242_v1  ;;  %vm1035_vm13 = vcmask 550912  }
  0x17   : > { %v211_v2 = vld.sshfl [vmem:[#allocation1 + $0x10] sm:$0xff pattern:$0x75316420] }
  0x18   : > { %216 = vrot.lane.b32.xlu0 %v211_v2, %s1191_s21  ;;  %294 = vst [vmem:[#allocation1 + $0x10] ss:$2 sm:$0xff] %v200_v0  ;;  %v210_v3 = vld.sshfl [vmem:[#allocation1 + $0x8] sm:$0xff pattern:$0x75316420] }
  0x19   : > { %214 = vrot.lane.b32.xlu1 %v210_v3, %s1191_s21  ;;  %v209_v4 = vld.sshfl [vmem:[#allocation1] sm:$0xff pattern:$0x75316420]  ;;  %v1140_v3 = vld [vmem:[%s1363_s2 + $0x18] sm:$0x7] }
  0x1a   : > { %292 = vst [vmem:[#allocation1] ss:$2 sm:$0xff] %v1242_v1 }
  0x1f   : > { %v1246_v5 = vld.sshfl [vmem:[#allocation1 + $0x10] sm:$0xff pattern:$0x75316420] }
  0x20   : > { %212 = vrot.lane.b32.xlu0 %v209_v4, %s1191_s21  ;;  %371 = vst [vmem:[#allocation1 + $0x10] ss:$2 sm:$0xff] %v200_v0 }
  0x21   : > { %v1248_v6 = vld.sshfl [vmem:[#allocation1] sm:$0xff pattern:$0x75316420]  ;;  %v1250_v7 = vld.sshfl [vmem:[#allocation1 + $0x8] sm:$0xff pattern:$0x75316420] }
  0x22   : > { %369 = vst [vmem:[#allocation1] ss:$2 sm:$0xff] %v1242_v1  ;;  %1106 = vmatpush.msk.msra.mxu3 %vm225_vm0, %v1248_v6 }
  0x23   : > { %1107 = vmatmul.msk.f32.vlgmr.msra.gmra.mxu3 %vm221_vm1, %v201_v29 }
  0x27   : > { %v374_v8 = vld.sshfl [vmem:[#allocation1 + $0x10] sm:$0xff pattern:$0x75316420] }
  0x28   : > { %460 = vst [vmem:[#allocation1 + $0x10] ss:$2 sm:$0xff] %v200_v0 }
  0x29   : > { %v372_v9 = vld.sshfl [vmem:[#allocation1] sm:$0xff pattern:$0x75316420]  ;;  %v373_v10 = vld.sshfl [vmem:[#allocation1 + $0x8] sm:$0xff pattern:$0x75316420] }
  0x2a   : > { %375 = vrot.lane.b32.xlu1 %v372_v9, %s1192_s22  ;;  %377 = vrot.lane.b32.xlu2 %v373_v10, %s1192_s22  ;;  %458 = vst [vmem:[#allocation1] ss:$2 sm:$0xff] %v1242_v1 }
  0x2f   : > { %v463_v11 = vld.sshfl [vmem:[#allocation1 + $0x10] sm:$0xff pattern:$0x75316420] }
  0x30   : > { %549 = vst [vmem:[#allocation1 + $0x10] ss:$2 sm:$0xff] %v200_v0 }
  0x31   : > { %v462_v12 = vld.sshfl [vmem:[#allocation1 + $0x8] sm:$0xff pattern:$0x75316420]  ;;  %v461_v13 = vld.sshfl [vmem:[#allocation1] sm:$0xff pattern:$0x75316420] }
  0x32   : > { %468 = vrot.lane.b32.xlu1 %v463_v11, %s1193_s23  ;;  %466 = vrot.lane.b32.xlu0 %v462_v12, %s1193_s23  ;;  %547 = vst [vmem:[#allocation1] ss:$2 sm:$0xff] %v1242_v1 }
  0x33   : > { %379 = vrot.lane.b32.xlu2 %v374_v8, %s1192_s22 }
  0x37   : > { %v552_v14 = vld.sshfl [vmem:[#allocation1 + $0x10] sm:$0xff pattern:$0x75316420] }
  0x38   : > { %638 = vst [vmem:[#allocation1 + $0x10] ss:$2 sm:$0xff] %v200_v0 }
  0x39   : > { %v551_v15 = vld.sshfl [vmem:[#allocation1 + $0x8] sm:$0xff pattern:$0x75316420]  ;;  %v550_v16 = vld.sshfl [vmem:[#allocation1] sm:$0xff pattern:$0x75316420] }
  0x3a   : > { %557 = vrot.lane.b32.xlu0 %v552_v14, %s1194_s24  ;;  %553 = vrot.lane.b32.xlu1 %v550_v16, %s1194_s24  ;;  %636 = vst [vmem:[#allocation1] ss:$2 sm:$0xff] %v1242_v1 }
  0x3b   : > { %464 = vrot.lane.b32.xlu2 %v461_v13, %s1193_s23  ;;  %v1154_v13 = vld [vmem:[%s1363_s2 + $0x20] sm:$0x7] }
  0x3f   : > { %v641_v17 = vld.sshfl [vmem:[#allocation1 + $0x10] sm:$0xff pattern:$0x75316420] }
  0x40   : > { %727 = vst [vmem:[#allocation1 + $0x10] ss:$2 sm:$0xff] %v200_v0 }
  0x41   : > { %v640_v18 = vld.sshfl [vmem:[#allocation1 + $0x8] sm:$0xff pattern:$0x75316420]  ;;  %v639_v19 = vld.sshfl [vmem:[#allocation1] sm:$0xff pattern:$0x75316420] }
  0x42   : > { %644 = vrot.lane.b32.xlu1 %v640_v18, %s1195_s25  ;;  %642 = vrot.lane.b32.xlu0 %v639_v19, %s1195_s25  ;;  %725 = vst [vmem:[#allocation1] ss:$2 sm:$0xff] %v1242_v1 }
  0x43   : > { %555 = vrot.lane.b32.xlu2 %v551_v15, %s1194_s24 }
  0x47   : > { %v730_v20 = vld.sshfl [vmem:[#allocation1 + $0x10] sm:$0xff pattern:$0x75316420] }
  0x48   : > { %816 = vst [vmem:[#allocation1 + $0x10] ss:$2 sm:$0xff] %v200_v0 }
  0x49   : > { %v729_v21 = vld.sshfl [vmem:[#allocation1 + $0x8] sm:$0xff pattern:$0x75316420]  ;;  %v728_v22 = vld.sshfl [vmem:[#allocation1] sm:$0xff pattern:$0x75316420] }
  0x4a   : > { %646 = vrot.lane.b32.xlu1 %v641_v17, %s1195_s25  ;;  %733 = vrot.lane.b32.xlu0 %v729_v21, %s1196_s26  ;;  %814 = vst [vmem:[#allocation1] ss:$2 sm:$0xff] %v1242_v1 }
  0x4b   : > { %731 = vrot.lane.b32.xlu2 %v728_v22, %s1196_s26 }
  0x4f   : > { %v819_v23 = vld.sshfl [vmem:[#allocation1 + $0x10] sm:$0xff pattern:$0x75316420] }
  0x50   : > { %905 = vst [vmem:[#allocation1 + $0x10] ss:$2 sm:$0xff] %v200_v0 }
  0x51   : > { %v818_v24 = vld.sshfl [vmem:[#allocation1 + $0x8] sm:$0xff pattern:$0x75316420]  ;;  %v817_v25 = vld.sshfl [vmem:[#allocation1] sm:$0xff pattern:$0x75316420] }
  0x52   : > { %824 = vrot.lane.b32.xlu1 %v819_v23, %s1197_s27  ;;  %822 = vrot.lane.b32.xlu0 %v818_v24, %s1197_s27  ;;  %903 = vst [vmem:[#allocation1] ss:$2 sm:$0xff] %v1242_v1 }
  0x53   : > { %735 = vrot.lane.b32.xlu2 %v730_v20, %s1196_s26 }
  0x57   : > { %v908_v26 = vld.sshfl [vmem:[#allocation1 + $0x10] sm:$0xff pattern:$0x75316420] }
  0x59   : > { %v906_v27 = vld.sshfl [vmem:[#allocation1] sm:$0xff pattern:$0x75316420]  ;;  %v907_v28 = vld.sshfl [vmem:[#allocation1 + $0x8] sm:$0xff pattern:$0x75316420] }
  0x5a   : > { %913 = vrot.lane.b32.xlu0 %v908_v26, %s1198_s28  ;;  %909 = vrot.lane.b32.xlu1 %v906_v27, %s1198_s28 }
  0x5b   : > { %820 = vrot.lane.b32.xlu2 %v817_v25, %s1197_s27 }
  0x62   : > { %993 = vperm.xlu0 %1182, %v990_v55  }
  0x63   : > { %911 = vrot.lane.b32.xlu2 %v907_v28, %s1198_s28  ;;  %s1200_s28 = smov 19  }
  0x84   : > { %v378_v30 = vpop.permute.xlu2 %377 }
  0x8a   : > { %v217_v32 = vpop.permute.xlu0 %216 }
  0x8b   : > { %v215_v33 = vpop.permute.xlu1 %214  ;;  %1104 = vmatpush.msk.msra.mxu2 %vm225_vm0, %v217_v32 }
  0x8c   : > { %v220_v34 = vsel %vm218_vm2, %v215_v33, %v217_v32  ;;  %1105 = vmatmul.msk.f32.vlgmr.msra.gmra.mxu2 %vm221_vm1, %v1099_v31 }
  0x8d   : > { %v380_v35 = vpop.permute.xlu2 %379  ;;  %1102 = vmatpush.msk.msra.mxu1 %vm225_vm0, %v220_v34 }
  0x8e   : > { %v383_v37 = vsel %vm381_vm3, %v378_v30, %v380_v35  ;;  %1103 = vmatmul.msk.f32.vlgmr.msra.gmra.mxu1 %vm221_vm1, %v1099_v31 }
  0x8f   : > { %1115 = vmatpush.msk.msrb.mxu3 %vm225_vm0, %v383_v37  ;;  %1110 = vmatpush.msk.msrb.mxu1 %vm225_vm0, %v1246_v5 }
  0x90   : > { %1116 = vmatmul.msk.f32.vlgmr.msrb.gmra.mxu3 %vm221_vm1, %v1112_v36 }
  0x92   : > { %v213_v38 = vpop.permute.xlu0 %212 }
  0x93   : > { %v219_v39 = vsel %vm218_vm2, %v213_v38, %v215_v33 }
  0x94   : > { %1100 = vmatpush.msk.msra.mxu0 %vm225_vm0, %v219_v39 }
  0x95   : > { %1101 = vmatmul.msk.f32.vlgmr.msra.gmra.mxu0 %vm221_vm1, %v1099_v31  ;;  %v465_v40 = vpop.permute.xlu2 %464 }
  0x96   : > { %1108 = vmatpush.msk.msrb.mxu0 %vm225_vm0, %v1250_v7  ;;  %1111 = vmatmul.msk.f32.vlgmr.msrb.gmra.mxu1 %vm221_vm1, %v201_v29  ;;  %v1147_v7 = vld [vmem:[%s1363_s2 + $0x1c] sm:$0x7] }
  0x98   : > { %1117 = vmatpush.msk.msra.mxu0 %vm225_vm0, %v380_v35 }
  0x9c   : > { %v376_v41 = vpop.permute.xlu1 %375 }
  0x9d   : > { %v382_v42 = vsel %vm381_vm3, %v376_v41, %v378_v30  ;;  %1109 = vmatmul.msk.f32.vlgmr.msrb.gmra.mxu0 %vm221_vm1, %v201_v29  ;;  %v556_v43 = vpop.permute.xlu2 %555 }
  0x9e   : > { %1113 = vmatpush.msk.msrb.mxu2 %vm225_vm0, %v382_v42 }
  0x9f   : > { %1114 = vmatmul.msk.f32.vlgmr.msrb.gmra.mxu2 %vm221_vm1, %v1112_v36 }
  0xa4   : > { %v469_v44 = vpop.permute.xlu1 %468  ;;  %v467_v45 = vpop.permute.xlu0 %466 }
  0xa5   : > { %v472_v47 = vsel %vm470_vm4, %v467_v45, %v469_v44  ;;  %v471_v48 = vsel %vm470_vm4, %v465_v40, %v467_v45  ;;  %1124 = vmatpush.msk.msra.mxu3 %vm225_vm0, %v469_v44  ;;  %1118 = vmatmul.msk.f32.vlgmr.msra.gmra.mxu0 %vm221_vm1, %v1112_v36  ;;  %v732_v49 = vpop.permute.xlu2 %731 }
  0xa6   : > { %1120 = vmatpush.msk.msra.mxu1 %vm225_vm0, %v471_v48  ;;  %1122 = vmatpush.msk.msra.mxu2 %vm225_vm0, %v472_v47  ;;  %v324_v19 = vpop.f32.mrf.mxu3 }
  0xa7   : > { %1123 = vmatmul.msk.f32.vlgmr.msra.gmra.mxu2 %vm221_vm1, %v1119_v46  ;;  %1121 = vmatmul.msk.f32.vlgmr.msra.gmra.mxu1 %vm221_vm1, %v1119_v46 }
  0xa8   : > { %1125 = vmatmul.msk.f32.vlgmr.msra.gmra.mxu3 %vm221_vm1, %v1119_v46 }
  0xac   : > { %v558_v50 = vpop.permute.xlu0 %557  ;;  %v554_v51 = vpop.permute.xlu1 %553 }
  0xad   : > { %v561_v53 = vsel %vm559_vm5, %v556_v43, %v558_v50  ;;  %v560_v54 = vsel %vm559_vm5, %v554_v51, %v556_v43  ;;  %1131 = vmatpush.msk.msrb.mxu2 %vm225_vm0, %v558_v50  ;;  %v736_v61 = vpop.permute.xlu2 %735 }
  0xae   : > { %1127 = vmatpush.msk.msrb.mxu0 %vm225_vm0, %v560_v54  ;;  %1129 = vmatpush.msk.msrb.mxu1 %vm225_vm0, %v561_v53 }
  0xaf   : > { %1128 = vmatmul.msk.f32.vlgmr.msrb.gmra.mxu0 %vm221_vm1, %v1126_v52  ;;  %1132 = vmatmul.msk.f32.vlgmr.msrb.gmra.mxu2 %vm221_vm1, %v1126_v52 }
  0xb0   : > { %1130 = vmatmul.msk.f32.vlgmr.msrb.gmra.mxu1 %vm221_vm1, %v1126_v52 }
  0xb4   : > { %v645_v57 = vpop.permute.xlu1 %644  ;;  %v643_v58 = vpop.permute.xlu0 %642 }
  0xb5   : > { %v649_v60 = vsel %vm648_vm6, %v643_v58, %v645_v57  ;;  %v821_v4 = vpop.permute.xlu2 %820  ;;  %v198_v58 = vld [vmem:[%s1361_s0] sm:$0x7] }
  0xb6   : > { %1134 = vmatpush.msk.msrb.mxu3 %vm225_vm0, %v649_v60 }
  0xb7   : > { %1135 = vmatmul.msk.f32.vlgmr.msrb.gmra.mxu3 %vm221_vm1, %v1133_v59 }
  0xbc   : > { %v647_v62 = vpop.permute.xlu1 %646  ;;  %v734_v63 = vpop.permute.xlu0 %733 }
  0xbd   : > { %v650_v0 = vsel %vm648_vm6, %v645_v57, %v647_v62  ;;  %v738_v1 = vsel %vm737_vm7, %v732_v49, %v734_v63  ;;  %v739_v2 = vsel %vm737_vm7, %v734_v63, %v736_v61  ;;  %1138 = vmatpush.msk.msra.mxu1 %vm225_vm0, %v647_v62  ;;  %v912_v10 = vpop.permute.xlu2 %911 }
  0xbe   : > { %1136 = vmatpush.msk.msra.mxu0 %vm225_vm0, %v650_v0  ;;  %1139 = vmatmul.msk.f32.vlgmr.msra.gmra.mxu1 %vm221_vm1, %v1133_v59 }
  0xbf   : > { %1141 = vmatpush.msk.msra.mxu2 %vm225_vm0, %v738_v1  ;;  %1143 = vmatpush.msk.msra.mxu3 %vm225_vm0, %v739_v2  ;;  %v1004_v1 = vperm.slane %v198_v58, 1 }
  0xc0   : > { %1137 = vmatmul.msk.f32.vlgmr.msra.gmra.mxu0 %vm221_vm1, %v1133_v59  ;;  %1142 = vmatmul.msk.f32.vlgmr.msra.gmra.mxu2 %vm221_vm1, %v1140_v3 }
  0xc1   : > { %1144 = vmatmul.msk.f32.vlgmr.msra.gmra.mxu3 %vm221_vm1, %v1140_v3  ;;  %1145 = vmatpush.msk.msrb.mxu0 %vm225_vm0, %v736_v61 }
  0xc4   : > { %v825_v5 = vpop.permute.xlu1 %824  ;;  %v823_v6 = vpop.permute.xlu0 %822 }
  0xc5   : > { %v828_v8 = vsel %vm826_vm8, %v823_v6, %v825_v5  ;;  %v827_v9 = vsel %vm826_vm8, %v821_v4, %v823_v6  ;;  %1152 = vmatpush.msk.msrb.mxu3 %vm225_vm0, %v825_v5  ;;  %v1003_v5 = vperm.slane %v198_v58, 0 }
  0xc6   : > { %1148 = vmatpush.msk.msrb.mxu1 %vm225_vm0, %v827_v9  ;;  %1150 = vmatpush.msk.msrb.mxu2 %vm225_vm0, %v828_v8 }
  0xc7   : > { %1149 = vmatmul.msk.f32.vlgmr.msrb.gmra.mxu1 %vm221_vm1, %v1147_v7 }
  0xc8   : > { %1146 = vmatmul.msk.f32.vlgmr.msrb.gmra.mxu0 %vm221_vm1, %v1140_v3  ;;  %1151 = vmatmul.msk.f32.vlgmr.msrb.gmra.mxu2 %vm221_vm1, %v1147_v7 }
  0xc9   : > { %1153 = vmatmul.msk.f32.vlgmr.msrb.gmra.mxu3 %vm221_vm1, %v1147_v7 }
  0xcc   : > { %v914_v11 = vpop.permute.xlu0 %913  ;;  %v910_v12 = vpop.permute.xlu1 %909 }
  0xcd   : > { %v917_v14 = vsel %vm915_vm9, %v912_v10, %v914_v11  ;;  %v916_v15 = vsel %vm915_vm9, %v910_v12, %v912_v10  ;;  %1159 = vmatpush.msk.msra.mxu2 %vm225_vm0, %v914_v11 }
  0xce   : > { %1155 = vmatpush.msk.msra.mxu0 %vm225_vm0, %v916_v15  ;;  %1157 = vmatpush.msk.msra.mxu1 %vm225_vm0, %v917_v14  ;;  %v1005_v15 = vperm.slane %v198_v58, 2 }
  0xcf   : > { %1158 = vmatmul.msk.f32.vlgmr.msra.gmra.mxu1 %vm221_vm1, %v1154_v13 }
  0xd0   : > { %1156 = vmatmul.msk.f32.vlgmr.msra.gmra.mxu0 %vm221_vm1, %v1154_v13  ;;  %1160 = vmatmul.msk.f32.vlgmr.msra.gmra.mxu2 %vm221_vm1, %v1154_v13 }
  0xd4   : > { %v994_v60 = vpop.permute.xlu0 %993 }
 0x10b   : > { %v269_v16 = vpop.f32.mrf.mxu1 }
 0x10f   : > { %v289_v18 = vpop.f32.mrf.mxu2 }
 0x112   : > { %v249_v17 = vpop.f32.mrf.mxu0 }
 0x113   : > { %v364_v20 = vpop.f32.mrf.mxu1  ;;  %v430_v23 = vpop.f32.mrf.mxu3  ;;  %v325_v34 = vadd.f32 %v324_v19, %v249_v17 }
 0x114   : > { %v365_v38 = vadd.f32 %v364_v20, %v289_v18 }
 0x11a   : > { %v344_v21 = vpop.f32.mrf.mxu0 }
 0x11b   : > { %v345_v33 = vadd.f32 %v344_v21, %v269_v16 }
 0x11d   : > { %v454_v37 = vadd.f32 %v430_v23, %v345_v33 }
 0x122   : > { %v410_v22 = vpop.f32.mrf.mxu2  ;;  %v450_v25 = vpop.f32.mrf.mxu0 }
 0x123   : > { %v453_v36 = vadd.f32 %v410_v22, %v325_v34  ;;  %v455_v46 = vadd.f32 %v450_v25, %v365_v38 }
 0x124   : > { %v499_v24 = vpop.f32.mrf.mxu1 }
 0x125   : > { %v542_v39 = vadd.f32 %v499_v24, %v453_v36 }
 0x12a   : > { %v519_v26 = vpop.f32.mrf.mxu2 }
 0x12b   : > { %v539_v27 = vpop.f32.mrf.mxu3  ;;  %v543_v40 = vadd.f32 %v519_v26, %v454_v37 }
 0x12c   : > { %v588_v29 = vpop.f32.mrf.mxu0  ;;  %v544_v51 = vadd.f32 %v539_v27, %v455_v46 }
 0x12d   : > { %v608_v28 = vpop.f32.mrf.mxu1  ;;  %v631_v42 = vadd.f32 %v588_v29, %v542_v39 }
 0x12e   : > { %v632_v47 = vadd.f32 %v608_v28, %v543_v40 }
 0x132   : > { %v628_v30 = vpop.f32.mrf.mxu2 }
 0x133   : > { %v633_v54 = vadd.f32 %v628_v30, %v544_v51 }
 0x13a   : > { %v677_v31 = vpop.f32.mrf.mxu3 }
 0x13b   : > { %v717_v32 = vpop.f32.mrf.mxu1  ;;  %v720_v48 = vadd.f32 %v677_v31, %v631_v42 }
 0x13c   : > { %v722_v61 = vadd.f32 %v717_v32, %v633_v54 }
 0x13d   : > { %v697_v35 = vpop.f32.mrf.mxu0 }
 0x13e   : > { %v721_v49 = vadd.f32 %v697_v35, %v632_v47 }
 0x143   : > { %v766_v41 = vpop.f32.mrf.mxu2 }
 0x144   : > { %v855_v43 = vpop.f32.mrf.mxu1  ;;  %v786_v44 = vpop.f32.mrf.mxu3  ;;  %v809_v50 = vadd.f32 %v766_v41, %v720_v48 }
 0x145   : > { %v806_v45 = vpop.f32.mrf.mxu0  ;;  %v810_v52 = vadd.f32 %v786_v44, %v721_v49 }
 0x146   : > { %v898_v55 = vadd.f32 %v855_v43, %v809_v50  ;;  %v811_v2 = vadd.f32 %v806_v45, %v722_v61 }
 0x14b   : > { %v875_v53 = vpop.f32.mrf.mxu2 }
 0x14c   : > { %v899_v56 = vadd.f32 %v875_v53, %v810_v52  ;;  %v964_v57 = vpop.f32.mrf.mxu1  ;;  %v895_v0 = vpop.f32.mrf.mxu3 }
 0x14d   : > { %v944_v59 = vpop.f32.mrf.mxu0  ;;  %v900_v6 = vadd.f32 %v895_v0, %v811_v2 }
 0x14e   : > { %v987_v62 = vadd.f32 %v944_v59, %v898_v55  ;;  %v988_v63 = vadd.f32 %v964_v57, %v899_v56 }
 0x150   : > { %v996_v3 = vadd.f32 %v994_v60, %v987_v62  ;;  %v997_v4 = vadd.f32 %v994_v60, %v988_v63 }
 0x152   : > { %v999_v7 = vmax.f32 %v996_v3, 0.0  ;;  %v1000_v8 = vmax.f32 %v997_v4, 0.0 }
 0x153   : > { %v984_v9 = vpop.f32.mrf.mxu2 }
 0x154   : > { %v989_v10 = vadd.f32 %v984_v9, %v900_v6  ;;  %v1010_v11 = vmul.f32 %v1004_v1, %v1000_v8  ;;  %v1009_v12 = vmul.f32 %v1003_v5, %v999_v7 }
 0x156   : > { %v998_v13 = vadd.f32 %v994_v60, %v989_v10  ;;  %1017 = vrot.lane.b32.xlu2 %v1010_v11, %s1200_s28  ;;  %1015 = vrot.lane.b32.xlu1 %v1009_v12, %s1200_s28 }
 0x158   : > { %v1001_v14 = vmax.f32 %v998_v13, 0.0 }
 0x15a   : > { %v1011_v16 = vmul.f32 %v1005_v15, %v1001_v14 }
 0x15e   : > { %1019 = vrot.lane.b32.xlu1 %v1011_v16, %s1200_s28 }
 0x1b0   : > { %v1018_v17 = vpop.permute.xlu2 %1017 }
 0x1c8   : > { %v1016_v18 = vpop.permute.xlu1 %1015 }
 0x1c9   : > { %v1022_v19 = vsel %vm1021_vm10, %v1016_v18, %v1018_v17  ;;  %v1026_v21 = vsel %vm1021_vm10, 0.0, %v1016_v18 }
 0x1ca   : > { %v1030_v20 = vrot.slane %v1022_v19, 4 }
 0x1cc   : > { %v1032_v22 = vsel %vm1031_vm11, %v1026_v21, %v1030_v20 }
 0x1cd   : > { %1034 = vst [vmem:[%s197_s5] sm:$0x77] %v1032_v22 }
 0x1d0   : > { %v1020_v23 = vpop.permute.xlu1 %1019 }
 0x1d1   : > { %v1023_v24 = vsel %vm1021_vm10, %v1018_v17, %v1020_v23 }
 0x1d2   : > { %v1028_v25 = vsel %vm1027_vm12, %v1023_v24, 0.0 }
 0x1d3   : > { %1036 = vst.msk [vmem:[%s197_s5 + $0x8] sm:$0x7] %vm1035_vm13, %v1028_v25 }
 0x1d4 PF: > { %s14_s15 = sadd.s32 1, %s1189_s15  }
 0x1d5   : > { %p11_p4 = scmp.ge.s32.totalorder %s14_s15, 4  }
 0x1d7   :  { %13 = sbr.rel (!%p11_p4) target bundleno = 1 (0x1), region = 83 }

// kernel: network_forward.36
= control target key start
LH: loop header
LB: loop body
LE: loop exit
PB: predicated region body
PF: predicated region fallthrough
CT: control target
= control target key end

     0   :  { %s1728_s13 = smov 0   ;;  %s1902_s0 = inlined_call_operand.vmem [shape: f32[1,286], index: 0, kind: input, shape index: {}]   ;;  %s1903_s1 = inlined_call_operand.vmem [shape: f32[2,3,286], index: 1, kind: input, shape index: {}]   ;;  %s1904_s2 = inlined_call_operand.vmem [shape: f32[3,1], index: 2, kind: input, shape index: {}]   ;;  %s1905_s3 = inlined_call_operand.vmem [shape: f32[3,1], index: 3, kind: input, shape index: {}]   ;;  %s1906_s4 = inlined_call_operand.vmem [shape: f32[2,3,324], index: 4, kind: input, shape index: {}]   ;;  %s1907_s5 = inlined_call_operand.vmem [shape: f32[9,3,3], index: 5, kind: input, shape index: {}]   ;;  %s1908_s6 = inlined_call_operand.vmem [shape: f32[3,1], index: 6, kind: input, shape index: {}]   ;;  %s1909_s7 = inlined_call_operand.vmem [shape: f32[2,3,324], index: 7, kind: input, shape index: {}, may-alias: {7,8}]   ;;  %s1910_s8 = inlined_call_operand.vmem [shape: f32[2,3,324], index: 8, kind: input, shape index: {}, may-alias: {7,8}]   ;;  %s1911_s9 = inlined_call_operand.vmem [shape: f32[2,3,324], index: 9, kind: output, shape index: {0}]   ;;  %s1912_s10 = inlined_call_operand.vmem [shape: f32[2,3,324], index: 10, kind: output, shape index: {1}]  }
   0x1 LB: > { %s1538_s14 = sadd.s32 4294967295, %s1660_s13   ;;  %p1542_p0 = scmp.ge.s32.totalorder %s1660_s13, 1  ;;  %s1660_s13 = sphi %s1728_s13, %s21_s13  }
   0x2   : > { %p345_p1 = scmp.lt.s32.totalorder %s1660_s13, 3 }
   0x4   : > { %p346_p2 = pnand %p1542_p0, %p345_p1 }
   0x5   : > { %p403_p3 = scmp.lt.s32.totalorder (!%p346_p2), %s1538_s14, 1  ;;  %s1664_s28 = smov (!%p346_p2), 19  }
   0x6   : > { %349 = sbr.rel (%p346_p2) target bundleno = 768 (0x300), region = 56  ;;  %s1665_s29 = smov (!%p346_p2), 127  }
   0x7   : > { %s1666_s30 = smov (!%p346_p2), 109   ;;  %s1667_s11 = smov (!%p346_p2), 126  }
   0x8   : > { %s1668_s12 = smov (!%p346_p2), 110   ;;  %s1670_s15 = smov (!%p346_p2), 92  }
   0x9   : > { %s1671_s16 = smov (!%p346_p2), 91   ;;  %s1672_s17 = smov (!%p346_p2), 90  }
   0xb   : > { %v436_v0 = vld [vmem:[%s1904_s2] sm:$0x7]  ;;  %v1662_v1 = vmov 0   ;;  %s1914_s14 = smov (!%p403_p3, %s1538_s14), 1  ;;  %v1663_v3 = vmov 839922192  }
   0xc   : > { %1636 = vset.pattern.permute.xlu0 %v1662_v1  ;;  %1637 = vset.pattern.permute.xlu2 %v1662_v1  ;;  %v437_v2 = vld [vmem:[%s1905_s3] sm:$0x7]  ;;  %v443_v4 = vunpack.c.l.s4 %v1663_v3  ;;  %s1742_s19 = smul.u32 12, %s1914_s14  ;;  %vm470_vm0 = vcmask 1043456   ;;  %vm489_vm1 = vcmask 154624   ;;  %vm533_vm2 = vcmask 1042432  }
   0xd   : > { %440 = vperm.xlu0 %1636, %v436_v0   ;;  %v1747_v7 = vld [vmem:[%s1902_s0] sm:$0x7]  ;;  %vm496_vm3 = vcmask 400384   ;;  %s1669_s14 = smov 108   ;;  %vm529_vm4 = vcmask 23552   ;;  %vm526_vm5 = vcmask 1039360  }
   0xe   : > { %v444_v6 = vunpack.c.0.s8 %v443_v4  ;;  %s407_s24 = scalar_lea.vmem %s1903_s1, %s1742_s19  ;;  %v464_v8 = vperm.slane %v1747_v7, 1  ;;  %v463_v13 = vperm.slane %v1747_v7, 0  ;;  %v465_v20 = vperm.slane %v1747_v7, 2  ;;  %s412_s27 = scalar_lea.vmem %s1906_s4, %s1742_s19  ;;  %v514_v44 = vld [vmem:[%s1907_s5] sm:$0x7] }
   0xf   : > { %v434_v10 = vld [vmem:[%s407_s24] sm:$0x77]  ;;  %v435_v11 = vld [vmem:[%s407_s24 + $0x8] sm:$0x7]  ;;  %vm677_vm6 = vcmask 1031168   ;;  %vm843_vm7 = vcmask 891904   ;;  %s422_s24 = scalar_lea.vmem %s1910_s8, %s1742_s19  ;;  %s427_s26 = scalar_lea.vmem %s1911_s9, %s1742_s19 }
  0x10   : > { %v469_v14 = vrot.slane %v464_v8, 4  ;;  %v498_v26 = vld [vmem:[%s412_s27] sm:$0x77]  ;;  %v499_v27 = vld [vmem:[%s412_s27 + $0x8] sm:$0x7]  ;;  %vm760_vm8 = vcmask 900096  }
  0x11   : > { %v1549_v48 = vld [vmem:[%s1907_s5 + $0x4] sm:$0x7]  ;;  %v1562_v59 = vld [vmem:[%s1907_s5 + $0x8] sm:$0x7]  ;;  %v1576_v3 = vld [vmem:[%s1907_s5 + $0x10] sm:$0x7] }
  0x12   : > { %v471_v21 = vsel %vm470_vm0, %v463_v13, %v469_v14  ;;  %vm926_vm9 = vcmask 883712   ;;  %vm1009_vm10 = vcmask 752640   ;;  %vm1092_vm11 = vcmask 744448  }
  0x13   : > { %vm1175_vm12 = vcmask 736256  }
  0x15   : > { %451 = vperm.xlu0 %1636, %v437_v2   ;;  %v1569_v2 = vld [vmem:[%s1907_s5 + $0xc] sm:$0x7] }
  0x7f   : > { %v441_v5 = vpop.permute.xlu0 %440 }
  0x80   : > { %v445_v9 = vperm.slane %v441_v5, %v444_v6 }
  0x82   : > { %v447_v15 = vmul.f32 %v445_v9, %v434_v10  ;;  %v448_v16 = vmul.f32 %v445_v9, %v435_v11  ;;  %v1583_v9 = vld [vmem:[%s1907_s5 + $0x14] sm:$0x7]  ;;  %v1250_v11 = vld [vmem:[%s1908_s6] sm:$0x7] }
  0x87   : > { %v452_v12 = vpop.permute.xlu0 %451 }
  0x88   : > { %v456_v17 = vperm.slane %v452_v12, %v444_v6 }
  0x8a   : > { %v458_v18 = vadd.f32 %v456_v17, %v447_v15  ;;  %v459_v19 = vadd.f32 %v456_v17, %v448_v16 }
  0x8c   : > { %v460_v22 = vmax.f32 %v458_v18, 0.0  ;;  %v461_v23 = vmax.f32 %v459_v19, 0.0  ;;  %v1590_v18 = vld [vmem:[%s1907_s5 + $0x18] sm:$0x7] }
  0x8e   : > { %v473_v24 = vmul.f32 %v471_v21, %v460_v22  ;;  %v474_v25 = vmul.f32 %v465_v20, %v461_v23 }
  0x90   : > { %477 = vst [vmem:[#allocation1] ss:$2 sm:$0xff] %v473_v24  ;;  %v1597_v24 = vld [vmem:[%s1907_s5 + $0x1c] sm:$0x7] }
  0x91   : > { %479 = vst [vmem:[#allocation1 + $0x10] ss:$2 sm:$0xff] %v474_v25 }
  0x97   : > { %v481_v28 = vld.sshfl [vmem:[#allocation1 + $0x8] sm:$0xff pattern:$0x75316420]  ;;  %v480_v29 = vld.sshfl [vmem:[#allocation1] sm:$0xff pattern:$0x75316420] }
  0x98   : > { %485 = vrot.lane.b32.xlu1 %v481_v28, %s1664_s28  ;;  %483 = vrot.lane.b32.xlu2 %v480_v29, %s1664_s28  ;;  %502 = vst [vmem:[#allocation1] ss:$2 sm:$0xff] %v498_v26  ;;  %v482_v30 = vld.sshfl [vmem:[#allocation1 + $0x10] sm:$0xff pattern:$0x75316420] }
  0x99   : > { %504 = vst [vmem:[#allocation1 + $0x10] ss:$2 sm:$0xff] %v499_v27 }
  0x9f   : > { %v505_v31 = vld.sshfl [vmem:[#allocation1] sm:$0xff pattern:$0x75316420]  ;;  %v506_v35 = vld.sshfl [vmem:[#allocation1 + $0x8] sm:$0xff pattern:$0x75316420] }
  0xa0   : > { %487 = vrot.lane.b32.xlu1 %v482_v30, %s1664_s28  ;;  %v507_v39 = vld.sshfl [vmem:[#allocation1 + $0x10] sm:$0xff pattern:$0x75316420] }
  0xf2   : > { %v484_v32 = vpop.permute.xlu2 %483 }
  0xf3   : > { %v495_v33 = vsel %vm489_vm1, 0.0, %v484_v32 }
  0xf4   : > { %v511_v34 = vadd.f32 %v505_v31, %v495_v33 }
  0xf6   : > { %520 = vrot.lane.b32.xlu1 %v511_v34, %s1665_s29  ;;  %1556 = vmatpush.msk.msra.mxu3 %vm533_vm2, %v511_v34 }
  0xf7   : > { %1557 = vmatmul.msk.f32.vlgmr.msra.gmra.mxu3 %vm529_vm4, %v514_v44 }
  0xfe   : > { %837 = vrot.lane.b32.xlu1 %v511_v34, %s1666_s30 }
 0x10a   : > { %v486_v36 = vpop.permute.xlu1 %485 }
 0x10b   : > { %v490_v37 = vsel %vm489_vm1, %v484_v32, %v486_v36  ;;  %v1604_v32 = vld [vmem:[%s1907_s5 + $0x20] sm:$0x7] }
 0x10c   : > { %v512_v38 = vadd.f32 %v506_v35, %v490_v37 }
 0x10e   : > { %673 = vrot.lane.b32.xlu0 %v512_v38, %s1667_s11  ;;  %522 = vrot.lane.b32.xlu2 %v512_v38, %s1665_s29 }
 0x112   : > { %v488_v40 = vpop.permute.xlu1 %487 }
 0x113   : > { %v491_v41 = vsel %vm489_vm1, %v486_v36, %v488_v40 }
 0x114   : > { %v497_v42 = vsel %vm496_vm3, %v491_v41, 0.0 }
 0x115   : > { %v513_v43 = vadd.f32 %v507_v39, %v497_v42 }
 0x116   : > { %671 = vrot.lane.b32.xlu2 %v511_v34, %s1667_s11 }
 0x117   : > { %524 = vrot.lane.b32.xlu0 %v513_v43, %s1665_s29  ;;  %675 = vrot.lane.b32.xlu1 %v513_v43, %s1667_s11 }
 0x11e   : > { %754 = vrot.lane.b32.xlu2 %v511_v34, %s1668_s12 }
 0x11f   : > { %756 = vrot.lane.b32.xlu0 %v512_v38, %s1668_s12  ;;  %758 = vrot.lane.b32.xlu1 %v513_v43, %s1668_s12 }
 0x126   : > { %839 = vrot.lane.b32.xlu2 %v512_v38, %s1666_s30 }
 0x127   : > { %922 = vrot.lane.b32.xlu0 %v512_v38, %s1669_s14  ;;  %1003 = vrot.lane.b32.xlu1 %v511_v34, %s1670_s15 }
 0x12e   : > { %920 = vrot.lane.b32.xlu2 %v511_v34, %s1669_s14 }
 0x12f   : > { %841 = vrot.lane.b32.xlu0 %v513_v43, %s1666_s30  ;;  %1007 = vrot.lane.b32.xlu1 %v513_v43, %s1670_s15  ;;  %s417_s30 = scalar_lea.vmem %s1909_s7, %s1742_s19 }
 0x136   : > { %1005 = vrot.lane.b32.xlu2 %v512_v38, %s1670_s15 }
 0x137   : > { %924 = vrot.lane.b32.xlu0 %v513_v43, %s1669_s14  ;;  %1090 = vrot.lane.b32.xlu1 %v513_v43, %s1671_s16  ;;  %s432_s14 = scalar_lea.vmem %s1912_s10, %s1742_s19 }
 0x13e   : > { %1086 = vrot.lane.b32.xlu2 %v511_v34, %s1671_s16 }
 0x13f   : > { %1088 = vrot.lane.b32.xlu0 %v512_v38, %s1671_s16  ;;  %1169 = vrot.lane.b32.xlu1 %v511_v34, %s1672_s17 }
 0x146   : > { %1171 = vrot.lane.b32.xlu2 %v512_v38, %s1672_s17 }
 0x147   : > { %1173 = vrot.lane.b32.xlu0 %v513_v43, %s1672_s17 }
 0x14e   : > { %1253 = vperm.xlu2 %1637, %v1250_v11  }
 0x168   : > { %v523_v45 = vpop.permute.xlu2 %522  ;;  %v521_v46 = vpop.permute.xlu1 %520 }
 0x169   : > { %v527_v47 = vsel %vm526_vm5, %v521_v46, %v523_v45 }
 0x16a   : > { %1550 = vmatpush.msk.msra.mxu0 %vm533_vm2, %v527_v47 }
 0x16b   : > { %1551 = vmatmul.msk.f32.vlgmr.msra.gmra.mxu0 %vm529_vm4, %v1549_v48 }
 0x16c   : > { %1558 = vmatpush.msk.msrb.mxu0 %vm533_vm2, %v512_v38 }
 0x170   : > { %v672_v49 = vpop.permute.xlu2 %671  ;;  %v838_v52 = vpop.permute.xlu1 %837 }
 0x173   : > { %1559 = vmatmul.msk.f32.vlgmr.msrb.gmra.mxu0 %vm529_vm4, %v514_v44 }
 0x178   : > { %v755_v50 = vpop.permute.xlu2 %754 }
 0x17a   : > { %v626_v36 = vpop.f32.mrf.mxu3 }
 0x180   : > { %v674_v51 = vpop.permute.xlu0 %673  ;;  %v840_v53 = vpop.permute.xlu2 %839 }
 0x181   : > { %v678_v58 = vsel %vm677_vm6, %v672_v49, %v674_v51  ;;  %v844_v60 = vsel %vm843_vm7, %v838_v52, %v840_v53 }
 0x188   : > { %v921_v63 = vpop.permute.xlu2 %920 }
 0x189   : > { %v525_v54 = vpop.permute.xlu0 %524  ;;  %v676_v55 = vpop.permute.xlu1 %675 }
 0x18a   : > { %1554 = vmatpush.msk.msra.mxu2 %vm533_vm2, %v525_v54  ;;  %1567 = vmatpush.msk.msra.mxu0 %vm533_vm2, %v676_v55  ;;  %v528_v56 = vsel %vm526_vm5, %v523_v45, %v525_v54  ;;  %v679_v57 = vsel %vm677_vm6, %v674_v51, %v676_v55 }
 0x18b   : > { %1552 = vmatpush.msk.msra.mxu1 %vm533_vm2, %v528_v56  ;;  %1555 = vmatmul.msk.f32.vlgmr.msra.gmra.mxu2 %vm529_vm4, %v1549_v48 }
 0x18c   : > { %1563 = vmatpush.msk.msrb.mxu2 %vm533_vm2, %v678_v58  ;;  %1565 = vmatpush.msk.msrb.mxu3 %vm533_vm2, %v679_v57 }
 0x18d   : > { %1577 = vmatpush.msk.msrb.mxu0 %vm533_vm2, %v844_v60  ;;  %1553 = vmatmul.msk.f32.vlgmr.msra.gmra.mxu1 %vm529_vm4, %v1549_v48 }
 0x18e   : > { %1560 = vmatpush.msk.msrb.mxu1 %vm533_vm2, %v513_v43  ;;  %1566 = vmatmul.msk.f32.vlgmr.msrb.gmra.mxu3 %vm529_vm4, %v1562_v59 }
 0x18f   : > { %1568 = vmatmul.msk.f32.vlgmr.msra.gmra.mxu0 %vm529_vm4, %v1562_v59 }
 0x190   : > { %v1006_v10 = vpop.permute.xlu2 %1005 }
 0x191   : > { %v757_v61 = vpop.permute.xlu0 %756  ;;  %v759_v62 = vpop.permute.xlu1 %758 }
 0x192   : > { %v761_v0 = vsel %vm760_vm8, %v755_v50, %v757_v61  ;;  %v762_v1 = vsel %vm760_vm8, %v757_v61, %v759_v62  ;;  %1574 = vmatpush.msk.msra.mxu3 %vm533_vm2, %v759_v62 }
 0x193   : > { %1564 = vmatmul.msk.f32.vlgmr.msrb.gmra.mxu2 %vm529_vm4, %v1562_v59  ;;  %1570 = vmatpush.msk.msra.mxu1 %vm533_vm2, %v761_v0 }
 0x194   : > { %1572 = vmatpush.msk.msra.mxu2 %vm533_vm2, %v762_v1 }
 0x195   : > { %1561 = vmatmul.msk.f32.vlgmr.msrb.gmra.mxu1 %vm529_vm4, %v514_v44 }
 0x196   : > { %1575 = vmatmul.msk.f32.vlgmr.msra.gmra.mxu3 %vm529_vm4, %v1569_v2 }
 0x197   : > { %1578 = vmatmul.msk.f32.vlgmr.msrb.gmra.mxu0 %vm529_vm4, %v1576_v3 }
 0x198   : > { %v1087_v19 = vpop.permute.xlu2 %1086 }
 0x199   : > { %v923_v4 = vpop.permute.xlu0 %922  ;;  %v1004_v5 = vpop.permute.xlu1 %1003 }
 0x19a   : > { %v927_v6 = vsel %vm926_vm9, %v921_v63, %v923_v4  ;;  %v1010_v17 = vsel %vm1009_vm10, %v1004_v5, %v1006_v10 }
 0x19b   : > { %1573 = vmatmul.msk.f32.vlgmr.msra.gmra.mxu2 %vm529_vm4, %v1569_v2  ;;  %1584 = vmatpush.msk.msrb.mxu3 %vm533_vm2, %v927_v6 }
 0x19d   : > { %1571 = vmatmul.msk.f32.vlgmr.msra.gmra.mxu1 %vm529_vm4, %v1569_v2 }
 0x19e   : > { %1585 = vmatmul.msk.f32.vlgmr.msrb.gmra.mxu3 %vm529_vm4, %v1583_v9 }
 0x1a0   : > { %v1172_v25 = vpop.permute.xlu2 %1171 }
 0x1a1   : > { %v842_v12 = vpop.permute.xlu0 %841  ;;  %v1008_v14 = vpop.permute.xlu1 %1007 }
 0x1a2   : > { %v845_v15 = vsel %vm843_vm7, %v840_v53, %v842_v12  ;;  %v1011_v16 = vsel %vm1009_vm10, %v1006_v10, %v1008_v14  ;;  %1581 = vmatpush.msk.msrb.mxu2 %vm533_vm2, %v842_v12 }
 0x1a3   : > { %1579 = vmatpush.msk.msrb.mxu1 %vm533_vm2, %v845_v15  ;;  %1582 = vmatmul.msk.f32.vlgmr.msrb.gmra.mxu2 %vm529_vm4, %v1576_v3 }
 0x1a4   : > { %1591 = vmatpush.msk.msra.mxu2 %vm533_vm2, %v1010_v17  ;;  %1593 = vmatpush.msk.msra.mxu3 %vm533_vm2, %v1011_v16 }
 0x1a5   : > { %1580 = vmatmul.msk.f32.vlgmr.msrb.gmra.mxu1 %vm529_vm4, %v1576_v3 }
 0x1a6   : > { %1594 = vmatmul.msk.f32.vlgmr.msra.gmra.mxu3 %vm529_vm4, %v1590_v18 }
 0x1a8   : > { %v1254_v15 = vpop.permute.xlu2 %1253 }
 0x1a9   : > { %v925_v21 = vpop.permute.xlu0 %924  ;;  %v1091_v22 = vpop.permute.xlu1 %1090 }
 0x1aa   : > { %v928_v23 = vsel %vm926_vm9, %v923_v4, %v925_v21  ;;  %1588 = vmatpush.msk.msra.mxu1 %vm533_vm2, %v925_v21  ;;  %1602 = vmatpush.msk.msrb.mxu3 %vm533_vm2, %v1091_v22 }
 0x1ab   : > { %1586 = vmatpush.msk.msra.mxu0 %vm533_vm2, %v928_v23  ;;  %1592 = vmatmul.msk.f32.vlgmr.msra.gmra.mxu2 %vm529_vm4, %v1590_v18 }
 0x1ac   : > { %1587 = vmatmul.msk.f32.vlgmr.msra.gmra.mxu0 %vm529_vm4, %v1583_v9 }
 0x1ad   : > { %1589 = vmatmul.msk.f32.vlgmr.msra.gmra.mxu1 %vm529_vm4, %v1583_v9  ;;  %1595 = vmatpush.msk.msrb.mxu0 %vm533_vm2, %v1008_v14 }
 0x1ae   : > { %1603 = vmatmul.msk.f32.vlgmr.msrb.gmra.mxu3 %vm529_vm4, %v1597_v24 }
 0x1b1   : > { %v1089_v26 = vpop.permute.xlu0 %1088  ;;  %v1170_v27 = vpop.permute.xlu1 %1169 }
 0x1b2   : > { %v1093_v28 = vsel %vm1092_vm11, %v1087_v19, %v1089_v26  ;;  %v1094_v29 = vsel %vm1092_vm11, %v1089_v26, %v1091_v22  ;;  %v1176_v30 = vsel %vm1175_vm12, %v1170_v27, %v1172_v25 }
 0x1b3   : > { %1598 = vmatpush.msk.msrb.mxu1 %vm533_vm2, %v1093_v28  ;;  %1600 = vmatpush.msk.msrb.mxu2 %vm533_vm2, %v1094_v29 }
 0x1b4   : > { %1605 = vmatpush.msk.msra.mxu0 %vm533_vm2, %v1176_v30  ;;  %1601 = vmatmul.msk.f32.vlgmr.msrb.gmra.mxu2 %vm529_vm4, %v1597_v24 }
 0x1b5   : > { %1596 = vmatmul.msk.f32.vlgmr.msrb.gmra.mxu0 %vm529_vm4, %v1590_v18  ;;  %1599 = vmatmul.msk.f32.vlgmr.msrb.gmra.mxu1 %vm529_vm4, %v1597_v24 }
 0x1b9   : > { %v1174_v31 = vpop.permute.xlu0 %1173 }
 0x1ba   : > { %v1177_v33 = vsel %vm1175_vm12, %v1172_v25, %v1174_v31  ;;  %1609 = vmatpush.msk.msra.mxu2 %vm533_vm2, %v1174_v31  ;;  %vm1394_vm12 = vcmask 550912  }
 0x1bb   : > { %1607 = vmatpush.msk.msra.mxu1 %vm533_vm2, %v1177_v33 }
 0x1bc   : > { %1610 = vmatmul.msk.f32.vlgmr.msra.gmra.mxu2 %vm529_vm4, %v1604_v32 }
 0x1bd   : > { %1606 = vmatmul.msk.f32.vlgmr.msra.gmra.mxu0 %vm529_vm4, %v1604_v32  ;;  %1608 = vmatmul.msk.f32.vlgmr.msra.gmra.mxu1 %vm529_vm4, %v1604_v32 }
 0x1e8   : > { %v557_v34 = vpop.f32.mrf.mxu0 }
 0x1e9   : > { %v627_v49 = vadd.f32 %v626_v36, %v557_v34 }
 0x1f0   : > { %v646_v38 = vpop.f32.mrf.mxu0 }
 0x20a   : > { %v577_v35 = vpop.f32.mrf.mxu1 }
 0x20b   : > { %v647_v50 = vadd.f32 %v646_v38, %v577_v35 }
 0x20c   : > { %v746_v42 = vpop.f32.mrf.mxu0 }
 0x20e   : > { %v597_v37 = vpop.f32.mrf.mxu2 }
 0x211   : > { %v726_v40 = vpop.f32.mrf.mxu3 }
 0x212   : > { %v666_v39 = vpop.f32.mrf.mxu1  ;;  %v750_v54 = vadd.f32 %v726_v40, %v647_v50 }
 0x213   : > { %v667_v56 = vadd.f32 %v666_v39, %v597_v37 }
 0x214   : > { %v872_v46 = vpop.f32.mrf.mxu0 }
 0x215   : > { %v751_v60 = vadd.f32 %v746_v42, %v667_v56 }
 0x216   : > { %v706_v41 = vpop.f32.mrf.mxu2 }
 0x217   : > { %v749_v51 = vadd.f32 %v706_v41, %v627_v49 }
 0x219   : > { %v829_v45 = vpop.f32.mrf.mxu3 }
 0x21a   : > { %v789_v43 = vpop.f32.mrf.mxu1  ;;  %v834_v0 = vadd.f32 %v829_v45, %v751_v60 }
 0x21b   : > { %v832_v58 = vadd.f32 %v789_v43, %v749_v51 }
 0x21d   : > { %v915_v62 = vadd.f32 %v872_v46, %v832_v58 }
 0x21e   : > { %v809_v44 = vpop.f32.mrf.mxu2 }
 0x21f   : > { %v833_v57 = vadd.f32 %v809_v44, %v750_v54 }
 0x221   : > { %v955_v52 = vpop.f32.mrf.mxu3 }
 0x222   : > { %v892_v47 = vpop.f32.mrf.mxu1  ;;  %v998_v4 = vadd.f32 %v955_v52, %v915_v62 }
 0x223   : > { %v916_v61 = vadd.f32 %v892_v47, %v833_v57 }
 0x226   : > { %v912_v48 = vpop.f32.mrf.mxu2 }
 0x227   : > { %v917_v5 = vadd.f32 %v912_v48, %v834_v0 }
 0x229   : > { %v975_v53 = vpop.f32.mrf.mxu0  ;;  %v1058_v63 = vpop.f32.mrf.mxu3 }
 0x22a   : > { %v995_v55 = vpop.f32.mrf.mxu1  ;;  %v999_v1 = vadd.f32 %v975_v53, %v916_v61 }
 0x22b   : > { %v1000_v11 = vadd.f32 %v995_v55, %v917_v5 }
 0x22c   : > { %v1082_v9 = vadd.f32 %v1058_v63, %v999_v1 }
 0x22e   : > { %v1038_v59 = vpop.f32.mrf.mxu2 }
 0x22f   : > { %v1081_v6 = vadd.f32 %v1038_v59, %v998_v4 }
 0x231   : > { %v1161_v19 = vpop.f32.mrf.mxu3 }
 0x232   : > { %v1078_v2 = vpop.f32.mrf.mxu0  ;;  %v1121_v3 = vpop.f32.mrf.mxu1 }
 0x233   : > { %v1164_v14 = vadd.f32 %v1121_v3, %v1081_v6  ;;  %v1083_v16 = vadd.f32 %v1078_v2, %v1000_v11  ;;  %v1261_v11 = vld [vmem:[%s422_s24] sm:$0x77] }
 0x235   : > { %v1166_v25 = vadd.f32 %v1161_v19, %v1083_v16 }
 0x237   : > { %v1141_v10 = vpop.f32.mrf.mxu2 }
 0x238   : > { %v1165_v12 = vadd.f32 %v1141_v10, %v1082_v9 }
 0x23a   : > { %v1204_v17 = vpop.f32.mrf.mxu0  ;;  %v1224_v18 = vpop.f32.mrf.mxu1 }
 0x23b   : > { %v1247_v21 = vadd.f32 %v1204_v17, %v1164_v14  ;;  %v1248_v22 = vadd.f32 %v1224_v18, %v1165_v12  ;;  %v1262_v12 = vld [vmem:[%s422_s24 + $0x8] sm:$0x7] }
 0x23d   : > { %v1256_v23 = vadd.f32 %v1254_v15, %v1247_v21  ;;  %v1257_v24 = vadd.f32 %v1254_v15, %v1248_v22 }
 0x23f   : > { %v1611_v26 = vmul.f32 -1.442695, %v1256_v23  ;;  %v1612_v27 = vmul.f32 -1.442695, %v1257_v24  ;;  %v1244_v28 = vpop.f32.mrf.mxu2 }
 0x240   : > { %v1249_v29 = vadd.f32 %v1244_v28, %v1166_v25 }
 0x241   : > { %1638 = vpow2.f32 %v1611_v26 }
 0x242   : > { %1640 = vpow2.f32 %v1612_v27  ;;  %v1258_v30 = vadd.f32 %v1254_v15, %v1249_v29 }
 0x244   : > { %v1613_v31 = vmul.f32 -1.442695, %v1258_v30 }
 0x246   : > { %1642 = vpow2.f32 %v1613_v31 }
 0x247   : > { %v1639_v32 = vpop.eup %1638 }
 0x248   : > { %v1641_v33 = vpop.eup %1640  ;;  %v1272_v34 = vadd.f32 1.0, %v1639_v32 }
 0x249   : > { %v1273_v35 = vadd.f32 1.0, %v1641_v33 }
 0x24a   : > { %1644 = vrcp.f32 %v1272_v34  ;;  %v1284_v44 = vand.u32 2147483647, %v1272_v34  ;;  %v1286_v45 = vand.u32 2147483648, %v1272_v34  ;;  %vm1280_vm15 = vweird.f32 %v1272_v34 }
 0x24b   : > { %1646 = vrcp.f32 %v1273_v35  ;;  %v1299_v48 = vand.u32 2147483647, %v1273_v35  ;;  %v1301_v49 = vand.u32 2147483648, %v1273_v35  ;;  %vm1295_vm2 = vweird.f32 %v1273_v35 }
 0x24c   : > { %v1643_v36 = vpop.eup %1642  ;;  %vm1285_vm5 = vcmp.eq.f32.partialorder %v1284_v44, 8.507059e+37  ;;  %v1287_v53 = vor.u32 1.1754944e-38, %v1286_v45 }
 0x24d   : > { %v1274_v37 = vadd.f32 1.0, %v1643_v36  ;;  %vm1300_vm7 = vcmp.eq.f32.partialorder %v1299_v48, 8.507059e+37  ;;  %v1302_v57 = vor.u32 1.1754944e-38, %v1301_v49 }
 0x24f   : > { %1648 = vrcp.f32 %v1274_v37  ;;  %v1316_v58 = vand.u32 2147483648, %v1274_v37  ;;  %v1314_v61 = vand.u32 2147483647, %v1274_v37  ;;  %vm1310_vm9 = vweird.f32 %v1274_v37 }
 0x250   : > { %v1645_v38 = vpop.eup %1644 }
 0x251   : > { %v1647_v39 = vpop.eup %1646  ;;  %v1276_v40 = vmul.f32 %v1645_v38, %v1272_v34  ;;  %vm1281_vm13 = vweird.f32 %v1645_v38  ;;  %v1317_v2 = vor.u32 1.1754944e-38, %v1316_v58  ;;  %vm1315_vm11 = vcmp.eq.f32.partialorder %v1314_v61, 8.507059e+37 }
 0x252   : > { %v1291_v41 = vmul.f32 %v1647_v39, %v1273_v35  ;;  %vm1296_vm14 = vweird.f32 %v1647_v39  ;;  %vm1282_vm4 = vmor %vm1280_vm15, %vm1281_vm13 }
 0x253   : > { %v1277_v42 = vsub.f32 1.0, %v1276_v40  ;;  %vm1297_vm6 = vmor %vm1295_vm2, %vm1296_vm14 }
 0x254   : > { %v1292_v43 = vsub.f32 1.0, %v1291_v41 }
 0x255   : > { %v1649_v46 = vpop.eup %1648  ;;  %v1278_v47 = vmul.f32 %v1645_v38, %v1277_v42  ;;  %v1259_v42 = vld [vmem:[%s417_s30] sm:$0x77] }
 0x256   : > { %v1293_v50 = vmul.f32 %v1647_v39, %v1292_v43  ;;  %v1306_v51 = vmul.f32 %v1649_v46, %v1274_v37  ;;  %vm1311_vm8 = vweird.f32 %v1649_v46 }
 0x257   : > { %v1279_v52 = vadd.f32 %v1645_v38, %v1278_v47  ;;  %vm1312_vm10 = vmor %vm1310_vm9, %vm1311_vm8 }
 0x258   : > { %v1294_v54 = vadd.f32 %v1647_v39, %v1293_v50  ;;  %v1307_v55 = vsub.f32 1.0, %v1306_v51 }
 0x259   : > { %v1283_v56 = vsel %vm1282_vm4, %v1645_v38, %v1279_v52 }
 0x25a   : > { %v1298_v59 = vsel %vm1297_vm6, %v1647_v39, %v1294_v54  ;;  %v1308_v60 = vmul.f32 %v1649_v46, %v1307_v55  ;;  %v1288_v62 = vsel %vm1285_vm5, %v1287_v53, %v1283_v56 }
 0x25b   : > { %v1303_v63 = vsel %vm1300_vm7, %v1302_v57, %v1298_v59  ;;  %v1320_v3 = vmul.f32 %v1288_v62, %v463_v13 }
 0x25c   : > { %v1321_v0 = vmul.f32 %v1303_v63, %v464_v8  ;;  %v1309_v1 = vadd.f32 %v1649_v46, %v1308_v60 }
 0x25e   : > { %v1326_v4 = vrot.slane %v1321_v0, 4  ;;  %v1313_v5 = vsel %vm1312_vm10, %v1649_v46, %v1309_v1  ;;  %v1260_v46 = vld [vmem:[%s417_s30 + $0x8] sm:$0x7] }
 0x25f   : > { %v1318_v6 = vsel %vm1315_vm11, %v1317_v2, %v1313_v5 }
 0x260   : > { %v1327_v9 = vsel %vm470_vm0, %v1320_v3, %v1326_v4  ;;  %v1322_v10 = vmul.f32 %v1318_v6, %v465_v20 }
 0x261   : > { %1328 = vrot.lane.b32.xlu0 %v1327_v9, %s1664_s28 }
 0x262   : > { %1330 = vrot.lane.b32.xlu1 %v1322_v10, %s1664_s28 }
 0x2d3   : > { %v1329_v8 = vpop.permute.xlu0 %1328 }
 0x2d4   : > { %v1332_v13 = vrot.slane %v1329_v8, 4  ;;  %v1331_v14 = vpop.permute.xlu1 %1330 }
 0x2d6   : > { %v1333_v15 = vsel %vm489_vm1, %v1332_v13, %v1329_v8  ;;  %v1334_v16 = vsel %vm489_vm1, %v1332_v13, %v1331_v14 }
 0x2d7   : > { %v1337_v17 = vadd.f32 %v1333_v15, %v1261_v11  ;;  %v1338_v7 = vadd.f32 %v1334_v16, %v1262_v12 }
 0x2d9   : > { %v1339_v20 = vmax.f32 %v1337_v17, 0.0001  ;;  %v1340_v18 = vmax.f32 %v1338_v7, 0.0001 }
 0x2db   : > { %v1341_v19 = vmin.f32 %v1339_v20, 1.0  ;;  %v1342_v21 = vmin.f32 %v1340_v18, 1.0 }
 0x2dd   : > { %1650 = vrcp.f32 %v1341_v19  ;;  %1379 = vst [vmem:[#allocation1] ss:$2 sm:$0xff] %v1341_v19  ;;  %v1354_v33 = vand.u32 2147483648, %v1341_v19  ;;  %v1352_v37 = vand.u32 2147483647, %v1341_v19  ;;  %v1369_v38 = vand.u32 2147483648, %v1342_v21 }
 0x2de   : > { %1652 = vrcp.f32 %v1342_v21  ;;  %1381 = vst [vmem:[#allocation1 + $0x10] ss:$2 sm:$0xff] %v1342_v21  ;;  %v1367_v40 = vand.u32 2147483647, %v1342_v21  ;;  %vm1348_vm15 = vweird.f32 %v1341_v19  ;;  %vm1363_vm4 = vweird.f32 %v1342_v21 }
 0x2df   : > { %v1355_v43 = vor.u32 1.1754944e-38, %v1354_v33  ;;  %vm1353_vm5 = vcmp.eq.f32.partialorder %v1352_v37, 8.507059e+37  ;;  %v1370_v47 = vor.u32 1.1754944e-38, %v1369_v38 }
 0x2e0   : > { %vm1368_vm7 = vcmp.eq.f32.partialorder %v1367_v40, 8.507059e+37 }
 0x2e3   : > { %v1651_v22 = vpop.eup %1650 }
 0x2e4   : > { %v1653_v23 = vpop.eup %1652  ;;  %v1344_v24 = vmul.f32 %v1651_v22, %v1341_v19  ;;  %v1382_v25 = vld.sshfl [vmem:[#allocation1] sm:$0xff pattern:$0x75316420]  ;;  %v1383_v26 = vld.sshfl [vmem:[#allocation1 + $0x8] sm:$0xff pattern:$0x75316420]  ;;  %vm1349_vm13 = vweird.f32 %v1651_v22 }
 0x2e5   : > { %v1359_v27 = vmul.f32 %v1653_v23, %v1342_v21  ;;  %v1384_v28 = vld.sshfl [vmem:[#allocation1 + $0x10] sm:$0xff pattern:$0x75316420]  ;;  %v1387_v29 = vsel %vm489_vm1, 0.0, %v1382_v25  ;;  %v1390_v30 = vrot.slane %v1383_v26, 4  ;;  %vm1364_vm14 = vweird.f32 %v1653_v23  ;;  %vm1350_vm2 = vmor %vm1348_vm15, %vm1349_vm13 }
 0x2e6   : > { %v1345_v31 = vsub.f32 1.0, %v1344_v24  ;;  %v1388_v32 = vsel %vm496_vm3, %v1384_v28, 0.0  ;;  %vm1365_vm6 = vmor %vm1363_vm4, %vm1364_vm14 }
 0x2e7   : > { %v1360_v34 = vsub.f32 1.0, %v1359_v27  ;;  %v1391_v35 = vsel %vm470_vm0, %v1387_v29, %v1390_v30  ;;  %1395 = vst.msk [vmem:[%s427_s26 + $0x8] sm:$0x7] %vm1394_vm12, %v1388_v32 }
 0x2e8   : > { %v1346_v36 = vmul.f32 %v1651_v22, %v1345_v31  ;;  %1393 = vst [vmem:[%s427_s26] sm:$0x77] %v1391_v35 }
 0x2e9   : > { %v1361_v39 = vmul.f32 %v1653_v23, %v1360_v34 }
 0x2ea   : > { %v1347_v41 = vadd.f32 %v1651_v22, %v1346_v36 }
 0x2eb   : > { %v1362_v44 = vadd.f32 %v1653_v23, %v1361_v39 }
 0x2ec   : > { %v1351_v45 = vsel %vm1350_vm2, %v1651_v22, %v1347_v41 }
 0x2ed   : > { %v1356_v48 = vsel %vm1353_vm5, %v1355_v43, %v1351_v45  ;;  %v1366_v49 = vsel %vm1365_vm6, %v1653_v23, %v1362_v44 }
 0x2ee   : > { %v1357_v50 = vmul.f32 %v1356_v48, %v1259_v42  ;;  %v1371_v51 = vsel %vm1368_vm7, %v1370_v47, %v1366_v49 }
 0x2ef   : > { %v1372_v52 = vmul.f32 %v1371_v51, %v1260_v46 }
 0x2f0   : > { %v1373_v53 = vmax.f32 %v1357_v50, 0.0 }
 0x2f1   : > { %v1374_v54 = vmax.f32 %v1372_v52, 0.0 }
 0x2f2   : > { %v1375_v55 = vmin.f32 %v1373_v53, 1.0 }
 0x2f3   : > { %v1376_v56 = vmin.f32 %v1374_v54, 1.0 }
 0x2f4   : > { %1398 = vst [vmem:[#allocation1] ss:$2 sm:$0xff] %v1375_v55 }
 0x2f5   : > { %1400 = vst [vmem:[#allocation1 + $0x10] ss:$2 sm:$0xff] %v1376_v56 }
 0x2fb   : > { %v1401_v57 = vld.sshfl [vmem:[#allocation1] sm:$0xff pattern:$0x75316420]  ;;  %v1402_v58 = vld.sshfl [vmem:[#allocation1 + $0x8] sm:$0xff pattern:$0x75316420] }
 0x2fc   : > { %v1406_v59 = vsel %vm489_vm1, 0.0, %v1401_v57  ;;  %v1409_v60 = vrot.slane %v1402_v58, 4  ;;  %v1403_v61 = vld.sshfl [vmem:[#allocation1 + $0x10] sm:$0xff pattern:$0x75316420] }
 0x2fd   : > { %v1407_v62 = vsel %vm496_vm3, %v1403_v61, 0.0 }
 0x2fe   : > { %v1410_v63 = vsel %vm470_vm0, %v1406_v59, %v1409_v60  ;;  %1413 = vst.msk [vmem:[%s432_s14 + $0x8] sm:$0x7] %vm1394_vm12, %v1407_v62 }
 0x2ff   : > { %1412 = vst [vmem:[%s432_s14] sm:$0x77] %v1410_v63 }
 0x300 PF: > { %s21_s13 = sadd.s32 1, %s1660_s13  }
 0x301   : > { %p18_p4 = scmp.ge.s32.totalorder %s21_s13, 4  }
 0x303   :  { %20 = sbr.rel (!%p18_p4) target bundleno = 1 (0x1), region = 119 }

// kernel: network_forward.37
= control target key start
LH: loop header
LB: loop body
LE: loop exit
PB: predicated region body
PF: predicated region fallthrough
CT: control target
= control target key end

     0   :  { %s1450_s15 = smov 0   ;;  %s1658_s0 = inlined_call_operand.vmem [shape: f32[1,286], index: 0, kind: input, shape index: {}]   ;;  %s1659_s1 = inlined_call_operand.vmem [shape: f32[2,3,324], index: 1, kind: input, shape index: {}]   ;;  %s1660_s2 = inlined_call_operand.vmem [shape: f32[9,16,3], index: 2, kind: input, shape index: {}]   ;;  %s1661_s3 = inlined_call_operand.vmem [shape: f32[2,16,286], index: 3, kind: output, shape index: {0}]   ;;  %s1662_s4 = inlined_call_operand.vmem [shape: f32[2,16,2], index: 4, kind: output, shape index: {1}]  }
   0x1 LB: > { %s1281_s16 = sadd.s32 4294967295, %s1415_s15   ;;  %p1285_p0 = scmp.ge.s32.totalorder %s1415_s15, 1  ;;  %s1415_s15 = sphi %s1450_s15, %s15_s15  }
   0x2   : > { %p165_p1 = scmp.lt.s32.totalorder %s1415_s15, 3 }
   0x4   : > { %p166_p2 = pnand %p1285_p0, %p165_p1 }
   0x5   : > { %p196_p3 = scmp.lt.s32.totalorder (!%p166_p2), %s1281_s16, 1  ;;  %s1417_s21 = smov (!%p166_p2), 127  }
   0x6   : > { %169 = sbr.rel (%p166_p2) target bundleno = 507 (0x1fb), region = 32  ;;  %s1418_s22 = smov (!%p166_p2), 126  }
   0x7   : > { %s1419_s23 = smov (!%p166_p2), 110   ;;  %s1420_s24 = smov (!%p166_p2), 109  }
   0x8   : > { %s1421_s25 = smov (!%p166_p2), 108   ;;  %s1422_s26 = smov (!%p166_p2), 92  }
   0x9   : > { %s1423_s27 = smov (!%p166_p2), 91   ;;  %s1424_s28 = smov (!%p166_p2), 90  }
   0xb   : > { %s1664_s16 = smov (!%p196_p3, %s1281_s16), 1  ;;  %vm243_vm0 = vcmask 1042432   ;;  %v1290_v30 = vld [vmem:[%s1660_s2 + $0x10] sm:$0xff]  ;;  %vm236_vm1 = vcmask 23552   ;;  %vm233_vm2 = vcmask 1039360   ;;  %vm421_vm3 = vcmask 1031168  }
   0xc   : > { %s1391_s17 = smul.u32 12, %s1664_s16  ;;  %v1291_v37 = vld [vmem:[%s1660_s2 + $0x18] sm:$0xff]  ;;  %v214_v39 = vld [vmem:[%s1660_s2] sm:$0xff]  ;;  %v215_v44 = vld [vmem:[%s1660_s2 + $0x8] sm:$0xff]  ;;  %vm526_vm4 = vcmask 900096   ;;  %vm631_vm5 = vcmask 891904  }
   0xd   : > { %v1310_v41 = vld [vmem:[%s1660_s2 + $0x20] sm:$0xff]  ;;  %v1311_v45 = vld [vmem:[%s1660_s2 + $0x28] sm:$0xff]  ;;  %v1321_v51 = vld [vmem:[%s1660_s2 + $0x30] sm:$0xff]  ;;  %vm736_vm6 = vcmask 883712   ;;  %vm841_vm7 = vcmask 752640   ;;  %vm946_vm8 = vcmask 744448  }
   0xe   : > { %s200_s20 = scalar_lea.vmem %s1659_s1, %s1391_s17  ;;  %v1322_v57 = vld [vmem:[%s1660_s2 + $0x38] sm:$0xff]  ;;  %v1332_v61 = vld [vmem:[%s1660_s2 + $0x40] sm:$0xff]  ;;  %vm1051_vm9 = vcmask 736256   ;;  %s1392_s17 = smul.u32 48, %s1664_s16  ;;  %vm1143_vm10 = vcmask 244736   ;;  %vm1171_vm11 = vcmask 7168  }
   0xf   : > { %v213_v0 = vld [vmem:[%s200_s20 + $0x8] sm:$0x7]  ;;  %v1464_v1 = vld [vmem:[%s200_s20] sm:$0x77]  ;;  %vm1190_vm12 = vcmask 15368  }
  0x10   : > { %223 = vst [vmem:[#allocation1 + $0x10] ss:$2 sm:$0xff] %v213_v0  ;;  %s1632_s20 = scalar_lea.vmem %s1661_s3, %s1392_s17 }
  0x11   : > { %221 = vst [vmem:[#allocation1] ss:$2 sm:$0xff] %v1464_v1 }
  0x17   : > { %v226_v2 = vld.sshfl [vmem:[#allocation1 + $0x10] sm:$0xff pattern:$0x75316420] }
  0x18   : > { %231 = vrot.lane.b32.xlu0 %v226_v2, %s1417_s21  ;;  %321 = vst [vmem:[#allocation1 + $0x10] ss:$2 sm:$0xff] %v213_v0  ;;  %v225_v3 = vld.sshfl [vmem:[#allocation1 + $0x8] sm:$0xff pattern:$0x75316420] }
  0x19   : > { %v224_v4 = vld.sshfl [vmem:[#allocation1] sm:$0xff pattern:$0x75316420] }
  0x1a   : > { %227 = vrot.lane.b32.xlu1 %v224_v4, %s1417_s21  ;;  %319 = vst [vmem:[#allocation1] ss:$2 sm:$0xff] %v1464_v1  ;;  %v1333_v4 = vld [vmem:[%s1660_s2 + $0x48] sm:$0xff] }
  0x1f   : > { %v1468_v5 = vld.sshfl [vmem:[#allocation1 + $0x10] sm:$0xff pattern:$0x75316420] }
  0x20   : > { %229 = vrot.lane.b32.xlu0 %v225_v3, %s1417_s21  ;;  %411 = vst [vmem:[#allocation1 + $0x10] ss:$2 sm:$0xff] %v213_v0 }
  0x21   : > { %v1470_v6 = vld.sshfl [vmem:[#allocation1] sm:$0xff pattern:$0x75316420]  ;;  %v1472_v7 = vld.sshfl [vmem:[#allocation1 + $0x8] sm:$0xff pattern:$0x75316420] }
  0x22   : > { %409 = vst [vmem:[#allocation1] ss:$2 sm:$0xff] %v1464_v1 }
  0x27   : > { %v414_v8 = vld.sshfl [vmem:[#allocation1 + $0x10] sm:$0xff pattern:$0x75316420] }
  0x28   : > { %516 = vst [vmem:[#allocation1 + $0x10] ss:$2 sm:$0xff] %v213_v0 }
  0x29   : > { %v412_v9 = vld.sshfl [vmem:[#allocation1] sm:$0xff pattern:$0x75316420]  ;;  %v413_v10 = vld.sshfl [vmem:[#allocation1 + $0x8] sm:$0xff pattern:$0x75316420] }
  0x2a   : > { %415 = vrot.lane.b32.xlu1 %v412_v9, %s1418_s22  ;;  %417 = vrot.lane.b32.xlu2 %v413_v10, %s1418_s22  ;;  %514 = vst [vmem:[#allocation1] ss:$2 sm:$0xff] %v1464_v1  ;;  %v1343_v10 = vld [vmem:[%s1660_s2 + $0x50] sm:$0xff] }
  0x2f   : > { %v519_v11 = vld.sshfl [vmem:[#allocation1 + $0x10] sm:$0xff pattern:$0x75316420] }
  0x30   : > { %621 = vst [vmem:[#allocation1 + $0x10] ss:$2 sm:$0xff] %v213_v0 }
  0x31   : > { %v518_v12 = vld.sshfl [vmem:[#allocation1 + $0x8] sm:$0xff pattern:$0x75316420]  ;;  %v517_v13 = vld.sshfl [vmem:[#allocation1] sm:$0xff pattern:$0x75316420] }
  0x32   : > { %524 = vrot.lane.b32.xlu1 %v519_v11, %s1419_s23  ;;  %522 = vrot.lane.b32.xlu0 %v518_v12, %s1419_s23  ;;  %619 = vst [vmem:[#allocation1] ss:$2 sm:$0xff] %v1464_v1  ;;  %v1354_v12 = vld [vmem:[%s1660_s2 + $0x60] sm:$0xff] }
  0x33   : > { %419 = vrot.lane.b32.xlu2 %v414_v8, %s1418_s22 }
  0x37   : > { %v624_v14 = vld.sshfl [vmem:[#allocation1 + $0x10] sm:$0xff pattern:$0x75316420] }
  0x38   : > { %726 = vst [vmem:[#allocation1 + $0x10] ss:$2 sm:$0xff] %v213_v0 }
  0x39   : > { %v623_v15 = vld.sshfl [vmem:[#allocation1 + $0x8] sm:$0xff pattern:$0x75316420]  ;;  %v622_v16 = vld.sshfl [vmem:[#allocation1] sm:$0xff pattern:$0x75316420] }
  0x3a   : > { %625 = vrot.lane.b32.xlu1 %v622_v16, %s1420_s24  ;;  %724 = vst [vmem:[#allocation1] ss:$2 sm:$0xff] %v1464_v1  ;;  %629 = vrot.lane.b32.xlu0 %v624_v14, %s1420_s24  ;;  %v1344_v16 = vld [vmem:[%s1660_s2 + $0x58] sm:$0xff] }
  0x3b   : > { %520 = vrot.lane.b32.xlu2 %v517_v13, %s1419_s23  ;;  %s1389_s23 = sshll.u32 %s1664_s16, 4 }
  0x3f   : > { %v729_v17 = vld.sshfl [vmem:[#allocation1 + $0x10] sm:$0xff pattern:$0x75316420] }
  0x40   : > { %831 = vst [vmem:[#allocation1 + $0x10] ss:$2 sm:$0xff] %v213_v0 }
  0x41   : > { %v728_v18 = vld.sshfl [vmem:[#allocation1 + $0x8] sm:$0xff pattern:$0x75316420]  ;;  %v727_v19 = vld.sshfl [vmem:[#allocation1] sm:$0xff pattern:$0x75316420] }
  0x42   : > { %732 = vrot.lane.b32.xlu1 %v728_v18, %s1421_s25  ;;  %730 = vrot.lane.b32.xlu0 %v727_v19, %s1421_s25  ;;  %829 = vst [vmem:[#allocation1] ss:$2 sm:$0xff] %v1464_v1  ;;  %v1365_v19 = vld [vmem:[%s1660_s2 + $0x70] sm:$0xff] }
  0x43   : > { %627 = vrot.lane.b32.xlu2 %v623_v15, %s1420_s24 }
  0x47   : > { %v834_v20 = vld.sshfl [vmem:[#allocation1 + $0x10] sm:$0xff pattern:$0x75316420] }
  0x48   : > { %936 = vst [vmem:[#allocation1 + $0x10] ss:$2 sm:$0xff] %v213_v0 }
  0x49   : > { %v833_v21 = vld.sshfl [vmem:[#allocation1 + $0x8] sm:$0xff pattern:$0x75316420]  ;;  %v832_v22 = vld.sshfl [vmem:[#allocation1] sm:$0xff pattern:$0x75316420] }
  0x4a   : > { %734 = vrot.lane.b32.xlu1 %v729_v17, %s1421_s25  ;;  %837 = vrot.lane.b32.xlu0 %v833_v21, %s1422_s26  ;;  %934 = vst [vmem:[#allocation1] ss:$2 sm:$0xff] %v1464_v1  ;;  %v1355_v17 = vld [vmem:[%s1660_s2 + $0x68] sm:$0xff]  ;;  %v1376_v21 = vld [vmem:[%s1660_s2 + $0x80] sm:$0xff] }
  0x4b   : > { %835 = vrot.lane.b32.xlu2 %v832_v22, %s1422_s26  ;;  %v1377_v22 = vld [vmem:[%s1660_s2 + $0x88] sm:$0xff] }
  0x4f   : > { %v939_v23 = vld.sshfl [vmem:[#allocation1 + $0x10] sm:$0xff pattern:$0x75316420] }
  0x50   : > { %1041 = vst [vmem:[#allocation1 + $0x10] ss:$2 sm:$0xff] %v213_v0 }
  0x51   : > { %v938_v24 = vld.sshfl [vmem:[#allocation1 + $0x8] sm:$0xff pattern:$0x75316420]  ;;  %v937_v25 = vld.sshfl [vmem:[#allocation1] sm:$0xff pattern:$0x75316420] }
  0x52   : > { %944 = vrot.lane.b32.xlu1 %v939_v23, %s1423_s27  ;;  %942 = vrot.lane.b32.xlu0 %v938_v24, %s1423_s27  ;;  %1039 = vst [vmem:[#allocation1] ss:$2 sm:$0xff] %v1464_v1 }
  0x53   : > { %839 = vrot.lane.b32.xlu2 %v834_v20, %s1422_s26  ;;  %v1366_v20 = vld [vmem:[%s1660_s2 + $0x78] sm:$0xff]  ;;  %s210_s26 = scalar_lea.vmem %s1662_s4, %s1389_s23 }
  0x57   : > { %v1044_v26 = vld.sshfl [vmem:[#allocation1 + $0x10] sm:$0xff pattern:$0x75316420] }
  0x59   : > { %v1042_v27 = vld.sshfl [vmem:[#allocation1] sm:$0xff pattern:$0x75316420]  ;;  %v1043_v28 = vld.sshfl [vmem:[#allocation1 + $0x8] sm:$0xff pattern:$0x75316420] }
  0x5a   : > { %1045 = vrot.lane.b32.xlu1 %v1042_v27, %s1424_s28  ;;  %1049 = vrot.lane.b32.xlu0 %v1044_v26, %s1424_s28 }
  0x5b   : > { %940 = vrot.lane.b32.xlu2 %v937_v25, %s1423_s27 }
  0x63   : > { %1047 = vrot.lane.b32.xlu2 %v1043_v28, %s1424_s28 }
  0x84   : > { %v418_v29 = vpop.permute.xlu2 %417 }
  0x8a   : > { %v232_v31 = vpop.permute.xlu0 %231 }
  0x8b   : > { %1298 = vmatpush.msk.msra.mxu2 %vm243_vm0, %v232_v31 }
  0x8c   : > { %1299 = vmatmul.msk.f32.vlgmr.msra.gmra.mxu2 %vm236_vm1, %v1290_v30  ;;  %v228_v32 = vpop.permute.xlu1 %227 }
  0x8d   : > { %v420_v34 = vpop.permute.xlu2 %419 }
  0x8e   : > { %v423_v38 = vsel %vm421_vm3, %v418_v29, %v420_v34 }
  0x92   : > { %v230_v33 = vpop.permute.xlu0 %229 }
  0x93   : > { %v234_v35 = vsel %vm233_vm2, %v228_v32, %v230_v33  ;;  %v235_v36 = vsel %vm233_vm2, %v230_v33, %v232_v31 }
  0x94   : > { %1292 = vmatpush.msk.msra.mxu0 %vm243_vm0, %v234_v35  ;;  %1390 = vmatpush.msk.msra.mxu3 %vm243_vm0, %v234_v35 }
  0x95   : > { %1295 = vmatpush.msk.msra.mxu1 %vm243_vm0, %v235_v36  ;;  %1293 = vmatmul.msk.f32.vlgmr.msra.gmra.mxu0 %vm236_vm1, %v1290_v30  ;;  %v521_v43 = vpop.permute.xlu2 %520 }
  0x96   : > { %1294 = vmatmul.msk.f32.vlgmr.msra.gmra.mxu3 %vm236_vm1, %v1291_v37  ;;  %1296 = vmatmul.msk.f32.vlgmr.msra.gmra.mxu1 %vm236_vm1, %v1290_v30 }
  0x97   : > { %1300 = vmatmul.msk.f32.gmra.mxu2 %vm236_vm1, %v1291_v37  ;;  %1301 = vmatpush.msk.msrb.mxu3 %vm243_vm0, %v1470_v6 }
  0x98   : > { %1304 = vmatpush.msk.msrb.mxu0 %vm243_vm0, %v1472_v7  ;;  %1307 = vmatpush.msk.msrb.mxu1 %vm243_vm0, %v1468_v5 }
  0x99   : > { %1315 = vmatpush.msk.msra.mxu3 %vm243_vm0, %v423_v38 }
  0x9a   : > { %1318 = vmatpush.msk.msra.mxu0 %vm243_vm0, %v420_v34 }
  0x9c   : > { %v416_v40 = vpop.permute.xlu1 %415 }
  0x9d   : > { %v422_v42 = vsel %vm421_vm3, %v416_v40, %v418_v29  ;;  %1305 = vmatmul.msk.f32.vlgmr.msrb.gmra.mxu0 %vm236_vm1, %v214_v39  ;;  %v628_v50 = vpop.permute.xlu2 %627 }
  0x9e   : > { %1312 = vmatpush.msk.msrb.mxu2 %vm243_vm0, %v422_v42  ;;  %1297 = vmatmul.msk.f32.gmra.mxu1 %vm236_vm1, %v1291_v37 }
  0x9f   : > { %1302 = vmatmul.msk.f32.vlgmr.msrb.gmra.mxu3 %vm236_vm1, %v214_v39  ;;  %1313 = vmatmul.msk.f32.vlgmr.msrb.gmra.mxu2 %vm236_vm1, %v1310_v41 }
  0xa4   : > { %v525_v46 = vpop.permute.xlu1 %524  ;;  %v523_v47 = vpop.permute.xlu0 %522 }
  0xa5   : > { %1306 = vmatmul.msk.f32.gmra.mxu0 %vm236_vm1, %v215_v44  ;;  %v528_v48 = vsel %vm526_vm4, %v523_v47, %v525_v46  ;;  %v527_v49 = vsel %vm526_vm4, %v521_v43, %v523_v47  ;;  %1329 = vmatpush.msk.msrb.mxu3 %vm243_vm0, %v525_v46  ;;  %v836_v56 = vpop.permute.xlu2 %835 }
  0xa6   : > { %1308 = vmatmul.msk.f32.vlgmr.msrb.gmra.mxu1 %vm236_vm1, %v214_v39  ;;  %1326 = vmatpush.msk.msra.mxu2 %vm243_vm0, %v528_v48 }
  0xa7   : > { %1303 = vmatmul.msk.f32.gmra.mxu3 %vm236_vm1, %v215_v44  ;;  %1314 = vmatmul.msk.f32.gmra.mxu2 %vm236_vm1, %v1311_v45 }
  0xa8   : > { %1323 = vmatpush.msk.msra.mxu1 %vm243_vm0, %v527_v49 }
  0xac   : > { %v626_v52 = vpop.permute.xlu1 %625  ;;  %v630_v53 = vpop.permute.xlu0 %629 }
  0xad   : > { %1319 = vmatmul.msk.f32.vlgmr.msra.gmra.mxu0 %vm236_vm1, %v1310_v41  ;;  %v632_v54 = vsel %vm631_vm5, %v626_v52, %v628_v50  ;;  %v633_v55 = vsel %vm631_vm5, %v628_v50, %v630_v53  ;;  %1340 = vmatpush.msk.msrb.mxu2 %vm243_vm0, %v630_v53  ;;  %v840_v62 = vpop.permute.xlu2 %839 }
  0xae   : > { %1309 = vmatmul.msk.f32.gmra.mxu1 %vm236_vm1, %v215_v44  ;;  %1334 = vmatpush.msk.msrb.mxu0 %vm243_vm0, %v632_v54 }
  0xaf   : > { %1316 = vmatmul.msk.f32.vlgmr.msra.gmra.mxu3 %vm236_vm1, %v1310_v41  ;;  %1327 = vmatmul.msk.f32.vlgmr.msra.gmra.mxu2 %vm236_vm1, %v1321_v51 }
  0xb0   : > { %1337 = vmatpush.msk.msrb.mxu1 %vm243_vm0, %v633_v55 }
  0xb4   : > { %v733_v58 = vpop.permute.xlu1 %732  ;;  %v731_v59 = vpop.permute.xlu0 %730 }
  0xb5   : > { %1320 = vmatmul.msk.f32.gmra.mxu0 %vm236_vm1, %v1311_v45  ;;  %v737_v60 = vsel %vm736_vm6, %v731_v59, %v733_v58  ;;  %v941_v5 = vpop.permute.xlu2 %940 }
  0xb6   : > { %1324 = vmatmul.msk.f32.vlgmr.msra.gmra.mxu1 %vm236_vm1, %v1321_v51  ;;  %1345 = vmatpush.msk.msra.mxu3 %vm243_vm0, %v737_v60 }
  0xb7   : > { %1317 = vmatmul.msk.f32.gmra.mxu3 %vm236_vm1, %v1311_v45  ;;  %1328 = vmatmul.msk.f32.gmra.mxu2 %vm236_vm1, %v1322_v57 }
  0xbc   : > { %v735_v63 = vpop.permute.xlu1 %734  ;;  %v838_v0 = vpop.permute.xlu0 %837 }
  0xbd   : > { %1335 = vmatmul.msk.f32.vlgmr.msrb.gmra.mxu0 %vm236_vm1, %v1332_v61  ;;  %v738_v1 = vsel %vm736_vm6, %v733_v58, %v735_v63  ;;  %v842_v2 = vsel %vm841_vm7, %v836_v56, %v838_v0  ;;  %v843_v3 = vsel %vm841_vm7, %v838_v0, %v840_v62  ;;  %1351 = vmatpush.msk.msra.mxu1 %vm243_vm0, %v735_v63  ;;  %v1048_v11 = vpop.permute.xlu2 %1047 }
  0xbe   : > { %1325 = vmatmul.msk.f32.gmra.mxu1 %vm236_vm1, %v1322_v57  ;;  %1348 = vmatpush.msk.msra.mxu0 %vm243_vm0, %v738_v1 }
  0xbf   : > { %1330 = vmatmul.msk.f32.vlgmr.msrb.gmra.mxu3 %vm236_vm1, %v1321_v51  ;;  %1341 = vmatmul.msk.f32.vlgmr.msrb.gmra.mxu2 %vm236_vm1, %v1332_v61 }
  0xc0   : > { %1356 = vmatpush.msk.msra.mxu2 %vm243_vm0, %v842_v2  ;;  %1359 = vmatpush.msk.msrb.mxu3 %vm243_vm0, %v843_v3 }
  0xc1   : > { %1362 = vmatpush.msk.msrb.mxu0 %vm243_vm0, %v840_v62 }
  0xc4   : > { %v945_v6 = vpop.permute.xlu1 %944  ;;  %v943_v7 = vpop.permute.xlu0 %942 }
  0xc5   : > { %1336 = vmatmul.msk.f32.gmra.mxu0 %vm236_vm1, %v1333_v4  ;;  %v948_v8 = vsel %vm946_vm8, %v943_v7, %v945_v6  ;;  %v947_v9 = vsel %vm946_vm8, %v941_v5, %v943_v7 }
  0xc6   : > { %1338 = vmatmul.msk.f32.vlgmr.msrb.gmra.mxu1 %vm236_vm1, %v1332_v61  ;;  %1370 = vmatpush.msk.msrb.mxu2 %vm243_vm0, %v948_v8 }
  0xc7   : > { %1331 = vmatmul.msk.f32.gmra.mxu3 %vm236_vm1, %v1322_v57  ;;  %1342 = vmatmul.msk.f32.gmra.mxu2 %vm236_vm1, %v1333_v4 }
  0xc8   : > { %1367 = vmatpush.msk.msrb.mxu1 %vm243_vm0, %v947_v9 }
  0xcc   : > { %v1046_v13 = vpop.permute.xlu1 %1045  ;;  %v1050_v15 = vpop.permute.xlu0 %1049 }
  0xcd   : > { %1349 = vmatmul.msk.f32.vlgmr.msra.gmra.mxu0 %vm236_vm1, %v1343_v10  ;;  %v1052_v14 = vsel %vm1051_vm9, %v1046_v13, %v1048_v11  ;;  %v1053_v18 = vsel %vm1051_vm9, %v1048_v11, %v1050_v15 }
  0xce   : > { %1339 = vmatmul.msk.f32.gmra.mxu1 %vm236_vm1, %v1333_v4  ;;  %1378 = vmatpush.msk.msra.mxu0 %vm243_vm0, %v1052_v14 }
  0xcf   : > { %1346 = vmatmul.msk.f32.vlgmr.msra.gmra.mxu3 %vm236_vm1, %v1343_v10  ;;  %1357 = vmatmul.msk.f32.vlgmr.msra.gmra.mxu2 %vm236_vm1, %v1354_v12 }
  0xd0   : > { %1373 = vmatpush.msk.msra.mxu3 %vm243_vm0, %v945_v6  ;;  %1384 = vmatpush.msk.msra.mxu2 %vm243_vm0, %v1050_v15 }
  0xd5   : > { %1350 = vmatmul.msk.f32.gmra.mxu0 %vm236_vm1, %v1344_v16 }
  0xd6   : > { %1352 = vmatmul.msk.f32.vlgmr.msra.gmra.mxu1 %vm236_vm1, %v1343_v10 }
  0xd7   : > { %1347 = vmatmul.msk.f32.gmra.mxu3 %vm236_vm1, %v1344_v16  ;;  %1358 = vmatmul.msk.f32.gmra.mxu2 %vm236_vm1, %v1355_v17 }
  0xd8   : > { %1381 = vmatpush.msk.msra.mxu1 %vm243_vm0, %v1053_v18 }
  0xdd   : > { %1363 = vmatmul.msk.f32.vlgmr.msrb.gmra.mxu0 %vm236_vm1, %v1354_v12 }
  0xde   : > { %1353 = vmatmul.msk.f32.gmra.mxu1 %vm236_vm1, %v1344_v16 }
  0xdf   : > { %1360 = vmatmul.msk.f32.vlgmr.msrb.gmra.mxu3 %vm236_vm1, %v1354_v12  ;;  %1371 = vmatmul.msk.f32.vlgmr.msrb.gmra.mxu2 %vm236_vm1, %v1365_v19 }
  0xe5   : > { %1364 = vmatmul.msk.f32.gmra.mxu0 %vm236_vm1, %v1355_v17 }
  0xe6   : > { %1368 = vmatmul.msk.f32.vlgmr.msrb.gmra.mxu1 %vm236_vm1, %v1365_v19 }
  0xe7   : > { %1361 = vmatmul.msk.f32.gmra.mxu3 %vm236_vm1, %v1355_v17  ;;  %1372 = vmatmul.msk.f32.gmra.mxu2 %vm236_vm1, %v1366_v20 }
  0xed   : > { %1379 = vmatmul.msk.f32.vlgmr.msra.gmra.mxu0 %vm236_vm1, %v1376_v21 }
  0xee   : > { %1369 = vmatmul.msk.f32.gmra.mxu1 %vm236_vm1, %v1366_v20 }
  0xef   : > { %1374 = vmatmul.msk.f32.vlgmr.msra.gmra.mxu3 %vm236_vm1, %v1365_v19  ;;  %1385 = vmatmul.msk.f32.vlgmr.msra.gmra.mxu2 %vm236_vm1, %v1376_v21 }
  0xf5   : > { %1380 = vmatmul.msk.f32.gmra.mxu0 %vm236_vm1, %v1377_v22 }
  0xf6   : > { %1382 = vmatmul.msk.f32.vlgmr.msra.gmra.mxu1 %vm236_vm1, %v1376_v21 }
  0xf7   : > { %1375 = vmatmul.msk.f32.gmra.mxu3 %vm236_vm1, %v1366_v20  ;;  %1386 = vmatmul.msk.f32.gmra.mxu2 %vm236_vm1, %v1377_v22 }
  0xfe   : > { %1383 = vmatmul.msk.f32.gmra.mxu1 %vm236_vm1, %v1377_v22 }
 0x10f   : > { %v313_v23 = vpop.f32.mrf.mxu2 }
 0x112   : > { %v267_v24 = vpop.f32.mrf.mxu0 }
 0x113   : > { %v290_v25 = vpop.f32.mrf.mxu1 }
 0x119   : > { %v270_v26 = vpop.f32.mrf.mxu3 }
 0x11a   : > { %v316_v27 = vpop.f32.mrf.mxu2  ;;  %v377_v28 = vpop.f32.mrf.mxu0 }
 0x11b   : > { %v293_v29 = vpop.f32.mrf.mxu1  ;;  %v378_v30 = vadd.f32 %v377_v28, %v290_v25 }
 0x122   : > { %v354_v31 = vpop.f32.mrf.mxu3  ;;  %v380_v32 = vpop.f32.mrf.mxu0 }
 0x123   : > { %v381_v33 = vadd.f32 %v380_v32, %v293_v29  ;;  %v400_v34 = vpop.f32.mrf.mxu1  ;;  %v453_v35 = vpop.f32.mrf.mxu2  ;;  %v355_v62 = vadd.f32 %v354_v31, %v267_v24  ;;  %v211_v31 = vld [vmem:[%s1658_s0] sm:$0x7] }
 0x124   : > { %v401_v36 = vadd.f32 %v400_v34, %v313_v23 }
 0x125   : > { %v505_v3 = vadd.f32 %v453_v35, %v355_v62 }
 0x12a   : > { %v357_v37 = vpop.f32.mrf.mxu3  ;;  %v499_v38 = vpop.f32.mrf.mxu0 }
 0x12b   : > { %v403_v39 = vpop.f32.mrf.mxu1  ;;  %v456_v40 = vpop.f32.mrf.mxu2  ;;  %v358_v5 = vadd.f32 %v357_v37, %v270_v26  ;;  %v507_v14 = vadd.f32 %v499_v38, %v401_v36  ;;  %v1149_v38 = vperm.slane %v211_v31, 0 }
 0x12c   : > { %v404_v41 = vadd.f32 %v403_v39, %v316_v27 }
 0x12d   : > { %v508_v13 = vadd.f32 %v456_v40, %v358_v5 }
 0x132   : > { %v476_v42 = vpop.f32.mrf.mxu3  ;;  %v502_v43 = vpop.f32.mrf.mxu0 }
 0x133   : > { %v558_v44 = vpop.f32.mrf.mxu1  ;;  %v581_v45 = vpop.f32.mrf.mxu2  ;;  %v506_v12 = vadd.f32 %v476_v42, %v378_v30  ;;  %v510_v34 = vadd.f32 %v502_v43, %v404_v41  ;;  %v1151_v41 = vperm.slane %v211_v31, 2 }
 0x134   : > { %v610_v4 = vadd.f32 %v558_v44, %v505_v3 }
 0x135   : > { %v611_v17 = vadd.f32 %v581_v45, %v506_v12 }
 0x13a   : > { %v479_v46 = vpop.f32.mrf.mxu3  ;;  %v663_v47 = vpop.f32.mrf.mxu0 }
 0x13b   : > { %v561_v48 = vpop.f32.mrf.mxu1  ;;  %v584_v49 = vpop.f32.mrf.mxu2  ;;  %v715_v6 = vadd.f32 %v663_v47, %v610_v4  ;;  %v509_v28 = vadd.f32 %v479_v46, %v381_v33  ;;  %v1150_v47 = vperm.slane %v211_v31, 1 }
 0x13c   : > { %v613_v15 = vadd.f32 %v561_v48, %v508_v13 }
 0x13d   : > { %v614_v37 = vadd.f32 %v584_v49, %v509_v28 }
 0x142   : > { %v604_v50 = vpop.f32.mrf.mxu3  ;;  %v666_v51 = vpop.f32.mrf.mxu0 }
 0x143   : > { %v686_v52 = vpop.f32.mrf.mxu1  ;;  %v709_v53 = vpop.f32.mrf.mxu2  ;;  %v612_v18 = vadd.f32 %v604_v50, %v507_v14  ;;  %v718_v19 = vadd.f32 %v666_v51, %v613_v15 }
 0x144   : > { %v716_v21 = vadd.f32 %v686_v52, %v611_v17 }
 0x145   : > { %v717_v30 = vadd.f32 %v709_v53, %v612_v18 }
 0x14a   : > { %v607_v54 = vpop.f32.mrf.mxu3  ;;  %v791_v55 = vpop.f32.mrf.mxu0 }
 0x14b   : > { %v689_v56 = vpop.f32.mrf.mxu1  ;;  %v1624_v57 = vpop.f32.mrf.mxu2  ;;  %v821_v29 = vadd.f32 %v791_v55, %v716_v21  ;;  %v615_v39 = vadd.f32 %v607_v54, %v510_v34 }
 0x14c   : > { %v719_v44 = vadd.f32 %v689_v56, %v614_v37 }
 0x14d   : > { %v720_v54 = vadd.f32 %v1624_v57, %v615_v39 }
 0x152   : > { %v768_v58 = vpop.f32.mrf.mxu3  ;;  %v794_v59 = vpop.f32.mrf.mxu0 }
 0x153   : > { %v814_v60 = vpop.f32.mrf.mxu1  ;;  %v873_v61 = vpop.f32.mrf.mxu2  ;;  %v820_v9 = vadd.f32 %v768_v58, %v715_v6  ;;  %v824_v43 = vadd.f32 %v794_v59, %v719_v44 }
 0x154   : > { %v822_v35 = vadd.f32 %v814_v60, %v717_v30 }
 0x155   : > { %v925_v16 = vadd.f32 %v873_v61, %v820_v9 }
 0x15a   : > { %v771_v63 = vpop.f32.mrf.mxu3  ;;  %v919_v0 = vpop.f32.mrf.mxu0 }
 0x15b   : > { %v1626_v1 = vpop.f32.mrf.mxu1  ;;  %v876_v2 = vpop.f32.mrf.mxu2  ;;  %v823_v24 = vadd.f32 %v771_v63, %v718_v19  ;;  %v927_v40 = vadd.f32 %v919_v0, %v822_v35 }
 0x15c   : > { %v825_v60 = vadd.f32 %v1626_v1, %v720_v54 }
 0x15d   : > { %v928_v36 = vadd.f32 %v876_v2, %v823_v24 }
 0x162   : > { %v896_v7 = vpop.f32.mrf.mxu3  ;;  %v922_v8 = vpop.f32.mrf.mxu0 }
 0x163   : > { %v978_v10 = vpop.f32.mrf.mxu1  ;;  %v1001_v11 = vpop.f32.mrf.mxu2  ;;  %v926_v32 = vadd.f32 %v896_v7, %v821_v29  ;;  %v930_v2 = vadd.f32 %v922_v8, %v825_v60 }
 0x164   : > { %v1030_v20 = vadd.f32 %v978_v10, %v925_v16 }
 0x165   : > { %v1031_v45 = vadd.f32 %v1001_v11, %v926_v32 }
 0x16a   : > { %v899_v22 = vpop.f32.mrf.mxu3  ;;  %v1083_v23 = vpop.f32.mrf.mxu0 }
 0x16b   : > { %v981_v25 = vpop.f32.mrf.mxu1  ;;  %v1004_v26 = vpop.f32.mrf.mxu2  ;;  %v1135_v27 = vadd.f32 %v1083_v23, %v1030_v20  ;;  %v929_v56 = vadd.f32 %v899_v22, %v824_v43 }
 0x16c   : > { %v1033_v42 = vadd.f32 %v981_v25, %v928_v36 }
 0x16d   : > { %1141 = vst [vmem:[%s1632_s20] sm:$0xff] %v1135_v27  ;;  %v1155_v53 = vmul.f32 %v1149_v38, %v1135_v27  ;;  %v1034_v4 = vadd.f32 %v1004_v26, %v929_v56 }
 0x16f   : > { %v1174_v62 = vmul.f32 %v1155_v53, %v1135_v27 }
 0x172   : > { %v1024_v33 = vpop.f32.mrf.mxu3  ;;  %v1086_v46 = vpop.f32.mrf.mxu0 }
 0x173   : > { %v1032_v48 = vadd.f32 %v1024_v33, %v927_v40  ;;  %v1138_v50 = vadd.f32 %v1086_v46, %v1033_v42  ;;  %v1106_v51 = vpop.f32.mrf.mxu1  ;;  %v1129_v52 = vpop.f32.mrf.mxu2 }
 0x174   : > { %v1136_v49 = vadd.f32 %v1106_v51, %v1031_v45 }
 0x175   : > { %1145 = vst [vmem:[%s1632_s20 + $0x18] sm:$0xff] %v1138_v50  ;;  %v1137_v55 = vadd.f32 %v1129_v52, %v1032_v48  ;;  %v1158_v11 = vmul.f32 %v1149_v38, %v1138_v50 }
 0x176   : > { %1142 = vst [vmem:[%s1632_s20 + $0x8] sm:$0xff] %v1136_v49  ;;  %v1156_v58 = vmul.f32 %v1150_v47, %v1136_v49 }
 0x177   : > { %1144 = vst.msk [vmem:[%s1632_s20 + $0x10] sm:$0xff] %vm1143_vm10, %v1137_v55  ;;  %v1157_v61 = vmul.f32 %v1151_v41, %v1137_v55  ;;  %v1177_v16 = vmul.f32 %v1158_v11, %v1138_v50 }
 0x178   : > { %v1175_v63 = vmul.f32 %v1156_v58, %v1136_v49  ;;  %v1161_v0 = vadd.f32 %v1156_v58, %v1155_v53 }
 0x179   : > { %v1162_v59 = vsel %vm1143_vm10, %v1157_v61, 0.0  ;;  %v1176_v3 = vmul.f32 %v1157_v61, %v1137_v55 }
 0x17a   : > { %v1027_v57 = vpop.f32.mrf.mxu3  ;;  %v1163_v5 = vadd.f32 %v1162_v59, %v1161_v0  ;;  %v1180_v6 = vadd.f32 %v1175_v63, %v1174_v62 }
 0x17b   : > { %v1035_v7 = vadd.f32 %v1027_v57, %v930_v2  ;;  %v1109_v9 = vpop.f32.mrf.mxu1  ;;  %v1132_v10 = vpop.f32.mrf.mxu2  ;;  %v1181_v1 = vsel %vm1143_vm10, %v1176_v3, 0.0 }
 0x17c   : > { %v1139_v12 = vadd.f32 %v1109_v9, %v1034_v4  ;;  %1164 = vadd.xlane.f32.xlu0 %v1163_v5  ;;  %v1182_v13 = vadd.f32 %v1181_v1, %v1180_v6 }
 0x17d   : > { %v1140_v14 = vadd.f32 %v1132_v10, %v1035_v7 }
 0x17e   : > { %1146 = vst [vmem:[%s1632_s20 + $0x20] sm:$0xff] %v1139_v12  ;;  %v1159_v8 = vmul.f32 %v1150_v47, %v1139_v12  ;;  %1183 = vadd.xlane.f32.xlu2 %v1182_v13 }
 0x17f   : > { %1147 = vst.msk [vmem:[%s1632_s20 + $0x28] sm:$0xff] %vm1143_vm10, %v1140_v14  ;;  %v1160_v15 = vmul.f32 %v1151_v41, %v1140_v14 }
 0x180   : > { %v1178_v17 = vmul.f32 %v1159_v8, %v1139_v12  ;;  %v1166_v18 = vadd.f32 %v1159_v8, %v1158_v11 }
 0x181   : > { %v1167_v19 = vsel %vm1143_vm10, %v1160_v15, 0.0  ;;  %v1179_v20 = vmul.f32 %v1160_v15, %v1140_v14 }
 0x182   : > { %v1168_v21 = vadd.f32 %v1167_v19, %v1166_v18  ;;  %v1185_v22 = vadd.f32 %v1178_v17, %v1177_v16 }
 0x183   : > { %v1186_v23 = vsel %vm1143_vm10, %v1179_v20, 0.0 }
 0x184   : > { %1169 = vadd.xlane.f32.xlu1 %v1168_v21  ;;  %v1187_v24 = vadd.f32 %v1186_v23, %v1185_v22 }
 0x186   : > { %1188 = vadd.xlane.f32.xlu2 %v1187_v24 }
 0x1ef   : > { %v1165_v25 = vpop.xlane.xlu0 %1164 }
 0x1f0   : > { %1172 = vst.msk [vmem:[%s210_s26] sm:$0xff] %vm1171_vm11, %v1165_v25 }
 0x1f1   : > { %v1184_v26 = vpop.xlane.xlu2 %1183 }
 0x1f2   : > { %1191 = vst.msk [vmem:[%s210_s26] sm:$0xff] %vm1190_vm12, %v1184_v26 }
 0x1f7   : > { %v1170_v27 = vpop.xlane.xlu1 %1169 }
 0x1f8   : > { %1173 = vst.msk [vmem:[%s210_s26 + $0x8] sm:$0xff] %vm1171_vm11, %v1170_v27 }
 0x1f9   : > { %v1189_v28 = vpop.xlane.xlu2 %1188 }
 0x1fa   : > { %1192 = vst.msk [vmem:[%s210_s26 + $0x8] sm:$0xff] %vm1190_vm12, %v1189_v28 }
 0x1fb PF: > { %s15_s15 = sadd.s32 1, %s1415_s15  }
 0x1fc   : > { %p12_p4 = scmp.ge.s32.totalorder %s15_s15, 4  }
 0x1fe   :  { %14 = sbr.rel (!%p12_p4) target bundleno = 1 (0x1), region = 91 }

// kernel: network_forward.38
= control target key start
LH: loop header
LB: loop body
LE: loop exit
PB: predicated region body
PF: predicated region fallthrough
CT: control target
= control target key end

     0   :  { %s413_s15 = smov 0   ;;  %s458_s0 = inlined_call_operand.vmem [shape: f32[1,286], index: 0, kind: input, shape index: {}]   ;;  %s459_s1 = inlined_call_operand.vmem [shape: f32[2,16,286], index: 1, kind: input, shape index: {}]   ;;  %s460_s2 = inlined_call_operand.vmem [shape: f32[16,1], index: 2, kind: input, shape index: {}]   ;;  %s461_s3 = inlined_call_operand.vmem [shape: f32[16,1], index: 3, kind: input, shape index: {}]   ;;  %s462_s4 = inlined_call_operand.vmem [shape: f32[2,16,324], index: 4, kind: output, shape index: {}]  }
   0x1 LB: > { %s356_s16 = sadd.s32 4294967295, %s384_s15   ;;  %p360_p0 = scmp.ge.s32.totalorder %s384_s15, 1  ;;  %s384_s15 = sphi %s413_s15, %s14_s15  }
   0x2   : > { %p162_p1 = scmp.lt.s32.totalorder %s384_s15, 3 }
   0x4   : > { %p163_p2 = pnand %p360_p0, %p162_p1 }
   0x5   : > { %p188_p3 = scmp.lt.s32.totalorder (!%p163_p2), %s356_s16, 1  ;;  %s387_s5 = smov (!%p163_p2), 19  }
   0x6   : > { %166 = sbr.rel (%p163_p2) target bundleno = 270 (0x10e), region = 36 }
   0xb   : > { %v207_v0 = vld [vmem:[%s461_s3] sm:$0xff]  ;;  %v386_v2 = vmov 0   ;;  %v208_v3 = vld [vmem:[%s461_s3 + $0x8] sm:$0xff]  ;;  %s464_s16 = smov (!%p188_p3, %s356_s16), 1  ;;  %vm278_vm0 = vcmask 154624   ;;  %vm291_vm1 = vcmask 400384  }
   0xc   : > { %v205_v1 = vld [vmem:[%s460_s2] sm:$0xff]  ;;  %377 = vset.pattern.permute.xlu1 %v386_v2  ;;  %376 = vset.pattern.permute.xlu0 %v386_v2  ;;  %v206_v4 = vld [vmem:[%s460_s2 + $0x8] sm:$0xff]  ;;  %s365_s25 = smul.u32 48, %s464_s16  ;;  %vm296_vm2 = vcmask 556032  }
   0xd   : > { %227 = vperm.xlu1 %377, %v207_v0   ;;  %211 = vperm.xlu0 %376, %v205_v1   ;;  %v198_v8 = vld [vmem:[%s458_s0] sm:$0x7] }
   0xe   : > { %s192_s28 = scalar_lea.vmem %s459_s1, %s365_s25  ;;  %v249_v12 = vperm.slane %v198_v8, 1  ;;  %v250_v29 = vperm.slane %v198_v8, 2  ;;  %v248_v39 = vperm.slane %v198_v8, 0  ;;  %s197_s8 = scalar_lea.vmem %s462_s4, %s365_s25 }
   0xf   : > { %v200_v5 = vld [vmem:[%s192_s28 + $0x8] sm:$0xff]  ;;  %v201_v9 = vld [vmem:[%s192_s28 + $0x10] sm:$0xff]  ;;  %v203_v15 = vld [vmem:[%s192_s28 + $0x20] sm:$0xff] }
  0x10   : > { %v204_v16 = vld [vmem:[%s192_s28 + $0x28] sm:$0xff]  ;;  %v202_v20 = vld [vmem:[%s192_s28 + $0x18] sm:$0xff]  ;;  %v199_v21 = vld [vmem:[%s192_s28] sm:$0xff] }
  0x15   : > { %232 = vperm.xlu1 %377, %v208_v3   ;;  %216 = vperm.xlu0 %376, %v206_v4  }
  0x7f   : > { %v228_v6 = vpop.permute.xlu1 %227  ;;  %v212_v7 = vpop.permute.xlu0 %211 }
  0x80   : > { %v220_v10 = vmul.f32 %v212_v7, %v200_v5  ;;  %v221_v13 = vmul.f32 %v212_v7, %v201_v9  ;;  %v219_v28 = vmul.f32 %v212_v7, %v199_v21 }
  0x82   : > { %v236_v11 = vadd.f32 %v228_v6, %v220_v10  ;;  %v237_v18 = vadd.f32 %v228_v6, %v221_v13  ;;  %v235_v36 = vadd.f32 %v228_v6, %v219_v28 }
  0x84   : > { %v242_v14 = vmax.f32 %v236_v11, 0.0  ;;  %v243_v30 = vmax.f32 %v237_v18, 0.0  ;;  %v241_v40 = vmax.f32 %v235_v36, 0.0 }
  0x86   : > { %v255_v17 = vmul.f32 %v249_v12, %v242_v14  ;;  %v256_v37 = vmul.f32 %v250_v29, %v243_v30  ;;  %v254_v42 = vmul.f32 %v248_v39, %v241_v40 }
  0x87   : > { %v217_v19 = vpop.permute.xlu0 %216  ;;  %v233_v24 = vpop.permute.xlu1 %232 }
  0x88   : > { %v223_v22 = vmul.f32 %v217_v19, %v203_v15  ;;  %v224_v23 = vmul.f32 %v217_v19, %v204_v16  ;;  %268 = vrot.lane.b32.xlu2 %v255_v17, %s387_s5  ;;  %v222_v25 = vmul.f32 %v217_v19, %v202_v20 }
  0x8a   : > { %v239_v26 = vadd.f32 %v233_v24, %v223_v22  ;;  %v240_v27 = vadd.f32 %v233_v24, %v224_v23  ;;  %v238_v33 = vadd.f32 %v233_v24, %v222_v25 }
  0x8c   : > { %v246_v31 = vmax.f32 %v240_v27, 0.0  ;;  %v245_v32 = vmax.f32 %v239_v26, 0.0  ;;  %v244_v38 = vmax.f32 %v238_v33, 0.0 }
  0x8e   : > { %v259_v34 = vmul.f32 %v250_v29, %v246_v31  ;;  %v258_v35 = vmul.f32 %v249_v12, %v245_v32  ;;  %v257_v41 = vmul.f32 %v248_v39, %v244_v38 }
  0x90   : > { %276 = vrot.lane.b32.xlu1 %v259_v34, %s387_s5  ;;  %274 = vrot.lane.b32.xlu0 %v258_v35, %s387_s5 }
  0x91   : > { %270 = vrot.lane.b32.xlu2 %v256_v37, %s387_s5 }
  0x98   : > { %272 = vrot.lane.b32.xlu0 %v257_v41, %s387_s5 }
  0x99   : > { %266 = vrot.lane.b32.xlu2 %v254_v42, %s387_s5 }
  0xe2   : > { %v269_v43 = vpop.permute.xlu2 %268 }
  0xeb   : > { %v271_v44 = vpop.permute.xlu2 %270 }
  0xec   : > { %v280_v45 = vsel %vm278_vm0, %v269_v43, %v271_v44 }
  0xed   : > { %v292_v46 = vsel %vm291_vm1, %v280_v45, 0.0 }
  0xee   : > { %297 = vst.msk [vmem:[%s197_s8 + $0x10] sm:$0xff] %vm296_vm2, %v292_v46 }
  0xf3   : > { %v267_v47 = vpop.permute.xlu2 %266 }
  0xf4   : > { %v279_v48 = vsel %vm278_vm0, %v267_v47, %v269_v43  ;;  %v289_v49 = vsel %vm278_vm0, 0.0, %v267_v47 }
  0xf5   : > { %294 = vst [vmem:[%s197_s8] sm:$0xff] %v289_v49 }
  0xf6   : > { %295 = vst [vmem:[%s197_s8 + $0x8] sm:$0xff] %v279_v48 }
 0x102   : > { %v277_v50 = vpop.permute.xlu1 %276  ;;  %v275_v51 = vpop.permute.xlu0 %274 }
 0x103   : > { %v282_v52 = vsel %vm278_vm0, %v275_v51, %v277_v50 }
 0x104   : > { %v293_v53 = vsel %vm291_vm1, %v282_v52, 0.0 }
 0x105   : > { %300 = vst.msk [vmem:[%s197_s8 + $0x28] sm:$0xff] %vm296_vm2, %v293_v53 }
 0x10a   : > { %v273_v54 = vpop.permute.xlu0 %272 }
 0x10b   : > { %v281_v55 = vsel %vm278_vm0, %v273_v54, %v275_v51  ;;  %v290_v56 = vsel %vm278_vm0, 0.0, %v273_v54 }
 0x10c   : > { %298 = vst [vmem:[%s197_s8 + $0x18] sm:$0xff] %v290_v56 }
 0x10d   : > { %299 = vst [vmem:[%s197_s8 + $0x20] sm:$0xff] %v281_v55 }
 0x10e PF: > { %s14_s15 = sadd.s32 1, %s384_s15  }
 0x10f   : > { %p11_p4 = scmp.ge.s32.totalorder %s14_s15, 4  }
 0x111   :  { %13 = sbr.rel (!%p11_p4) target bundleno = 1 (0x1), region = 66 }

// kernel: network_forward.41
= control target key start
LH: loop header
LB: loop body
LE: loop exit
PB: predicated region body
PF: predicated region fallthrough
CT: control target
= control target key end

     0   :  { %s490_s18 = smov 0   ;;  %s540_s0 = inlined_call_operand.vmem [shape: f32[1,286], index: 0, kind: input, shape index: {}]   ;;  %s541_s1 = inlined_call_operand.vmem [shape: f32[2,16,286], index: 1, kind: input, shape index: {}]   ;;  %s542_s2 = inlined_call_operand.vmem [shape: f32[16,1], index: 2, kind: input, shape index: {}]   ;;  %s543_s3 = inlined_call_operand.vmem [shape: f32[16,1], index: 3, kind: input, shape index: {}]   ;;  %s544_s4 = inlined_call_operand.vmem [shape: f32[2,16,324], index: 4, kind: input, shape index: {}]   ;;  %s545_s5 = inlined_call_operand.vmem [shape: f32[2,16,324], index: 5, kind: output, shape index: {}]  }
   0x1 LB: > { %s427_s19 = sadd.s32 4294967295, %s456_s18   ;;  %p431_p0 = scmp.ge.s32.totalorder %s456_s18, 1  ;;  %s456_s18 = sphi %s490_s18, %s15_s18  }
   0x2   : > { %p197_p1 = scmp.lt.s32.totalorder %s456_s18, 3 }
   0x4   : > { %p198_p2 = pnand %p431_p0, %p197_p1 }
   0x5   : > { %p230_p3 = scmp.lt.s32.totalorder (!%p198_p2), %s427_s19, 1  ;;  %s459_s9 = smov (!%p198_p2), 19  }
   0x6   : > { %201 = sbr.rel (%p198_p2) target bundleno = 272 (0x110), region = 40 }
   0xb   : > { %v254_v0 = vld [vmem:[%s543_s3] sm:$0xff]  ;;  %v458_v2 = vmov 0   ;;  %v255_v3 = vld [vmem:[%s543_s3 + $0x8] sm:$0xff]  ;;  %s547_s19 = smov (!%p230_p3, %s427_s19), 1  ;;  %vm325_vm0 = vcmask 154624   ;;  %vm338_vm1 = vcmask 400384  }
   0xc   : > { %v252_v1 = vld [vmem:[%s542_s2] sm:$0xff]  ;;  %449 = vset.pattern.permute.xlu1 %v458_v2  ;;  %448 = vset.pattern.permute.xlu0 %v458_v2  ;;  %v253_v4 = vld [vmem:[%s542_s2 + $0x8] sm:$0xff]  ;;  %s510_s28 = smul.u32 48, %s547_s19  ;;  %vm355_vm2 = vcmask 556032  }
   0xd   : > { %274 = vperm.xlu1 %449, %v254_v0   ;;  %258 = vperm.xlu0 %448, %v252_v1   ;;  %v245_v8 = vld [vmem:[%s540_s0] sm:$0x7] }
   0xe   : > { %s234_s6 = scalar_lea.vmem %s541_s1, %s510_s28  ;;  %v296_v12 = vperm.slane %v245_v8, 1  ;;  %v297_v29 = vperm.slane %v245_v8, 2  ;;  %v295_v39 = vperm.slane %v245_v8, 0  ;;  %s239_s12 = scalar_lea.vmem %s544_s4, %s510_s28 }
   0xf   : > { %v247_v5 = vld [vmem:[%s234_s6 + $0x8] sm:$0xff]  ;;  %v248_v9 = vld [vmem:[%s234_s6 + $0x10] sm:$0xff]  ;;  %v250_v15 = vld [vmem:[%s234_s6 + $0x20] sm:$0xff]  ;;  %s244_s15 = scalar_lea.vmem %s545_s5, %s510_s28 }
  0x10   : > { %v251_v16 = vld [vmem:[%s234_s6 + $0x28] sm:$0xff]  ;;  %v249_v20 = vld [vmem:[%s234_s6 + $0x18] sm:$0xff]  ;;  %v246_v21 = vld [vmem:[%s234_s6] sm:$0xff] }
  0x11   : > { %v343_v44 = vld [vmem:[%s239_s12 + $0x10] sm:$0xff]  ;;  %v341_v49 = vld [vmem:[%s239_s12] sm:$0xff]  ;;  %v342_v50 = vld [vmem:[%s239_s12 + $0x8] sm:$0xff] }
  0x12   : > { %v346_v57 = vld [vmem:[%s239_s12 + $0x28] sm:$0xff]  ;;  %v344_v62 = vld [vmem:[%s239_s12 + $0x18] sm:$0xff]  ;;  %v345_v63 = vld [vmem:[%s239_s12 + $0x20] sm:$0xff] }
  0x15   : > { %279 = vperm.xlu1 %449, %v255_v3   ;;  %263 = vperm.xlu0 %448, %v253_v4  }
  0x7f   : > { %v275_v6 = vpop.permute.xlu1 %274  ;;  %v259_v7 = vpop.permute.xlu0 %258 }
  0x80   : > { %v267_v10 = vmul.f32 %v259_v7, %v247_v5  ;;  %v268_v13 = vmul.f32 %v259_v7, %v248_v9  ;;  %v266_v28 = vmul.f32 %v259_v7, %v246_v21 }
  0x82   : > { %v283_v11 = vadd.f32 %v275_v6, %v267_v10  ;;  %v284_v18 = vadd.f32 %v275_v6, %v268_v13  ;;  %v282_v36 = vadd.f32 %v275_v6, %v266_v28 }
  0x84   : > { %v289_v14 = vmax.f32 %v283_v11, 0.0  ;;  %v290_v30 = vmax.f32 %v284_v18, 0.0  ;;  %v288_v40 = vmax.f32 %v282_v36, 0.0 }
  0x86   : > { %v302_v17 = vmul.f32 %v296_v12, %v289_v14  ;;  %v303_v37 = vmul.f32 %v297_v29, %v290_v30  ;;  %v301_v42 = vmul.f32 %v295_v39, %v288_v40 }
  0x87   : > { %v264_v19 = vpop.permute.xlu0 %263  ;;  %v280_v24 = vpop.permute.xlu1 %279 }
  0x88   : > { %v270_v22 = vmul.f32 %v264_v19, %v250_v15  ;;  %v271_v23 = vmul.f32 %v264_v19, %v251_v16  ;;  %315 = vrot.lane.b32.xlu2 %v302_v17, %s459_s9  ;;  %v269_v25 = vmul.f32 %v264_v19, %v249_v20 }
  0x8a   : > { %v286_v26 = vadd.f32 %v280_v24, %v270_v22  ;;  %v287_v27 = vadd.f32 %v280_v24, %v271_v23  ;;  %v285_v33 = vadd.f32 %v280_v24, %v269_v25 }
  0x8c   : > { %v293_v31 = vmax.f32 %v287_v27, 0.0  ;;  %v292_v32 = vmax.f32 %v286_v26, 0.0  ;;  %v291_v38 = vmax.f32 %v285_v33, 0.0 }
  0x8e   : > { %v306_v34 = vmul.f32 %v297_v29, %v293_v31  ;;  %v305_v35 = vmul.f32 %v296_v12, %v292_v32  ;;  %v304_v41 = vmul.f32 %v295_v39, %v291_v38 }
  0x90   : > { %323 = vrot.lane.b32.xlu1 %v306_v34, %s459_s9  ;;  %321 = vrot.lane.b32.xlu0 %v305_v35, %s459_s9 }
  0x91   : > { %317 = vrot.lane.b32.xlu2 %v303_v37, %s459_s9 }
  0x98   : > { %319 = vrot.lane.b32.xlu0 %v304_v41, %s459_s9 }
  0x99   : > { %313 = vrot.lane.b32.xlu2 %v301_v42, %s459_s9 }
  0xe2   : > { %v316_v43 = vpop.permute.xlu2 %315 }
  0xeb   : > { %v318_v45 = vpop.permute.xlu2 %317 }
  0xec   : > { %v327_v46 = vsel %vm325_vm0, %v316_v43, %v318_v45 }
  0xed   : > { %v339_v47 = vsel %vm338_vm1, %v327_v46, 0.0 }
  0xee   : > { %v349_v48 = vadd.f32 %v343_v44, %v339_v47 }
  0xf0   : > { %356 = vst.msk [vmem:[%s244_s15 + $0x10] sm:$0xff] %vm355_vm2, %v349_v48 }
  0xf3   : > { %v314_v51 = vpop.permute.xlu2 %313 }
  0xf4   : > { %v326_v52 = vsel %vm325_vm0, %v314_v51, %v316_v43  ;;  %v336_v53 = vsel %vm325_vm0, 0.0, %v314_v51 }
  0xf5   : > { %v347_v54 = vadd.f32 %v341_v49, %v336_v53  ;;  %v348_v55 = vadd.f32 %v342_v50, %v326_v52 }
  0xf7   : > { %353 = vst [vmem:[%s244_s15] sm:$0xff] %v347_v54 }
  0xf8   : > { %354 = vst [vmem:[%s244_s15 + $0x8] sm:$0xff] %v348_v55 }
 0x102   : > { %v324_v56 = vpop.permute.xlu1 %323  ;;  %v322_v58 = vpop.permute.xlu0 %321 }
 0x103   : > { %v329_v59 = vsel %vm325_vm0, %v322_v58, %v324_v56 }
 0x104   : > { %v340_v60 = vsel %vm338_vm1, %v329_v59, 0.0 }
 0x105   : > { %v352_v61 = vadd.f32 %v346_v57, %v340_v60 }
 0x107   : > { %359 = vst.msk [vmem:[%s244_s15 + $0x28] sm:$0xff] %vm355_vm2, %v352_v61 }
 0x10a   : > { %v320_v0 = vpop.permute.xlu0 %319 }
 0x10b   : > { %v328_v1 = vsel %vm325_vm0, %v320_v0, %v322_v58  ;;  %v337_v2 = vsel %vm325_vm0, 0.0, %v320_v0 }
 0x10c   : > { %v350_v3 = vadd.f32 %v344_v62, %v337_v2  ;;  %v351_v4 = vadd.f32 %v345_v63, %v328_v1 }
 0x10e   : > { %357 = vst [vmem:[%s244_s15 + $0x18] sm:$0xff] %v350_v3 }
 0x10f   : > { %358 = vst [vmem:[%s244_s15 + $0x20] sm:$0xff] %v351_v4 }
 0x110 PF: > { %s15_s18 = sadd.s32 1, %s456_s18  }
 0x111   : > { %p12_p4 = scmp.ge.s32.totalorder %s15_s18, 4  }
 0x113   :  { %14 = sbr.rel (!%p12_p4) target bundleno = 1 (0x1), region = 73 }

// kernel: network_forward.39
= control target key start
LH: loop header
LB: loop body
LE: loop exit
PB: predicated region body
PF: predicated region fallthrough
CT: control target
= control target key end

     0   :  { %s1554_s15 = smov 0   ;;  %s1773_s0 = inlined_call_operand.vmem [shape: f32[1,286], index: 0, kind: input, shape index: {}]   ;;  %s1774_s1 = inlined_call_operand.vmem [shape: f32[2,16,324], index: 1, kind: input, shape index: {}]   ;;  %s1775_s2 = inlined_call_operand.vmem [shape: f32[9,16,16], index: 2, kind: input, shape index: {}]   ;;  %s1776_s3 = inlined_call_operand.vmem [shape: f32[2,16,286], index: 3, kind: output, shape index: {0}]   ;;  %s1777_s4 = inlined_call_operand.vmem [shape: f32[2,16,2], index: 4, kind: output, shape index: {1}]  }
   0x1 LB: > { %s1292_s16 = sadd.s32 4294967295, %s1519_s15   ;;  %p1296_p0 = scmp.ge.s32.totalorder %s1519_s15, 1  ;;  %s1519_s15 = sphi %s1554_s15, %s15_s15  }
   0x2   : > { %p165_p1 = scmp.lt.s32.totalorder %s1519_s15, 3 }
   0x4   : > { %p166_p2 = pnand %p1296_p0, %p165_p1 }
   0x5   : > { %p196_p3 = scmp.lt.s32.totalorder (!%p166_p2), %s1292_s16, 1  ;;  %s1521_s21 = smov (!%p166_p2), 127  }
   0x6   : > { %169 = sbr.rel (%p166_p2) target bundleno = 506 (0x1fa), region = 32  ;;  %s1522_s22 = smov (!%p166_p2), 126  }
   0x7   : > { %s1523_s23 = smov (!%p166_p2), 110   ;;  %s1524_s24 = smov (!%p166_p2), 109  }
   0x8   : > { %s1525_s25 = smov (!%p166_p2), 108   ;;  %s1526_s26 = smov (!%p166_p2), 92  }
   0x9   : > { %s1527_s27 = smov (!%p166_p2), 91   ;;  %s1528_s28 = smov (!%p166_p2), 90  }
   0xb   : > { %s1779_s16 = smov (!%p196_p3, %s1292_s16), 1  ;;  %v1301_v19 = vld [vmem:[%s1775_s2 + $0x10] sm:$0xff]  ;;  %vm252_vm0 = vcmask 130048   ;;  %vm418_vm1 = vcmask 1031168   ;;  %vm241_vm2 = vcmask 1039360   ;;  %v1302_v37 = vld [vmem:[%s1775_s2 + $0x18] sm:$0xff] }
   0xc   : > { %s1376_s17 = smul.u32 48, %s1779_s16  ;;  %vm525_vm3 = vcmask 900096   ;;  %v218_v51 = vld [vmem:[%s1775_s2] sm:$0xff]  ;;  %vm632_vm4 = vcmask 891904   ;;  %vm739_vm5 = vcmask 883712   ;;  %vm846_vm6 = vcmask 752640  }
   0xd   : > { %v1315_v54 = vld [vmem:[%s1775_s2 + $0x20] sm:$0xff]  ;;  %vm953_vm7 = vcmask 744448   ;;  %vm1060_vm8 = vcmask 736256   ;;  %vm1154_vm9 = vcmask 244736   ;;  %vm1182_vm10 = vcmask 7168  }
   0xe   : > { %s200_s20 = scalar_lea.vmem %s1774_s1, %s1376_s17  ;;  %vm1201_vm11 = vcmask 15368  }
   0xf   : > { %v1570_v0 = vld [vmem:[%s200_s20 + $0x10] sm:$0xff]  ;;  %v1572_v1 = vld [vmem:[%s200_s20 + $0x28] sm:$0xff]  ;;  %v1574_v2 = vld [vmem:[%s200_s20] sm:$0xff] }
  0x10   : > { %v1393_v3 = vpack.i.bf16 %v1570_v0, %v1572_v1  ;;  %v1578_v4 = vld [vmem:[%s200_s20 + $0x8] sm:$0xff]  ;;  %v1584_v7 = vld [vmem:[%s200_s20 + $0x18] sm:$0xff]  ;;  %v1586_v8 = vld [vmem:[%s200_s20 + $0x20] sm:$0xff] }
  0x11   : > { %v1403_v5 = vpack.i.bf16 %v1574_v2, %v1578_v4  ;;  %v1413_v6 = vpack.i.bf16 %v1578_v4, %v1574_v2  ;;  %v1398_v9 = vpack.i.bf16 %v1584_v7, %v1586_v8  ;;  %v1408_v10 = vpack.i.bf16 %v1586_v8, %v1584_v7 }
  0x12   : > { %1394 = vrot.lane.b32.xlu0 %v1393_v3, %s1521_s21  ;;  %v1423_v11 = vpack.i.bf16 %v1572_v1, %v1586_v8  ;;  %v1428_v12 = vpack.i.bf16 %v1570_v0, %v1578_v4  ;;  %v1433_v13 = vpack.i.bf16 %v1574_v2, %v1584_v7 }
  0x13   : > { %1404 = vrot.lane.b32.xlu1 %v1403_v5, %s1521_s21  ;;  %1414 = vrot.lane.b32.xlu2 %v1413_v6, %s1522_s22 }
  0x1a   : > { %1399 = vrot.lane.b32.xlu0 %v1398_v9, %s1521_s21  ;;  %s1749_s21 = scalar_lea.vmem %s1776_s3, %s1376_s17  ;;  %s1373_s17 = sshll.u32 %s1779_s16, 4 }
  0x1b   : > { %1409 = vrot.lane.b32.xlu1 %v1408_v10, %s1522_s22  ;;  %1419 = vrot.lane.b32.xlu2 %v1393_v3, %s1522_s22 }
  0x22   : > { %1424 = vrot.lane.b32.xlu0 %v1423_v11, %s1523_s23 }
  0x23   : > { %1429 = vrot.lane.b32.xlu1 %v1428_v12, %s1523_s23  ;;  %1434 = vrot.lane.b32.xlu2 %v1433_v13, %s1523_s23 }
  0x2a   : > { %1439 = vrot.lane.b32.xlu0 %v1393_v3, %s1524_s24 }
  0x2b   : > { %1444 = vrot.lane.b32.xlu1 %v1408_v10, %s1524_s24  ;;  %1449 = vrot.lane.b32.xlu2 %v1413_v6, %s1524_s24 }
  0x32   : > { %1454 = vrot.lane.b32.xlu0 %v1408_v10, %s1525_s25 }
  0x33   : > { %1459 = vrot.lane.b32.xlu1 %v1413_v6, %s1525_s25  ;;  %1464 = vrot.lane.b32.xlu2 %v1408_v10, %s1526_s26 }
  0x3a   : > { %1469 = vrot.lane.b32.xlu0 %v1413_v6, %s1526_s26 }
  0x3b   : > { %1474 = vrot.lane.b32.xlu1 %v1393_v3, %s1525_s25  ;;  %1479 = vrot.lane.b32.xlu2 %v1393_v3, %s1526_s26  ;;  %s210_s26 = scalar_lea.vmem %s1777_s4, %s1373_s17 }
  0x42   : > { %1484 = vrot.lane.b32.xlu0 %v1423_v11, %s1527_s27 }
  0x43   : > { %1489 = vrot.lane.b32.xlu1 %v1428_v12, %s1527_s27  ;;  %1494 = vrot.lane.b32.xlu2 %v1433_v13, %s1527_s27 }
  0x4a   : > { %1499 = vrot.lane.b32.xlu0 %v1393_v3, %s1528_s28 }
  0x4b   : > { %1504 = vrot.lane.b32.xlu1 %v1408_v10, %s1528_s28  ;;  %1509 = vrot.lane.b32.xlu2 %v1413_v6, %s1528_s28 }
  0x6d   : > { %v1415_v14 = vpop.permute.xlu2 %1414 }
  0x6e   : > { %v1417_v27 = vunpack.i.h.bf16 %v1415_v14  ;;  %v1416_v30 = vunpack.i.l.bf16 %v1415_v14 }
  0x70   : > { %v419_v40 = vsel %vm418_vm1, %v1416_v30, %v1417_v27 }
  0x75   : > { %v1601_v20 = vpop.permute.xlu2 %1419 }
  0x76   : > { %v1421_v36 = vunpack.i.l.bf16 %v1601_v20  ;;  %v1422_v39 = vunpack.i.h.bf16 %v1601_v20 }
  0x78   : > { %v420_v47 = vsel %vm418_vm1, %v1417_v27, %v1422_v39 }
  0x7d   : > { %v1435_v35 = vpop.permute.xlu2 %1434 }
  0x7e   : > { %v1436_v41 = vunpack.i.l.bf16 %v1435_v35  ;;  %v1437_v48 = vunpack.i.h.bf16 %v1435_v35 }
  0x84   : > { %v1395_v15 = vpop.permute.xlu0 %1394 }
  0x85   : > { %v1405_v16 = vpop.permute.xlu1 %1404  ;;  %v1396_v17 = vunpack.i.l.bf16 %v1395_v15  ;;  %v1397_v18 = vunpack.i.h.bf16 %v1395_v15  ;;  %v1450_v58 = vpop.permute.xlu2 %1449 }
  0x86   : > { %v1407_v21 = vunpack.i.h.bf16 %v1405_v16  ;;  %v1406_v23 = vunpack.i.l.bf16 %v1405_v16 }
  0x87   : > { %319 = vmatpush.msra.mxu2 %v1396_v17 }
  0x88   : > { %v242_v33 = vsel %vm241_vm2, %v1407_v21, %v1406_v23  ;;  %v243_v38 = vsel %vm241_vm2, %v1406_v23, %v1397_v18 }
  0x89   : > { %320 = vmatpush.msra.mxu2 %v1397_v18 }
  0x8a   : > { %1307 = vmatmul.msk.f32.vlgmr.msra.gmra.mxu2 %vm252_vm0, %v1301_v19 }
  0x8c   : > { %v1400_v22 = vpop.permute.xlu0 %1399 }
  0x8d   : > { %v1402_v24 = vunpack.i.h.bf16 %v1400_v22  ;;  %v1401_v25 = vunpack.i.l.bf16 %v1400_v22  ;;  %v1410_v26 = vpop.permute.xlu1 %1409  ;;  %v1465_v10 = vpop.permute.xlu2 %1464 }
  0x8e   : > { %v1412_v28 = vunpack.i.h.bf16 %v1410_v26  ;;  %v1411_v29 = vunpack.i.l.bf16 %v1410_v26  ;;  %v1467_v13 = vunpack.i.h.bf16 %v1465_v10  ;;  %v1466_v14 = vunpack.i.l.bf16 %v1465_v10 }
  0x8f   : > { %v244_v31 = vsel %vm241_vm2, %v1402_v24, %v1401_v25  ;;  %v245_v32 = vsel %vm241_vm2, %v1401_v25, %v1396_v17  ;;  %v1323_v17 = vld [vmem:[%s1775_s2 + $0x30] sm:$0xff] }
  0x90   : > { %273 = vmatpush.msra.mxu0 %v244_v31  ;;  %1374 = vmatpush.msra.mxu3 %v244_v31  ;;  %v421_v34 = vsel %vm418_vm1, %v1411_v29, %v1412_v28  ;;  %v422_v43 = vsel %vm418_vm1, %v1412_v28, %v1421_v36  ;;  %v1324_v29 = vld [vmem:[%s1775_s2 + $0x38] sm:$0xff] }
  0x91   : > { %296 = vmatpush.msra.mxu1 %v245_v32  ;;  %449 = vmatpush.msrb.mxu2 %v421_v34 }
  0x92   : > { %274 = vmatpush.msra.mxu0 %v242_v33  ;;  %1375 = vmatpush.msra.mxu3 %v242_v33 }
  0x93   : > { %297 = vmatpush.msra.mxu1 %v243_v38  ;;  %1303 = vmatmul.msk.f32.vlgmr.msra.gmra.mxu0 %vm252_vm0, %v1301_v19 }
  0x94   : > { %1304 = vmatmul.msk.f32.vlgmr.msra.gmra.mxu3 %vm252_vm0, %v1302_v37  ;;  %1305 = vmatmul.msk.f32.vlgmr.msra.gmra.mxu1 %vm252_vm0, %v1301_v19  ;;  %v1425_v42 = vpop.permute.xlu0 %1424  ;;  %v849_v19 = vsel %vm846_vm6, %v1466_v14, %v1467_v13 }
  0x95   : > { %348 = vmatpush.msrb.mxu3 %v1584_v7  ;;  %1308 = vmatmul.msk.f32.gmra.mxu2 %vm252_vm0, %v1302_v37  ;;  %v1427_v44 = vunpack.i.h.bf16 %v1425_v42  ;;  %v1426_v45 = vunpack.i.l.bf16 %v1425_v42  ;;  %v1430_v46 = vpop.permute.xlu1 %1429  ;;  %v1480_v31 = vpop.permute.xlu2 %1479 }
  0x96   : > { %394 = vmatpush.msrb.mxu1 %v1572_v1  ;;  %450 = vmatpush.msrb.mxu2 %v419_v40  ;;  %v1431_v49 = vunpack.i.l.bf16 %v1430_v46  ;;  %v1432_v52 = vunpack.i.h.bf16 %v1430_v46  ;;  %v1451_v1 = vunpack.i.l.bf16 %v1450_v58  ;;  %v1481_v33 = vunpack.i.l.bf16 %v1480_v31 }
  0x97   : > { %349 = vmatpush.msrb.mxu3 %v1574_v2  ;;  %371 = vmatpush.msrb.mxu0 %v1586_v8  ;;  %v528_v50 = vsel %vm525_vm3, %v1436_v41, %v1426_v45  ;;  %v529_v53 = vsel %vm525_vm3, %v1426_v45, %v1427_v44  ;;  %v219_v2 = vld [vmem:[%s1775_s2 + $0x8] sm:$0xff]  ;;  %v1482_v38 = vunpack.i.h.bf16 %v1480_v31 }
  0x98   : > { %395 = vmatpush.msrb.mxu1 %v1570_v0  ;;  %579 = vmatpush.msra.mxu2 %v529_v53  ;;  %v526_v55 = vsel %vm525_vm3, %v1437_v48, %v1431_v49  ;;  %v527_v56 = vsel %vm525_vm3, %v1431_v49, %v1432_v52  ;;  %v1452_v0 = vunpack.i.h.bf16 %v1450_v58  ;;  %v850_v41 = vsel %vm846_vm6, %v1467_v13, %v1481_v33 }
  0x99   : > { %472 = vmatpush.msra.mxu3 %v422_v43  ;;  %372 = vmatpush.msrb.mxu0 %v1578_v4  ;;  %v1316_v4 = vld [vmem:[%s1775_s2 + $0x28] sm:$0xff] }
  0x9a   : > { %556 = vmatpush.msra.mxu1 %v528_v50  ;;  %580 = vmatpush.msra.mxu2 %v527_v56  ;;  %v633_v6 = vsel %vm632_vm4, %v1451_v1, %v1452_v0  ;;  %v1339_v56 = vld [vmem:[%s1775_s2 + $0x50] sm:$0xff]  ;;  %v1348_v1 = vld [vmem:[%s1775_s2 + $0x68] sm:$0xff] }
  0x9b   : > { %473 = vmatpush.msra.mxu3 %v420_v47  ;;  %495 = vmatpush.msra.mxu0 %v1421_v36  ;;  %v1332_v47 = vld [vmem:[%s1775_s2 + $0x48] sm:$0xff] }
  0x9c   : > { %1311 = vmatmul.msk.f32.vlgmr.msrb.gmra.mxu0 %vm252_vm0, %v218_v51  ;;  %1306 = vmatmul.msk.f32.gmra.mxu1 %vm252_vm0, %v1302_v37  ;;  %v1440_v57 = vpop.permute.xlu0 %1439  ;;  %v1331_v37 = vld [vmem:[%s1775_s2 + $0x40] sm:$0xff] }
  0x9d   : > { %1309 = vmatmul.msk.f32.vlgmr.msrb.gmra.mxu3 %vm252_vm0, %v218_v51  ;;  %496 = vmatpush.msra.mxu0 %v1422_v39  ;;  %v1445_v59 = vpop.permute.xlu1 %1444  ;;  %v1441_v60 = vunpack.i.l.bf16 %v1440_v57  ;;  %v1442_v63 = vunpack.i.h.bf16 %v1440_v57  ;;  %v1495_v42 = vpop.permute.xlu2 %1494 }
  0x9e   : > { %1317 = vmatmul.msk.f32.vlgmr.msrb.gmra.mxu2 %vm252_vm0, %v1315_v54  ;;  %602 = vmatpush.msrb.mxu3 %v1427_v44  ;;  %v1447_v61 = vunpack.i.h.bf16 %v1445_v59  ;;  %v1446_v62 = vunpack.i.l.bf16 %v1445_v59  ;;  %v1496_v46 = vunpack.i.l.bf16 %v1495_v42  ;;  %v1497_v48 = vunpack.i.h.bf16 %v1495_v42  ;;  %v1347_v59 = vld [vmem:[%s1775_s2 + $0x60] sm:$0xff] }
  0x9f   : > { %557 = vmatpush.msra.mxu1 %v526_v55  ;;  %709 = vmatpush.msrb.mxu2 %v1441_v60  ;;  %v634_v7 = vsel %vm632_vm4, %v1452_v0, %v1442_v63  ;;  %v1340_v0 = vld [vmem:[%s1775_s2 + $0x58] sm:$0xff] }
  0xa0   : > { %603 = vmatpush.msrb.mxu3 %v1432_v52  ;;  %v635_v3 = vsel %vm632_vm4, %v1446_v62, %v1447_v61  ;;  %v636_v5 = vsel %vm632_vm4, %v1447_v61, %v1441_v60 }
  0xa1   : > { %663 = vmatpush.msrb.mxu0 %v635_v3  ;;  %710 = vmatpush.msrb.mxu2 %v1442_v63 }
  0xa3   : > { %664 = vmatpush.msrb.mxu0 %v633_v6  ;;  %v1363_v6 = vld [vmem:[%s1775_s2 + $0x80] sm:$0xff] }
  0xa4   : > { %1312 = vmatmul.msk.f32.gmra.mxu0 %vm252_vm0, %v219_v2  ;;  %1313 = vmatmul.msk.f32.vlgmr.msrb.gmra.mxu1 %vm252_vm0, %v218_v51  ;;  %v1455_v8 = vpop.permute.xlu0 %1454 }
  0xa5   : > { %1310 = vmatmul.msk.f32.gmra.mxu3 %vm252_vm0, %v219_v2  ;;  %v1460_v9 = vpop.permute.xlu1 %1459  ;;  %686 = vmatpush.msrb.mxu1 %v636_v5  ;;  %v1457_v11 = vunpack.i.h.bf16 %v1455_v8  ;;  %v1456_v12 = vunpack.i.l.bf16 %v1455_v8  ;;  %v1510_v52 = vpop.permute.xlu2 %1509  ;;  %v1356_v5 = vld [vmem:[%s1775_s2 + $0x78] sm:$0xff] }
  0xa6   : > { %1318 = vmatmul.msk.f32.gmra.mxu2 %vm252_vm0, %v1316_v4  ;;  %v1462_v15 = vunpack.i.h.bf16 %v1460_v9  ;;  %v1461_v16 = vunpack.i.l.bf16 %v1460_v9  ;;  %v1512_v57 = vunpack.i.h.bf16 %v1510_v52  ;;  %v1511_v58 = vunpack.i.l.bf16 %v1510_v52 }
  0xa7   : > { %687 = vmatpush.msrb.mxu1 %v634_v7  ;;  %v742_v18 = vsel %vm739_vm5, %v1456_v12, %v1457_v11  ;;  %v1364_v7 = vld [vmem:[%s1775_s2 + $0x88] sm:$0xff] }
  0xa8   : > { %v740_v20 = vsel %vm739_vm5, %v1461_v16, %v1462_v15  ;;  %v1061_v63 = vsel %vm1060_vm8, %v1511_v58, %v1512_v57 }
  0xac   : > { %1321 = vmatmul.msk.f32.vlgmr.msra.gmra.mxu0 %vm252_vm0, %v1315_v54  ;;  %1314 = vmatmul.msk.f32.gmra.mxu1 %vm252_vm0, %v219_v2  ;;  %v1470_v21 = vpop.permute.xlu0 %1469 }
  0xad   : > { %1319 = vmatmul.msk.f32.vlgmr.msra.gmra.mxu3 %vm252_vm0, %v1315_v54  ;;  %v1475_v22 = vpop.permute.xlu1 %1474  ;;  %v1472_v23 = vunpack.i.h.bf16 %v1470_v21  ;;  %v1471_v24 = vunpack.i.l.bf16 %v1470_v21 }
  0xae   : > { %1327 = vmatmul.msk.f32.vlgmr.msra.gmra.mxu2 %vm252_vm0, %v1323_v17  ;;  %770 = vmatpush.msra.mxu3 %v742_v18  ;;  %v1477_v25 = vunpack.i.h.bf16 %v1475_v22  ;;  %v1476_v26 = vunpack.i.l.bf16 %v1475_v22 }
  0xaf   : > { %877 = vmatpush.msra.mxu2 %v849_v19  ;;  %v847_v27 = vsel %vm846_vm6, %v1471_v24, %v1472_v23  ;;  %v848_v44 = vsel %vm846_vm6, %v1472_v23, %v1482_v38 }
  0xb0   : > { %771 = vmatpush.msra.mxu3 %v740_v20  ;;  %v743_v28 = vsel %vm739_vm5, %v1457_v11, %v1476_v26  ;;  %v741_v30 = vsel %vm739_vm5, %v1462_v15, %v1477_v25 }
  0xb1   : > { %878 = vmatpush.msra.mxu2 %v847_v27  ;;  %793 = vmatpush.msra.mxu0 %v743_v28 }
  0xb3   : > { %794 = vmatpush.msra.mxu0 %v741_v30 }
  0xb4   : > { %1322 = vmatmul.msk.f32.gmra.mxu0 %vm252_vm0, %v1316_v4  ;;  %1325 = vmatmul.msk.f32.vlgmr.msra.gmra.mxu1 %vm252_vm0, %v1323_v17  ;;  %v1485_v32 = vpop.permute.xlu0 %1484 }
  0xb5   : > { %1320 = vmatmul.msk.f32.gmra.mxu3 %vm252_vm0, %v1316_v4  ;;  %816 = vmatpush.msra.mxu1 %v1476_v26  ;;  %v1490_v34 = vpop.permute.xlu1 %1489  ;;  %v1487_v35 = vunpack.i.h.bf16 %v1485_v32  ;;  %v1486_v36 = vunpack.i.l.bf16 %v1485_v32  ;;  %v1355_v4 = vld [vmem:[%s1775_s2 + $0x70] sm:$0xff] }
  0xb6   : > { %1328 = vmatmul.msk.f32.gmra.mxu2 %vm252_vm0, %v1324_v29  ;;  %v1492_v39 = vunpack.i.h.bf16 %v1490_v34  ;;  %v1491_v40 = vunpack.i.l.bf16 %v1490_v34 }
  0xb7   : > { %817 = vmatpush.msra.mxu1 %v1477_v25  ;;  %v957_v43 = vsel %vm953_vm7, %v1486_v36, %v1487_v35  ;;  %v956_v49 = vsel %vm953_vm7, %v1496_v46, %v1486_v36 }
  0xb8   : > { %v955_v45 = vsel %vm953_vm7, %v1491_v40, %v1492_v39  ;;  %v954_v50 = vsel %vm953_vm7, %v1497_v48, %v1491_v40 }
  0xbc   : > { %1333 = vmatmul.msk.f32.vlgmr.msrb.gmra.mxu0 %vm252_vm0, %v1331_v37  ;;  %1326 = vmatmul.msk.f32.gmra.mxu1 %vm252_vm0, %v1324_v29  ;;  %v1500_v53 = vpop.permute.xlu0 %1499 }
  0xbd   : > { %1329 = vmatmul.msk.f32.vlgmr.msrb.gmra.mxu3 %vm252_vm0, %v1323_v17  ;;  %923 = vmatpush.msrb.mxu0 %v1481_v33  ;;  %v1505_v51 = vpop.permute.xlu1 %1504  ;;  %v1501_v60 = vunpack.i.l.bf16 %v1500_v53  ;;  %v1502_v62 = vunpack.i.h.bf16 %v1500_v53 }
  0xbe   : > { %1337 = vmatmul.msk.f32.vlgmr.msrb.gmra.mxu2 %vm252_vm0, %v1331_v37  ;;  %900 = vmatpush.msrb.mxu3 %v850_v41  ;;  %v1507_v54 = vunpack.i.h.bf16 %v1505_v51  ;;  %v1506_v55 = vunpack.i.l.bf16 %v1505_v51 }
  0xbf   : > { %1007 = vmatpush.msrb.mxu2 %v957_v43  ;;  %924 = vmatpush.msrb.mxu0 %v1482_v38  ;;  %v1062_v3 = vsel %vm1060_vm8, %v1512_v57, %v1502_v62 }
  0xc0   : > { %901 = vmatpush.msrb.mxu3 %v848_v44  ;;  %v1063_v61 = vsel %vm1060_vm8, %v1506_v55, %v1507_v54  ;;  %v1064_v2 = vsel %vm1060_vm8, %v1507_v54, %v1501_v60 }
  0xc1   : > { %1008 = vmatpush.msrb.mxu2 %v955_v45 }
  0xc4   : > { %1334 = vmatmul.msk.f32.gmra.mxu0 %vm252_vm0, %v1332_v47  ;;  %1335 = vmatmul.msk.f32.vlgmr.msrb.gmra.mxu1 %vm252_vm0, %v1331_v37 }
  0xc5   : > { %1330 = vmatmul.msk.f32.gmra.mxu3 %vm252_vm0, %v1324_v29  ;;  %984 = vmatpush.msrb.mxu1 %v956_v49 }
  0xc6   : > { %1338 = vmatmul.msk.f32.gmra.mxu2 %vm252_vm0, %v1332_v47 }
  0xc7   : > { %985 = vmatpush.msrb.mxu1 %v954_v50 }
  0xcc   : > { %1343 = vmatmul.msk.f32.vlgmr.msra.gmra.mxu0 %vm252_vm0, %v1339_v56  ;;  %1336 = vmatmul.msk.f32.gmra.mxu1 %vm252_vm0, %v1332_v47 }
  0xcd   : > { %1341 = vmatmul.msk.f32.vlgmr.msra.gmra.mxu3 %vm252_vm0, %v1339_v56  ;;  %1091 = vmatpush.msra.mxu0 %v1063_v61 }
  0xce   : > { %1349 = vmatmul.msk.f32.vlgmr.msra.gmra.mxu2 %vm252_vm0, %v1347_v59  ;;  %1030 = vmatpush.msra.mxu3 %v1487_v35 }
  0xcf   : > { %1137 = vmatpush.msra.mxu2 %v1501_v60  ;;  %1092 = vmatpush.msra.mxu0 %v1061_v63 }
  0xd0   : > { %1031 = vmatpush.msra.mxu3 %v1492_v39 }
  0xd1   : > { %1138 = vmatpush.msra.mxu2 %v1502_v62 }
  0xd4   : > { %1344 = vmatmul.msk.f32.gmra.mxu0 %vm252_vm0, %v1340_v0  ;;  %1345 = vmatmul.msk.f32.vlgmr.msra.gmra.mxu1 %vm252_vm0, %v1339_v56 }
  0xd5   : > { %1342 = vmatmul.msk.f32.gmra.mxu3 %vm252_vm0, %v1340_v0  ;;  %1114 = vmatpush.msra.mxu1 %v1064_v2 }
  0xd6   : > { %1350 = vmatmul.msk.f32.gmra.mxu2 %vm252_vm0, %v1348_v1 }
  0xd7   : > { %1115 = vmatpush.msra.mxu1 %v1062_v3 }
  0xdc   : > { %1353 = vmatmul.msk.f32.vlgmr.msrb.gmra.mxu0 %vm252_vm0, %v1347_v59  ;;  %1346 = vmatmul.msk.f32.gmra.mxu1 %vm252_vm0, %v1340_v0 }
  0xdd   : > { %1351 = vmatmul.msk.f32.vlgmr.msrb.gmra.mxu3 %vm252_vm0, %v1347_v59 }
  0xde   : > { %1359 = vmatmul.msk.f32.vlgmr.msrb.gmra.mxu2 %vm252_vm0, %v1355_v4 }
  0xe4   : > { %1354 = vmatmul.msk.f32.gmra.mxu0 %vm252_vm0, %v1348_v1  ;;  %1357 = vmatmul.msk.f32.vlgmr.msrb.gmra.mxu1 %vm252_vm0, %v1355_v4 }
  0xe5   : > { %1352 = vmatmul.msk.f32.gmra.mxu3 %vm252_vm0, %v1348_v1 }
  0xe6   : > { %1360 = vmatmul.msk.f32.gmra.mxu2 %vm252_vm0, %v1356_v5 }
  0xec   : > { %1365 = vmatmul.msk.f32.vlgmr.msra.gmra.mxu0 %vm252_vm0, %v1363_v6  ;;  %1358 = vmatmul.msk.f32.gmra.mxu1 %vm252_vm0, %v1356_v5 }
  0xed   : > { %1361 = vmatmul.msk.f32.vlgmr.msra.gmra.mxu3 %vm252_vm0, %v1355_v4 }
  0xee   : > { %1369 = vmatmul.msk.f32.vlgmr.msra.gmra.mxu2 %vm252_vm0, %v1363_v6 }
  0xf4   : > { %1366 = vmatmul.msk.f32.gmra.mxu0 %vm252_vm0, %v1364_v7  ;;  %1367 = vmatmul.msk.f32.vlgmr.msra.gmra.mxu1 %vm252_vm0, %v1363_v6 }
  0xf5   : > { %1362 = vmatmul.msk.f32.gmra.mxu3 %vm252_vm0, %v1356_v5 }
  0xf6   : > { %1370 = vmatmul.msk.f32.gmra.mxu2 %vm252_vm0, %v1364_v7 }
  0xfc   : > { %1368 = vmatmul.msk.f32.gmra.mxu1 %vm252_vm0, %v1364_v7 }
 0x10d   : > { %v322_v8 = vpop.f32.mrf.mxu2 }
 0x110   : > { %v276_v9 = vpop.f32.mrf.mxu0 }
 0x111   : > { %v299_v10 = vpop.f32.mrf.mxu1 }
 0x117   : > { %v279_v11 = vpop.f32.mrf.mxu3 }
 0x118   : > { %v325_v12 = vpop.f32.mrf.mxu2 }
 0x119   : > { %v374_v13 = vpop.f32.mrf.mxu0  ;;  %v302_v14 = vpop.f32.mrf.mxu1 }
 0x11a   : > { %v375_v15 = vadd.f32 %v374_v13, %v299_v10 }
 0x120   : > { %v351_v16 = vpop.f32.mrf.mxu3 }
 0x121   : > { %v377_v17 = vpop.f32.mrf.mxu0  ;;  %v452_v18 = vpop.f32.mrf.mxu2  ;;  %v352_v47 = vadd.f32 %v351_v16, %v276_v9  ;;  %v211_v16 = vld [vmem:[%s1773_s0] sm:$0x7] }
 0x122   : > { %v378_v19 = vadd.f32 %v377_v17, %v302_v14  ;;  %v397_v20 = vpop.f32.mrf.mxu1 }
 0x123   : > { %v398_v21 = vadd.f32 %v397_v20, %v322_v8  ;;  %v504_v52 = vadd.f32 %v452_v18, %v352_v47 }
 0x128   : > { %v354_v22 = vpop.f32.mrf.mxu3 }
 0x129   : > { %v455_v23 = vpop.f32.mrf.mxu2  ;;  %v498_v24 = vpop.f32.mrf.mxu0  ;;  %v355_v54 = vadd.f32 %v354_v22, %v279_v11 }
 0x12a   : > { %v400_v25 = vpop.f32.mrf.mxu1  ;;  %v506_v63 = vadd.f32 %v498_v24, %v398_v21  ;;  %v1160_v24 = vperm.slane %v211_v16, 0 }
 0x12b   : > { %v401_v26 = vadd.f32 %v400_v25, %v325_v12  ;;  %v507_v62 = vadd.f32 %v455_v23, %v355_v54 }
 0x130   : > { %v475_v27 = vpop.f32.mrf.mxu3 }
 0x131   : > { %v501_v28 = vpop.f32.mrf.mxu0  ;;  %v582_v29 = vpop.f32.mrf.mxu2  ;;  %v505_v61 = vadd.f32 %v475_v27, %v375_v15 }
 0x132   : > { %v559_v30 = vpop.f32.mrf.mxu1  ;;  %v509_v17 = vadd.f32 %v501_v28, %v401_v26 }
 0x133   : > { %v611_v53 = vadd.f32 %v559_v30, %v504_v52  ;;  %v612_v2 = vadd.f32 %v582_v29, %v505_v61 }
 0x138   : > { %v478_v31 = vpop.f32.mrf.mxu3 }
 0x139   : > { %v585_v32 = vpop.f32.mrf.mxu2  ;;  %v666_v33 = vpop.f32.mrf.mxu0  ;;  %v508_v10 = vadd.f32 %v478_v31, %v378_v19 }
 0x13a   : > { %v562_v34 = vpop.f32.mrf.mxu1  ;;  %v718_v55 = vadd.f32 %v666_v33, %v611_v53 }
 0x13b   : > { %v614_v0 = vadd.f32 %v562_v34, %v507_v62  ;;  %v615_v21 = vadd.f32 %v585_v32, %v508_v10  ;;  %v1161_v34 = vperm.slane %v211_v16, 1 }
 0x140   : > { %v605_v35 = vpop.f32.mrf.mxu3 }
 0x141   : > { %v669_v36 = vpop.f32.mrf.mxu0  ;;  %v712_v37 = vpop.f32.mrf.mxu2  ;;  %v613_v3 = vadd.f32 %v605_v35, %v506_v63 }
 0x142   : > { %v689_v38 = vpop.f32.mrf.mxu1  ;;  %v721_v4 = vadd.f32 %v669_v36, %v614_v0  ;;  %v1162_v36 = vperm.slane %v211_v16, 2 }
 0x143   : > { %v719_v7 = vadd.f32 %v689_v38, %v612_v2  ;;  %v720_v14 = vadd.f32 %v712_v37, %v613_v3 }
 0x148   : > { %v608_v39 = vpop.f32.mrf.mxu3 }
 0x149   : > { %v715_v40 = vpop.f32.mrf.mxu2  ;;  %v796_v41 = vpop.f32.mrf.mxu0  ;;  %v616_v22 = vadd.f32 %v608_v39, %v509_v17 }
 0x14a   : > { %v692_v42 = vpop.f32.mrf.mxu1  ;;  %v826_v15 = vadd.f32 %v796_v41, %v719_v7 }
 0x14b   : > { %v722_v27 = vadd.f32 %v692_v42, %v615_v21  ;;  %v723_v26 = vadd.f32 %v715_v40, %v616_v22 }
 0x150   : > { %v773_v43 = vpop.f32.mrf.mxu3 }
 0x151   : > { %v799_v44 = vpop.f32.mrf.mxu0  ;;  %v880_v45 = vpop.f32.mrf.mxu2  ;;  %v825_v59 = vadd.f32 %v773_v43, %v718_v55 }
 0x152   : > { %v819_v46 = vpop.f32.mrf.mxu1  ;;  %v829_v28 = vadd.f32 %v799_v44, %v722_v27 }
 0x153   : > { %v932_v1 = vadd.f32 %v880_v45, %v825_v59  ;;  %v827_v18 = vadd.f32 %v819_v46, %v720_v14 }
 0x158   : > { %v776_v48 = vpop.f32.mrf.mxu3 }
 0x159   : > { %v883_v49 = vpop.f32.mrf.mxu2  ;;  %v926_v50 = vpop.f32.mrf.mxu0  ;;  %v828_v11 = vadd.f32 %v776_v48, %v721_v4 }
 0x15a   : > { %v822_v51 = vpop.f32.mrf.mxu1  ;;  %v934_v25 = vadd.f32 %v926_v50, %v827_v18 }
 0x15b   : > { %v935_v23 = vadd.f32 %v883_v49, %v828_v11  ;;  %v830_v42 = vadd.f32 %v822_v51, %v723_v26 }
 0x160   : > { %v903_v56 = vpop.f32.mrf.mxu3 }
 0x161   : > { %v929_v57 = vpop.f32.mrf.mxu0  ;;  %v1010_v58 = vpop.f32.mrf.mxu2  ;;  %v933_v20 = vadd.f32 %v903_v56, %v826_v15 }
 0x162   : > { %v987_v60 = vpop.f32.mrf.mxu1  ;;  %v937_v47 = vadd.f32 %v929_v57, %v830_v42 }
 0x163   : > { %v1039_v5 = vadd.f32 %v987_v60, %v932_v1  ;;  %v1040_v30 = vadd.f32 %v1010_v58, %v933_v20 }
 0x168   : > { %v906_v6 = vpop.f32.mrf.mxu3 }
 0x169   : > { %v1013_v8 = vpop.f32.mrf.mxu2  ;;  %v1094_v9 = vpop.f32.mrf.mxu0  ;;  %v936_v43 = vadd.f32 %v906_v6, %v829_v28 }
 0x16a   : > { %v990_v12 = vpop.f32.mrf.mxu1  ;;  %v1146_v13 = vadd.f32 %v1094_v9, %v1039_v5 }
 0x16b   : > { %v1042_v19 = vadd.f32 %v990_v12, %v935_v23  ;;  %v1043_v52 = vadd.f32 %v1013_v8, %v936_v43 }
 0x16c   : > { %1152 = vst [vmem:[%s1749_s21] sm:$0xff] %v1146_v13  ;;  %v1166_v37 = vmul.f32 %v1160_v24, %v1146_v13 }
 0x16e   : > { %v1185_v48 = vmul.f32 %v1166_v37, %v1146_v13 }
 0x170   : > { %v1033_v29 = vpop.f32.mrf.mxu3 }
 0x171   : > { %v1041_v31 = vadd.f32 %v1033_v29, %v934_v25  ;;  %v1097_v33 = vpop.f32.mrf.mxu0  ;;  %v1140_v35 = vpop.f32.mrf.mxu2 }
 0x172   : > { %v1149_v32 = vadd.f32 %v1097_v33, %v1042_v19  ;;  %v1117_v38 = vpop.f32.mrf.mxu1 }
 0x173   : > { %v1147_v39 = vadd.f32 %v1117_v38, %v1040_v30  ;;  %v1148_v41 = vadd.f32 %v1140_v35, %v1041_v31 }
 0x174   : > { %1156 = vst [vmem:[%s1749_s21 + $0x18] sm:$0xff] %v1149_v32  ;;  %v1169_v59 = vmul.f32 %v1160_v24, %v1149_v32 }
 0x175   : > { %1153 = vst [vmem:[%s1749_s21 + $0x8] sm:$0xff] %v1147_v39  ;;  %v1167_v45 = vmul.f32 %v1161_v34, %v1147_v39  ;;  %v1168_v46 = vmul.f32 %v1162_v36, %v1148_v41 }
 0x176   : > { %1155 = vst.msk [vmem:[%s1749_s21 + $0x10] sm:$0xff] %vm1154_vm9, %v1148_v41  ;;  %v1188_v1 = vmul.f32 %v1169_v59, %v1149_v32 }
 0x177   : > { %v1186_v49 = vmul.f32 %v1167_v45, %v1147_v39  ;;  %v1172_v40 = vadd.f32 %v1167_v45, %v1166_v37  ;;  %v1173_v44 = vsel %vm1154_vm9, %v1168_v46, 0.0  ;;  %v1187_v50 = vmul.f32 %v1168_v46, %v1148_v41 }
 0x178   : > { %v1036_v53 = vpop.f32.mrf.mxu3 }
 0x179   : > { %v1044_v54 = vadd.f32 %v1036_v53, %v937_v47  ;;  %v1143_v51 = vpop.f32.mrf.mxu2  ;;  %v1174_v55 = vadd.f32 %v1173_v44, %v1172_v40  ;;  %v1191_v56 = vadd.f32 %v1186_v49, %v1185_v48  ;;  %v1192_v58 = vsel %vm1154_vm9, %v1187_v50, 0.0 }
 0x17a   : > { %v1120_v57 = vpop.f32.mrf.mxu1 }
 0x17b   : > { %v1150_v60 = vadd.f32 %v1120_v57, %v1043_v52  ;;  %v1151_v61 = vadd.f32 %v1143_v51, %v1044_v54  ;;  %1175 = vadd.xlane.f32.xlu0 %v1174_v55  ;;  %v1193_v62 = vadd.f32 %v1192_v58, %v1191_v56 }
 0x17d   : > { %1157 = vst [vmem:[%s1749_s21 + $0x20] sm:$0xff] %v1150_v60  ;;  %v1170_v63 = vmul.f32 %v1161_v34, %v1150_v60  ;;  %1194 = vadd.xlane.f32.xlu2 %v1193_v62  ;;  %v1171_v0 = vmul.f32 %v1162_v36, %v1151_v61 }
 0x17e   : > { %1158 = vst.msk [vmem:[%s1749_s21 + $0x28] sm:$0xff] %vm1154_vm9, %v1151_v61 }
 0x17f   : > { %v1189_v2 = vmul.f32 %v1170_v63, %v1150_v60  ;;  %v1177_v3 = vadd.f32 %v1170_v63, %v1169_v59  ;;  %v1178_v4 = vsel %vm1154_vm9, %v1171_v0, 0.0  ;;  %v1190_v5 = vmul.f32 %v1171_v0, %v1151_v61 }
 0x181   : > { %v1179_v6 = vadd.f32 %v1178_v4, %v1177_v3  ;;  %v1196_v7 = vadd.f32 %v1189_v2, %v1188_v1  ;;  %v1197_v8 = vsel %vm1154_vm9, %v1190_v5, 0.0 }
 0x183   : > { %1180 = vadd.xlane.f32.xlu1 %v1179_v6  ;;  %v1198_v9 = vadd.f32 %v1197_v8, %v1196_v7 }
 0x185   : > { %1199 = vadd.xlane.f32.xlu2 %v1198_v9 }
 0x1ee   : > { %v1176_v10 = vpop.xlane.xlu0 %1175 }
 0x1ef   : > { %1183 = vst.msk [vmem:[%s210_s26] sm:$0xff] %vm1182_vm10, %v1176_v10 }
 0x1f0   : > { %v1195_v11 = vpop.xlane.xlu2 %1194 }
 0x1f1   : > { %1202 = vst.msk [vmem:[%s210_s26] sm:$0xff] %vm1201_vm11, %v1195_v11 }
 0x1f6   : > { %v1181_v12 = vpop.xlane.xlu1 %1180 }
 0x1f7   : > { %1184 = vst.msk [vmem:[%s210_s26 + $0x8] sm:$0xff] %vm1182_vm10, %v1181_v12 }
 0x1f8   : > { %v1200_v13 = vpop.xlane.xlu2 %1199 }
 0x1f9   : > { %1203 = vst.msk [vmem:[%s210_s26 + $0x8] sm:$0xff] %vm1201_vm11, %v1200_v13 }
 0x1fa PF: > { %s15_s15 = sadd.s32 1, %s1519_s15  }
 0x1fb   : > { %p12_p4 = scmp.ge.s32.totalorder %s15_s15, 4  }
 0x1fd   :  { %14 = sbr.rel (!%p12_p4) target bundleno = 1 (0x1), region = 82 }

// kernel: network_forward.40
= control target key start
LH: loop header
LB: loop body
LE: loop exit
PB: predicated region body
PF: predicated region fallthrough
CT: control target
= control target key end

     0   :  { %s1710_s21 = smov 0   ;;  %s1982_s0 = inlined_call_operand.vmem [shape: f32[1,286], index: 0, kind: input, shape index: {}]   ;;  %s1983_s1 = inlined_call_operand.vmem [shape: f32[2,16,286], index: 1, kind: input, shape index: {}]   ;;  %s1984_s2 = inlined_call_operand.vmem [shape: f32[16,1], index: 2, kind: input, shape index: {}]   ;;  %s1985_s3 = inlined_call_operand.vmem [shape: f32[16,1], index: 3, kind: input, shape index: {}]   ;;  %s1986_s4 = inlined_call_operand.vmem [shape: f32[9,16,16], index: 4, kind: input, shape index: {}]   ;;  %s1987_s5 = inlined_call_operand.vmem [shape: f32[2,16,286], index: 5, kind: output, shape index: {0}]   ;;  %s1988_s6 = inlined_call_operand.vmem [shape: f32[2,16,2], index: 6, kind: output, shape index: {1}]  }
   0x1 LB: > { %s1426_s22 = sadd.s32 4294967295, %s1663_s21   ;;  %p1430_p0 = scmp.ge.s32.totalorder %s1663_s21, 1  ;;  %s1663_s21 = sphi %s1710_s21, %s17_s21  }
   0x2   : > { %p215_p1 = scmp.lt.s32.totalorder %s1663_s21, 3 }
   0x4   : > { %p216_p2 = pnand %p1430_p0, %p215_p1 }
   0x5   : > { %p250_p3 = scmp.lt.s32.totalorder (!%p216_p2), %s1426_s22, 1  ;;  %s1666_s13 = smov (!%p216_p2), 19  }
   0x6   : > { %219 = sbr.rel (%p216_p2) target bundleno = 754 (0x2f2), region = 40  ;;  %s1667_s14 = smov (!%p216_p2), 127  }
   0x7   : > { %s1668_s15 = smov (!%p216_p2), 126   ;;  %s1669_s16 = smov (!%p216_p2), 110  }
   0x8   : > { %s1670_s17 = smov (!%p216_p2), 109   ;;  %s1671_s18 = smov (!%p216_p2), 108  }
   0x9   : > { %s1672_s19 = smov (!%p216_p2), 92   ;;  %s1673_s20 = smov (!%p216_p2), 91  }
   0xa   : > { %s1674_s23 = smov (!%p216_p2), 90  }
   0xb   : > { %v275_v0 = vld [vmem:[%s1985_s3 + $0x8] sm:$0xff]  ;;  %v1665_v2 = vmov 0   ;;  %v274_v3 = vld [vmem:[%s1985_s3] sm:$0xff]  ;;  %s1990_s22 = smov (!%p250_p3, %s1426_s22), 1  ;;  %vm345_vm0 = vcmask 154624   ;;  %vm358_vm1 = vcmask 400384  }
   0xc   : > { %v273_v1 = vld [vmem:[%s1984_s2 + $0x8] sm:$0xff]  ;;  %1536 = vset.pattern.permute.xlu1 %v1665_v2  ;;  %1535 = vset.pattern.permute.xlu0 %v1665_v2  ;;  %v272_v4 = vld [vmem:[%s1984_s2] sm:$0xff]  ;;  %s1516_s7 = smul.u32 48, %s1990_s22  ;;  %vm382_vm2 = vcmask 1039360   ;;  %vm393_vm3 = vcmask 130048   ;;  %vm1443_vm4 = vmneg %vm345_vm0  ;;  %vm559_vm5 = vcmask 1031168  }
   0xd   : > { %299 = vperm.xlu1 %1536, %v275_v0   ;;  %283 = vperm.xlu0 %1535, %v273_v1   ;;  %v265_v9 = vld [vmem:[%s1982_s0] sm:$0x7]  ;;  %vm666_vm6 = vcmask 900096   ;;  %vm773_vm7 = vcmask 891904   ;;  %vm880_vm8 = vcmask 883712   ;;  %vm987_vm9 = vcmask 752640  }
   0xe   : > { %s254_s10 = scalar_lea.vmem %s1983_s1, %s1516_s7  ;;  %v1741_v13 = vperm.slane %v265_v9, 1  ;;  %v1744_v25 = vperm.slane %v265_v9, 2  ;;  %v1749_v39 = vperm.slane %v265_v9, 0  ;;  %vm1094_vm10 = vcmask 744448  }
   0xf   : > { %v270_v5 = vld [vmem:[%s254_s10 + $0x20] sm:$0xff]  ;;  %v271_v8 = vld [vmem:[%s254_s10 + $0x28] sm:$0xff]  ;;  %v268_v16 = vld [vmem:[%s254_s10 + $0x10] sm:$0xff]  ;;  %vm1201_vm11 = vcmask 736256   ;;  %vm1295_vm12 = vcmask 244736   ;;  %vm1316_vm13 = vcmask 7168  }
  0x10   : > { %v267_v15 = vld [vmem:[%s254_s10 + $0x8] sm:$0xff]  ;;  %v269_v19 = vld [vmem:[%s254_s10 + $0x18] sm:$0xff]  ;;  %v266_v21 = vld [vmem:[%s254_s10] sm:$0xff]  ;;  %vm1335_vm14 = vcmask 15368  }
  0x15   : > { %294 = vperm.xlu1 %1536, %v274_v3   ;;  %278 = vperm.xlu0 %1535, %v272_v4  }
  0x7f   : > { %v300_v6 = vpop.permute.xlu1 %299  ;;  %v284_v7 = vpop.permute.xlu0 %283 }
  0x80   : > { %v290_v10 = vmul.f32 %v284_v7, %v270_v5  ;;  %v291_v11 = vmul.f32 %v284_v7, %v271_v8  ;;  %v289_v26 = vmul.f32 %v284_v7, %v269_v19 }
  0x82   : > { %v306_v12 = vadd.f32 %v300_v6, %v290_v10  ;;  %v307_v17 = vadd.f32 %v300_v6, %v291_v11  ;;  %v305_v33 = vadd.f32 %v300_v6, %v289_v26  ;;  %v1435_v11 = vld [vmem:[%s1986_s4 + $0x10] sm:$0xff] }
  0x84   : > { %v312_v14 = vmax.f32 %v306_v12, 0.0  ;;  %v313_v29 = vmax.f32 %v307_v17, 0.0  ;;  %v311_v38 = vmax.f32 %v305_v33, 0.0 }
  0x86   : > { %v325_v18 = vmul.f32 %v1741_v13, %v312_v14  ;;  %v326_v34 = vmul.f32 %v1744_v25, %v313_v29  ;;  %v324_v41 = vmul.f32 %v1749_v39, %v311_v38 }
  0x87   : > { %v279_v20 = vpop.permute.xlu0 %278  ;;  %v295_v24 = vpop.permute.xlu1 %294 }
  0x88   : > { %v287_v22 = vmul.f32 %v279_v20, %v267_v15  ;;  %v288_v23 = vmul.f32 %v279_v20, %v268_v16  ;;  %341 = vrot.lane.b32.xlu2 %v325_v18, %s1666_s13  ;;  %v286_v30 = vmul.f32 %v279_v20, %v266_v21 }
  0x8a   : > { %v303_v27 = vadd.f32 %v295_v24, %v287_v22  ;;  %v304_v28 = vadd.f32 %v295_v24, %v288_v23  ;;  %v302_v37 = vadd.f32 %v295_v24, %v286_v30  ;;  %v1436_v22 = vld [vmem:[%s1986_s4 + $0x18] sm:$0xff] }
  0x8c   : > { %v310_v31 = vmax.f32 %v304_v28, 0.0  ;;  %v309_v32 = vmax.f32 %v303_v27, 0.0  ;;  %v308_v40 = vmax.f32 %v302_v37, 0.0 }
  0x8e   : > { %v323_v35 = vmul.f32 %v1744_v25, %v310_v31  ;;  %v322_v36 = vmul.f32 %v1741_v13, %v309_v32  ;;  %v321_v42 = vmul.f32 %v1749_v39, %v308_v40 }
  0x90   : > { %343 = vrot.lane.b32.xlu2 %v326_v34, %s1666_s13  ;;  %337 = vrot.lane.b32.xlu1 %v323_v35, %s1666_s13  ;;  %v361_v35 = vld [vmem:[%s1986_s4] sm:$0xff] }
  0x91   : > { %335 = vrot.lane.b32.xlu0 %v322_v36, %s1666_s13 }
  0x98   : > { %339 = vrot.lane.b32.xlu2 %v324_v41, %s1666_s13 }
  0x99   : > { %333 = vrot.lane.b32.xlu0 %v321_v42, %s1666_s13 }
  0xe2   : > { %v342_v43 = vpop.permute.xlu2 %341 }
  0xea   : > { %v344_v44 = vpop.permute.xlu2 %343 }
  0xeb   : > { %v1763_v49 = vsel %vm345_vm0, %v342_v43, %v344_v44  ;;  %v1455_v44 = vld [vmem:[%s1986_s4 + $0x20] sm:$0xff] }
  0xec   : > { %v360_v53 = vsel %vm358_vm1, %v1763_v49, 0.0 }
  0xf2   : > { %v1753_v45 = vpop.permute.xlu2 %339 }
  0xf3   : > { %v1757_v46 = vsel %vm345_vm0, %v1753_v45, %v342_v43  ;;  %v357_v47 = vsel %vm345_vm0, 0.0, %v1753_v45 }
  0xf4   : > { %v1542_v48 = vpack.i.bf16 %v357_v47, %v1757_v46  ;;  %v1552_v61 = vpack.i.bf16 %v1757_v46, %v357_v47  ;;  %v1567_v63 = vpack.i.bf16 %v360_v53, %v1757_v46 }
  0xf6   : > { %1543 = vrot.lane.b32.xlu2 %v1542_v48, %s1667_s14 }
 0x102   : > { %v338_v50 = vpop.permute.xlu1 %337 }
 0x103   : > { %v336_v51 = vpop.permute.xlu0 %335 }
 0x104   : > { %v1766_v52 = vsel %vm345_vm0, %v336_v51, %v338_v50 }
 0x105   : > { %v359_v54 = vsel %vm358_vm1, %v1766_v52, 0.0 }
 0x106   : > { %v1537_v55 = vpack.i.bf16 %v359_v54, %v360_v53 }
 0x108   : > { %1538 = vrot.lane.b32.xlu1 %v1537_v55, %s1667_s14 }
 0x10b   : > { %v1772_v56 = vpop.permute.xlu0 %333 }
 0x10c   : > { %v1776_v57 = vsel %vm345_vm0, %v1772_v56, %v336_v51  ;;  %v356_v58 = vsel %vm345_vm0, 0.0, %v1772_v56 }
 0x10d   : > { %v1557_v59 = vpack.i.bf16 %v1776_v57, %v356_v58  ;;  %v1547_v60 = vpack.i.bf16 %v356_v58, %v1776_v57  ;;  %v1572_v62 = vpack.i.bf16 %v359_v54, %v1776_v57  ;;  %v1577_v0 = vpack.i.bf16 %v356_v58, %v357_v47 }
 0x10f   : > { %1558 = vrot.lane.b32.xlu2 %v1557_v59, %s1668_s15  ;;  %1548 = vrot.lane.b32.xlu0 %v1547_v60, %s1667_s14 }
 0x110   : > { %1553 = vrot.lane.b32.xlu1 %v1552_v61, %s1668_s15 }
 0x117   : > { %1573 = vrot.lane.b32.xlu2 %v1572_v62, %s1669_s16  ;;  %1563 = vrot.lane.b32.xlu0 %v1537_v55, %s1668_s15 }
 0x118   : > { %1568 = vrot.lane.b32.xlu1 %v1567_v63, %s1669_s16 }
 0x11f   : > { %1588 = vrot.lane.b32.xlu2 %v1552_v61, %s1670_s17  ;;  %1578 = vrot.lane.b32.xlu0 %v1577_v0, %s1669_s16 }
 0x120   : > { %1583 = vrot.lane.b32.xlu1 %v1537_v55, %s1670_s17 }
 0x127   : > { %1603 = vrot.lane.b32.xlu2 %v1557_v59, %s1671_s18  ;;  %1593 = vrot.lane.b32.xlu0 %v1557_v59, %s1670_s17 }
 0x128   : > { %1598 = vrot.lane.b32.xlu1 %v1552_v61, %s1671_s18 }
 0x12f   : > { %1618 = vrot.lane.b32.xlu2 %v1537_v55, %s1671_s18  ;;  %1608 = vrot.lane.b32.xlu0 %v1552_v61, %s1672_s19  ;;  %s1955_s18 = scalar_lea.vmem %s1987_s5, %s1516_s7  ;;  %s1513_s7 = sshll.u32 %s1990_s22, 4 }
 0x130   : > { %1613 = vrot.lane.b32.xlu1 %v1557_v59, %s1672_s19 }
 0x137   : > { %1633 = vrot.lane.b32.xlu2 %v1572_v62, %s1673_s20  ;;  %1623 = vrot.lane.b32.xlu0 %v1537_v55, %s1672_s19 }
 0x138   : > { %1628 = vrot.lane.b32.xlu1 %v1567_v63, %s1673_s20 }
 0x13f   : > { %1648 = vrot.lane.b32.xlu2 %v1552_v61, %s1674_s23  ;;  %1638 = vrot.lane.b32.xlu0 %v1577_v0, %s1673_s20 }
 0x140   : > { %1643 = vrot.lane.b32.xlu1 %v1537_v55, %s1674_s23 }
 0x147   : > { %1653 = vrot.lane.b32.xlu0 %v1557_v59, %s1674_s23  ;;  %s264_s23 = scalar_lea.vmem %s1988_s6, %s1513_s7 }
 0x150   : > { %v1544_v1 = vpop.permute.xlu2 %1543 }
 0x151   : > { %v1546_v2 = vunpack.i.h.bf16 %v1544_v1  ;;  %v1545_v3 = vunpack.i.l.bf16 %v1544_v1 }
 0x153   : > { %v385_v4 = vsel %vm382_vm2, %v1546_v2, %v1545_v3 }
 0x154   : > { %414 = vmatpush.msra.mxu0 %v385_v4  ;;  %1514 = vmatpush.msra.mxu3 %v385_v4 }
 0x169   : > { %v1786_v5 = vpop.permute.xlu2 %1558 }
 0x16a   : > { %v1561_v23 = vunpack.i.h.bf16 %v1786_v5  ;;  %v1560_v24 = vunpack.i.l.bf16 %v1786_v5 }
 0x16c   : > { %v560_v28 = vsel %vm559_vm5, %v1560_v24, %v1561_v23 }
 0x171   : > { %v1788_v6 = vpop.permute.xlu2 %1573 }
 0x172   : > { %v1576_v31 = vunpack.i.h.bf16 %v1788_v6  ;;  %v1575_v36 = vunpack.i.l.bf16 %v1788_v6 }
 0x179   : > { %v1795_v19 = vpop.permute.xlu2 %1588 }
 0x17a   : > { %v1539_v7 = vpop.permute.xlu1 %1538  ;;  %v1591_v37 = vunpack.i.h.bf16 %v1795_v19  ;;  %v1590_v38 = vunpack.i.l.bf16 %v1795_v19 }
 0x17b   : > { %v1540_v8 = vunpack.i.l.bf16 %v1539_v7  ;;  %v1541_v10 = vunpack.i.h.bf16 %v1539_v7 }
 0x17d   : > { %460 = vmatpush.msra.mxu2 %v1540_v8  ;;  %v386_v9 = vsel %vm382_vm2, %v1545_v3, %v1540_v8 }
 0x17e   : > { %437 = vmatpush.msra.mxu1 %v386_v9  ;;  %v1463_v9 = vld [vmem:[%s1986_s4 + $0x30] sm:$0xff] }
 0x17f   : > { %461 = vmatpush.msra.mxu2 %v1541_v10 }
 0x180   : > { %1441 = vmatmul.msk.f32.vlgmr.msra.gmra.mxu2 %vm393_vm3, %v1435_v11 }
 0x181   : > { %v1549_v12 = vpop.permute.xlu0 %1548  ;;  %v1828_v42 = vpop.permute.xlu2 %1603 }
 0x182   : > { %v1551_v14 = vunpack.i.h.bf16 %v1549_v12  ;;  %v1550_v15 = vunpack.i.l.bf16 %v1549_v12  ;;  %v1554_v16 = vpop.permute.xlu1 %1553  ;;  %v1606_v4 = vunpack.i.h.bf16 %v1828_v42  ;;  %v1605_v5 = vunpack.i.l.bf16 %v1828_v42 }
 0x183   : > { %v1556_v17 = vunpack.i.h.bf16 %v1554_v16  ;;  %v1555_v18 = vunpack.i.l.bf16 %v1554_v16 }
 0x184   : > { %v383_v20 = vsel %vm382_vm2, %v1551_v14, %v1550_v15  ;;  %v384_v21 = vsel %vm382_vm2, %v1550_v15, %v1541_v10  ;;  %v881_v10 = vsel %vm880_vm8, %v1605_v5, %v1606_v4 }
 0x185   : > { %415 = vmatpush.msra.mxu0 %v383_v20  ;;  %1515 = vmatpush.msra.mxu3 %v383_v20  ;;  %v562_v26 = vsel %vm559_vm5, %v1555_v18, %v1556_v17 }
 0x186   : > { %438 = vmatpush.msra.mxu1 %v384_v21  ;;  %1437 = vmatmul.msk.f32.vlgmr.msra.gmra.mxu0 %vm393_vm3, %v1435_v11  ;;  %v1464_v21 = vld [vmem:[%s1986_s4 + $0x38] sm:$0xff] }
 0x187   : > { %1438 = vmatmul.msk.f32.vlgmr.msra.gmra.mxu3 %vm393_vm3, %v1436_v22  ;;  %1439 = vmatmul.msk.f32.vlgmr.msra.gmra.mxu1 %vm393_vm3, %v1435_v11 }
 0x188   : > { %1444 = vmatpush.msk.msrb.mxu3 %vm1443_vm4, %v1753_v45  ;;  %512 = vmatpush.msrb.mxu0 %v1757_v46  ;;  %v776_v45 = vsel %vm773_vm7, %v1590_v38, %v1591_v37  ;;  %v668_v46 = vsel %vm666_vm6, %v1575_v36, %v1576_v31  ;;  %v1472_v38 = vld [vmem:[%s1986_s4 + $0x48] sm:$0xff] }
 0x189   : > { %1451 = vmatpush.msk.msrb.mxu1 %vm358_vm1, %v1763_v49  ;;  %590 = vmatpush.msrb.mxu2 %v562_v26  ;;  %v1564_v27 = vpop.permute.xlu0 %1563  ;;  %v1471_v26 = vld [vmem:[%s1986_s4 + $0x40] sm:$0xff] }
 0x18a   : > { %1442 = vmatmul.msk.f32.gmra.mxu2 %vm393_vm3, %v1436_v22  ;;  %1446 = vmatpush.msk.msrb.mxu3 %vm1443_vm4, %v1772_v56  ;;  %v1565_v29 = vunpack.i.l.bf16 %v1564_v27  ;;  %v1569_v30 = vpop.permute.xlu1 %1568  ;;  %v1566_v32 = vunpack.i.h.bf16 %v1564_v27  ;;  %v1456_v56 = vld [vmem:[%s1986_s4 + $0x28] sm:$0xff] }
 0x18b   : > { %513 = vmatpush.msrb.mxu0 %v1776_v57  ;;  %1452 = vmatpush.msk.msrb.mxu1 %vm358_vm1, %v1766_v52  ;;  %v1571_v33 = vunpack.i.h.bf16 %v1569_v30  ;;  %v1570_v34 = vunpack.i.l.bf16 %v1569_v30  ;;  %v362_v52 = vld [vmem:[%s1986_s4 + $0x8] sm:$0xff]  ;;  %v1619_v57 = vpop.permute.xlu2 %1618 }
 0x18c   : > { %591 = vmatpush.msrb.mxu2 %v560_v28  ;;  %v563_v40 = vsel %vm559_vm5, %v1556_v17, %v1565_v29  ;;  %v561_v43 = vsel %vm559_vm5, %v1561_v23, %v1566_v32  ;;  %v1620_v63 = vunpack.i.l.bf16 %v1619_v57  ;;  %v1621_v8 = vunpack.i.h.bf16 %v1619_v57  ;;  %v1480_v57 = vld [vmem:[%s1986_s4 + $0x58] sm:$0xff] }
 0x18d   : > { %636 = vmatpush.msra.mxu0 %v1565_v29  ;;  %613 = vmatpush.msra.mxu3 %v563_v40  ;;  %v670_v41 = vsel %vm666_vm6, %v1570_v34, %v1571_v33 }
 0x18e   : > { %1449 = vmatmul.msk.f32.vlgmr.msrb.gmra.mxu0 %vm393_vm3, %v361_v35  ;;  %720 = vmatpush.msra.mxu2 %v670_v41  ;;  %v882_v12 = vsel %vm880_vm8, %v1606_v4, %v1621_v8 }
 0x18f   : > { %1440 = vmatmul.msk.f32.gmra.mxu1 %vm393_vm3, %v1436_v22  ;;  %1447 = vmatmul.msk.f32.vlgmr.msrb.gmra.mxu3 %vm393_vm3, %v361_v35 }
 0x190   : > { %637 = vmatpush.msra.mxu0 %v1566_v32  ;;  %614 = vmatpush.msra.mxu3 %v561_v43 }
 0x191   : > { %721 = vmatpush.msra.mxu2 %v668_v46  ;;  %v1579_v47 = vpop.permute.xlu0 %1578 }
 0x192   : > { %804 = vmatpush.msrb.mxu0 %v776_v45  ;;  %1457 = vmatmul.msk.f32.vlgmr.msrb.gmra.mxu2 %vm393_vm3, %v1455_v44  ;;  %v1580_v48 = vunpack.i.l.bf16 %v1579_v47  ;;  %v1584_v49 = vpop.permute.xlu1 %1583  ;;  %v1581_v50 = vunpack.i.h.bf16 %v1579_v47 }
 0x193   : > { %743 = vmatpush.msrb.mxu3 %v1571_v33  ;;  %v1585_v51 = vunpack.i.l.bf16 %v1584_v49  ;;  %v1586_v54 = vunpack.i.h.bf16 %v1584_v49  ;;  %v1634_v27 = vpop.permute.xlu2 %1633 }
 0x194   : > { %v669_v53 = vsel %vm666_vm6, %v1580_v48, %v1570_v34  ;;  %v667_v55 = vsel %vm666_vm6, %v1581_v50, %v1575_v36  ;;  %v1636_v32 = vunpack.i.h.bf16 %v1634_v27  ;;  %v1635_v33 = vunpack.i.l.bf16 %v1634_v27  ;;  %v1479_v48 = vld [vmem:[%s1986_s4 + $0x50] sm:$0xff] }
 0x195   : > { %744 = vmatpush.msrb.mxu3 %v1576_v31  ;;  %697 = vmatpush.msra.mxu1 %v669_v53  ;;  %v777_v58 = vsel %vm773_vm7, %v1591_v37, %v1585_v51  ;;  %v1487_v53 = vld [vmem:[%s1986_s4 + $0x60] sm:$0xff] }
 0x196   : > { %850 = vmatpush.msrb.mxu2 %v1585_v51  ;;  %1450 = vmatmul.msk.f32.gmra.mxu0 %vm393_vm3, %v362_v52  ;;  %v1096_v40 = vsel %vm1094_vm10, %v1635_v33, %v1636_v32 }
 0x197   : > { %1448 = vmatmul.msk.f32.gmra.mxu3 %vm393_vm3, %v362_v52  ;;  %1453 = vmatmul.msk.f32.vlgmr.msrb.gmra.mxu1 %vm393_vm3, %v361_v35 }
 0x198   : > { %698 = vmatpush.msra.mxu1 %v667_v55  ;;  %851 = vmatpush.msrb.mxu2 %v1586_v54 }
 0x199   : > { %v1594_v59 = vpop.permute.xlu0 %1593 }
 0x19a   : > { %827 = vmatpush.msrb.mxu1 %v777_v58  ;;  %1458 = vmatmul.msk.f32.gmra.mxu2 %vm393_vm3, %v1456_v56  ;;  %v1596_v60 = vunpack.i.h.bf16 %v1594_v59  ;;  %v1595_v61 = vunpack.i.l.bf16 %v1594_v59  ;;  %v1599_v62 = vpop.permute.xlu1 %1598  ;;  %v1488_v59 = vld [vmem:[%s1986_s4 + $0x68] sm:$0xff] }
 0x19b   : > { %v1601_v0 = vunpack.i.h.bf16 %v1599_v62  ;;  %v1600_v1 = vunpack.i.l.bf16 %v1599_v62  ;;  %v1649_v43 = vpop.permute.xlu2 %1648  ;;  %v1496_v62 = vld [vmem:[%s1986_s4 + $0x78] sm:$0xff] }
 0x19c   : > { %v774_v2 = vsel %vm773_vm7, %v1595_v61, %v1596_v60  ;;  %v775_v3 = vsel %vm773_vm7, %v1596_v60, %v1586_v54  ;;  %v1651_v45 = vunpack.i.h.bf16 %v1649_v43  ;;  %v1650_v46 = vunpack.i.l.bf16 %v1649_v43  ;;  %v1495_v61 = vld [vmem:[%s1986_s4 + $0x70] sm:$0xff] }
 0x19d   : > { %805 = vmatpush.msrb.mxu0 %v774_v2  ;;  %828 = vmatpush.msrb.mxu1 %v775_v3  ;;  %v883_v6 = vsel %vm880_vm8, %v1600_v1, %v1601_v0  ;;  %v884_v7 = vsel %vm880_vm8, %v1601_v0, %v1620_v63  ;;  %v1504_v0 = vld [vmem:[%s1986_s4 + $0x88] sm:$0xff] }
 0x19e   : > { %1461 = vmatmul.msk.f32.vlgmr.msra.gmra.mxu0 %vm393_vm3, %v1455_v44 }
 0x19f   : > { %1454 = vmatmul.msk.f32.gmra.mxu1 %vm393_vm3, %v362_v52  ;;  %1459 = vmatmul.msk.f32.vlgmr.msra.gmra.mxu3 %vm393_vm3, %v1455_v44  ;;  %v1204_v52 = vsel %vm1201_vm11, %v1650_v46, %v1651_v45 }
 0x1a0   : > { %911 = vmatpush.msra.mxu3 %v883_v6  ;;  %934 = vmatpush.msra.mxu0 %v884_v7 }
 0x1a1   : > { %v1609_v11 = vpop.permute.xlu0 %1608 }
 0x1a2   : > { %1467 = vmatmul.msk.f32.vlgmr.msra.gmra.mxu2 %vm393_vm3, %v1463_v9  ;;  %912 = vmatpush.msra.mxu3 %v881_v10  ;;  %v1611_v14 = vunpack.i.h.bf16 %v1609_v11  ;;  %v1610_v15 = vunpack.i.l.bf16 %v1609_v11  ;;  %v1614_v16 = vpop.permute.xlu1 %1613 }
 0x1a3   : > { %935 = vmatpush.msra.mxu0 %v882_v12  ;;  %v1616_v17 = vunpack.i.h.bf16 %v1614_v16  ;;  %v1615_v18 = vunpack.i.l.bf16 %v1614_v16 }
 0x1a4   : > { %v990_v19 = vsel %vm987_vm9, %v1610_v15, %v1611_v14 }
 0x1a5   : > { %1018 = vmatpush.msra.mxu2 %v990_v19  ;;  %v988_v20 = vsel %vm987_vm9, %v1615_v18, %v1616_v17 }
 0x1a6   : > { %1462 = vmatmul.msk.f32.gmra.mxu0 %vm393_vm3, %v1456_v56 }
 0x1a7   : > { %1460 = vmatmul.msk.f32.gmra.mxu3 %vm393_vm3, %v1456_v56  ;;  %1465 = vmatmul.msk.f32.vlgmr.msra.gmra.mxu1 %vm393_vm3, %v1463_v9 }
 0x1a8   : > { %957 = vmatpush.msra.mxu1 %v1620_v63  ;;  %1019 = vmatpush.msra.mxu2 %v988_v20  ;;  %v1503_v63 = vld [vmem:[%s1986_s4 + $0x80] sm:$0xff] }
 0x1a9   : > { %v1624_v22 = vpop.permute.xlu0 %1623 }
 0x1aa   : > { %1468 = vmatmul.msk.f32.gmra.mxu2 %vm393_vm3, %v1464_v21  ;;  %958 = vmatpush.msra.mxu1 %v1621_v8  ;;  %v1625_v23 = vunpack.i.l.bf16 %v1624_v22  ;;  %v1629_v24 = vpop.permute.xlu1 %1628  ;;  %v1626_v28 = vunpack.i.h.bf16 %v1624_v22 }
 0x1ab   : > { %v1631_v30 = vunpack.i.h.bf16 %v1629_v24  ;;  %v1630_v31 = vunpack.i.l.bf16 %v1629_v24 }
 0x1ac   : > { %v991_v29 = vsel %vm987_vm9, %v1611_v14, %v1625_v23  ;;  %v989_v34 = vsel %vm987_vm9, %v1616_v17, %v1626_v28 }
 0x1ad   : > { %v1098_v36 = vsel %vm1094_vm10, %v1630_v31, %v1631_v30 }
 0x1ae   : > { %1473 = vmatmul.msk.f32.vlgmr.msrb.gmra.mxu0 %vm393_vm3, %v1471_v26 }
 0x1af   : > { %1466 = vmatmul.msk.f32.gmra.mxu1 %vm393_vm3, %v1464_v21  ;;  %1469 = vmatmul.msk.f32.vlgmr.msrb.gmra.mxu3 %vm393_vm3, %v1463_v9 }
 0x1b0   : > { %1041 = vmatpush.msrb.mxu3 %v991_v29  ;;  %1064 = vmatpush.msrb.mxu0 %v1625_v23 }
 0x1b1   : > { %v1639_v35 = vpop.permute.xlu0 %1638 }
 0x1b2   : > { %1477 = vmatmul.msk.f32.vlgmr.msrb.gmra.mxu2 %vm393_vm3, %v1471_v26  ;;  %1042 = vmatpush.msrb.mxu3 %v989_v34  ;;  %v1640_v37 = vunpack.i.l.bf16 %v1639_v35  ;;  %v1641_v41 = vunpack.i.h.bf16 %v1639_v35  ;;  %v1644_v49 = vpop.permute.xlu1 %1643 }
 0x1b3   : > { %1065 = vmatpush.msrb.mxu0 %v1626_v28  ;;  %1148 = vmatpush.msrb.mxu2 %v1098_v36  ;;  %v1645_v54 = vunpack.i.l.bf16 %v1644_v49  ;;  %v1646_v56 = vunpack.i.h.bf16 %v1644_v49 }
 0x1b4   : > { %v1097_v42 = vsel %vm1094_vm10, %v1640_v37, %v1630_v31  ;;  %v1095_v44 = vsel %vm1094_vm10, %v1641_v41, %v1635_v33 }
 0x1b5   : > { %1149 = vmatpush.msrb.mxu2 %v1096_v40  ;;  %v1205_v58 = vsel %vm1201_vm11, %v1651_v45, %v1645_v54 }
 0x1b6   : > { %1474 = vmatmul.msk.f32.gmra.mxu0 %vm393_vm3, %v1472_v38 }
 0x1b7   : > { %1470 = vmatmul.msk.f32.gmra.mxu3 %vm393_vm3, %v1464_v21  ;;  %1475 = vmatmul.msk.f32.vlgmr.msrb.gmra.mxu1 %vm393_vm3, %v1471_v26 }
 0x1b8   : > { %1125 = vmatpush.msrb.mxu1 %v1097_v42 }
 0x1b9   : > { %v1654_v47 = vpop.permute.xlu0 %1653 }
 0x1ba   : > { %1478 = vmatmul.msk.f32.gmra.mxu2 %vm393_vm3, %v1472_v38  ;;  %1126 = vmatpush.msrb.mxu1 %v1095_v44  ;;  %v1656_v50 = vunpack.i.h.bf16 %v1654_v47  ;;  %v1655_v51 = vunpack.i.l.bf16 %v1654_v47 }
 0x1bc   : > { %v1202_v55 = vsel %vm1201_vm11, %v1655_v51, %v1656_v50  ;;  %v1203_v60 = vsel %vm1201_vm11, %v1656_v50, %v1646_v56 }
 0x1be   : > { %1483 = vmatmul.msk.f32.vlgmr.msra.gmra.mxu0 %vm393_vm3, %v1479_v48 }
 0x1bf   : > { %1476 = vmatmul.msk.f32.gmra.mxu1 %vm393_vm3, %v1472_v38  ;;  %1481 = vmatmul.msk.f32.vlgmr.msra.gmra.mxu3 %vm393_vm3, %v1479_v48 }
 0x1c0   : > { %1171 = vmatpush.msra.mxu3 %v1631_v30  ;;  %1232 = vmatpush.msra.mxu0 %v1204_v52 }
 0x1c2   : > { %1489 = vmatmul.msk.f32.vlgmr.msra.gmra.mxu2 %vm393_vm3, %v1487_v53  ;;  %1172 = vmatpush.msra.mxu3 %v1636_v32 }
 0x1c3   : > { %1233 = vmatpush.msra.mxu0 %v1202_v55  ;;  %1278 = vmatpush.msra.mxu2 %v1645_v54 }
 0x1c5   : > { %1279 = vmatpush.msra.mxu2 %v1646_v56 }
 0x1c6   : > { %1484 = vmatmul.msk.f32.gmra.mxu0 %vm393_vm3, %v1480_v57 }
 0x1c7   : > { %1482 = vmatmul.msk.f32.gmra.mxu3 %vm393_vm3, %v1480_v57  ;;  %1485 = vmatmul.msk.f32.vlgmr.msra.gmra.mxu1 %vm393_vm3, %v1479_v48 }
 0x1c8   : > { %1255 = vmatpush.msra.mxu1 %v1205_v58 }
 0x1ca   : > { %1490 = vmatmul.msk.f32.gmra.mxu2 %vm393_vm3, %v1488_v59  ;;  %1256 = vmatpush.msra.mxu1 %v1203_v60 }
 0x1ce   : > { %1493 = vmatmul.msk.f32.vlgmr.msrb.gmra.mxu0 %vm393_vm3, %v1487_v53 }
 0x1cf   : > { %1486 = vmatmul.msk.f32.gmra.mxu1 %vm393_vm3, %v1480_v57  ;;  %1491 = vmatmul.msk.f32.vlgmr.msrb.gmra.mxu3 %vm393_vm3, %v1487_v53 }
 0x1d2   : > { %1499 = vmatmul.msk.f32.vlgmr.msrb.gmra.mxu2 %vm393_vm3, %v1495_v61 }
 0x1d6   : > { %1494 = vmatmul.msk.f32.gmra.mxu0 %vm393_vm3, %v1488_v59 }
 0x1d7   : > { %1492 = vmatmul.msk.f32.gmra.mxu3 %vm393_vm3, %v1488_v59  ;;  %1497 = vmatmul.msk.f32.vlgmr.msrb.gmra.mxu1 %vm393_vm3, %v1495_v61 }
 0x1da   : > { %1500 = vmatmul.msk.f32.gmra.mxu2 %vm393_vm3, %v1496_v62 }
 0x1de   : > { %1505 = vmatmul.msk.f32.vlgmr.msra.gmra.mxu0 %vm393_vm3, %v1503_v63 }
 0x1df   : > { %1498 = vmatmul.msk.f32.gmra.mxu1 %vm393_vm3, %v1496_v62  ;;  %1501 = vmatmul.msk.f32.vlgmr.msra.gmra.mxu3 %vm393_vm3, %v1495_v61 }
 0x1e2   : > { %1509 = vmatmul.msk.f32.vlgmr.msra.gmra.mxu2 %vm393_vm3, %v1503_v63 }
 0x1e6   : > { %1506 = vmatmul.msk.f32.gmra.mxu0 %vm393_vm3, %v1504_v0 }
 0x1e7   : > { %1502 = vmatmul.msk.f32.gmra.mxu3 %vm393_vm3, %v1496_v62  ;;  %1507 = vmatmul.msk.f32.vlgmr.msra.gmra.mxu1 %vm393_vm3, %v1503_v63 }
 0x1ea   : > { %1510 = vmatmul.msk.f32.gmra.mxu2 %vm393_vm3, %v1504_v0 }
 0x1ef   : > { %1508 = vmatmul.msk.f32.gmra.mxu1 %vm393_vm3, %v1504_v0 }
 0x203   : > { %v417_v1 = vpop.f32.mrf.mxu0  ;;  %v463_v2 = vpop.f32.mrf.mxu2 }
 0x204   : > { %v440_v3 = vpop.f32.mrf.mxu1 }
 0x20a   : > { %v420_v4 = vpop.f32.mrf.mxu3 }
 0x20b   : > { %v515_v5 = vpop.f32.mrf.mxu0 }
 0x20c   : > { %v443_v6 = vpop.f32.mrf.mxu1  ;;  %v516_v7 = vadd.f32 %v515_v5, %v440_v3 }
 0x20d   : > { %v466_v8 = vpop.f32.mrf.mxu2 }
 0x212   : > { %v492_v9 = vpop.f32.mrf.mxu3 }
 0x213   : > { %v518_v10 = vpop.f32.mrf.mxu0  ;;  %v493_v43 = vadd.f32 %v492_v9, %v417_v1 }
 0x214   : > { %v519_v11 = vadd.f32 %v518_v10, %v443_v6  ;;  %v538_v12 = vpop.f32.mrf.mxu1 }
 0x215   : > { %v539_v14 = vadd.f32 %v538_v12, %v463_v2  ;;  %v593_v15 = vpop.f32.mrf.mxu2 }
 0x216   : > { %v645_v48 = vadd.f32 %v593_v15, %v493_v43 }
 0x21a   : > { %v495_v16 = vpop.f32.mrf.mxu3 }
 0x21b   : > { %v639_v17 = vpop.f32.mrf.mxu0  ;;  %v496_v50 = vadd.f32 %v495_v16, %v420_v4 }
 0x21c   : > { %v541_v18 = vpop.f32.mrf.mxu1  ;;  %v647_v59 = vadd.f32 %v639_v17, %v539_v14 }
 0x21d   : > { %v542_v19 = vadd.f32 %v541_v18, %v466_v8  ;;  %v596_v20 = vpop.f32.mrf.mxu2 }
 0x21e   : > { %v648_v58 = vadd.f32 %v596_v20, %v496_v50 }
 0x222   : > { %v616_v21 = vpop.f32.mrf.mxu3 }
 0x223   : > { %v642_v22 = vpop.f32.mrf.mxu0  ;;  %v646_v56 = vadd.f32 %v616_v21, %v516_v7 }
 0x224   : > { %v700_v23 = vpop.f32.mrf.mxu1  ;;  %v650_v14 = vadd.f32 %v642_v22, %v542_v19 }
 0x225   : > { %v723_v24 = vpop.f32.mrf.mxu2  ;;  %v752_v49 = vadd.f32 %v700_v23, %v645_v48 }
 0x226   : > { %v753_v62 = vadd.f32 %v723_v24, %v646_v56 }
 0x22a   : > { %v619_v26 = vpop.f32.mrf.mxu3 }
 0x22b   : > { %v807_v27 = vpop.f32.mrf.mxu0  ;;  %v649_v8 = vadd.f32 %v619_v26, %v519_v11 }
 0x22c   : > { %v703_v28 = vpop.f32.mrf.mxu1  ;;  %v859_v51 = vadd.f32 %v807_v27, %v752_v49 }
 0x22d   : > { %v726_v29 = vpop.f32.mrf.mxu2  ;;  %v755_v60 = vadd.f32 %v703_v28, %v648_v58 }
 0x22e   : > { %v756_v20 = vadd.f32 %v726_v29, %v649_v8 }
 0x232   : > { %v746_v30 = vpop.f32.mrf.mxu3 }
 0x233   : > { %v810_v31 = vpop.f32.mrf.mxu0  ;;  %v754_v63 = vadd.f32 %v746_v30, %v647_v59 }
 0x234   : > { %v830_v32 = vpop.f32.mrf.mxu1  ;;  %v862_v0 = vadd.f32 %v810_v31, %v755_v60 }
 0x235   : > { %v853_v33 = vpop.f32.mrf.mxu2  ;;  %v860_v3 = vadd.f32 %v830_v32, %v753_v62 }
 0x236   : > { %v861_v9 = vadd.f32 %v853_v33, %v754_v63 }
 0x23a   : > { %v749_v34 = vpop.f32.mrf.mxu3 }
 0x23b   : > { %v937_v35 = vpop.f32.mrf.mxu0  ;;  %v757_v17 = vadd.f32 %v749_v34, %v650_v14 }
 0x23c   : > { %v833_v36 = vpop.f32.mrf.mxu1  ;;  %v967_v10 = vadd.f32 %v937_v35, %v860_v3 }
 0x23d   : > { %v856_v37 = vpop.f32.mrf.mxu2  ;;  %v863_v27 = vadd.f32 %v833_v36, %v756_v20 }
 0x23e   : > { %v864_v26 = vadd.f32 %v856_v37, %v757_v17 }
 0x242   : > { %v914_v38 = vpop.f32.mrf.mxu3 }
 0x243   : > { %v940_v40 = vpop.f32.mrf.mxu0  ;;  %v966_v54 = vadd.f32 %v914_v38, %v859_v51 }
 0x244   : > { %v960_v41 = vpop.f32.mrf.mxu1  ;;  %v970_v19 = vadd.f32 %v940_v40, %v863_v27 }
 0x245   : > { %v1021_v42 = vpop.f32.mrf.mxu2  ;;  %v968_v15 = vadd.f32 %v960_v41, %v861_v9 }
 0x246   : > { %v1073_v61 = vadd.f32 %v1021_v42, %v966_v54 }
 0x24a   : > { %v917_v44 = vpop.f32.mrf.mxu3 }
 0x24b   : > { %v1067_v45 = vpop.f32.mrf.mxu0  ;;  %v969_v5 = vadd.f32 %v917_v44, %v862_v0 }
 0x24c   : > { %v963_v46 = vpop.f32.mrf.mxu1  ;;  %v1075_v21 = vadd.f32 %v1067_v45, %v968_v15 }
 0x24d   : > { %v1024_v47 = vpop.f32.mrf.mxu2  ;;  %v971_v35 = vadd.f32 %v963_v46, %v864_v26 }
 0x24e   : > { %v1076_v18 = vadd.f32 %v1024_v47, %v969_v5 }
 0x252   : > { %v1044_v52 = vpop.f32.mrf.mxu3 }
 0x253   : > { %v1070_v53 = vpop.f32.mrf.mxu0  ;;  %v1074_v16 = vadd.f32 %v1044_v52, %v967_v10 }
 0x254   : > { %v1128_v55 = vpop.f32.mrf.mxu1  ;;  %v1078_v37 = vadd.f32 %v1070_v53, %v971_v35 }
 0x255   : > { %v1151_v57 = vpop.f32.mrf.mxu2  ;;  %v1180_v1 = vadd.f32 %v1128_v55, %v1073_v61 }
 0x256   : > { %v1181_v28 = vadd.f32 %v1151_v57, %v1074_v16 }
 0x25a   : > { %v1047_v2 = vpop.f32.mrf.mxu3 }
 0x25b   : > { %v1235_v4 = vpop.f32.mrf.mxu0  ;;  %v1077_v38 = vadd.f32 %v1047_v2, %v970_v19 }
 0x25c   : > { %v1131_v6 = vpop.f32.mrf.mxu1  ;;  %v1287_v7 = vadd.f32 %v1235_v4, %v1180_v1 }
 0x25d   : > { %v1154_v12 = vpop.f32.mrf.mxu2  ;;  %v1183_v23 = vadd.f32 %v1131_v6, %v1076_v18 }
 0x25e   : > { %1293 = vst [vmem:[%s1955_s18] sm:$0xff] %v1287_v7  ;;  %v1300_v22 = vmul.f32 %v1287_v7, %v1749_v39  ;;  %v1184_v48 = vadd.f32 %v1154_v12, %v1077_v38 }
 0x260   : > { %v1319_v42 = vmul.f32 %v1300_v22, %v1287_v7 }
 0x262   : > { %v1174_v24 = vpop.f32.mrf.mxu3 }
 0x263   : > { %v1182_v30 = vadd.f32 %v1174_v24, %v1075_v21  ;;  %v1238_v11 = vpop.f32.mrf.mxu0 }
 0x264   : > { %v1290_v31 = vadd.f32 %v1238_v11, %v1183_v23  ;;  %v1258_v32 = vpop.f32.mrf.mxu1 }
 0x265   : > { %v1288_v33 = vadd.f32 %v1258_v32, %v1181_v28  ;;  %v1281_v34 = vpop.f32.mrf.mxu2 }
 0x266   : > { %1297 = vst [vmem:[%s1955_s18 + $0x18] sm:$0xff] %v1290_v31  ;;  %v1289_v29 = vadd.f32 %v1281_v34, %v1182_v30  ;;  %v1303_v54 = vmul.f32 %v1290_v31, %v1749_v39 }
 0x267   : > { %1294 = vst [vmem:[%s1955_s18 + $0x8] sm:$0xff] %v1288_v33  ;;  %v1301_v36 = vmul.f32 %v1288_v33, %v1741_v13 }
 0x268   : > { %1296 = vst.msk [vmem:[%s1955_s18 + $0x10] sm:$0xff] %vm1295_vm12, %v1289_v29  ;;  %v1302_v41 = vmul.f32 %v1289_v29, %v1744_v25  ;;  %v1322_v60 = vmul.f32 %v1303_v54, %v1290_v31 }
 0x269   : > { %v1320_v43 = vmul.f32 %v1301_v36, %v1288_v33  ;;  %v1306_v40 = vadd.f32 %v1301_v36, %v1300_v22 }
 0x26a   : > { %v1177_v44 = vpop.f32.mrf.mxu3  ;;  %v1307_v45 = vsel %vm1295_vm12, %v1302_v41, 0.0  ;;  %v1321_v47 = vmul.f32 %v1302_v41, %v1289_v29 }
 0x26b   : > { %v1185_v46 = vadd.f32 %v1177_v44, %v1078_v37  ;;  %v1308_v49 = vadd.f32 %v1307_v45, %v1306_v40  ;;  %v1325_v50 = vadd.f32 %v1320_v43, %v1319_v42 }
 0x26c   : > { %v1261_v51 = vpop.f32.mrf.mxu1  ;;  %v1326_v52 = vsel %vm1295_vm12, %v1321_v47, 0.0 }
 0x26d   : > { %v1291_v55 = vadd.f32 %v1261_v51, %v1184_v48  ;;  %v1284_v53 = vpop.f32.mrf.mxu2  ;;  %1309 = vadd.xlane.f32.xlu1 %v1308_v49  ;;  %v1327_v56 = vadd.f32 %v1326_v52, %v1325_v50 }
 0x26e   : > { %v1292_v57 = vadd.f32 %v1284_v53, %v1185_v46 }
 0x26f   : > { %1298 = vst [vmem:[%s1955_s18 + $0x20] sm:$0xff] %v1291_v55  ;;  %v1304_v58 = vmul.f32 %v1291_v55, %v1741_v13  ;;  %1328 = vadd.xlane.f32.xlu0 %v1327_v56 }
 0x270   : > { %1299 = vst.msk [vmem:[%s1955_s18 + $0x28] sm:$0xff] %vm1295_vm12, %v1292_v57  ;;  %v1305_v59 = vmul.f32 %v1292_v57, %v1744_v25 }
 0x271   : > { %v1323_v61 = vmul.f32 %v1304_v58, %v1291_v55  ;;  %v1311_v62 = vadd.f32 %v1304_v58, %v1303_v54 }
 0x272   : > { %v1312_v63 = vsel %vm1295_vm12, %v1305_v59, 0.0  ;;  %v1324_v39 = vmul.f32 %v1305_v59, %v1292_v57 }
 0x273   : > { %v1313_v0 = vadd.f32 %v1312_v63, %v1311_v62  ;;  %v1330_v1 = vadd.f32 %v1323_v61, %v1322_v60 }
 0x274   : > { %v1331_v2 = vsel %vm1295_vm12, %v1324_v39, 0.0 }
 0x275   : > { %1314 = vadd.xlane.f32.xlu2 %v1313_v0  ;;  %v1332_v3 = vadd.f32 %v1331_v2, %v1330_v1 }
 0x27d   : > { %1333 = vadd.xlane.f32.xlu2 %v1332_v3 }
 0x2e0   : > { %v1310_v13 = vpop.xlane.xlu1 %1309 }
 0x2e1   : > { %1317 = vst.msk [vmem:[%s264_s23] sm:$0xff] %vm1316_vm13, %v1310_v13 }
 0x2e2   : > { %v1329_v25 = vpop.xlane.xlu0 %1328 }
 0x2e3   : > { %1336 = vst.msk [vmem:[%s264_s23] sm:$0xff] %vm1335_vm14, %v1329_v25 }
 0x2e8   : > { %v1315_v4 = vpop.xlane.xlu2 %1314 }
 0x2e9   : > { %1318 = vst.msk [vmem:[%s264_s23 + $0x8] sm:$0xff] %vm1316_vm13, %v1315_v4 }
 0x2f0   : > { %v1334_v5 = vpop.xlane.xlu2 %1333 }
 0x2f1   : > { %1337 = vst.msk [vmem:[%s264_s23 + $0x8] sm:$0xff] %vm1335_vm14, %v1334_v5 }
 0x2f2 PF: > { %s17_s21 = sadd.s32 1, %s1663_s21  }
 0x2f3   : > { %p14_p4 = scmp.ge.s32.totalorder %s17_s21, 4  }
 0x2f5   :  { %16 = sbr.rel (!%p14_p4) target bundleno = 1 (0x1), region = 90 }

// kernel: network_forward.48
= control target key start
LH: loop header
LB: loop body
LE: loop exit
PB: predicated region body
PF: predicated region fallthrough
CT: control target
= control target key end

     0   :  { %s1549_s21 = smov 0   ;;  %s1707_s0 = inlined_call_operand.vmem [shape: f32[1,286], index: 0, kind: input, shape index: {}]   ;;  %s1708_s1 = inlined_call_operand.vmem [shape: f32[2,16,324], index: 1, kind: input, shape index: {}]   ;;  %s1709_s2 = inlined_call_operand.vmem [shape: f32[9,3,16], index: 2, kind: input, shape index: {}]   ;;  %s1710_s3 = inlined_call_operand.vmem [shape: f32[3,1], index: 3, kind: input, shape index: {}]   ;;  %s1711_s4 = inlined_call_operand.vmem [shape: f32[2,3,324], index: 4, kind: input, shape index: {}]   ;;  %s1712_s5 = inlined_call_operand.vmem [shape: f32[2,3,324], index: 5, kind: input, shape index: {}]   ;;  %s1713_s6 = inlined_call_operand.vmem [shape: f32[2,3,324], index: 6, kind: output, shape index: {}]  }
   0x1 LB: > { %s1294_s22 = sadd.s32 4294967295, %s1502_s21   ;;  %p1298_p0 = scmp.ge.s32.totalorder %s1502_s21, 1  ;;  %s1502_s21 = sphi %s1549_s21, %s16_s21  }
   0x2   : > { %p232_p1 = scmp.lt.s32.totalorder %s1502_s21, 3 }
   0x4   : > { %p233_p2 = pnand %p1298_p0, %p232_p1 }
   0x5   : > { %p272_p3 = scmp.lt.s32.totalorder (!%p233_p2), %s1294_s22, 1  ;;  %s1504_s27 = smov (!%p233_p2), 127  }
   0x6   : > { %236 = sbr.rel (%p233_p2) target bundleno = 494 (0x1ee), region = 44  ;;  %s1505_s28 = smov (!%p233_p2), 126  }
   0x7   : > { %s1506_s29 = smov (!%p233_p2), 110   ;;  %s1507_s30 = smov (!%p233_p2), 109  }
   0x8   : > { %s1508_s7 = smov (!%p233_p2), 108   ;;  %s1509_s8 = smov (!%p233_p2), 92  }
   0x9   : > { %s1510_s9 = smov (!%p233_p2), 91   ;;  %s1511_s10 = smov (!%p233_p2), 90  }
   0xa   : > { %s1513_s11 = smov (!%p233_p2), 19  }
   0xb   : > { %s1715_s22 = smov (!%p272_p3, %s1294_s22), 1  ;;  %v1583_v13 = vld [vmem:[%s1709_s2] sm:$0x7]  ;;  %vm331_vm0 = vcmask 130048   ;;  %vm320_vm1 = vcmask 1039360   ;;  %vm472_vm2 = vcmask 1031168  }
   0xc   : > { %s1343_s23 = smul.u32 48, %s1715_s22  ;;  %v1303_v33 = vld [vmem:[%s1709_s2 + $0x4] sm:$0x7]  ;;  %v1310_v43 = vld [vmem:[%s1709_s2 + $0x8] sm:$0x7]  ;;  %vm563_vm3 = vcmask 900096  }
   0xd   : > { %v1314_v58 = vld [vmem:[%s1709_s2 + $0xc] sm:$0x7]  ;;  %vm654_vm4 = vcmask 891904   ;;  %vm836_vm5 = vcmask 752640   ;;  %vm745_vm6 = vcmask 883712   ;;  %vm927_vm7 = vcmask 744448  }
   0xe   : > { %s276_s26 = scalar_lea.vmem %s1708_s1, %s1343_s23  ;;  %vm1018_vm8 = vcmask 736256   ;;  %s1344_s12 = smul.u32 12, %s1715_s22 }
   0xf   : > { %v1563_v0 = vld [vmem:[%s276_s26 + $0x20] sm:$0xff]  ;;  %v1565_v1 = vld [vmem:[%s276_s26 + $0x28] sm:$0xff]  ;;  %v296_v4 = vld [vmem:[%s276_s26 + $0x18] sm:$0xff] }
  0x10   : > { %v293_v2 = vld [vmem:[%s276_s26] sm:$0xff]  ;;  %v1363_v3 = vpack.i.bf16 %v1565_v1, %v1563_v0  ;;  %v1569_v6 = vld [vmem:[%s276_s26 + $0x8] sm:$0xff]  ;;  %412 = vmatpush.msra.mxu3 %v296_v4  ;;  %v1572_v8 = vld [vmem:[%s276_s26 + $0x10] sm:$0xff]  ;;  %v1378_v10 = vpack.i.bf16 %v1563_v0, %v296_v4  ;;  %s286_s15 = scalar_lea.vmem %s1712_s5, %s1344_s12  ;;  %s281_s18 = scalar_lea.vmem %s1711_s4, %s1344_s12 }
  0x11   : > { %v1373_v5 = vpack.i.bf16 %v293_v2, %v296_v4  ;;  %v1383_v7 = vpack.i.bf16 %v1569_v6, %v293_v2  ;;  %v1368_v9 = vpack.i.bf16 %v1572_v8, %v1569_v6  ;;  %v1388_v11 = vpack.i.bf16 %v1572_v8, %v1565_v1  ;;  %s291_s20 = scalar_lea.vmem %s1713_s6, %s1344_s12 }
  0x12   : > { %1364 = vrot.lane.b32.xlu0 %v1363_v3, %s1504_s27  ;;  %413 = vmatpush.msra.mxu3 %v293_v2  ;;  %v1398_v12 = vpack.i.bf16 %v293_v2, %v1565_v1 }
  0x13   : > { %1374 = vrot.lane.b32.xlu1 %v1373_v5, %s1504_s27  ;;  %1384 = vrot.lane.b32.xlu2 %v1383_v7, %s1505_s28 }
  0x14   : > { %1307 = vmatmul.msk.f32.vlgmr.msra.gmra.mxu3 %vm331_vm0, %v1583_v13 }
  0x1a   : > { %1369 = vrot.lane.b32.xlu0 %v1368_v9, %s1504_s27 }
  0x1b   : > { %1379 = vrot.lane.b32.xlu1 %v1378_v10, %s1505_s28  ;;  %1389 = vrot.lane.b32.xlu2 %v1388_v11, %s1505_s28 }
  0x22   : > { %1394 = vrot.lane.b32.xlu0 %v1378_v10, %s1506_s29 }
  0x23   : > { %1399 = vrot.lane.b32.xlu1 %v1398_v12, %s1506_s29  ;;  %1404 = vrot.lane.b32.xlu2 %v1368_v9, %s1506_s29 }
  0x2a   : > { %1409 = vrot.lane.b32.xlu0 %v1363_v3, %s1507_s30 }
  0x2b   : > { %1414 = vrot.lane.b32.xlu1 %v1368_v9, %s1507_s30  ;;  %1419 = vrot.lane.b32.xlu2 %v1373_v5, %s1507_s30 }
  0x32   : > { %1424 = vrot.lane.b32.xlu0 %v1378_v10, %s1508_s7 }
  0x33   : > { %1429 = vrot.lane.b32.xlu1 %v1383_v7, %s1508_s7  ;;  %1434 = vrot.lane.b32.xlu2 %v1378_v10, %s1509_s8 }
  0x3a   : > { %1439 = vrot.lane.b32.xlu0 %v1388_v11, %s1508_s7 }
  0x3b   : > { %1444 = vrot.lane.b32.xlu1 %v1383_v7, %s1509_s8  ;;  %1449 = vrot.lane.b32.xlu2 %v1388_v11, %s1509_s8  ;;  %v1095_v11 = vld [vmem:[%s1710_s3] sm:$0x7] }
  0x42   : > { %1454 = vrot.lane.b32.xlu0 %v1378_v10, %s1510_s9 }
  0x43   : > { %1459 = vrot.lane.b32.xlu1 %v1398_v12, %s1510_s9  ;;  %1464 = vrot.lane.b32.xlu2 %v1368_v9, %s1510_s9 }
  0x4a   : > { %1469 = vrot.lane.b32.xlu0 %v1363_v3, %s1511_s10 }
  0x4b   : > { %1474 = vrot.lane.b32.xlu1 %v1368_v9, %s1511_s10  ;;  %1479 = vrot.lane.b32.xlu2 %v1373_v5, %s1511_s10 }
  0x6d   : > { %v1385_v14 = vpop.permute.xlu2 %1384 }
  0x6e   : > { %v1387_v30 = vunpack.i.h.bf16 %v1385_v14  ;;  %v1386_v35 = vunpack.i.l.bf16 %v1385_v14 }
  0x70   : > { %v473_v41 = vsel %vm472_vm2, %v1386_v35, %v1387_v30 }
  0x75   : > { %v1390_v15 = vpop.permute.xlu2 %1389 }
  0x76   : > { %v1391_v24 = vunpack.i.l.bf16 %v1390_v15  ;;  %v1392_v36 = vunpack.i.h.bf16 %v1390_v15 }
  0x78   : > { %v474_v42 = vsel %vm472_vm2, %v1387_v30, %v1392_v36 }
  0x7d   : > { %v1587_v17 = vpop.permute.xlu2 %1404 }
  0x7e   : > { %v1407_v45 = vunpack.i.h.bf16 %v1587_v17  ;;  %v1406_v50 = vunpack.i.l.bf16 %v1587_v17 }
  0x80   : > { %v565_v55 = vsel %vm563_vm3, %v1406_v50, %v1407_v45 }
  0x84   : > { %v1365_v16 = vpop.permute.xlu0 %1364 }
  0x85   : > { %v1366_v18 = vunpack.i.l.bf16 %v1365_v16  ;;  %v1375_v19 = vpop.permute.xlu1 %1374  ;;  %v1367_v20 = vunpack.i.h.bf16 %v1365_v16  ;;  %v1594_v34 = vpop.permute.xlu2 %1419  ;;  %v1512_v16 = vmov 0  }
  0x86   : > { %v1376_v21 = vunpack.i.l.bf16 %v1375_v19  ;;  %v1377_v26 = vunpack.i.h.bf16 %v1375_v19  ;;  %v1421_v56 = vunpack.i.l.bf16 %v1594_v34  ;;  %1483 = vset.pattern.permute.xlu0 %v1512_v16  ;;  %v1318_v19 = vld [vmem:[%s1709_s2 + $0x10] sm:$0x7] }
  0x87   : > { %389 = vmatpush.msra.mxu2 %v1367_v20  ;;  %v324_v22 = vsel %vm320_vm1, %v1366_v18, %v1367_v20  ;;  %1098 = vperm.xlu0 %1483, %v1095_v11  }
  0x88   : > { %v323_v23 = vsel %vm320_vm1, %v1376_v21, %v1366_v18  ;;  %369 = vmatpush.msra.mxu1 %v324_v22  ;;  %v1322_v21 = vld [vmem:[%s1709_s2 + $0x14] sm:$0x7] }
  0x89   : > { %349 = vmatpush.msra.mxu0 %v323_v23 }
  0x8c   : > { %v1370_v25 = vpop.permute.xlu0 %1369 }
  0x8d   : > { %v1371_v27 = vunpack.i.l.bf16 %v1370_v25  ;;  %v1380_v28 = vpop.permute.xlu1 %1379  ;;  %v1372_v29 = vunpack.i.h.bf16 %v1370_v25  ;;  %v1435_v54 = vpop.permute.xlu2 %1434 }
  0x8e   : > { %v1382_v31 = vunpack.i.h.bf16 %v1380_v28  ;;  %v1381_v32 = vunpack.i.l.bf16 %v1380_v28  ;;  %v1437_v63 = vunpack.i.h.bf16 %v1435_v54 }
  0x8f   : > { %390 = vmatpush.msra.mxu2 %v1372_v29  ;;  %v321_v37 = vsel %vm320_vm1, %v1377_v26, %v1371_v27  ;;  %v322_v38 = vsel %vm320_vm1, %v1371_v27, %v1372_v29 }
  0x90   : > { %350 = vmatpush.msra.mxu0 %v321_v37  ;;  %370 = vmatpush.msra.mxu1 %v322_v38  ;;  %v475_v39 = vsel %vm472_vm2, %v1381_v32, %v1382_v31  ;;  %v476_v40 = vsel %vm472_vm2, %v1382_v31, %v1391_v24  ;;  %vm1179_vm2 = vcmask 1043456  }
  0x91   : > { %1306 = vmatmul.msk.f32.vlgmr.msra.gmra.mxu2 %vm331_vm0, %v1303_v33  ;;  %520 = vmatpush.msrb.mxu3 %v476_v40 }
  0x92   : > { %500 = vmatpush.msrb.mxu2 %v475_v39  ;;  %1304 = vmatmul.msk.f32.vlgmr.msra.gmra.mxu0 %vm331_vm0, %v1303_v33 }
  0x93   : > { %1305 = vmatmul.msk.f32.vlgmr.msra.gmra.mxu1 %vm331_vm0, %v1303_v33  ;;  %432 = vmatpush.msrb.mxu0 %v1563_v0  ;;  %v1436_v0 = vunpack.i.l.bf16 %v1435_v54  ;;  %v1326_v33 = vld [vmem:[%s1709_s2 + $0x18] sm:$0x7] }
  0x94   : > { %501 = vmatpush.msrb.mxu2 %v473_v41  ;;  %521 = vmatpush.msrb.mxu3 %v474_v42  ;;  %v1395_v44 = vpop.permute.xlu0 %1394 }
  0x95   : > { %433 = vmatpush.msrb.mxu0 %v1569_v6  ;;  %v1397_v46 = vunpack.i.h.bf16 %v1395_v44  ;;  %v1396_v47 = vunpack.i.l.bf16 %v1395_v44  ;;  %v1400_v48 = vpop.permute.xlu1 %1399  ;;  %452 = vmatpush.msrb.mxu1 %v1565_v1  ;;  %v1422_v1 = vunpack.i.h.bf16 %v1594_v34  ;;  %v839_v6 = vsel %vm836_vm5, %v1436_v0, %v1437_v63 }
  0x96   : > { %v1401_v49 = vunpack.i.l.bf16 %v1400_v48  ;;  %1312 = vmatmul.msk.f32.vlgmr.msrb.gmra.mxu3 %vm331_vm0, %v1310_v43  ;;  %v1402_v51 = vunpack.i.h.bf16 %v1400_v48  ;;  %v1330_v48 = vld [vmem:[%s1709_s2 + $0x1c] sm:$0x7] }
  0x97   : > { %540 = vmatpush.msra.mxu0 %v1391_v24  ;;  %453 = vmatpush.msrb.mxu1 %v1572_v8  ;;  %v566_v52 = vsel %vm563_vm3, %v1396_v47, %v1397_v46  ;;  %v1636_v8 = vpop.permute.xlu2 %1449 }
  0x98   : > { %631 = vmatpush.msra.mxu3 %v1401_v49  ;;  %v567_v53 = vsel %vm563_vm3, %v1397_v46, %v1401_v49  ;;  %v564_v57 = vsel %vm563_vm3, %v1402_v51, %v1406_v50  ;;  %v1451_v15 = vunpack.i.l.bf16 %v1636_v8  ;;  %v1452_v24 = vunpack.i.h.bf16 %v1636_v8 }
  0x99   : > { %541 = vmatpush.msra.mxu0 %v1392_v36  ;;  %1311 = vmatmul.msk.f32.vlgmr.msrb.gmra.mxu2 %vm331_vm0, %v1310_v43 }
  0x9a   : > { %591 = vmatpush.msra.mxu1 %v566_v52  ;;  %611 = vmatpush.msra.mxu2 %v567_v53  ;;  %v840_v23 = vsel %vm836_vm5, %v1437_v63, %v1451_v15  ;;  %v1334_v63 = vld [vmem:[%s1709_s2 + $0x20] sm:$0x7] }
  0x9b   : > { %1308 = vmatmul.msk.f32.vlgmr.msrb.gmra.mxu0 %vm331_vm0, %v1583_v13  ;;  %1309 = vmatmul.msk.f32.vlgmr.msrb.gmra.mxu1 %vm331_vm0, %v1583_v13 }
  0x9c   : > { %632 = vmatpush.msra.mxu3 %v1407_v45  ;;  %592 = vmatpush.msra.mxu1 %v564_v57  ;;  %v1410_v59 = vpop.permute.xlu0 %1409 }
  0x9d   : > { %612 = vmatpush.msra.mxu2 %v565_v55  ;;  %v1412_v60 = vunpack.i.h.bf16 %v1410_v59  ;;  %v1411_v61 = vunpack.i.l.bf16 %v1410_v59  ;;  %v1415_v62 = vpop.permute.xlu1 %1414 }
  0x9e   : > { %v1416_v2 = vunpack.i.l.bf16 %v1415_v62  ;;  %1317 = vmatmul.msk.f32.vlgmr.msra.gmra.mxu3 %vm331_vm0, %v1314_v58  ;;  %v1417_v3 = vunpack.i.h.bf16 %v1415_v62 }
  0x9f   : > { %722 = vmatpush.msrb.mxu2 %v1412_v60  ;;  %v657_v4 = vsel %vm654_vm4, %v1421_v56, %v1411_v61  ;;  %v658_v5 = vsel %vm654_vm4, %v1411_v61, %v1412_v60  ;;  %v1465_v31 = vpop.permute.xlu2 %1464 }
  0xa0   : > { %682 = vmatpush.msrb.mxu0 %v657_v4  ;;  %702 = vmatpush.msrb.mxu1 %v658_v5  ;;  %v655_v7 = vsel %vm654_vm4, %v1422_v1, %v1416_v2  ;;  %v656_v9 = vsel %vm654_vm4, %v1416_v2, %v1417_v3  ;;  %v1467_v38 = vunpack.i.h.bf16 %v1465_v31  ;;  %v1466_v41 = vunpack.i.l.bf16 %v1465_v31  ;;  %v415_v2 = vpop.f32.mrf.mxu3 }
  0xa1   : > { %1316 = vmatmul.msk.f32.vlgmr.msra.gmra.mxu2 %vm331_vm0, %v1314_v58 }
  0xa2   : > { %723 = vmatpush.msrb.mxu2 %v1417_v3  ;;  %683 = vmatpush.msrb.mxu0 %v655_v7  ;;  %v929_v47 = vsel %vm927_vm7, %v1466_v41, %v1467_v38 }
  0xa3   : > { %1313 = vmatmul.msk.f32.vlgmr.msra.gmra.mxu0 %vm331_vm0, %v1310_v43  ;;  %1315 = vmatmul.msk.f32.vlgmr.msra.gmra.mxu1 %vm331_vm0, %v1314_v58 }
  0xa4   : > { %703 = vmatpush.msrb.mxu1 %v656_v9  ;;  %v1425_v10 = vpop.permute.xlu0 %1424  ;;  %864 = vmatpush.msra.mxu2 %v839_v6 }
  0xa5   : > { %v1427_v12 = vunpack.i.h.bf16 %v1425_v10  ;;  %v1426_v13 = vunpack.i.l.bf16 %v1425_v10  ;;  %v1430_v14 = vpop.permute.xlu1 %1429 }
  0xa6   : > { %v1432_v17 = vunpack.i.h.bf16 %v1430_v14  ;;  %v1431_v18 = vunpack.i.l.bf16 %v1430_v14 }
  0xa7   : > { %v748_v20 = vsel %vm745_vm6, %v1426_v13, %v1427_v12  ;;  %v1480_v49 = vpop.permute.xlu2 %1479 }
  0xa8   : > { %773 = vmatpush.msrb.mxu3 %v748_v20  ;;  %v746_v22 = vsel %vm745_vm6, %v1431_v18, %v1432_v17  ;;  %v1481_v51 = vunpack.i.l.bf16 %v1480_v49  ;;  %v1482_v53 = vunpack.i.h.bf16 %v1480_v49 }
  0xa9   : > { %1321 = vmatmul.msk.f32.vlgmr.msrb.gmra.mxu2 %vm331_vm0, %v1318_v19 }
  0xaa   : > { %774 = vmatpush.msrb.mxu3 %v746_v22 }
  0xab   : > { %1319 = vmatmul.msk.f32.vlgmr.msrb.gmra.mxu0 %vm331_vm0, %v1318_v19  ;;  %1320 = vmatmul.msk.f32.vlgmr.msrb.gmra.mxu1 %vm331_vm0, %v1318_v19 }
  0xac   : > { %1323 = vmatmul.msk.f32.vlgmr.msrb.gmra.mxu3 %vm331_vm0, %v1322_v21  ;;  %v1440_v25 = vpop.permute.xlu0 %1439 }
  0xad   : > { %884 = vmatpush.msra.mxu3 %v840_v23  ;;  %v1441_v26 = vunpack.i.l.bf16 %v1440_v25  ;;  %v1445_v27 = vpop.permute.xlu1 %1444  ;;  %v1442_v28 = vunpack.i.h.bf16 %v1440_v25 }
  0xae   : > { %v1447_v29 = vunpack.i.h.bf16 %v1445_v27  ;;  %v1446_v30 = vunpack.i.l.bf16 %v1445_v27 }
  0xaf   : > { %813 = vmatpush.msra.mxu1 %v1441_v26  ;;  %v749_v32 = vsel %vm745_vm6, %v1427_v12, %v1441_v26  ;;  %v747_v36 = vsel %vm745_vm6, %v1432_v17, %v1442_v28  ;;  %vm1186_vm6 = vcmask 154624  }
  0xb0   : > { %793 = vmatpush.msra.mxu0 %v749_v32  ;;  %v837_v34 = vsel %vm836_vm5, %v1446_v30, %v1447_v29  ;;  %v838_v35 = vsel %vm836_vm5, %v1447_v29, %v1452_v24 }
  0xb1   : > { %865 = vmatpush.msra.mxu2 %v837_v34  ;;  %885 = vmatpush.msra.mxu3 %v838_v35 }
  0xb2   : > { %814 = vmatpush.msra.mxu1 %v1442_v28  ;;  %1327 = vmatmul.msk.f32.vlgmr.msra.gmra.mxu2 %vm331_vm0, %v1326_v33 }
  0xb3   : > { %794 = vmatpush.msra.mxu0 %v747_v36  ;;  %1325 = vmatmul.msk.f32.vlgmr.msra.gmra.mxu1 %vm331_vm0, %v1322_v21 }
  0xb4   : > { %1324 = vmatmul.msk.f32.vlgmr.msra.gmra.mxu0 %vm331_vm0, %v1322_v21  ;;  %1328 = vmatmul.msk.f32.vlgmr.msra.gmra.mxu3 %vm331_vm0, %v1326_v33  ;;  %v1455_v37 = vpop.permute.xlu0 %1454 }
  0xb5   : > { %904 = vmatpush.msrb.mxu0 %v1451_v15  ;;  %v1457_v39 = vunpack.i.h.bf16 %v1455_v37  ;;  %v1456_v40 = vunpack.i.l.bf16 %v1455_v37  ;;  %v1460_v42 = vpop.permute.xlu1 %1459 }
  0xb6   : > { %v1462_v43 = vunpack.i.h.bf16 %v1460_v42  ;;  %v1461_v44 = vunpack.i.l.bf16 %v1460_v42 }
  0xb7   : > { %905 = vmatpush.msrb.mxu0 %v1452_v24  ;;  %v930_v45 = vsel %vm927_vm7, %v1456_v40, %v1457_v39 }
  0xb8   : > { %995 = vmatpush.msrb.mxu3 %v1461_v44  ;;  %955 = vmatpush.msrb.mxu1 %v930_v45  ;;  %v931_v46 = vsel %vm927_vm7, %v1457_v39, %v1461_v44  ;;  %v928_v50 = vsel %vm927_vm7, %v1462_v43, %v1466_v41  ;;  %vm1206_vm7 = vcmask 400384  }
  0xb9   : > { %975 = vmatpush.msrb.mxu2 %v931_v46 }
  0xba   : > { %996 = vmatpush.msrb.mxu3 %v1467_v38  ;;  %956 = vmatpush.msrb.mxu1 %v928_v50 }
  0xbb   : > { %976 = vmatpush.msrb.mxu2 %v929_v47  ;;  %1331 = vmatmul.msk.f32.vlgmr.msrb.gmra.mxu1 %vm331_vm0, %v1330_v48 }
  0xbc   : > { %1329 = vmatmul.msk.f32.vlgmr.msrb.gmra.mxu0 %vm331_vm0, %v1326_v33  ;;  %1332 = vmatmul.msk.f32.vlgmr.msrb.gmra.mxu2 %vm331_vm0, %v1330_v48  ;;  %v1470_v52 = vpop.permute.xlu0 %1469 }
  0xbd   : > { %1333 = vmatmul.msk.f32.vlgmr.msrb.gmra.mxu3 %vm331_vm0, %v1330_v48  ;;  %v1472_v54 = vunpack.i.h.bf16 %v1470_v52  ;;  %v1471_v55 = vunpack.i.l.bf16 %v1470_v52  ;;  %v1475_v56 = vpop.permute.xlu1 %1474 }
  0xbe   : > { %v1477_v57 = vunpack.i.h.bf16 %v1475_v56  ;;  %v1476_v58 = vunpack.i.l.bf16 %v1475_v56 }
  0xbf   : > { %1086 = vmatpush.msra.mxu2 %v1472_v54  ;;  %v1021_v59 = vsel %vm1018_vm8, %v1481_v51, %v1471_v55  ;;  %v1022_v60 = vsel %vm1018_vm8, %v1471_v55, %v1472_v54 }
  0xc0   : > { %1046 = vmatpush.msra.mxu0 %v1021_v59  ;;  %1066 = vmatpush.msra.mxu1 %v1022_v60  ;;  %v1019_v61 = vsel %vm1018_vm8, %v1482_v53, %v1476_v58  ;;  %v1020_v62 = vsel %vm1018_vm8, %v1476_v58, %v1477_v57  ;;  %vm1213_vm8 = vcmask 550912  }
  0xc1   : > { %1087 = vmatpush.msra.mxu2 %v1477_v57 }
  0xc2   : > { %1047 = vmatpush.msra.mxu0 %v1019_v61  ;;  %1067 = vmatpush.msra.mxu1 %v1020_v62 }
  0xc3   : > { %1336 = vmatmul.msk.f32.vlgmr.msra.gmra.mxu1 %vm331_vm0, %v1334_v63 }
  0xc4   : > { %1335 = vmatmul.msk.f32.vlgmr.msra.gmra.mxu0 %vm331_vm0, %v1334_v63  ;;  %1337 = vmatmul.msk.f32.vlgmr.msra.gmra.mxu2 %vm331_vm0, %v1334_v63 }
  0xf9   : > { %v1099_v43 = vpop.permute.xlu0 %1098 }
 0x10f   : > { %v352_v0 = vpop.f32.mrf.mxu0 }
 0x110   : > { %v372_v1 = vpop.f32.mrf.mxu1  ;;  %v416_v19 = vadd.f32 %v415_v2, %v352_v0 }
 0x114   : > { %v392_v3 = vpop.f32.mrf.mxu2 }
 0x118   : > { %v435_v4 = vpop.f32.mrf.mxu0  ;;  %v455_v5 = vpop.f32.mrf.mxu1 }
 0x119   : > { %v523_v7 = vpop.f32.mrf.mxu3  ;;  %v436_v16 = vadd.f32 %v435_v4, %v372_v1  ;;  %v456_v24 = vadd.f32 %v455_v5, %v392_v3 }
 0x11b   : > { %v547_v20 = vadd.f32 %v523_v7, %v436_v16 }
 0x11c   : > { %v503_v6 = vpop.f32.mrf.mxu2 }
 0x11d   : > { %v546_v21 = vadd.f32 %v503_v6, %v416_v19  ;;  %v292_v6 = vld [vmem:[%s1707_s0] sm:$0x7] }
 0x120   : > { %v543_v8 = vpop.f32.mrf.mxu0  ;;  %v594_v9 = vpop.f32.mrf.mxu1 }
 0x121   : > { %v634_v11 = vpop.f32.mrf.mxu3  ;;  %v637_v25 = vadd.f32 %v594_v9, %v546_v21  ;;  %v548_v29 = vadd.f32 %v543_v8, %v456_v24 }
 0x123   : > { %v639_v34 = vadd.f32 %v634_v11, %v548_v29 }
 0x124   : > { %v614_v10 = vpop.f32.mrf.mxu2 }
 0x125   : > { %v638_v22 = vadd.f32 %v614_v10, %v547_v20 }
 0x128   : > { %v705_v12 = vpop.f32.mrf.mxu1  ;;  %v685_v13 = vpop.f32.mrf.mxu0 }
 0x129   : > { %v728_v30 = vadd.f32 %v685_v13, %v637_v25  ;;  %v729_v31 = vadd.f32 %v705_v12, %v638_v22 }
 0x12c   : > { %v725_v14 = vpop.f32.mrf.mxu2 }
 0x12d   : > { %v730_v38 = vadd.f32 %v725_v14, %v639_v34 }
 0x12f   : > { %v776_v15 = vpop.f32.mrf.mxu3 }
 0x130   : > { %v816_v17 = vpop.f32.mrf.mxu1  ;;  %v819_v32 = vadd.f32 %v776_v15, %v728_v30  ;;  %v1166_v15 = vperm.slane %v292_v6, 0 }
 0x131   : > { %v796_v18 = vpop.f32.mrf.mxu0  ;;  %v821_v44 = vadd.f32 %v816_v17, %v730_v38 }
 0x132   : > { %v820_v33 = vadd.f32 %v796_v18, %v729_v31  ;;  %v1167_v18 = vperm.slane %v292_v6, 1  ;;  %v1168_v31 = vperm.slane %v292_v6, 2 }
 0x135   : > { %v867_v23 = vpop.f32.mrf.mxu2 }
 0x136   : > { %v910_v35 = vadd.f32 %v867_v23, %v819_v32 }
 0x137   : > { %v887_v27 = vpop.f32.mrf.mxu3 }
 0x138   : > { %v958_v26 = vpop.f32.mrf.mxu1  ;;  %v911_v36 = vadd.f32 %v887_v27, %v820_v33 }
 0x139   : > { %v907_v28 = vpop.f32.mrf.mxu0  ;;  %v1001_v39 = vadd.f32 %v958_v26, %v910_v35 }
 0x13a   : > { %v912_v48 = vadd.f32 %v907_v28, %v821_v44  ;;  %v1104_v44 = vld [vmem:[%s281_s18] sm:$0x77] }
 0x13f   : > { %v978_v37 = vpop.f32.mrf.mxu2 }
 0x140   : > { %v1002_v40 = vadd.f32 %v978_v37, %v911_v36  ;;  %v1069_v41 = vpop.f32.mrf.mxu1  ;;  %v998_v47 = vpop.f32.mrf.mxu3 }
 0x141   : > { %v1049_v42 = vpop.f32.mrf.mxu0  ;;  %v1003_v51 = vadd.f32 %v998_v47, %v912_v48 }
 0x142   : > { %v1092_v45 = vadd.f32 %v1049_v42, %v1001_v39  ;;  %v1093_v46 = vadd.f32 %v1069_v41, %v1002_v40  ;;  %v1106_v40 = vld [vmem:[%s286_s15] sm:$0x77]  ;;  %v1107_v41 = vld [vmem:[%s286_s15 + $0x8] sm:$0x7] }
 0x144   : > { %v1101_v49 = vadd.f32 %v1099_v43, %v1092_v45  ;;  %v1102_v50 = vadd.f32 %v1099_v43, %v1093_v46  ;;  %v1105_v45 = vld [vmem:[%s281_s18 + $0x8] sm:$0x7] }
 0x146   : > { %v1338_v52 = vmul.f32 -1.442695, %v1101_v49  ;;  %v1339_v53 = vmul.f32 -1.442695, %v1102_v50 }
 0x147   : > { %v1089_v54 = vpop.f32.mrf.mxu2 }
 0x148   : > { %1484 = vpow2.f32 %v1338_v52  ;;  %v1094_v55 = vadd.f32 %v1089_v54, %v1003_v51 }
 0x149   : > { %1486 = vpow2.f32 %v1339_v53 }
 0x14a   : > { %v1103_v56 = vadd.f32 %v1099_v43, %v1094_v55 }
 0x14c   : > { %v1340_v57 = vmul.f32 -1.442695, %v1103_v56 }
 0x14e   : > { %v1485_v58 = vpop.eup %1484  ;;  %1488 = vpow2.f32 %v1340_v57 }
 0x14f   : > { %v1487_v59 = vpop.eup %1486  ;;  %v1117_v60 = vadd.f32 1.0, %v1485_v58 }
 0x150   : > { %v1118_v61 = vadd.f32 1.0, %v1487_v59 }
 0x151   : > { %1490 = vrcp.f32 %v1117_v60  ;;  %v1129_v7 = vand.u32 2147483647, %v1117_v60  ;;  %v1131_v9 = vand.u32 2147483648, %v1117_v60  ;;  %vm1125_vm11 = vweird.f32 %v1117_v60 }
 0x152   : > { %1492 = vrcp.f32 %v1118_v61  ;;  %v1146_v10 = vand.u32 2147483648, %v1118_v61  ;;  %v1144_v13 = vand.u32 2147483647, %v1118_v61  ;;  %vm1140_vm14 = vweird.f32 %v1118_v61 }
 0x153   : > { %vm1130_vm13 = vcmp.eq.f32.partialorder %v1129_v7, 8.507059e+37  ;;  %v1132_v20 = vor.u32 1.1754944e-38, %v1131_v9 }
 0x154   : > { %v1489_v62 = vpop.eup %1488  ;;  %v1147_v21 = vor.u32 1.1754944e-38, %v1146_v10  ;;  %vm1145_vm0 = vcmp.eq.f32.partialorder %v1144_v13, 8.507059e+37 }
 0x155   : > { %v1119_v63 = vadd.f32 1.0, %v1489_v62 }
 0x157   : > { %v1491_v0 = vpop.eup %1490  ;;  %1494 = vrcp.f32 %v1119_v63  ;;  %v1159_v24 = vand.u32 2147483647, %v1119_v63  ;;  %v1161_v25 = vand.u32 2147483648, %v1119_v63  ;;  %vm1155_vm3 = vweird.f32 %v1119_v63 }
 0x158   : > { %v1493_v1 = vpop.eup %1492  ;;  %v1121_v2 = vmul.f32 %v1491_v0, %v1117_v60  ;;  %vm1126_vm9 = vweird.f32 %v1491_v0 }
 0x159   : > { %v1136_v3 = vmul.f32 %v1493_v1, %v1118_v61  ;;  %vm1141_vm10 = vweird.f32 %v1493_v1  ;;  %vm1127_vm12 = vmor %vm1125_vm11, %vm1126_vm9  ;;  %v1162_v34 = vor.u32 1.1754944e-38, %v1161_v25  ;;  %vm1160_vm5 = vcmp.eq.f32.partialorder %v1159_v24, 8.507059e+37 }
 0x15a   : > { %v1122_v4 = vsub.f32 1.0, %v1121_v2  ;;  %vm1142_vm15 = vmor %vm1140_vm14, %vm1141_vm10 }
 0x15b   : > { %v1137_v5 = vsub.f32 1.0, %v1136_v3 }
 0x15c   : > { %v1123_v8 = vmul.f32 %v1491_v0, %v1122_v4 }
 0x15d   : > { %v1495_v11 = vpop.eup %1494  ;;  %v1138_v12 = vmul.f32 %v1493_v1, %v1137_v5 }
 0x15e   : > { %v1124_v14 = vadd.f32 %v1491_v0, %v1123_v8  ;;  %v1151_v16 = vmul.f32 %v1495_v11, %v1119_v63  ;;  %vm1156_vm1 = vweird.f32 %v1495_v11 }
 0x15f   : > { %v1139_v17 = vadd.f32 %v1493_v1, %v1138_v12  ;;  %vm1157_vm4 = vmor %vm1155_vm3, %vm1156_vm1 }
 0x160   : > { %v1128_v19 = vsel %vm1127_vm12, %v1491_v0, %v1124_v14  ;;  %v1152_v22 = vsub.f32 1.0, %v1151_v16 }
 0x161   : > { %v1143_v23 = vsel %vm1142_vm15, %v1493_v1, %v1139_v17  ;;  %v1133_v26 = vsel %vm1130_vm13, %v1132_v20, %v1128_v19 }
 0x162   : > { %v1148_v27 = vsel %vm1145_vm0, %v1147_v21, %v1143_v23  ;;  %v1153_v28 = vmul.f32 %v1495_v11, %v1152_v22  ;;  %v1172_v32 = vmul.f32 %v1166_v15, %v1133_v26 }
 0x163   : > { %v1173_v29 = vmul.f32 %v1167_v18, %v1148_v27 }
 0x164   : > { %v1154_v30 = vadd.f32 %v1495_v11, %v1153_v28 }
 0x165   : > { %v1178_v33 = vrot.slane %v1173_v29, 4 }
 0x166   : > { %v1158_v35 = vsel %vm1157_vm4, %v1495_v11, %v1154_v30 }
 0x167   : > { %v1180_v36 = vsel %vm1179_vm2, %v1172_v32, %v1178_v33  ;;  %v1163_v37 = vsel %vm1160_vm5, %v1162_v34, %v1158_v35 }
 0x168   : > { %1181 = vrot.lane.b32.xlu1 %v1180_v36, %s1513_s11  ;;  %v1174_v38 = vmul.f32 %v1168_v31, %v1163_v37 }
 0x16a   : > { %1183 = vrot.lane.b32.xlu2 %v1174_v38, %s1513_s11 }
 0x1c4   : > { %v1184_v43 = vpop.permute.xlu2 %1183 }
 0x1da   : > { %v1182_v39 = vpop.permute.xlu1 %1181 }
 0x1db   : > { %v1185_v42 = vrot.slane %v1182_v39, 4 }
 0x1dd   : > { %v1187_v46 = vsel %vm1186_vm6, %v1185_v42, %v1182_v39  ;;  %v1188_v47 = vsel %vm1186_vm6, %v1185_v42, %v1184_v43 }
 0x1de   : > { %v1191_v48 = vsub.f32 %v1106_v40, %v1187_v46  ;;  %v1192_v49 = vsub.f32 %v1107_v41, %v1188_v47 }
 0x1e0   : > { %v1193_v50 = vadd.f32 %v1191_v48, %v1104_v44  ;;  %v1194_v51 = vadd.f32 %v1192_v49, %v1105_v45 }
 0x1e2   : > { %1197 = vst [vmem:[#allocation1] ss:$2 sm:$0xff] %v1193_v50 }
 0x1e3   : > { %1199 = vst [vmem:[#allocation1 + $0x10] ss:$2 sm:$0xff] %v1194_v51 }
 0x1e9   : > { %v1200_v52 = vld.sshfl [vmem:[#allocation1] sm:$0xff pattern:$0x75316420]  ;;  %v1201_v53 = vld.sshfl [vmem:[#allocation1 + $0x8] sm:$0xff pattern:$0x75316420] }
 0x1ea   : > { %v1202_v54 = vld.sshfl [vmem:[#allocation1 + $0x10] sm:$0xff pattern:$0x75316420]  ;;  %v1205_v55 = vsel %vm1186_vm6, 0.0, %v1200_v52  ;;  %v1209_v56 = vrot.slane %v1201_v53, 4 }
 0x1eb   : > { %v1207_v57 = vsel %vm1206_vm7, %v1202_v54, 0.0 }
 0x1ec   : > { %v1210_v58 = vsel %vm1179_vm2, %v1205_v55, %v1209_v56  ;;  %1214 = vst.msk [vmem:[%s291_s20 + $0x8] sm:$0x7] %vm1213_vm8, %v1207_v57 }
 0x1ed   : > { %1212 = vst [vmem:[%s291_s20] sm:$0x77] %v1210_v58 }
 0x1ee PF: > { %s16_s21 = sadd.s32 1, %s1502_s21  }
 0x1ef   : > { %p13_p4 = scmp.ge.s32.totalorder %s16_s21, 4  }
 0x1f1   :  { %15 = sbr.rel (!%p13_p4) target bundleno = 1 (0x1), region = 89 }

// kernel: network_forward.66
= control target key start
LH: loop header
LB: loop body
LE: loop exit
PB: predicated region body
PF: predicated region fallthrough
CT: control target
= control target key end

     0   :  { %16 = vsyncpa [#allocation3], 0  ;;  %s2076_s0 = inlined_call_operand.vmem [shape: f32[1,286], index: 0, kind: input, shape index: {}]   ;;  %s2077_s1 = inlined_call_operand.vmem [shape: f32[2,3,286], index: 1, kind: input, shape index: {}]   ;;  %s2078_s2 = inlined_call_operand.vmem [shape: f32[3,1], index: 2, kind: input, shape index: {}]   ;;  %s2079_s3 = inlined_call_operand.vmem [shape: f32[3,1], index: 3, kind: input, shape index: {}]   ;;  %s2080_s4 = inlined_call_operand.vmem [shape: f32[2,3,324], index: 4, kind: input, shape index: {}]   ;;  %s2081_s5 = inlined_call_operand.vmem [shape: f32[9,3,3], index: 5, kind: input, shape index: {}]   ;;  %s2082_s6 = inlined_call_operand.vmem [shape: f32[3,1], index: 6, kind: input, shape index: {}]   ;;  %s2083_s7 = inlined_call_operand.vmem [shape: f32[2,3,324], index: 7, kind: input, shape index: {}]   ;;  %s2084_s8 = inlined_call_operand.vmem [shape: f32[2,3,324], index: 8, kind: input, shape index: {}]   ;;  %s2085_s9 = inlined_call_operand.vmem [shape: f32[2,3,324], index: 9, kind: output, shape index: {0}]   ;;  %s2086_s10 = inlined_call_operand.hbm [shape: f32[2,3,324], index: 10, kind: output, shape index: {1}]  }
   0x1   :  { %18 = vsyncpa [#allocation3 + $0x1], 0  ;;  %s1835_s13 = smov 0   ;;  %s1837_s14 = smov 0  }
   0x2   :  { %s1839_s15 = smov 0   ;;  %s1841_s16 = smov 0  }
   0x3 LB: > { %s1856_s17 = sadd.s32 4294967295, %s1767_s16   ;;  %s1557_s18 = sadd.s32 4294967294, %s1767_s16   ;;  %s1767_s16 = sphi %s1841_s16, %s2092_s16   ;;  %s1763_s15 = sphi %s1839_s15, %s2091_s15   ;;  %s1759_s14 = sphi %s1837_s14, %s2090_s14   ;;  %s1755_s13 = sphi %s1835_s13, %s2089_s13  }
   0x4   : > { %s1860_s19 = sadd.s32 1, %s1767_s16   ;;  %s266_s20 = sadd.s32 1, %s1763_s15 }
   0x5   : > { %s263_s21 = ssub.s32 %s1767_s16, %s1860_s19  ;;  %p276_p0 = scmp.ne.s32.totalorder %s1763_s15, %s1759_s14 }
   0x6   : > { %p264_p1 = scmp.eq.s32.totalorder %s263_s21, 0  ;;  %p277_p2 = scmp.eq.s32.totalorder %s1856_s17, 1 }
   0x7   : > { %p282_p3 = scmp.ne.s32.totalorder %s1759_s14, %s1755_s13  ;;  %p283_p4 = scmp.eq.s32.totalorder %s1557_s18, 1 }
   0x8   : > { %s1871_s22 = scalar_select %p264_p1, %s1763_s15, %s266_s20  }
   0x9   : > { %p1873_p5 = por %p277_p2, %p276_p0  ;;  %p1877_p6 = por %p283_p4, %p282_p3 }
   0xa   : > { %p1560_p7 = scmp.ge.s32.totalorder %s1767_s16, 1  ;;  %p348_p8 = scmp.lt.s32.totalorder %s1767_s16, 3 }
   0xc   : > { %p349_p9 = pnand %p1560_p7, %p348_p8 }
   0xd   : > { %p406_p10 = scmp.lt.s32.totalorder (!%p349_p9), %s1856_s17, 1  ;;  %s1771_s28 = smov (!%p349_p9), 19  }
   0xe   : > { %352 = sbr.rel (%p349_p9) target bundleno = 778 (0x30a), region = 56  ;;  %s1773_s11 = smov (!%p349_p9), 109  }
   0xf   : > { %s1774_s12 = smov (!%p349_p9), 126   ;;  %s1775_s18 = smov (!%p349_p9), 110  }
  0x10   : > { %s1776_s20 = smov (!%p349_p9), 108   ;;  %s1778_s25 = smov (!%p349_p9), 91  }
  0x11   : > { %s1779_s26 = smov (!%p349_p9), 90  }
  0x13   : > { %v434_v0 = vld [vmem:[%s2078_s2] sm:$0x7]  ;;  %v1769_v1 = vmov 0   ;;  %s407_s29 = scalar_select %p406_p10, %s1856_s17, 1  ;;  %v1770_v3 = vmov 839922192  }
  0x14   : > { %1687 = vset.pattern.permute.xlu0 %v1769_v1  ;;  %1688 = vset.pattern.permute.xlu2 %v1769_v1  ;;  %v435_v2 = vld [vmem:[%s2079_s3] sm:$0x7]  ;;  %v441_v4 = vunpack.c.l.s4 %v1770_v3  ;;  %vm468_vm0 = vcmask 1043456   ;;  %vm487_vm1 = vcmask 154624   ;;  %vm531_vm2 = vcmask 1042432  }
  0x15   : > { %438 = vperm.xlu0 %1687, %v434_v0   ;;  %s1891_s30 = smul.u32 12, %s407_s29  ;;  %v1896_v7 = vld [vmem:[%s2076_s0] sm:$0x7]  ;;  %s1772_s29 = smov 127   ;;  %vm494_vm3 = vcmask 400384   ;;  %vm527_vm4 = vcmask 23552  }
  0x16   : > { %v442_v6 = vunpack.c.0.s8 %v441_v4  ;;  %v462_v8 = vperm.slane %v1896_v7, 1  ;;  %v461_v13 = vperm.slane %v1896_v7, 0  ;;  %v463_v20 = vperm.slane %v1896_v7, 2  ;;  %v512_v44 = vld [vmem:[%s2081_s5] sm:$0x7] }
  0x17   : > { %s410_s21 = scalar_lea.vmem %s2077_s1, %s1891_s30  ;;  %s415_s27 = scalar_lea.vmem %s2080_s4, %s1891_s30  ;;  %vm524_vm5 = vcmask 1039360   ;;  %v1566_v48 = vld [vmem:[%s2081_s5 + $0x4] sm:$0x7]  ;;  %vm675_vm6 = vcmask 1031168   ;;  %vm841_vm7 = vcmask 891904   ;;  %vm758_vm8 = vcmask 900096  }
  0x18   : > { %v432_v10 = vld [vmem:[%s410_s21] sm:$0x77]  ;;  %v433_v11 = vld [vmem:[%s410_s21 + $0x8] sm:$0x7]  ;;  %v467_v14 = vrot.slane %v462_v8, 4  ;;  %s1777_s21 = smov 92  }
  0x19   : > { %v496_v26 = vld [vmem:[%s415_s27] sm:$0x77]  ;;  %v497_v27 = vld [vmem:[%s415_s27 + $0x8] sm:$0x7]  ;;  %v1593_v3 = vld [vmem:[%s2081_s5 + $0x10] sm:$0x7]  ;;  %s420_s27 = scalar_lea.vmem %s2083_s7, %s1891_s30 }
  0x1a   : > { %v469_v21 = vsel %vm468_vm0, %v461_v13, %v467_v14  ;;  %v1579_v59 = vld [vmem:[%s2081_s5 + $0x8] sm:$0x7]  ;;  %vm924_vm9 = vcmask 883712   ;;  %vm1007_vm10 = vcmask 752640   ;;  %vm1090_vm11 = vcmask 744448  }
  0x1b   : > { %vm1173_vm12 = vcmask 736256  }
  0x1d   : > { %449 = vperm.xlu0 %1687, %v435_v2   ;;  %v1586_v2 = vld [vmem:[%s2081_s5 + $0xc] sm:$0x7] }
  0x87   : > { %v439_v5 = vpop.permute.xlu0 %438 }
  0x88   : > { %v443_v9 = vperm.slane %v439_v5, %v442_v6 }
  0x8a   : > { %v445_v15 = vmul.f32 %v443_v9, %v432_v10  ;;  %v446_v16 = vmul.f32 %v443_v9, %v433_v11  ;;  %v1600_v9 = vld [vmem:[%s2081_s5 + $0x14] sm:$0x7]  ;;  %v1248_v11 = vld [vmem:[%s2082_s6] sm:$0x7] }
  0x8f   : > { %v450_v12 = vpop.permute.xlu0 %449 }
  0x90   : > { %v454_v17 = vperm.slane %v450_v12, %v442_v6 }
  0x92   : > { %v456_v18 = vadd.f32 %v454_v17, %v445_v15  ;;  %v457_v19 = vadd.f32 %v454_v17, %v446_v16 }
  0x94   : > { %v458_v22 = vmax.f32 %v456_v18, 0.0  ;;  %v459_v23 = vmax.f32 %v457_v19, 0.0  ;;  %v1607_v18 = vld [vmem:[%s2081_s5 + $0x18] sm:$0x7] }
  0x96   : > { %v471_v24 = vmul.f32 %v469_v21, %v458_v22  ;;  %v472_v25 = vmul.f32 %v463_v20, %v459_v23 }
  0x98   : > { %475 = vst [vmem:[#allocation1] ss:$2 sm:$0xff] %v471_v24  ;;  %v1614_v24 = vld [vmem:[%s2081_s5 + $0x1c] sm:$0x7] }
  0x99   : > { %477 = vst [vmem:[#allocation1 + $0x10] ss:$2 sm:$0xff] %v472_v25 }
  0x9f   : > { %v479_v28 = vld.sshfl [vmem:[#allocation1 + $0x8] sm:$0xff pattern:$0x75316420]  ;;  %v478_v29 = vld.sshfl [vmem:[#allocation1] sm:$0xff pattern:$0x75316420] }
  0xa0   : > { %483 = vrot.lane.b32.xlu1 %v479_v28, %s1771_s28  ;;  %481 = vrot.lane.b32.xlu2 %v478_v29, %s1771_s28  ;;  %500 = vst [vmem:[#allocation1] ss:$2 sm:$0xff] %v496_v26  ;;  %v480_v30 = vld.sshfl [vmem:[#allocation1 + $0x10] sm:$0xff pattern:$0x75316420] }
  0xa1   : > { %502 = vst [vmem:[#allocation1 + $0x10] ss:$2 sm:$0xff] %v497_v27 }
  0xa7   : > { %v503_v31 = vld.sshfl [vmem:[#allocation1] sm:$0xff pattern:$0x75316420]  ;;  %v504_v35 = vld.sshfl [vmem:[#allocation1 + $0x8] sm:$0xff pattern:$0x75316420] }
  0xa8   : > { %485 = vrot.lane.b32.xlu1 %v480_v30, %s1771_s28  ;;  %v505_v39 = vld.sshfl [vmem:[#allocation1 + $0x10] sm:$0xff pattern:$0x75316420] }
  0xfa   : > { %v482_v32 = vpop.permute.xlu2 %481 }
  0xfb   : > { %v493_v33 = vsel %vm487_vm1, 0.0, %v482_v32 }
  0xfc   : > { %v509_v34 = vadd.f32 %v503_v31, %v493_v33 }
  0xfe   : > { %518 = vrot.lane.b32.xlu1 %v509_v34, %s1772_s29  ;;  %1573 = vmatpush.msk.msra.mxu3 %vm531_vm2, %v509_v34 }
  0xff   : > { %1574 = vmatmul.msk.f32.vlgmr.msra.gmra.mxu3 %vm527_vm4, %v512_v44 }
 0x106   : > { %835 = vrot.lane.b32.xlu1 %v509_v34, %s1773_s11 }
 0x112   : > { %v484_v36 = vpop.permute.xlu1 %483 }
 0x113   : > { %v488_v37 = vsel %vm487_vm1, %v482_v32, %v484_v36  ;;  %v1621_v32 = vld [vmem:[%s2081_s5 + $0x20] sm:$0x7] }
 0x114   : > { %v510_v38 = vadd.f32 %v504_v35, %v488_v37 }
 0x116   : > { %671 = vrot.lane.b32.xlu0 %v510_v38, %s1774_s12  ;;  %520 = vrot.lane.b32.xlu2 %v510_v38, %s1772_s29 }
 0x11a   : > { %v486_v40 = vpop.permute.xlu1 %485 }
 0x11b   : > { %v489_v41 = vsel %vm487_vm1, %v484_v36, %v486_v40 }
 0x11c   : > { %v495_v42 = vsel %vm494_vm3, %v489_v41, 0.0 }
 0x11d   : > { %v511_v43 = vadd.f32 %v505_v39, %v495_v42 }
 0x11e   : > { %669 = vrot.lane.b32.xlu2 %v509_v34, %s1774_s12 }
 0x11f   : > { %522 = vrot.lane.b32.xlu0 %v511_v43, %s1772_s29  ;;  %673 = vrot.lane.b32.xlu1 %v511_v43, %s1774_s12  ;;  %s1725_s12 = scalar_lea.hbm %s2086_s10, 24 }
 0x126   : > { %752 = vrot.lane.b32.xlu2 %v509_v34, %s1775_s18 }
 0x127   : > { %754 = vrot.lane.b32.xlu0 %v510_v38, %s1775_s18  ;;  %756 = vrot.lane.b32.xlu1 %v511_v43, %s1775_s18  ;;  %s425_s18 = scalar_lea.vmem %s2084_s8, %s1891_s30 }
 0x12e   : > { %837 = vrot.lane.b32.xlu2 %v510_v38, %s1773_s11 }
 0x12f   : > { %920 = vrot.lane.b32.xlu0 %v510_v38, %s1776_s20  ;;  %1001 = vrot.lane.b32.xlu1 %v509_v34, %s1777_s21 }
 0x136   : > { %918 = vrot.lane.b32.xlu2 %v509_v34, %s1776_s20 }
 0x137   : > { %839 = vrot.lane.b32.xlu0 %v511_v43, %s1773_s11  ;;  %1005 = vrot.lane.b32.xlu1 %v511_v43, %s1777_s21  ;;  %s1636_s11 = smul.u32 12, %s1856_s17 }
 0x13e   : > { %1003 = vrot.lane.b32.xlu2 %v510_v38, %s1777_s21  ;;  %s430_s21 = scalar_lea.vmem %s2085_s9, %s1891_s30  ;;  %s403_s30 = sand.u32 1, %s1759_s14  }
 0x13f   : > { %922 = vrot.lane.b32.xlu0 %v511_v43, %s1776_s20  ;;  %1088 = vrot.lane.b32.xlu1 %v511_v43, %s1778_s25  ;;  %s1634_s29 = smul.u32 12, %s403_s30  ;;  %s1418_s17 = scalar_lea.sflag [#allocation3], %s403_s30 }
 0x141   : > { %s405_s20 = scalar_lea.vmem [#allocation2], %s1634_s29 }
 0x146   : > { %1084 = vrot.lane.b32.xlu2 %v509_v34, %s1778_s25 }
 0x147   : > { %1086 = vrot.lane.b32.xlu0 %v510_v38, %s1778_s25  ;;  %1167 = vrot.lane.b32.xlu1 %v509_v34, %s1779_s26 }
 0x14e   : > { %1169 = vrot.lane.b32.xlu2 %v510_v38, %s1779_s26 }
 0x14f   : > { %1171 = vrot.lane.b32.xlu0 %v511_v43, %s1779_s26 }
 0x156   : > { %1251 = vperm.xlu2 %1688, %v1248_v11  }
 0x170   : > { %v521_v45 = vpop.permute.xlu2 %520  ;;  %v519_v46 = vpop.permute.xlu1 %518 }
 0x171   : > { %v525_v47 = vsel %vm524_vm5, %v519_v46, %v521_v45 }
 0x172   : > { %1567 = vmatpush.msk.msra.mxu0 %vm531_vm2, %v525_v47 }
 0x173   : > { %1568 = vmatmul.msk.f32.vlgmr.msra.gmra.mxu0 %vm527_vm4, %v1566_v48 }
 0x174   : > { %1575 = vmatpush.msk.msrb.mxu0 %vm531_vm2, %v510_v38 }
 0x178   : > { %v670_v49 = vpop.permute.xlu2 %669  ;;  %v836_v52 = vpop.permute.xlu1 %835 }
 0x17b   : > { %1576 = vmatmul.msk.f32.vlgmr.msrb.gmra.mxu0 %vm527_vm4, %v512_v44 }
 0x180   : > { %v753_v50 = vpop.permute.xlu2 %752 }
 0x182   : > { %v624_v36 = vpop.f32.mrf.mxu3 }
 0x188   : > { %v672_v51 = vpop.permute.xlu0 %671  ;;  %v838_v53 = vpop.permute.xlu2 %837 }
 0x189   : > { %v676_v58 = vsel %vm675_vm6, %v670_v49, %v672_v51  ;;  %v842_v60 = vsel %vm841_vm7, %v836_v52, %v838_v53 }
 0x190   : > { %v919_v63 = vpop.permute.xlu2 %918 }
 0x191   : > { %v523_v54 = vpop.permute.xlu0 %522  ;;  %v674_v55 = vpop.permute.xlu1 %673 }
 0x192   : > { %1571 = vmatpush.msk.msra.mxu2 %vm531_vm2, %v523_v54  ;;  %1584 = vmatpush.msk.msra.mxu0 %vm531_vm2, %v674_v55  ;;  %v526_v56 = vsel %vm524_vm5, %v521_v45, %v523_v54  ;;  %v677_v57 = vsel %vm675_vm6, %v672_v51, %v674_v55 }
 0x193   : > { %1569 = vmatpush.msk.msra.mxu1 %vm531_vm2, %v526_v56  ;;  %1572 = vmatmul.msk.f32.vlgmr.msra.gmra.mxu2 %vm527_vm4, %v1566_v48 }
 0x194   : > { %1580 = vmatpush.msk.msrb.mxu2 %vm531_vm2, %v676_v58  ;;  %1582 = vmatpush.msk.msrb.mxu3 %vm531_vm2, %v677_v57 }
 0x195   : > { %1594 = vmatpush.msk.msrb.mxu0 %vm531_vm2, %v842_v60  ;;  %1570 = vmatmul.msk.f32.vlgmr.msra.gmra.mxu1 %vm527_vm4, %v1566_v48 }
 0x196   : > { %1577 = vmatpush.msk.msrb.mxu1 %vm531_vm2, %v511_v43  ;;  %1583 = vmatmul.msk.f32.vlgmr.msrb.gmra.mxu3 %vm527_vm4, %v1579_v59 }
 0x197   : > { %1585 = vmatmul.msk.f32.vlgmr.msra.gmra.mxu0 %vm527_vm4, %v1579_v59 }
 0x198   : > { %v1004_v10 = vpop.permute.xlu2 %1003 }
 0x199   : > { %v755_v61 = vpop.permute.xlu0 %754  ;;  %v757_v62 = vpop.permute.xlu1 %756 }
 0x19a   : > { %v759_v0 = vsel %vm758_vm8, %v753_v50, %v755_v61  ;;  %v760_v1 = vsel %vm758_vm8, %v755_v61, %v757_v62  ;;  %1591 = vmatpush.msk.msra.mxu3 %vm531_vm2, %v757_v62 }
 0x19b   : > { %1581 = vmatmul.msk.f32.vlgmr.msrb.gmra.mxu2 %vm527_vm4, %v1579_v59  ;;  %1587 = vmatpush.msk.msra.mxu1 %vm531_vm2, %v759_v0 }
 0x19c   : > { %1589 = vmatpush.msk.msra.mxu2 %vm531_vm2, %v760_v1 }
 0x19d   : > { %1578 = vmatmul.msk.f32.vlgmr.msrb.gmra.mxu1 %vm527_vm4, %v512_v44 }
 0x19e   : > { %1592 = vmatmul.msk.f32.vlgmr.msra.gmra.mxu3 %vm527_vm4, %v1586_v2 }
 0x19f   : > { %1595 = vmatmul.msk.f32.vlgmr.msrb.gmra.mxu0 %vm527_vm4, %v1593_v3 }
 0x1a0   : > { %v1085_v19 = vpop.permute.xlu2 %1084 }
 0x1a1   : > { %v921_v4 = vpop.permute.xlu0 %920  ;;  %v1002_v5 = vpop.permute.xlu1 %1001 }
 0x1a2   : > { %v925_v6 = vsel %vm924_vm9, %v919_v63, %v921_v4  ;;  %v1008_v17 = vsel %vm1007_vm10, %v1002_v5, %v1004_v10 }
 0x1a3   : > { %1590 = vmatmul.msk.f32.vlgmr.msra.gmra.mxu2 %vm527_vm4, %v1586_v2  ;;  %1601 = vmatpush.msk.msrb.mxu3 %vm531_vm2, %v925_v6 }
 0x1a5   : > { %1588 = vmatmul.msk.f32.vlgmr.msra.gmra.mxu1 %vm527_vm4, %v1586_v2 }
 0x1a6   : > { %1602 = vmatmul.msk.f32.vlgmr.msrb.gmra.mxu3 %vm527_vm4, %v1600_v9 }
 0x1a8   : > { %v1170_v25 = vpop.permute.xlu2 %1169 }
 0x1a9   : > { %v840_v12 = vpop.permute.xlu0 %839  ;;  %v1006_v14 = vpop.permute.xlu1 %1005 }
 0x1aa   : > { %v843_v15 = vsel %vm841_vm7, %v838_v53, %v840_v12  ;;  %v1009_v16 = vsel %vm1007_vm10, %v1004_v10, %v1006_v14  ;;  %1598 = vmatpush.msk.msrb.mxu2 %vm531_vm2, %v840_v12 }
 0x1ab   : > { %1596 = vmatpush.msk.msrb.mxu1 %vm531_vm2, %v843_v15  ;;  %1599 = vmatmul.msk.f32.vlgmr.msrb.gmra.mxu2 %vm527_vm4, %v1593_v3 }
 0x1ac   : > { %1608 = vmatpush.msk.msra.mxu2 %vm531_vm2, %v1008_v17  ;;  %1610 = vmatpush.msk.msra.mxu3 %vm531_vm2, %v1009_v16 }
 0x1ad   : > { %1597 = vmatmul.msk.f32.vlgmr.msrb.gmra.mxu1 %vm527_vm4, %v1593_v3 }
 0x1ae   : > { %1611 = vmatmul.msk.f32.vlgmr.msra.gmra.mxu3 %vm527_vm4, %v1607_v18 }
 0x1b0   : > { %v1252_v15 = vpop.permute.xlu2 %1251 }
 0x1b1   : > { %v923_v21 = vpop.permute.xlu0 %922  ;;  %v1089_v22 = vpop.permute.xlu1 %1088 }
 0x1b2   : > { %v926_v23 = vsel %vm924_vm9, %v921_v4, %v923_v21  ;;  %1605 = vmatpush.msk.msra.mxu1 %vm531_vm2, %v923_v21  ;;  %1619 = vmatpush.msk.msrb.mxu3 %vm531_vm2, %v1089_v22 }
 0x1b3   : > { %1603 = vmatpush.msk.msra.mxu0 %vm531_vm2, %v926_v23  ;;  %1609 = vmatmul.msk.f32.vlgmr.msra.gmra.mxu2 %vm527_vm4, %v1607_v18 }
 0x1b4   : > { %1604 = vmatmul.msk.f32.vlgmr.msra.gmra.mxu0 %vm527_vm4, %v1600_v9 }
 0x1b5   : > { %1606 = vmatmul.msk.f32.vlgmr.msra.gmra.mxu1 %vm527_vm4, %v1600_v9  ;;  %1612 = vmatpush.msk.msrb.mxu0 %vm531_vm2, %v1006_v14 }
 0x1b6   : > { %1620 = vmatmul.msk.f32.vlgmr.msrb.gmra.mxu3 %vm527_vm4, %v1614_v24 }
 0x1b9   : > { %v1087_v26 = vpop.permute.xlu0 %1086  ;;  %v1168_v27 = vpop.permute.xlu1 %1167 }
 0x1ba   : > { %v1091_v28 = vsel %vm1090_vm11, %v1085_v19, %v1087_v26  ;;  %v1092_v29 = vsel %vm1090_vm11, %v1087_v26, %v1089_v22  ;;  %v1174_v30 = vsel %vm1173_vm12, %v1168_v27, %v1170_v25 }
 0x1bb   : > { %1615 = vmatpush.msk.msrb.mxu1 %vm531_vm2, %v1091_v28  ;;  %1617 = vmatpush.msk.msrb.mxu2 %vm531_vm2, %v1092_v29 }
 0x1bc   : > { %1622 = vmatpush.msk.msra.mxu0 %vm531_vm2, %v1174_v30  ;;  %1618 = vmatmul.msk.f32.vlgmr.msrb.gmra.mxu2 %vm527_vm4, %v1614_v24 }
 0x1bd   : > { %1613 = vmatmul.msk.f32.vlgmr.msrb.gmra.mxu0 %vm527_vm4, %v1607_v18  ;;  %1616 = vmatmul.msk.f32.vlgmr.msrb.gmra.mxu1 %vm527_vm4, %v1614_v24 }
 0x1c1   : > { %v1172_v31 = vpop.permute.xlu0 %1171 }
 0x1c2   : > { %v1175_v33 = vsel %vm1173_vm12, %v1170_v25, %v1172_v31  ;;  %1626 = vmatpush.msk.msra.mxu2 %vm531_vm2, %v1172_v31  ;;  %vm1392_vm12 = vcmask 550912  }
 0x1c3   : > { %1624 = vmatpush.msk.msra.mxu1 %vm531_vm2, %v1175_v33 }
 0x1c4   : > { %1627 = vmatmul.msk.f32.vlgmr.msra.gmra.mxu2 %vm527_vm4, %v1621_v32 }
 0x1c5   : > { %1623 = vmatmul.msk.f32.vlgmr.msra.gmra.mxu0 %vm527_vm4, %v1621_v32  ;;  %1625 = vmatmul.msk.f32.vlgmr.msra.gmra.mxu1 %vm527_vm4, %v1621_v32 }
 0x1f0   : > { %v555_v34 = vpop.f32.mrf.mxu0 }
 0x1f1   : > { %v625_v49 = vadd.f32 %v624_v36, %v555_v34 }
 0x1f8   : > { %v644_v38 = vpop.f32.mrf.mxu0 }
 0x212   : > { %v575_v35 = vpop.f32.mrf.mxu1 }
 0x213   : > { %v645_v50 = vadd.f32 %v644_v38, %v575_v35 }
 0x214   : > { %v744_v42 = vpop.f32.mrf.mxu0 }
 0x216   : > { %v595_v37 = vpop.f32.mrf.mxu2 }
 0x219   : > { %v724_v40 = vpop.f32.mrf.mxu3 }
 0x21a   : > { %v664_v39 = vpop.f32.mrf.mxu1  ;;  %v748_v54 = vadd.f32 %v724_v40, %v645_v50 }
 0x21b   : > { %v665_v56 = vadd.f32 %v664_v39, %v595_v37 }
 0x21c   : > { %v870_v46 = vpop.f32.mrf.mxu0 }
 0x21d   : > { %v749_v60 = vadd.f32 %v744_v42, %v665_v56 }
 0x21e   : > { %v704_v41 = vpop.f32.mrf.mxu2 }
 0x21f   : > { %v747_v51 = vadd.f32 %v704_v41, %v625_v49 }
 0x221   : > { %v827_v45 = vpop.f32.mrf.mxu3 }
 0x222   : > { %v787_v43 = vpop.f32.mrf.mxu1  ;;  %v832_v0 = vadd.f32 %v827_v45, %v749_v60 }
 0x223   : > { %v830_v58 = vadd.f32 %v787_v43, %v747_v51 }
 0x225   : > { %v913_v62 = vadd.f32 %v870_v46, %v830_v58 }
 0x226   : > { %v807_v44 = vpop.f32.mrf.mxu2 }
 0x227   : > { %v831_v57 = vadd.f32 %v807_v44, %v748_v54 }
 0x229   : > { %v953_v52 = vpop.f32.mrf.mxu3 }
 0x22a   : > { %v890_v47 = vpop.f32.mrf.mxu1  ;;  %v996_v4 = vadd.f32 %v953_v52, %v913_v62 }
 0x22b   : > { %v914_v61 = vadd.f32 %v890_v47, %v831_v57 }
 0x22e   : > { %v910_v48 = vpop.f32.mrf.mxu2 }
 0x22f   : > { %v915_v5 = vadd.f32 %v910_v48, %v832_v0 }
 0x231   : > { %v973_v53 = vpop.f32.mrf.mxu0  ;;  %v1056_v63 = vpop.f32.mrf.mxu3 }
 0x232   : > { %v993_v55 = vpop.f32.mrf.mxu1  ;;  %v997_v1 = vadd.f32 %v973_v53, %v914_v61 }
 0x233   : > { %v998_v11 = vadd.f32 %v993_v55, %v915_v5 }
 0x234   : > { %v1080_v9 = vadd.f32 %v1056_v63, %v997_v1 }
 0x236   : > { %v1036_v59 = vpop.f32.mrf.mxu2 }
 0x237   : > { %v1079_v6 = vadd.f32 %v1036_v59, %v996_v4 }
 0x239   : > { %v1159_v19 = vpop.f32.mrf.mxu3 }
 0x23a   : > { %v1076_v2 = vpop.f32.mrf.mxu0  ;;  %v1119_v3 = vpop.f32.mrf.mxu1 }
 0x23b   : > { %v1162_v14 = vadd.f32 %v1119_v3, %v1079_v6  ;;  %v1081_v16 = vadd.f32 %v1076_v2, %v998_v11  ;;  %v1259_v11 = vld [vmem:[%s425_s18] sm:$0x77] }
 0x23d   : > { %v1164_v25 = vadd.f32 %v1159_v19, %v1081_v16 }
 0x23f   : > { %v1139_v10 = vpop.f32.mrf.mxu2 }
 0x240   : > { %v1163_v12 = vadd.f32 %v1139_v10, %v1080_v9 }
 0x242   : > { %v1202_v17 = vpop.f32.mrf.mxu0  ;;  %v1222_v18 = vpop.f32.mrf.mxu1 }
 0x243   : > { %v1245_v21 = vadd.f32 %v1202_v17, %v1162_v14  ;;  %v1246_v22 = vadd.f32 %v1222_v18, %v1163_v12  ;;  %v1260_v12 = vld [vmem:[%s425_s18 + $0x8] sm:$0x7] }
 0x245   : > { %v1254_v23 = vadd.f32 %v1252_v15, %v1245_v21  ;;  %v1255_v24 = vadd.f32 %v1252_v15, %v1246_v22 }
 0x247   : > { %v1628_v26 = vmul.f32 -1.442695, %v1254_v23  ;;  %v1629_v27 = vmul.f32 -1.442695, %v1255_v24  ;;  %v1242_v28 = vpop.f32.mrf.mxu2 }
 0x248   : > { %v1247_v29 = vadd.f32 %v1242_v28, %v1164_v25 }
 0x249   : > { %1689 = vpow2.f32 %v1628_v26 }
 0x24a   : > { %1691 = vpow2.f32 %v1629_v27  ;;  %v1256_v30 = vadd.f32 %v1252_v15, %v1247_v29 }
 0x24c   : > { %v1630_v31 = vmul.f32 -1.442695, %v1256_v30 }
 0x24e   : > { %1693 = vpow2.f32 %v1630_v31 }
 0x24f   : > { %v1690_v32 = vpop.eup %1689 }
 0x250   : > { %v1692_v33 = vpop.eup %1691  ;;  %v1270_v34 = vadd.f32 1.0, %v1690_v32 }
 0x251   : > { %v1271_v35 = vadd.f32 1.0, %v1692_v33 }
 0x252   : > { %1695 = vrcp.f32 %v1270_v34  ;;  %v1282_v44 = vand.u32 2147483647, %v1270_v34  ;;  %v1284_v45 = vand.u32 2147483648, %v1270_v34  ;;  %vm1278_vm15 = vweird.f32 %v1270_v34 }
 0x253   : > { %1697 = vrcp.f32 %v1271_v35  ;;  %v1297_v48 = vand.u32 2147483647, %v1271_v35  ;;  %v1299_v49 = vand.u32 2147483648, %v1271_v35  ;;  %vm1293_vm2 = vweird.f32 %v1271_v35 }
 0x254   : > { %v1694_v36 = vpop.eup %1693  ;;  %vm1283_vm5 = vcmp.eq.f32.partialorder %v1282_v44, 8.507059e+37  ;;  %v1285_v53 = vor.u32 1.1754944e-38, %v1284_v45 }
 0x255   : > { %v1272_v37 = vadd.f32 1.0, %v1694_v36  ;;  %vm1298_vm7 = vcmp.eq.f32.partialorder %v1297_v48, 8.507059e+37  ;;  %v1300_v57 = vor.u32 1.1754944e-38, %v1299_v49 }
 0x257   : > { %1699 = vrcp.f32 %v1272_v37  ;;  %v1314_v58 = vand.u32 2147483648, %v1272_v37  ;;  %v1312_v61 = vand.u32 2147483647, %v1272_v37  ;;  %vm1308_vm9 = vweird.f32 %v1272_v37 }
 0x258   : > { %v1696_v38 = vpop.eup %1695 }
 0x259   : > { %v1698_v39 = vpop.eup %1697  ;;  %v1274_v40 = vmul.f32 %v1696_v38, %v1270_v34  ;;  %vm1279_vm13 = vweird.f32 %v1696_v38  ;;  %v1315_v2 = vor.u32 1.1754944e-38, %v1314_v58  ;;  %vm1313_vm11 = vcmp.eq.f32.partialorder %v1312_v61, 8.507059e+37 }
 0x25a   : > { %v1289_v41 = vmul.f32 %v1698_v39, %v1271_v35  ;;  %vm1294_vm14 = vweird.f32 %v1698_v39  ;;  %vm1280_vm4 = vmor %vm1278_vm15, %vm1279_vm13 }
 0x25b   : > { %v1275_v42 = vsub.f32 1.0, %v1274_v40  ;;  %vm1295_vm6 = vmor %vm1293_vm2, %vm1294_vm14 }
 0x25c   : > { %v1290_v43 = vsub.f32 1.0, %v1289_v41 }
 0x25d   : > { %v1700_v46 = vpop.eup %1699  ;;  %v1276_v47 = vmul.f32 %v1696_v38, %v1275_v42  ;;  %v1257_v42 = vld [vmem:[%s420_s27] sm:$0x77] }
 0x25e   : > { %v1291_v50 = vmul.f32 %v1698_v39, %v1290_v43  ;;  %v1304_v51 = vmul.f32 %v1700_v46, %v1272_v37  ;;  %vm1309_vm8 = vweird.f32 %v1700_v46 }
 0x25f   : > { %v1277_v52 = vadd.f32 %v1696_v38, %v1276_v47  ;;  %vm1310_vm10 = vmor %vm1308_vm9, %vm1309_vm8 }
 0x260   : > { %v1292_v54 = vadd.f32 %v1698_v39, %v1291_v50  ;;  %v1305_v55 = vsub.f32 1.0, %v1304_v51 }
 0x261   : > { %v1281_v56 = vsel %vm1280_vm4, %v1696_v38, %v1277_v52 }
 0x262   : > { %v1296_v59 = vsel %vm1295_vm6, %v1698_v39, %v1292_v54  ;;  %v1306_v60 = vmul.f32 %v1700_v46, %v1305_v55  ;;  %v1286_v62 = vsel %vm1283_vm5, %v1285_v53, %v1281_v56 }
 0x263   : > { %v1301_v63 = vsel %vm1298_vm7, %v1300_v57, %v1296_v59  ;;  %v1318_v3 = vmul.f32 %v1286_v62, %v461_v13 }
 0x264   : > { %v1319_v0 = vmul.f32 %v1301_v63, %v462_v8  ;;  %v1307_v1 = vadd.f32 %v1700_v46, %v1306_v60 }
 0x266   : > { %v1324_v4 = vrot.slane %v1319_v0, 4  ;;  %v1311_v5 = vsel %vm1310_vm10, %v1700_v46, %v1307_v1  ;;  %v1258_v46 = vld [vmem:[%s420_s27 + $0x8] sm:$0x7] }
 0x267   : > { %v1316_v6 = vsel %vm1313_vm11, %v1315_v2, %v1311_v5 }
 0x268   : > { %v1325_v9 = vsel %vm468_vm0, %v1318_v3, %v1324_v4  ;;  %v1320_v10 = vmul.f32 %v1316_v6, %v463_v20 }
 0x269   : > { %1326 = vrot.lane.b32.xlu0 %v1325_v9, %s1771_s28 }
 0x26a   : > { %1328 = vrot.lane.b32.xlu1 %v1320_v10, %s1771_s28  ;;  %s1432_s28 = scalar_lea.hbm %s2086_s10, %s1636_s11 }
 0x26b   : > { %s1436_s25 = sshll.u32 %s1432_s28, 4  ;;  %s1437_s25 = int_to_ptr.hbm [resolvable:$true] %s1436_s25 }
 0x26c   : > { %s1719_s26 = sshra.s32 %s1437_s25, 4  ;;  %s1720_s26 = int_to_ptr.hbm [resolvable:$true] %s1719_s26 }
 0x26d   : > { %s1721_s27 = scalar_lea.hbm %s1720_s26, 12  ;;  %p1726_p0 = scmp.lt.s32.totalorder %s1720_s26, %s2086_s10 }
 0x26e   : > { %p1722_p11 = scmp.ne.s32.totalorder %s1720_s26, %s1721_s27  ;;  %p1727_p1 = scmp.lt.s32.totalorder %s1725_s12, %s1721_s27 }
 0x270   : > { %p1723_p12 = pnand %p1722_p11, %p1873_p5  ;;  %p1728_p2 = por %p1727_p1, %p1726_p0 }
 0x272   : > { %p1724_p13 = pneg %p1723_p12 }
 0x274   : > { %p1729_p3 = pnand %p1728_p2, %p1724_p13 }
 0x2db   : > { %v1327_v8 = vpop.permute.xlu0 %1326 }
 0x2dc   : > { %v1330_v13 = vrot.slane %v1327_v8, 4  ;;  %v1329_v14 = vpop.permute.xlu1 %1328 }
 0x2de   : > { %v1331_v15 = vsel %vm487_vm1, %v1330_v13, %v1327_v8  ;;  %v1332_v16 = vsel %vm487_vm1, %v1330_v13, %v1329_v14 }
 0x2df   : > { %v1335_v7 = vadd.f32 %v1331_v15, %v1259_v11  ;;  %v1336_v20 = vadd.f32 %v1332_v16, %v1260_v12 }
 0x2e1   : > { %v1337_v17 = vmax.f32 %v1335_v7, 0.0001  ;;  %v1338_v18 = vmax.f32 %v1336_v20, 0.0001 }
 0x2e3   : > { %v1339_v19 = vmin.f32 %v1337_v17, 1.0  ;;  %v1340_v21 = vmin.f32 %v1338_v18, 1.0 }
 0x2e5   : > { %1701 = vrcp.f32 %v1339_v19  ;;  %1377 = vst [vmem:[#allocation1] ss:$2 sm:$0xff] %v1339_v19  ;;  %v1352_v33 = vand.u32 2147483648, %v1339_v19  ;;  %v1350_v37 = vand.u32 2147483647, %v1339_v19  ;;  %v1367_v38 = vand.u32 2147483648, %v1340_v21 }
 0x2e6   : > { %1703 = vrcp.f32 %v1340_v21  ;;  %1379 = vst [vmem:[#allocation1 + $0x10] ss:$2 sm:$0xff] %v1340_v21  ;;  %v1365_v40 = vand.u32 2147483647, %v1340_v21  ;;  %vm1346_vm15 = vweird.f32 %v1339_v19  ;;  %vm1361_vm4 = vweird.f32 %v1340_v21 }
 0x2e7   : > { %v1353_v43 = vor.u32 1.1754944e-38, %v1352_v33  ;;  %vm1351_vm5 = vcmp.eq.f32.partialorder %v1350_v37, 8.507059e+37  ;;  %v1368_v47 = vor.u32 1.1754944e-38, %v1367_v38 }
 0x2e8   : > { %vm1366_vm7 = vcmp.eq.f32.partialorder %v1365_v40, 8.507059e+37 }
 0x2eb   : > { %v1702_v22 = vpop.eup %1701 }
 0x2ec   : > { %v1704_v23 = vpop.eup %1703  ;;  %v1342_v24 = vmul.f32 %v1702_v22, %v1339_v19  ;;  %v1380_v25 = vld.sshfl [vmem:[#allocation1] sm:$0xff pattern:$0x75316420]  ;;  %v1381_v26 = vld.sshfl [vmem:[#allocation1 + $0x8] sm:$0xff pattern:$0x75316420]  ;;  %vm1347_vm13 = vweird.f32 %v1702_v22 }
 0x2ed   : > { %v1357_v27 = vmul.f32 %v1704_v23, %v1340_v21  ;;  %v1382_v28 = vld.sshfl [vmem:[#allocation1 + $0x10] sm:$0xff pattern:$0x75316420]  ;;  %v1385_v29 = vsel %vm487_vm1, 0.0, %v1380_v25  ;;  %v1388_v30 = vrot.slane %v1381_v26, 4  ;;  %vm1362_vm14 = vweird.f32 %v1704_v23  ;;  %vm1348_vm2 = vmor %vm1346_vm15, %vm1347_vm13 }
 0x2ee   : > { %v1343_v31 = vsub.f32 1.0, %v1342_v24  ;;  %v1386_v32 = vsel %vm494_vm3, %v1382_v28, 0.0  ;;  %vm1363_vm6 = vmor %vm1361_vm4, %vm1362_vm14 }
 0x2ef   : > { %v1358_v34 = vsub.f32 1.0, %v1357_v27  ;;  %v1389_v35 = vsel %vm468_vm0, %v1385_v29, %v1388_v30  ;;  %1393 = vst.msk [vmem:[%s430_s21 + $0x8] sm:$0x7] %vm1392_vm12, %v1386_v32 }
 0x2f0   : > { %v1344_v36 = vmul.f32 %v1702_v22, %v1343_v31  ;;  %1391 = vst [vmem:[%s430_s21] sm:$0x77] %v1389_v35  ;;  %s1434_s21 = sshll.u32 %s405_s20, 4  ;;  %s1435_s21 = int_to_ptr.vmem [resolvable:$true] %s1434_s21 }
 0x2f1   : > { %v1359_v39 = vmul.f32 %v1704_v23, %v1358_v34 }
 0x2f2   : > { %v1345_v41 = vadd.f32 %v1702_v22, %v1344_v36 }
 0x2f3   : > { %v1360_v44 = vadd.f32 %v1704_v23, %v1359_v39 }
 0x2f4   : > { %v1349_v45 = vsel %vm1348_vm2, %v1702_v22, %v1345_v41 }
 0x2f5   : > { %v1354_v48 = vsel %vm1351_vm5, %v1353_v43, %v1349_v45  ;;  %v1364_v49 = vsel %vm1363_vm6, %v1704_v23, %v1360_v44 }
 0x2f6   : > { %v1355_v50 = vmul.f32 %v1354_v48, %v1257_v42  ;;  %v1369_v51 = vsel %vm1366_vm7, %v1368_v47, %v1364_v49 }
 0x2f7   : > { %v1370_v52 = vmul.f32 %v1369_v51, %v1258_v46 }
 0x2f8   : > { %v1371_v53 = vmax.f32 %v1355_v50, 0.0 }
 0x2f9   : > { %v1372_v54 = vmax.f32 %v1370_v52, 0.0 }
 0x2fa   : > { %v1373_v55 = vmin.f32 %v1371_v53, 1.0 }
 0x2fb   : > { %v1374_v56 = vmin.f32 %v1372_v54, 1.0 }
 0x2fc   : > { %1396 = vst [vmem:[#allocation1] ss:$2 sm:$0xff] %v1373_v55 }
 0x2fd   : > { %1398 = vst [vmem:[#allocation1 + $0x10] ss:$2 sm:$0xff] %v1374_v56 }
 0x303   : > { %v1399_v57 = vld.sshfl [vmem:[#allocation1] sm:$0xff pattern:$0x75316420]  ;;  %v1400_v58 = vld.sshfl [vmem:[#allocation1 + $0x8] sm:$0xff pattern:$0x75316420] }
 0x304   : > { %v1401_v59 = vld.sshfl [vmem:[#allocation1 + $0x10] sm:$0xff pattern:$0x75316420]  ;;  %v1404_v60 = vsel %vm487_vm1, 0.0, %v1399_v57  ;;  %v1407_v61 = vrot.slane %v1400_v58, 4 }
 0x305   : > { %v1405_v62 = vsel %vm494_vm3, %v1401_v59, 0.0 }
 0x306   : > { %v1408_v63 = vsel %vm468_vm0, %v1404_v60, %v1407_v61  ;;  %1411 = vst.msk [vmem:[%s405_s20 + $0x8] sm:$0x7] %vm1392_vm12, %v1405_v62 }
 0x307   : > { %1410 = vst [vmem:[%s405_s20] sm:$0x77] %v1408_v63 }
 0x308   : > { %1732 = shalt.err (!%p1729_p3)
}
 0x309   : > { %1637 = dma.vmem_to_hbm [thread:$0]  (%p1873_p5), %s1435_s21, 192, %s1437_s25, %s1418_s17  }
 0x30a PF: > { %p1643_p4 = scmp.ge.s32.totalorder %s1767_s16, 2  ;;  %s1456_s30 = sand.u32 1, %s1755_s13  }
 0x30b   : > { %s1457_s20 = scalar_lea.sflag [#allocation3], %s1456_s30 }
 0x30c   : > { %p1640_p7 = pnand %p1643_p4, %p1877_p6 }
 0x30e   : > { %p1641_p8 = pneg %p1640_p7 }
 0x310   : > { %1750 = dma.done.wait (%p1641_p8), %s1457_s20, 192  }
 0x311   : > { %1752 = vsyncadd (%p1641_p8), %s1457_s20, 4294967104  ;;  %p21_p9 = scmp.ge.s32.totalorder %s1860_s19, 4   ;;  %s2089_s13 = smov %s1759_s14 }
 0x312   : > { %s2090_s14 = smov %s1763_s15  ;;  %s2091_s15 = smov %s1871_s22 }
 0x313   : > { %s2092_s16 = smov %s1860_s19  ;;  %23 = sbr.rel (!%p21_p9) target bundleno = 3 (0x3), region = 124 }
 0x318   :  { %1463 = vsyncpa [#allocation3], 1 }
 0x319   :  { %1465 = vsyncpa [#allocation3 + $0x1], 1 }

// kernel: network_forward.67
= control target key start
LH: loop header
LB: loop body
LE: loop exit
PB: predicated region body
PF: predicated region fallthrough
CT: control target
= control target key end

     0   :  { %s351_s15 = smov [#allocation3]   ;;  %s401_s0 = inlined_call_operand.vmem [shape: f32[2], index: 0, kind: input, shape index: {}]   ;;  %s402_s1 = inlined_call_operand.vmem [shape: f32[2,3,256], index: 1, kind: input, shape index: {}]   ;;  %s403_s2 = inlined_call_operand.vmem [shape: f32[2,3,256], index: 2, kind: input, shape index: {}]   ;;  %s404_s3 = inlined_call_operand.vmem [shape: f32[2,3,256], index: 3, kind: output, shape index: {}]  }
   0x1   :  { %s9_s14 = sshll.u32 %s401_s0, 4  ;;  %s10_s14 = int_to_ptr.vmem [resolvable:$true] %s9_s14 }
   0x2   :  { %12 = dma.vmem_to_smem %s10_s14, 16, %s351_s15, [#allocation2] }
   0x3   :  { %345 = dma.done.wait [#allocation2], 16 }
   0x4   :  { %346 = vsyncadd [#allocation2], 4294967280 }
   0x5   :  { %15 = sfence }
   0x6   :  { %s376_s16 = smov 0  }
   0x7 LB: > { %s293_s17 = sadd.s32 4294967295, %s349_s16   ;;  %p297_p0 = scmp.ge.s32.totalorder %s349_s16, 1  ;;  %s349_s16 = sphi %s376_s16, %s21_s16  }
   0x8   : > { %p131_p1 = scmp.lt.s32.totalorder %s349_s16, 3 }
   0xa   : > { %p132_p2 = pnand %p297_p0, %p131_p1 }
   0xb   : > { %p158_p3 = scmp.lt.s32.totalorder (!%p132_p2), %s293_s17, 1  ;;  %s173_s21 = sld [smem:[#allocation3]] (!%p132_p2) }
   0xc   : > { %135 = sbr.rel (%p132_p2) target bundleno = 90 (0x5a), region = 28  ;;  %s352_s22 = smov (!%p132_p2), 0.0001  }
   0xd   : > { %s304_s24 = sld [smem:[#allocation3 + $0x1]] (!%p132_p2) }
  0x11   : > { %s406_s17 = smov (!%p158_p3, %s293_s17), 1  ;;  %s174_s23 = smax.f32 %s352_s22, %s173_s21 }
  0x12   : > { %s384_s0 = sshll.u32 %s406_s17, 3  ;;  %v195_v12 = vstv %s174_s23 }
  0x13   : > { %s167_s20 = scalar_lea.vmem %s403_s2, %s384_s0  ;;  %s162_s27 = scalar_lea.vmem %s402_s1, %s384_s0  ;;  %v204_v17 = vstv %s304_s24 }
  0x14   : > { %v177_v0 = vld [vmem:[%s167_s20] sm:$0x77]  ;;  %s199_s28 = sadd.f32 1.0, %s304_s24  ;;  %s172_s4 = scalar_lea.vmem %s404_s3, %s384_s0 }
  0x15   : > { %321 = vrcp.f32 %v177_v0  ;;  %v189_v3 = vand.u32 2147483648, %v177_v0  ;;  %vm183_vm0 = vweird.f32 %v177_v0  ;;  %v187_v5 = vand.u32 2147483647, %v177_v0  ;;  %v176_v19 = vld [vmem:[%s162_s27] sm:$0x77] }
  0x16   : > { %v200_v21 = vstv %s199_s28 }
  0x17   : > { %v190_v7 = vor.u32 1.1754944e-38, %v189_v3  ;;  %vm188_vm3 = vcmp.eq.f32.partialorder %v187_v5, 8.507059e+37 }
  0x1b   : > { %v322_v1 = vpop.eup %321 }
  0x1c   : > { %v179_v2 = vmul.f32 %v322_v1, %v177_v0  ;;  %vm184_vm1 = vweird.f32 %v322_v1 }
  0x1d   : > { %vm185_vm2 = vmor %vm183_vm0, %vm184_vm1 }
  0x1e   : > { %v180_v4 = vsub.f32 1.0, %v179_v2 }
  0x20   : > { %v181_v6 = vmul.f32 %v322_v1, %v180_v4 }
  0x22   : > { %v182_v8 = vadd.f32 %v322_v1, %v181_v6 }
  0x24   : > { %v186_v9 = vsel %vm185_vm2, %v322_v1, %v182_v8 }
  0x25   : > { %v191_v10 = vsel %vm188_vm3, %v190_v7, %v186_v9 }
  0x26   : > { %323 = vlog2.f32 %v191_v10 }
  0x2c   : > { %v324_v11 = vpop.eup %323 }
  0x2d   : > { %v194_v13 = vmul.f32 0.6931472, %v324_v11 }
  0x2f   : > { %v196_v14 = vmul.f32 %v195_v12, %v194_v13 }
  0x31   : > { %v197_v15 = vmul.f32 1.442695, %v196_v14 }
  0x33   : > { %325 = vpow2.f32 %v197_v15 }
  0x39   : > { %v326_v16 = vpop.eup %325 }
  0x3a   : > { %v305_v18 = vadd.f32 -1.0, %v326_v16  ;;  %v201_v26 = vmul.f32 %v326_v16, %v200_v21 }
  0x3c   : > { %v205_v20 = vmul.f32 %v305_v18, %v204_v17  ;;  %v202_v32 = vmul.f32 %v201_v26, %v176_v19 }
  0x3e   : > { %v206_v22 = vmul.f32 %v205_v20, %v176_v19 }
  0x40   : > { %v207_v23 = vadd.f32 %v206_v22, %v200_v21 }
  0x42   : > { %327 = vrcp.f32 %v207_v23  ;;  %v219_v27 = vand.u32 2147483648, %v207_v23  ;;  %vm213_vm4 = vweird.f32 %v207_v23  ;;  %v217_v29 = vand.u32 2147483647, %v207_v23 }
  0x44   : > { %v220_v31 = vor.u32 1.1754944e-38, %v219_v27  ;;  %vm218_vm7 = vcmp.eq.f32.partialorder %v217_v29, 8.507059e+37 }
  0x48   : > { %v328_v24 = vpop.eup %327 }
  0x49   : > { %v209_v25 = vmul.f32 %v328_v24, %v207_v23  ;;  %vm214_vm5 = vweird.f32 %v328_v24 }
  0x4a   : > { %vm215_vm6 = vmor %vm213_vm4, %vm214_vm5 }
  0x4b   : > { %v210_v28 = vsub.f32 1.0, %v209_v25 }
  0x4d   : > { %v211_v30 = vmul.f32 %v328_v24, %v210_v28 }
  0x4f   : > { %v212_v33 = vadd.f32 %v328_v24, %v211_v30 }
  0x51   : > { %v216_v34 = vsel %vm215_vm6, %v328_v24, %v212_v33 }
  0x52   : > { %v221_v35 = vsel %vm218_vm7, %v220_v31, %v216_v34 }
  0x53   : > { %v222_v36 = vmul.f32 %v221_v35, %v202_v32 }
  0x55   : > { %v223_v37 = vmax.f32 %v222_v36, 0.0 }
  0x57   : > { %v224_v38 = vmin.f32 %v223_v37, 1.0 }
  0x59   : > { %225 = vst [vmem:[%s172_s4] sm:$0x77] %v224_v38 }
  0x5a PF: > { %s21_s16 = sadd.s32 1, %s349_s16  }
  0x5b   : > { %p18_p4 = scmp.ge.s32.totalorder %s21_s16, 4  }
  0x5d   :  { %20 = sbr.rel (!%p18_p4) target bundleno = 7 (0x7), region = 61 }

</bundles_post_ra>
